<compile_context>
chip_gen: v7x
topology: tpu7x:2x2x1
jax: 0.10.0
libtpu: 0.0.40
codegen_flags: <defaults>
</compile_context>

<pallas_src>
import functools

import jax
import jax.numpy as jnp
import numpy as np
from jax import lax
from jax.experimental import pallas as pl
from jax.experimental.pallas import tpu as pltpu

EXPANSION = 4
BN_EPS = 1e-5
LANE = 128          # lane width: channel axes padded to this
MAX_TM = 2048       # hard ceiling on the (M, C) row tile


def _round_up(x, m):
    return (x + m - 1) // m * m


@functools.lru_cache(maxsize=None)
def _vmem_limit_bytes():
    # Generation-aware scoped-VMEM ceiling: ~80% of physical VMEM
    # (v5e/v6e: 128 MiB -> ~100 MiB, v7x: 64 MiB -> ~51 MiB).  Conservative
    # fallback if the query is unavailable.
    try:
        cap = int(pltpu.get_tpu_info().vmem_capacity_bytes)
        return min(int(cap * 0.8), 112 * 1024 * 1024)
    except Exception:
        return 48 * 1024 * 1024


def _compiler_params(sem):
    return pltpu.CompilerParams(dimension_semantics=sem,
                                vmem_limit_bytes=_vmem_limit_bytes())


def _tile_m(m, channels):
    """Row tile for the flattened (M, C) kernels: a multiple of 128, as large
    as the VMEM budget allows (double-buffered bf16 x/y blocks + headroom)."""
    row_bytes = 2 * 2 * channels                    # bf16, double-buffered
    budget = _vmem_limit_bytes() // 4               # weights + scratch headroom
    cap = max(LANE, min(MAX_TM, budget // max(row_bytes, 1) // LANE * LANE))
    return int(min(cap, _round_up(m, LANE)))


def _rows_per_step(ho, wo):
    """Output rows per conv2 grid step: largest divisor of ho such that the
    per-step MXU M dim (rows*wo) is ~256 (64 when wo forces the per-row path)."""
    target = 256 if wo % 8 == 0 else 64
    limit = min(ho, max(1, -(-target // wo)))
    rows = 1
    for d in range(1, ho + 1):
        if ho % d == 0 and d <= limit:
            rows = d
    return rows


def _pad2(a, rows, cols):
    return jnp.pad(a, ((0, rows - a.shape[0]), (0, cols - a.shape[1])))


# --------------------------------------------------------------------------
# Kernels
# --------------------------------------------------------------------------
def _bn_scale_shift(s, ss, g, b, inv_m):
    mean = s * inv_m
    var = ss * inv_m - mean * mean          # biased variance, like torch BN
    scale = lax.rsqrt(var + BN_EPS) * g
    shift = b - mean * scale
    return scale, shift


def _mm_stats_kernel(x_ref, w_ref, y_ref, ps_ref, pss_ref):
    """1x1 conv tile: y = x @ w (bf16 MXU operands, f32 accumulation), bf16
    writeback, plus this tile's per-channel sum / sum-of-squares partials.
    Padded rows of x are zero, so the unmasked partial sums stay exact."""
    y = jnp.dot(x_ref[...], w_ref[...], preferred_element_type=jnp.float32)
    y_ref[...] = y.astype(y_ref.dtype)
    ps_ref[0] = jnp.sum(y, axis=0, keepdims=True)
    pss_ref[0] = jnp.sum(y * y, axis=0, keepdims=True)


def _mm_bn_stats_kernel(x_ref, w_ref, s_ref, ss_ref, g_ref, b_ref,
                        y_ref, ps_ref, pss_ref, *, inv_m, m_real, tm,
                        mask_rows):
    """Fused BN+ReLU (previous layer) -> 1x1 conv -> stats partials.  The
    scale/shift/relu ride free under the MXU-bound matmul; padded rows are
    zeroed (compile-time gated) so stats and the matmul stay exact."""
    scale, shift = _bn_scale_shift(s_ref[...], ss_ref[...], g_ref[...],
                                   b_ref[...], inv_m)
    x = jnp.maximum(x_ref[...].astype(jnp.float32) * scale + shift, 0.0)
    if mask_rows:
        row = pl.program_id(0) * tm + lax.broadcasted_iota(jnp.int32, (tm, 1), 0)
        x = jnp.where(row < m_real, x, 0.0)
    y = jnp.dot(x.astype(jnp.bfloat16), w_ref[...],
                preferred_element_type=jnp.float32)
    y_ref[...] = y.astype(y_ref.dtype)
    ps_ref[0] = jnp.sum(y, axis=0, keepdims=True)
    pss_ref[0] = jnp.sum(y * y, axis=0, keepdims=True)


def _conv3x3_stats_kernel(x_ref, w_ref, y_ref, ps_ref, pss_ref, *,
                          stride, rows, wo):
    """`rows` output rows of a 3x3/stride conv.  The 2-D phase-split, spatially
    padded image stays resident in VMEM; the 9 taps become MXU matmuls with
    M = rows*wo (flattened when wo is sublane-aligned)."""
    i = pl.program_id(1)
    cin = x_ref.shape[-1]
    cout = w_ref.shape[-1]
    if wo % 8 == 0:
        acc = jnp.zeros((rows * wo, cout), jnp.float32)
        for dy in range(3):
            for dx in range(3):
                p = (dy % stride) * stride + (dx % stride)
                win = x_ref[p, pl.ds(i * rows + dy // stride, rows),
                            pl.ds(dx // stride, wo), :]
                if wo % 16 == 0:
                    lhs = win.reshape(rows * wo, cin)
                else:       # route the collapse through f32's native (8,128) tiling
                    lhs = win.astype(jnp.float32).reshape(rows * wo, cin)
                    lhs = lhs.astype(jnp.bfloat16)
                acc = acc + jnp.dot(lhs, w_ref[3 * dy + dx],
                                    preferred_element_type=jnp.float32)
        y = acc.reshape(rows, wo, cout)
        ps_ref[0] = jnp.sum(acc, axis=0, keepdims=True)
        pss_ref[0] = jnp.sum(acc * acc, axis=0, keepdims=True)
    else:
        # TODO(synk): per-row fallback under-fills the MXU when wo % 8 != 0.
        row_accs = []
        for r in range(rows):
            acc_r = jnp.zeros((wo, cout), jnp.float32)
            for dy in range(3):
                for dx in range(3):
                    p = (dy % stride) * stride + (dx % stride)
                    win = x_ref[p, i * rows + r + dy // stride,
                                pl.ds(dx // stride, wo), :]
                    acc_r = acc_r + jnp.dot(win, w_ref[3 * dy + dx],
                                            preferred_element_type=jnp.float32)
            row_accs.append(acc_r)
        y = jnp.stack(row_accs, axis=0)
        ps_ref[0] = jnp.sum(y, axis=(0, 1))[None, :]
        pss_ref[0] = jnp.sum(y * y, axis=(0, 1))[None, :]
    y_ref[...] = y.astype(y_ref.dtype)


def _bn_act_kernel(y_ref, s_ref, ss_ref, g_ref, b_ref, o_ref, *, inv_m, relu):
    scale, shift = _bn_scale_shift(s_ref[...], ss_ref[...], g_ref[...],
                                   b_ref[...], inv_m)
    y = y_ref[...].astype(jnp.float32) * scale + shift
    if relu:
        y = jnp.maximum(y, 0.0)
    o_ref[...] = y.astype(o_ref.dtype)


def _bn_add_id_kernel(y_ref, s_ref, ss_ref, g_ref, b_ref, r_ref, o_ref, *,
                      inv_m):
    scale, shift = _bn_scale_shift(s_ref[...], ss_ref[...], g_ref[...],
                                   b_ref[...], inv_m)
    y = y_ref[...].astype(jnp.float32) * scale + shift \
        + r_ref[...].astype(jnp.float32)
    o_ref[...] = jnp.maximum(y, 0.0).astype(o_ref.dtype)


def _bn_add_proj_kernel(y_ref, s_ref, ss_ref, g_ref, b_ref,
                        r_ref, rs_ref, rss_ref, rg_ref, rb_ref, o_ref, *,
                        inv_m):
    sc3, sh3 = _bn_scale_shift(s_ref[...], ss_ref[...], g_ref[...],
                               b_ref[...], inv_m)
    scs, shs = _bn_scale_shift(rs_ref[...], rss_ref[...], rg_ref[...],
                               rb_ref[...], inv_m)
    y = (y_ref[...].astype(jnp.float32) * sc3 + sh3) \
        + (r_ref[...].astype(jnp.float32) * scs + shs)
    o_ref[...] = jnp.maximum(y, 0.0).astype(o_ref.dtype)


# --------------------------------------------------------------------------
# pallas_call wrappers
# --------------------------------------------------------------------------
def _conv1x1_stats(x, w, *, tm, fuse=None):
    m, cin = x.shape
    cout = w.shape[1]
    nt = m // tm
    x_spec = pl.BlockSpec((tm, cin), lambda i: (i, 0))
    w_spec = pl.BlockSpec((cin, cout), lambda i: (0, 0))      # resident

    def vec(c):
        return pl.BlockSpec((1, c), lambda i: (0, 0))

    if fuse is None:
        kernel, in_specs, args = _mm_stats_kernel, [x_spec, w_spec], (x, w)
    else:
        kernel = functools.partial(
            _mm_bn_stats_kernel, inv_m=fuse["inv_m"], m_real=fuse["m_real"],
            tm=tm, mask_rows=(m != fuse["m_real"]))
        in_specs = [x_spec, w_spec] + [vec(cin)] * 4
        args = (x, w, fuse["s"], fuse["ss"], fuse["g"], fuse["b"])

    y, ps, pss = pl.pallas_call(
        kernel,
        grid=(nt,),
        in_specs=in_specs,
        out_specs=(pl.BlockSpec((tm, cout), lambda i: (i, 0)),
                   pl.BlockSpec((1, 1, cout), lambda i: (i, 0, 0)),
                   pl.BlockSpec((1, 1, cout), lambda i: (i, 0, 0))),
        out_shape=(jax.ShapeDtypeStruct((m, cout), jnp.bfloat16),
                   jax.ShapeDtypeStruct((nt, 1, cout), jnp.float32),
                   jax.ShapeDtypeStruct((nt, 1, cout), jnp.float32)),
        compiler_params=_compiler_params(("parallel",)),
    )(*args)
    return y, jnp.sum(ps, axis=0), jnp.sum(pss, axis=0)


def _conv3x3_stats(xph, w9, *, stride, n, ho, wo, rows):
    _, hq, wq, cin = xph.shape
    cout = w9.shape[-1]
    nt = ho // rows
    kernel = functools.partial(_conv3x3_stats_kernel, stride=stride,
                               rows=rows, wo=wo)
    y, ps, pss = pl.pallas_call(
        kernel,
        grid=(n, nt),
        in_specs=[pl.BlockSpec((stride * stride, hq, wq, cin),
                               lambda b, i: (b, 0, 0, 0)),      # per-image
                  pl.BlockSpec((9, cin, cout), lambda b, i: (0, 0, 0))],
        out_specs=(pl.BlockSpec((rows, wo, cout),
                                lambda b, i: (b * nt + i, 0, 0)),
                   pl.BlockSpec((1, 1, cout), lambda b, i: (b * nt + i, 0, 0)),
                   pl.BlockSpec((1, 1, cout), lambda b, i: (b * nt + i, 0, 0))),
        out_shape=(jax.ShapeDtypeStruct((n * ho, wo, cout), jnp.bfloat16),
                   jax.ShapeDtypeStruct((n * nt, 1, cout), jnp.float32),
                   jax.ShapeDtypeStruct((n * nt, 1, cout), jnp.float32)),
        compiler_params=_compiler_params(("parallel", "parallel")),
    )(xph, w9)
    return y, jnp.sum(ps, axis=0), jnp.sum(pss, axis=0)


def _bn_act(y, s, ss, g, b, *, tm, inv_m, relu, out_dtype):
    m, c = y.shape
    kernel = functools.partial(_bn_act_kernel, inv_m=inv_m, relu=relu)
    return pl.pallas_call(
        kernel,
        grid=(m // tm,),
        in_specs=[pl.BlockSpec((tm, c), lambda i: (i, 0))]
        + [pl.BlockSpec((1, c), lambda i: (0, 0))] * 4,
        out_specs=pl.BlockSpec((tm, c), lambda i: (i, 0)),
        out_shape=jax.ShapeDtypeStruct((m, c), out_dtype),
        compiler_params=_compiler_params(("parallel",)),
    )(y, s, ss, g, b)


def _bn_add_id(y, s, ss, g, b, r, *, tm, inv_m):
    m, c = y.shape
    kernel = functools.partial(_bn_add_id_kernel, inv_m=inv_m)
    return pl.pallas_call(
        kernel,
        grid=(m // tm,),
        in_specs=[pl.BlockSpec((tm, c), lambda i: (i, 0))]
        + [pl.BlockSpec((1, c), lambda i: (0, 0))] * 4
        + [pl.BlockSpec((tm, c), lambda i: (i, 0))],
        out_specs=pl.BlockSpec((tm, c), lambda i: (i, 0)),
        out_shape=jax.ShapeDtypeStruct((m, c), jnp.float32),
        compiler_params=_compiler_params(("parallel",)),
    )(y, s, ss, g, b, r)


def _bn_add_proj(y, s, ss, g, b, r, rs, rss, rg, rb, *, tm, inv_m):
    m, c = y.shape
    kernel = functools.partial(_bn_add_proj_kernel, inv_m=inv_m)
    return pl.pallas_call(
        kernel,
        grid=(m // tm,),
        in_specs=[pl.BlockSpec((tm, c), lambda i: (i, 0))]
        + [pl.BlockSpec((1, c), lambda i: (0, 0))] * 4
        + [pl.BlockSpec((tm, c), lambda i: (i, 0))]
        + [pl.BlockSpec((1, c), lambda i: (0, 0))] * 4,
        out_specs=pl.BlockSpec((tm, c), lambda i: (i, 0)),
        out_shape=jax.ShapeDtypeStruct((m, c), jnp.float32),
        compiler_params=_compiler_params(("parallel",)),
    )(y, s, ss, g, b, r, rs, rss, rg, rb)


# --------------------------------------------------------------------------
# Glue: spatial pad + 2-D column/row-phase split for the 3x3 conv
# --------------------------------------------------------------------------
def _make_phases(x_nhwc, stride):
    # (N, H, W, C) -> (N*stride*stride, hq, wq, C).  Padded index j = q*s + r
    # lands in phase r at within-phase index q, so every 3x3 tap becomes a
    # *contiguous* slice along both spatial axes inside the kernel.
    n, h, w, c = x_nhwc.shape
    hp, wp = h + 2, w + 2
    hq = -(-hp // stride)
    wq = -(-wp // stride)
    xp = jnp.pad(x_nhwc, ((0, 0), (1, 1 + hq * stride - hp),
                          (1, 1 + wq * stride - wp), (0, 0)))
    xp = xp.reshape(n, hq, stride, wq, stride, c).transpose(0, 2, 4, 1, 3, 5)
    return xp.reshape(n * stride * stride, hq, wq, c), hq, wq


# --------------------------------------------------------------------------
# Parameters (deterministic, in-script) -- unpadded, shared with the reference
# --------------------------------------------------------------------------
def init_bottleneck_params(key, in_planes, planes, stride):
    out_planes = EXPANSION * planes
    ks = jax.random.split(key, 4)

    def conv_w(k, shape, fan_in):
        return jax.random.normal(k, shape, jnp.float32) * (1.0 / np.sqrt(fan_in))

    p = {
        "w1": conv_w(ks[0], (in_planes, planes), in_planes),      # 1x1 (Cin,Cout)
        "g1": jnp.ones((1, planes), jnp.float32),
        "b1": jnp.zeros((1, planes), jnp.float32),
        "w2": conv_w(ks[1], (3, 3, planes, planes), 9 * planes),  # 3x3 HWIO
        "g2": jnp.ones((1, planes), jnp.float32),
        "b2": jnp.zeros((1, planes), jnp.float32),
        "w3": conv_w(ks[2], (planes, out_planes), planes),        # 1x1 (Cin,Cout)
        "g3": jnp.ones((1, out_planes), jnp.float32),
        "b3": jnp.zeros((1, out_planes), jnp.float32),
    }
    if stride != 1 or in_planes != out_planes:
        p["ws"] = conv_w(ks[3], (in_planes, out_planes), in_planes)
        p["gs"] = jnp.ones((1, out_planes), jnp.float32)
        p["bs"] = jnp.zeros((1, out_planes), jnp.float32)
    return p


# --------------------------------------------------------------------------
# Forward pass
# --------------------------------------------------------------------------
def bottleneck_forward(params, x_nchw, *, stride):
    n, cin, h, w = x_nchw.shape
    planes = params["w1"].shape[1]
    out_planes = EXPANSION * planes
    ho = (h + 2 - 3) // stride + 1
    wo = (w + 2 - 3) // stride + 1

    cin_p = _round_up(cin, LANE)
    cmid_p = _round_up(planes, LANE)
    cout_p = _round_up(out_planes, LANE)

    # pad / repack parameters: weights bf16, channel axes padded to 128 lanes
    w1 = _pad2(params["w1"], cin_p, cmid_p).astype(jnp.bfloat16)
    w3 = _pad2(params["w3"], cmid_p, cout_p).astype(jnp.bfloat16)
    w2 = jnp.pad(params["w2"], ((0, 0), (0, 0),
                                (0, cmid_p - planes), (0, cmid_p - planes)))
    w2 = w2.reshape(9, cmid_p, cmid_p).astype(jnp.bfloat16)
    g1 = _pad2(params["g1"], 1, cmid_p); b1 = _pad2(params["b1"], 1, cmid_p)
    g2 = _pad2(params["g2"], 1, cmid_p); b2 = _pad2(params["b2"], 1, cmid_p)
    g3 = _pad2(params["g3"], 1, cout_p); b3 = _pad2(params["b3"], 1, cout_p)

    x_nhwc = jnp.transpose(x_nchw, (0, 2, 3, 1))
    x_bf16 = x_nhwc.astype(jnp.bfloat16)   # pre-cast: halves conv1/shortcut reads

    # ---- conv1 (1x1): tiled over M = N*H*W, per-tile stats partials
    m1 = n * h * w
    tm1 = _tile_m(m1, cin_p + cmid_p)
    m1p = _round_up(m1, tm1)
    xf = jnp.pad(x_bf16.reshape(m1, cin), ((0, m1p - m1), (0, cin_p - cin)))
    y1, s1, ss1 = _conv1x1_stats(xf, w1, tm=tm1)

    # ---- bn1 + relu (bf16 writeback), restore NHWC for conv2
    out1 = _bn_act(y1, s1, ss1, g1, b1, tm=tm1, inv_m=1.0 / m1,
                   relu=True, out_dtype=jnp.bfloat16)
    out1 = out1[:m1].reshape(n, h, w, cmid_p)

    # ---- conv2 (3x3, stride, pad=1): halo kept resident in VMEM,
    #      rows*wo output pixels per grid step (MXU M ~256)
    xph, hq, wq = _make_phases(out1, stride)
    rows = _rows_per_step(ho, wo)
    y2, s2, ss2 = _conv3x3_stats(xph, w2, stride=stride, n=n, ho=ho, wo=wo,
                                 rows=rows)

    # ---- conv3 (1x1) with bn2 + relu fused into its input path
    m2 = n * ho * wo
    tm2 = _tile_m(m2, cmid_p + cout_p)
    m2p = _round_up(m2, tm2)
    y2f = jnp.pad(y2.reshape(m2, cmid_p), ((0, m2p - m2), (0, 0)))
    y3, s3, ss3 = _conv1x1_stats(
        y2f, w3, tm=tm2,
        fuse=dict(s=s2, ss=ss2, g=g2, b=b2, inv_m=1.0 / m2, m_real=m2))

    # ---- bn3 + shortcut + residual add + relu, one fused tiled pass
    if "ws" in params:          # projection shortcut: conv1x1(stride) + bn
        ws = _pad2(params["ws"], cin_p, cout_p).astype(jnp.bfloat16)
        gs = _pad2(params["gs"], 1, cout_p); bs = _pad2(params["bs"], 1, cout_p)
        xs = x_bf16[:, ::stride, ::stride, :].reshape(m2, cin)
        xs = jnp.pad(xs, ((0, m2p - m2), (0, cin_p - cin)))
        ysc, ssc, sssc = _conv1x1_stats(xs, ws, tm=tm2)
        out3 = _bn_add_proj(y3, s3, ss3, g3, b3, ysc, ssc, sssc, gs, bs,
                            tm=tm2, inv_m=1.0 / m2)
    else:                       # identity shortcut (stride==1, cin==out_planes)
        xres = jnp.pad(x_bf16.reshape(m2, cin),
                       ((0, m2p - m2), (0, cout_p - cin)))
        out3 = _bn_add_id(y3, s3, ss3, g3, b3, xres, tm=tm2, inv_m=1.0 / m2)

    out = out3[:m2, :out_planes].reshape(n, ho, wo, out_planes)
    return jnp.transpose(out, (0, 3, 1, 2))                 # back to NCHW


# --------------------------------------------------------------------------
# Pure-JAX f32 reference (sanity check against the Pallas path)
# --------------------------------------------------------------------------
def reference_forward(params, x_nchw, *, stride):
    def bn(y, g, b):
        mu = y.mean(axis=(0, 1, 2), keepdims=True)
        var = jnp.square(y - mu).mean(axis=(0, 1, 2), keepdims=True)
        return (y - mu) * lax.rsqrt(var + BN_EPS) * g.reshape(1, 1, 1, -1) \
               + b.reshape(1, 1, 1, -1)

    x = jnp.transpose(x_nchw, (0, 2, 3, 1))
    o = jax.nn.relu(bn(jnp.einsum("nhwc,co->nhwo", x, params["w1"]),
                       params["g1"], params["b1"]))
    o = lax.conv_general_dilated(
        o, params["w2"], (stride, stride), ((1, 1), (1, 1)),
        dimension_numbers=("NHWC", "HWIO", "NHWC"))
    o = jax.nn.relu(bn(o, params["g2"], params["b2"]))
    o = bn(jnp.einsum("nhwc,co->nhwo", o, params["w3"]),
           params["g3"], params["b3"])
    if stride != 1 or x.shape[-1] != EXPANSION * params["w1"].shape[1]:
        s = x[:, ::stride, ::stride, :]
        s = bn(jnp.einsum("nhwc,co->nhwo", s, params["ws"]),
               params["gs"], params["bs"])
    else:
        s = x
    o = jax.nn.relu(o + s)
    return jnp.transpose(o, (0, 3, 1, 2))


# --------------------------------------------------------------------------
if __name__ == "__main__":
    key = jax.random.PRNGKey(0)

    configs = [
        # (in_planes, planes, stride, input NCHW shape)
        (4, 4, 1, (2, 4, 16, 16)),     # projection shortcut (channel change)
        (16, 4, 2, (2, 16, 16, 16)),   # projection shortcut with stride 2
        (16, 4, 1, (2, 16, 16, 16)),   # identity shortcut
    ]

    for in_planes, planes, stride, xshape in configs:
        kp, kx, key = jax.random.split(key, 3)
        params = init_bottleneck_params(kp, in_planes, planes, stride)
        x = jax.random.normal(kx, xshape, jnp.float32)

        fwd = jax.jit(functools.partial(bottleneck_forward, stride=stride))
        out = jax.block_until_ready(fwd(params, x))

        ref = jax.block_until_ready(reference_forward(params, x, stride=stride))
        assert out.shape == ref.shape, (out.shape, ref.shape)
        assert np.isfinite(np.asarray(out)).all()
        # bf16 MXU operands + bf16 intermediates (f32 accumulation/BN math)
        np.testing.assert_allclose(np.asarray(out), np.asarray(ref),
                                   rtol=4e-2, atol=4e-2)

    print("KERNEL_OK")
</pallas_src>

<mosaic_0001>
module attributes {stable_mosaic.version = 11 : i64} {
  func.func @_bn_act_kernel(%arg0: i32, %arg1: memref<512x128xbf16, #tpu.memory_space<vmem>>, %arg2: memref<1x128xf32, #tpu.memory_space<vmem>>, %arg3: memref<1x128xf32, #tpu.memory_space<vmem>>, %arg4: memref<1x128xf32, #tpu.memory_space<vmem>>, %arg5: memref<1x128xf32, #tpu.memory_space<vmem>>, %arg6: memref<512x128xbf16, #tpu.memory_space<vmem>>) attributes {dimension_semantics = [#tpu.dimension_semantics<parallel>], iteration_bounds = array<i64: 1>, scalar_prefetch = 0 : i64, scratch_operands = 0 : i64, tpu.core_type = #tpu.core_type<tc>, window_params = [{transform_indices = @transform_0, window_bounds = array<i64: 512, 128>}, {pipeline_mode = #tpu.pipeline_mode<synchronous>, transform_indices = @transform_1, window_bounds = array<i64: 1, 128>}, {pipeline_mode = #tpu.pipeline_mode<synchronous>, transform_indices = @transform_2, window_bounds = array<i64: 1, 128>}, {pipeline_mode = #tpu.pipeline_mode<synchronous>, transform_indices = @transform_3, window_bounds = array<i64: 1, 128>}, {pipeline_mode = #tpu.pipeline_mode<synchronous>, transform_indices = @transform_4, window_bounds = array<i64: 1, 128>}, {transform_indices = @transform_5, window_bounds = array<i64: 512, 128>}]} {
    %c0 = arith.constant 0 : index
    %c0_0 = arith.constant 0 : index
    %0 = vector.load %arg2[%c0, %c0_0] : memref<1x128xf32, #tpu.memory_space<vmem>>, vector<1x128xf32>
    %c0_1 = arith.constant 0 : index
    %c0_2 = arith.constant 0 : index
    %1 = vector.load %arg3[%c0_1, %c0_2] : memref<1x128xf32, #tpu.memory_space<vmem>>, vector<1x128xf32>
    %c0_3 = arith.constant 0 : index
    %c0_4 = arith.constant 0 : index
    %2 = vector.load %arg4[%c0_3, %c0_4] : memref<1x128xf32, #tpu.memory_space<vmem>>, vector<1x128xf32>
    %c0_5 = arith.constant 0 : index
    %c0_6 = arith.constant 0 : index
    %3 = vector.load %arg5[%c0_5, %c0_6] : memref<1x128xf32, #tpu.memory_space<vmem>>, vector<1x128xf32>
    %cst = arith.constant 0.001953125 : f32
    %4 = vector.broadcast %cst : f32 to vector<1x128xf32>
    %5 = arith.mulf %0, %4 : vector<1x128xf32>
    %cst_7 = arith.constant 0.001953125 : f32
    %6 = vector.broadcast %cst_7 : f32 to vector<1x128xf32>
    %7 = arith.mulf %1, %6 : vector<1x128xf32>
    %8 = arith.mulf %5, %5 : vector<1x128xf32>
    %9 = arith.subf %7, %8 : vector<1x128xf32>
    %cst_8 = arith.constant 9.99999974E-6 : f32
    %10 = vector.broadcast %cst_8 : f32 to vector<1x128xf32>
    %11 = arith.addf %9, %10 : vector<1x128xf32>
    %12 = math.rsqrt %11 : vector<1x128xf32>
    %13 = arith.mulf %12, %2 : vector<1x128xf32>
    %14 = arith.mulf %5, %13 : vector<1x128xf32>
    %15 = arith.subf %3, %14 : vector<1x128xf32>
    %c0_9 = arith.constant 0 : index
    %c0_10 = arith.constant 0 : index
    %16 = vector.load %arg1[%c0_9, %c0_10] : memref<512x128xbf16, #tpu.memory_space<vmem>>, vector<512x128xbf16>
    %17 = arith.extf %16 : vector<512x128xbf16> to vector<512x128xf32>
    %18 = vector.broadcast %13 : vector<1x128xf32> to vector<512x128xf32>
    %19 = arith.mulf %17, %18 : vector<512x128xf32>
    %20 = vector.broadcast %15 : vector<1x128xf32> to vector<512x128xf32>
    %21 = arith.addf %19, %20 : vector<512x128xf32>
    %cst_11 = arith.constant 0.000000e+00 : f32
    %22 = vector.broadcast %cst_11 : f32 to vector<512x128xf32>
    %23 = arith.maximumf %21, %22 : vector<512x128xf32>
    %24 = arith.truncf %23 : vector<512x128xf32> to vector<512x128xbf16>
    %c0_12 = arith.constant 0 : index
    %c0_13 = arith.constant 0 : index
    %25 = vector.load %arg6[%c0_12, %c0_13] : memref<512x128xbf16, #tpu.memory_space<vmem>>, vector<512x128xbf16>
    tpu.vector_store %arg6[%c0_12, %c0_13], %24 {strides = array<i32>} : memref<512x128xbf16, #tpu.memory_space<vmem>>, vector<512x128xbf16>,
    return
  }
  func.func @transform_0(%arg0: i32) -> (i32, i32) {
    %c0_i32 = arith.constant 0 : i32
    %c0_i32_0 = arith.constant 0 : i32
    return %arg0, %c0_i32 : i32, i32
  }
  func.func @transform_1(%arg0: i32) -> (i32, i32) {
    %c0_i32 = arith.constant 0 : i32
    %c0_i32_0 = arith.constant 0 : i32
    %c0_i32_1 = arith.constant 0 : i32
    return %c0_i32, %c0_i32_0 : i32, i32
  }
  func.func @transform_2(%arg0: i32) -> (i32, i32) {
    %c0_i32 = arith.constant 0 : i32
    %c0_i32_0 = arith.constant 0 : i32
    %c0_i32_1 = arith.constant 0 : i32
    return %c0_i32, %c0_i32_0 : i32, i32
  }
  func.func @transform_3(%arg0: i32) -> (i32, i32) {
    %c0_i32 = arith.constant 0 : i32
    %c0_i32_0 = arith.constant 0 : i32
    %c0_i32_1 = arith.constant 0 : i32
    return %c0_i32, %c0_i32_0 : i32, i32
  }
  func.func @transform_4(%arg0: i32) -> (i32, i32) {
    %c0_i32 = arith.constant 0 : i32
    %c0_i32_0 = arith.constant 0 : i32
    %c0_i32_1 = arith.constant 0 : i32
    return %c0_i32, %c0_i32_0 : i32, i32
  }
  func.func @transform_5(%arg0: i32) -> (i32, i32) {
    %c0_i32 = arith.constant 0 : i32
    %c0_i32_0 = arith.constant 0 : i32
    return %arg0, %c0_i32 : i32, i32
  }
}

module attributes {stable_mosaic.version = 11 : i64} {
  func.func @_mm_stats_kernel(%arg0: i32, %arg1: memref<512x128xbf16, #tpu.memory_space<vmem>>, %arg2: memref<128x128xbf16, #tpu.memory_space<vmem>>, %arg3: memref<512x128xbf16, #tpu.memory_space<vmem>>, %arg4: memref<1x1x128xf32, #tpu.memory_space<vmem>>, %arg5: memref<1x1x128xf32, #tpu.memory_space<vmem>>) attributes {dimension_semantics = [#tpu.dimension_semantics<parallel>], iteration_bounds = array<i64: 1>, scalar_prefetch = 0 : i64, scratch_operands = 0 : i64, tpu.core_type = #tpu.core_type<tc>, window_params = [{transform_indices = @transform_0, window_bounds = array<i64: 512, 128>}, {pipeline_mode = #tpu.pipeline_mode<synchronous>, transform_indices = @transform_1, window_bounds = array<i64: 128, 128>}, {transform_indices = @transform_2, window_bounds = array<i64: 512, 128>}, {transform_indices = @transform_3, window_bounds = array<i64: 1, 1, 128>}, {transform_indices = @transform_4, window_bounds = array<i64: 1, 1, 128>}]} {
    %c0 = arith.constant 0 : index
    %c0_0 = arith.constant 0 : index
    %0 = vector.load %arg1[%c0, %c0_0] : memref<512x128xbf16, #tpu.memory_space<vmem>>, vector<512x128xbf16>
    %c0_1 = arith.constant 0 : index
    %c0_2 = arith.constant 0 : index
    %1 = vector.load %arg2[%c0_1, %c0_2] : memref<128x128xbf16, #tpu.memory_space<vmem>>, vector<128x128xbf16>
    %cst = arith.constant dense<0.000000e+00> : vector<512x128xf32>
    %2 = tpu.matmul %0, %1, %cst {dimension_numbers = #tpu.dot_dimension_numbers<[1], [0], [0], [1], [0, 0, 1, 1], [], []>} : vector<512x128xbf16>, vector<128x128xbf16>, vector<512x128xf32> -> vector<512x128xf32>
    %3 = arith.truncf %2 : vector<512x128xf32> to vector<512x128xbf16>
    %c0_3 = arith.constant 0 : index
    %c0_4 = arith.constant 0 : index
    %4 = vector.load %arg3[%c0_3, %c0_4] : memref<512x128xbf16, #tpu.memory_space<vmem>>, vector<512x128xbf16>
    tpu.vector_store %arg3[%c0_3, %c0_4], %3 {strides = array<i32>} : memref<512x128xbf16, #tpu.memory_space<vmem>>, vector<512x128xbf16>,
    %cst_5 = arith.constant dense<0.000000e+00> : vector<128xf32>
    %5 = vector.multi_reduction <add>, %2, %cst_5 [0] : vector<512x128xf32> to vector<128xf32>
    %6 = vector.shape_cast %5 : vector<128xf32> to vector<1x128xf32>
    %c0_6 = arith.constant 0 : index
    %c0_7 = arith.constant 0 : index
    %c0_8 = arith.constant 0 : index
    %7 = vector.load %arg4[%c0_6, %c0_7, %c0_8] : memref<1x1x128xf32, #tpu.memory_space<vmem>>, vector<1x1x128xf32>
    %8 = vector.shape_cast %7 : vector<1x1x128xf32> to vector<1x128xf32>
    %9 = vector.shape_cast %6 : vector<1x128xf32> to vector<1x1x128xf32>
    tpu.vector_store %arg4[%c0_6, %c0_7, %c0_8], %9 {strides = array<i32>} : memref<1x1x128xf32, #tpu.memory_space<vmem>>, vector<1x1x128xf32>,
    %10 = arith.mulf %2, %2 : vector<512x128xf32>
    %cst_9 = arith.constant dense<0.000000e+00> : vector<128xf32>
    %11 = vector.multi_reduction <add>, %10, %cst_9 [0] : vector<512x128xf32> to vector<128xf32>
    %12 = vector.shape_cast %11 : vector<128xf32> to vector<1x128xf32>
    %c0_10 = arith.constant 0 : index
    %c0_11 = arith.constant 0 : index
    %c0_12 = arith.constant 0 : index
    %13 = vector.load %arg5[%c0_10, %c0_11, %c0_12] : memref<1x1x128xf32, #tpu.memory_space<vmem>>, vector<1x1x128xf32>
    %14 = vector.shape_cast %13 : vector<1x1x128xf32> to vector<1x128xf32>
    %15 = vector.shape_cast %12 : vector<1x128xf32> to vector<1x1x128xf32>
    tpu.vector_store %arg5[%c0_10, %c0_11, %c0_12], %15 {strides = array<i32>} : memref<1x1x128xf32, #tpu.memory_space<vmem>>, vector<1x1x128xf32>,
    return
  }
  func.func @transform_0(%arg0: i32) -> (i32, i32) {
    %c0_i32 = arith.constant 0 : i32
    %c0_i32_0 = arith.constant 0 : i32
    return %arg0, %c0_i32 : i32, i32
  }
  func.func @transform_1(%arg0: i32) -> (i32, i32) {
    %c0_i32 = arith.constant 0 : i32
    %c0_i32_0 = arith.constant 0 : i32
    %c0_i32_1 = arith.constant 0 : i32
    return %c0_i32, %c0_i32_0 : i32, i32
  }
  func.func @transform_2(%arg0: i32) -> (i32, i32) {
    %c0_i32 = arith.constant 0 : i32
    %c0_i32_0 = arith.constant 0 : i32
    return %arg0, %c0_i32 : i32, i32
  }
  func.func @transform_3(%arg0: i32) -> (i32, i32, i32) {
    %c0_i32 = arith.constant 0 : i32
    %c0_i32_0 = arith.constant 0 : i32
    %c0_i32_1 = arith.constant 0 : i32
    return %arg0, %c0_i32, %c0_i32_0 : i32, i32, i32
  }
  func.func @transform_4(%arg0: i32) -> (i32, i32, i32) {
    %c0_i32 = arith.constant 0 : i32
    %c0_i32_0 = arith.constant 0 : i32
    %c0_i32_1 = arith.constant 0 : i32
    return %arg0, %c0_i32, %c0_i32_0 : i32, i32, i32
  }
}

module attributes {stable_mosaic.version = 11 : i64} {
  func.func @_conv3x3_stats_kernel(%arg0: i32, %arg1: i32, %arg2: memref<1x18x18x128xbf16, #tpu.memory_space<vmem>>, %arg3: memref<9x128x128xbf16, #tpu.memory_space<vmem>>, %arg4: memref<16x16x128xbf16, #tpu.memory_space<vmem>>, %arg5: memref<1x1x128xf32, #tpu.memory_space<vmem>>, %arg6: memref<1x1x128xf32, #tpu.memory_space<vmem>>) attributes {dimension_semantics = [#tpu.dimension_semantics<parallel>, #tpu.dimension_semantics<parallel>], iteration_bounds = array<i64: 2, 1>, scalar_prefetch = 0 : i64, scratch_operands = 0 : i64, tpu.core_type = #tpu.core_type<tc>, window_params = [{transform_indices = @transform_0, window_bounds = array<i64: 1, 18, 18, 128>}, {pipeline_mode = #tpu.pipeline_mode<synchronous>, transform_indices = @transform_1, window_bounds = array<i64: 9, 128, 128>}, {transform_indices = @transform_2, window_bounds = array<i64: 16, 16, 128>}, {transform_indices = @transform_3, window_bounds = array<i64: 1, 1, 128>}, {transform_indices = @transform_4, window_bounds = array<i64: 1, 1, 128>}]} {
    %cst = arith.constant 0.000000e+00 : f32
    %0 = vector.broadcast %cst : f32 to vector<256x128xf32>
    %c16_i32 = arith.constant 16 : i32
    %1 = arith.muli %arg1, %c16_i32 : i32
    %c0_i32 = arith.constant 0 : i32
    %2 = arith.addi %1, %c0_i32 : i32
    %c0 = arith.constant 0 : index
    %3 = arith.index_cast %2 : i32 to index
    %c0_0 = arith.constant 0 : index
    %c0_1 = arith.constant 0 : index
    %4 = vector.load %arg2[%c0, %3, %c0_0, %c0_1] : memref<1x18x18x128xbf16, #tpu.memory_space<vmem>>, vector<1x16x16x128xbf16>
    %5 = vector.shape_cast %4 : vector<1x16x16x128xbf16> to vector<16x16x128xbf16>
    %6 = vector.shape_cast %5 : vector<16x16x128xbf16> to vector<256x128xbf16>
    %c0_2 = arith.constant 0 : index
    %c0_3 = arith.constant 0 : index
    %c0_4 = arith.constant 0 : index
    %7 = vector.load %arg3[%c0_2, %c0_3, %c0_4] : memref<9x128x128xbf16, #tpu.memory_space<vmem>>, vector<1x128x128xbf16>
    %8 = vector.shape_cast %7 : vector<1x128x128xbf16> to vector<128x128xbf16>
    %cst_5 = arith.constant dense<0.000000e+00> : vector<256x128xf32>
    %9 = tpu.matmul %6, %8, %cst_5 {dimension_numbers = #tpu.dot_dimension_numbers<[1], [0], [0], [1], [0, 0, 1, 1], [], []>} : vector<256x128xbf16>, vector<128x128xbf16>, vector<256x128xf32> -> vector<256x128xf32>
    %10 = arith.addf %0, %9 : vector<256x128xf32>
    %c16_i32_6 = arith.constant 16 : i32
    %11 = arith.muli %arg1, %c16_i32_6 : i32
    %c0_i32_7 = arith.constant 0 : i32
    %12 = arith.addi %11, %c0_i32_7 : i32
    %c0_8 = arith.constant 0 : index
    %13 = arith.index_cast %12 : i32 to index
    %c1 = arith.constant 1 : index
    %c0_9 = arith.constant 0 : index
    %14 = vector.load %arg2[%c0_8, %13, %c1, %c0_9] : memref<1x18x18x128xbf16, #tpu.memory_space<vmem>>, vector<1x16x16x128xbf16>
    %15 = vector.shape_cast %14 : vector<1x16x16x128xbf16> to vector<16x16x128xbf16>
    %16 = vector.shape_cast %15 : vector<16x16x128xbf16> to vector<256x128xbf16>
    %c1_10 = arith.constant 1 : index
    %c0_11 = arith.constant 0 : index
    %c0_12 = arith.constant 0 : index
    %17 = vector.load %arg3[%c1_10, %c0_11, %c0_12] : memref<9x128x128xbf16, #tpu.memory_space<vmem>>, vector<1x128x128xbf16>
    %18 = vector.shape_cast %17 : vector<1x128x128xbf16> to vector<128x128xbf16>
    %cst_13 = arith.constant dense<0.000000e+00> : vector<256x128xf32>
    %19 = tpu.matmul %16, %18, %cst_13 {dimension_numbers = #tpu.dot_dimension_numbers<[1], [0], [0], [1], [0, 0, 1, 1], [], []>} : vector<256x128xbf16>, vector<128x128xbf16>, vector<256x128xf32> -> vector<256x128xf32>
    %20 = arith.addf %10, %19 : vector<256x128xf32>
    %c16_i32_14 = arith.constant 16 : i32
    %21 = arith.muli %arg1, %c16_i32_14 : i32
    %c0_i32_15 = arith.constant 0 : i32
    %22 = arith.addi %21, %c0_i32_15 : i32
    %c0_16 = arith.constant 0 : index
    %23 = arith.index_cast %22 : i32 to index
    %c2 = arith.constant 2 : index
    %c0_17 = arith.constant 0 : index
    %24 = vector.load %arg2[%c0_16, %23, %c2, %c0_17] : memref<1x18x18x128xbf16, #tpu.memory_space<vmem>>, vector<1x16x16x128xbf16>
    %25 = vector.shape_cast %24 : vector<1x16x16x128xbf16> to vector<16x16x128xbf16>
    %26 = vector.shape_cast %25 : vector<16x16x128xbf16> to vector<256x128xbf16>
    %c2_18 = arith.constant 2 : index
    %c0_19 = arith.constant 0 : index
    %c0_20 = arith.constant 0 : index
    %27 = vector.load %arg3[%c2_18, %c0_19, %c0_20] : memref<9x128x128xbf16, #tpu.memory_space<vmem>>, vector<1x128x128xbf16>
    %28 = vector.shape_cast %27 : vector<1x128x128xbf16> to vector<128x128xbf16>
    %cst_21 = arith.constant dense<0.000000e+00> : vector<256x128xf32>
    %29 = tpu.matmul %26, %28, %cst_21 {dimension_numbers = #tpu.dot_dimension_numbers<[1], [0], [0], [1], [0, 0, 1, 1], [], []>} : vector<256x128xbf16>, vector<128x128xbf16>, vector<256x128xf32> -> vector<256x128xf32>
    %30 = arith.addf %20, %29 : vector<256x128xf32>
    %c16_i32_22 = arith.constant 16 : i32
    %31 = arith.muli %arg1, %c16_i32_22 : i32
    %c1_i32 = arith.constant 1 : i32
    %32 = arith.addi %31, %c1_i32 : i32
    %c0_23 = arith.constant 0 : index
    %33 = arith.index_cast %32 : i32 to index
    %c0_24 = arith.constant 0 : index
    %c0_25 = arith.constant 0 : index
    %34 = vector.load %arg2[%c0_23, %33, %c0_24, %c0_25] : memref<1x18x18x128xbf16, #tpu.memory_space<vmem>>, vector<1x16x16x128xbf16>
    %35 = vector.shape_cast %34 : vector<1x16x16x128xbf16> to vector<16x16x128xbf16>
    %36 = vector.shape_cast %35 : vector<16x16x128xbf16> to vector<256x128xbf16>
    %c3 = arith.constant 3 : index
    %c0_26 = arith.constant 0 : index
    %c0_27 = arith.constant 0 : index
    %37 = vector.load %arg3[%c3, %c0_26, %c0_27] : memref<9x128x128xbf16, #tpu.memory_space<vmem>>, vector<1x128x128xbf16>
    %38 = vector.shape_cast %37 : vector<1x128x128xbf16> to vector<128x128xbf16>
    %cst_28 = arith.constant dense<0.000000e+00> : vector<256x128xf32>
    %39 = tpu.matmul %36, %38, %cst_28 {dimension_numbers = #tpu.dot_dimension_numbers<[1], [0], [0], [1], [0, 0, 1, 1], [], []>} : vector<256x128xbf16>, vector<128x128xbf16>, vector<256x128xf32> -> vector<256x128xf32>
    %40 = arith.addf %30, %39 : vector<256x128xf32>
    %c16_i32_29 = arith.constant 16 : i32
    %41 = arith.muli %arg1, %c16_i32_29 : i32
    %c1_i32_30 = arith.constant 1 : i32
    %42 = arith.addi %41, %c1_i32_30 : i32
    %c0_31 = arith.constant 0 : index
    %43 = arith.index_cast %42 : i32 to index
    %c1_32 = arith.constant 1 : index
    %c0_33 = arith.constant 0 : index
    %44 = vector.load %arg2[%c0_31, %43, %c1_32, %c0_33] : memref<1x18x18x128xbf16, #tpu.memory_space<vmem>>, vector<1x16x16x128xbf16>
    %45 = vector.shape_cast %44 : vector<1x16x16x128xbf16> to vector<16x16x128xbf16>
    %46 = vector.shape_cast %45 : vector<16x16x128xbf16> to vector<256x128xbf16>
    %c4 = arith.constant 4 : index
    %c0_34 = arith.constant 0 : index
    %c0_35 = arith.constant 0 : index
    %47 = vector.load %arg3[%c4, %c0_34, %c0_35] : memref<9x128x128xbf16, #tpu.memory_space<vmem>>, vector<1x128x128xbf16>
    %48 = vector.shape_cast %47 : vector<1x128x128xbf16> to vector<128x128xbf16>
    %cst_36 = arith.constant dense<0.000000e+00> : vector<256x128xf32>
    %49 = tpu.matmul %46, %48, %cst_36 {dimension_numbers = #tpu.dot_dimension_numbers<[1], [0], [0], [1], [0, 0, 1, 1], [], []>} : vector<256x128xbf16>, vector<128x128xbf16>, vector<256x128xf32> -> vector<256x128xf32>
    %50 = arith.addf %40, %49 : vector<256x128xf32>
    %c16_i32_37 = arith.constant 16 : i32
    %51 = arith.muli %arg1, %c16_i32_37 : i32
    %c1_i32_38 = arith.constant 1 : i32
    %52 = arith.addi %51, %c1_i32_38 : i32
    %c0_39 = arith.constant 0 : index
    %53 = arith.index_cast %52 : i32 to index
    %c2_40 = arith.constant 2 : index
    %c0_41 = arith.constant 0 : index
    %54 = vector.load %arg2[%c0_39, %53, %c2_40, %c0_41] : memref<1x18x18x128xbf16, #tpu.memory_space<vmem>>, vector<1x16x16x128xbf16>
    %55 = vector.shape_cast %54 : vector<1x16x16x128xbf16> to vector<16x16x128xbf16>
    %56 = vector.shape_cast %55 : vector<16x16x128xbf16> to vector<256x128xbf16>
    %c5 = arith.constant 5 : index
    %c0_42 = arith.constant 0 : index
    %c0_43 = arith.constant 0 : index
    %57 = vector.load %arg3[%c5, %c0_42, %c0_43] : memref<9x128x128xbf16, #tpu.memory_space<vmem>>, vector<1x128x128xbf16>
    %58 = vector.shape_cast %57 : vector<1x128x128xbf16> to vector<128x128xbf16>
    %cst_44 = arith.constant dense<0.000000e+00> : vector<256x128xf32>
    %59 = tpu.matmul %56, %58, %cst_44 {dimension_numbers = #tpu.dot_dimension_numbers<[1], [0], [0], [1], [0, 0, 1, 1], [], []>} : vector<256x128xbf16>, vector<128x128xbf16>, vector<256x128xf32> -> vector<256x128xf32>
    %60 = arith.addf %50, %59 : vector<256x128xf32>
    %c16_i32_45 = arith.constant 16 : i32
    %61 = arith.muli %arg1, %c16_i32_45 : i32
    %c2_i32 = arith.constant 2 : i32
    %62 = arith.addi %61, %c2_i32 : i32
    %c0_46 = arith.constant 0 : index
    %63 = arith.index_cast %62 : i32 to index
    %c0_47 = arith.constant 0 : index
    %c0_48 = arith.constant 0 : index
    %64 = vector.load %arg2[%c0_46, %63, %c0_47, %c0_48] : memref<1x18x18x128xbf16, #tpu.memory_space<vmem>>, vector<1x16x16x128xbf16>
    %65 = vector.shape_cast %64 : vector<1x16x16x128xbf16> to vector<16x16x128xbf16>
    %66 = vector.shape_cast %65 : vector<16x16x128xbf16> to vector<256x128xbf16>
    %c6 = arith.constant 6 : index
    %c0_49 = arith.constant 0 : index
    %c0_50 = arith.constant 0 : index
    %67 = vector.load %arg3[%c6, %c0_49, %c0_50] : memref<9x128x128xbf16, #tpu.memory_space<vmem>>, vector<1x128x128xbf16>
    %68 = vector.shape_cast %67 : vector<1x128x128xbf16> to vector<128x128xbf16>
    %cst_51 = arith.constant dense<0.000000e+00> : vector<256x128xf32>
    %69 = tpu.matmul %66, %68, %cst_51 {dimension_numbers = #tpu.dot_dimension_numbers<[1], [0], [0], [1], [0, 0, 1, 1], [], []>} : vector<256x128xbf16>, vector<128x128xbf16>, vector<256x128xf32> -> vector<256x128xf32>
    %70 = arith.addf %60, %69 : vector<256x128xf32>
    %c16_i32_52 = arith.constant 16 : i32
    %71 = arith.muli %arg1, %c16_i32_52 : i32
    %c2_i32_53 = arith.constant 2 : i32
    %72 = arith.addi %71, %c2_i32_53 : i32
    %c0_54 = arith.constant 0 : index
    %73 = arith.index_cast %72 : i32 to index
    %c1_55 = arith.constant 1 : index
    %c0_56 = arith.constant 0 : index
    %74 = vector.load %arg2[%c0_54, %73, %c1_55, %c0_56] : memref<1x18x18x128xbf16, #tpu.memory_space<vmem>>, vector<1x16x16x128xbf16>
    %75 = vector.shape_cast %74 : vector<1x16x16x128xbf16> to vector<16x16x128xbf16>
    %76 = vector.shape_cast %75 : vector<16x16x128xbf16> to vector<256x128xbf16>
    %c7 = arith.constant 7 : index
    %c0_57 = arith.constant 0 : index
    %c0_58 = arith.constant 0 : index
    %77 = vector.load %arg3[%c7, %c0_57, %c0_58] : memref<9x128x128xbf16, #tpu.memory_space<vmem>>, vector<1x128x128xbf16>
    %78 = vector.shape_cast %77 : vector<1x128x128xbf16> to vector<128x128xbf16>
    %cst_59 = arith.constant dense<0.000000e+00> : vector<256x128xf32>
    %79 = tpu.matmul %76, %78, %cst_59 {dimension_numbers = #tpu.dot_dimension_numbers<[1], [0], [0], [1], [0, 0, 1, 1], [], []>} : vector<256x128xbf16>, vector<128x128xbf16>, vector<256x128xf32> -> vector<256x128xf32>
    %80 = arith.addf %70, %79 : vector<256x128xf32>
    %c16_i32_60 = arith.constant 16 : i32
    %81 = arith.muli %arg1, %c16_i32_60 : i32
    %c2_i32_61 = arith.constant 2 : i32
    %82 = arith.addi %81, %c2_i32_61 : i32
    %c0_62 = arith.constant 0 : index
    %83 = arith.index_cast %82 : i32 to index
    %c2_63 = arith.constant 2 : index
    %c0_64 = arith.constant 0 : index
    %84 = vector.load %arg2[%c0_62, %83, %c2_63, %c0_64] : memref<1x18x18x128xbf16, #tpu.memory_space<vmem>>, vector<1x16x16x128xbf16>
    %85 = vector.shape_cast %84 : vector<1x16x16x128xbf16> to vector<16x16x128xbf16>
    %86 = vector.shape_cast %85 : vector<16x16x128xbf16> to vector<256x128xbf16>
    %c8 = arith.constant 8 : index
    %c0_65 = arith.constant 0 : index
    %c0_66 = arith.constant 0 : index
    %87 = vector.load %arg3[%c8, %c0_65, %c0_66] : memref<9x128x128xbf16, #tpu.memory_space<vmem>>, vector<1x128x128xbf16>
    %88 = vector.shape_cast %87 : vector<1x128x128xbf16> to vector<128x128xbf16>
    %cst_67 = arith.constant dense<0.000000e+00> : vector<256x128xf32>
    %89 = tpu.matmul %86, %88, %cst_67 {dimension_numbers = #tpu.dot_dimension_numbers<[1], [0], [0], [1], [0, 0, 1, 1], [], []>} : vector<256x128xbf16>, vector<128x128xbf16>, vector<256x128xf32> -> vector<256x128xf32>
    %90 = arith.addf %80, %89 : vector<256x128xf32>
    %91 = vector.shape_cast %90 : vector<256x128xf32> to vector<16x16x128xf32>
    %cst_68 = arith.constant dense<0.000000e+00> : vector<128xf32>
    %92 = vector.multi_reduction <add>, %90, %cst_68 [0] : vector<256x128xf32> to vector<128xf32>
    %93 = vector.shape_cast %92 : vector<128xf32> to vector<1x128xf32>
    %c0_69 = arith.constant 0 : index
    %c0_70 = arith.constant 0 : index
    %c0_71 = arith.constant 0 : index
    %94 = vector.load %arg5[%c0_69, %c0_70, %c0_71] : memref<1x1x128xf32, #tpu.memory_space<vmem>>, vector<1x1x128xf32>
    %95 = vector.shape_cast %94 : vector<1x1x128xf32> to vector<1x128xf32>
    %96 = vector.shape_cast %93 : vector<1x128xf32> to vector<1x1x128xf32>
    tpu.vector_store %arg5[%c0_69, %c0_70, %c0_71], %96 {strides = array<i32>} : memref<1x1x128xf32, #tpu.memory_space<vmem>>, vector<1x1x128xf32>,
    %97 = arith.mulf %90, %90 : vector<256x128xf32>
    %cst_72 = arith.constant dense<0.000000e+00> : vector<128xf32>
    %98 = vector.multi_reduction <add>, %97, %cst_72 [0] : vector<256x128xf32> to vector<128xf32>
    %99 = vector.shape_cast %98 : vector<128xf32> to vector<1x128xf32>
    %c0_73 = arith.constant 0 : index
    %c0_74 = arith.constant 0 : index
    %c0_75 = arith.constant 0 : index
    %100 = vector.load %arg6[%c0_73, %c0_74, %c0_75] : memref<1x1x128xf32, #tpu.memory_space<vmem>>, vector<1x1x128xf32>
    %101 = vector.shape_cast %100 : vector<1x1x128xf32> to vector<1x128xf32>
    %102 = vector.shape_cast %99 : vector<1x128xf32> to vector<1x1x128xf32>
    tpu.vector_store %arg6[%c0_73, %c0_74, %c0_75], %102 {strides = array<i32>} : memref<1x1x128xf32, #tpu.memory_space<vmem>>, vector<1x1x128xf32>,
    %103 = arith.truncf %91 : vector<16x16x128xf32> to vector<16x16x128xbf16>
    %c0_76 = arith.constant 0 : index
    %c0_77 = arith.constant 0 : index
    %c0_78 = arith.constant 0 : index
    %104 = vector.load %arg4[%c0_76, %c0_77, %c0_78] : memref<16x16x128xbf16, #tpu.memory_space<vmem>>, vector<16x16x128xbf16>
    tpu.vector_store %arg4[%c0_76, %c0_77, %c0_78], %103 {strides = array<i32>} : memref<16x16x128xbf16, #tpu.memory_space<vmem>>, vector<16x16x128xbf16>,
    return
  }
  func.func @transform_0(%arg0: i32, %arg1: i32) -> (i32, i32, i32, i32) {
    %c0_i32 = arith.constant 0 : i32
    %c0_i32_0 = arith.constant 0 : i32
    %c0_i32_1 = arith.constant 0 : i32
    %c0_i32_2 = arith.constant 0 : i32
    return %arg0, %c0_i32, %c0_i32_0, %c0_i32_1 : i32, i32, i32, i32
  }
  func.func @transform_1(%arg0: i32, %arg1: i32) -> (i32, i32, i32) {
    %c0_i32 = arith.constant 0 : i32
    %c0_i32_0 = arith.constant 0 : i32
    %c0_i32_1 = arith.constant 0 : i32
    %c0_i32_2 = arith.constant 0 : i32
    return %c0_i32, %c0_i32_0, %c0_i32_1 : i32, i32, i32
  }
  func.func @transform_2(%arg0: i32, %arg1: i32) -> (i32, i32, i32) {
    %c1_i32 = arith.constant 1 : i32
    %0 = arith.muli %arg0, %c1_i32 : i32
    %1 = arith.addi %0, %arg1 : i32
    %c0_i32 = arith.constant 0 : i32
    %c0_i32_0 = arith.constant 0 : i32
    %c0_i32_1 = arith.constant 0 : i32
    return %1, %c0_i32, %c0_i32_0 : i32, i32, i32
  }
  func.func @transform_3(%arg0: i32, %arg1: i32) -> (i32, i32, i32) {
    %c1_i32 = arith.constant 1 : i32
    %0 = arith.muli %arg0, %c1_i32 : i32
    %1 = arith.addi %0, %arg1 : i32
    %c0_i32 = arith.constant 0 : i32
    %c0_i32_0 = arith.constant 0 : i32
    %c0_i32_1 = arith.constant 0 : i32
    return %1, %c0_i32, %c0_i32_0 : i32, i32, i32
  }
  func.func @transform_4(%arg0: i32, %arg1: i32) -> (i32, i32, i32) {
    %c1_i32 = arith.constant 1 : i32
    %0 = arith.muli %arg0, %c1_i32 : i32
    %1 = arith.addi %0, %arg1 : i32
    %c0_i32 = arith.constant 0 : i32
    %c0_i32_0 = arith.constant 0 : i32
    %c0_i32_1 = arith.constant 0 : i32
    return %1, %c0_i32, %c0_i32_0 : i32, i32, i32
  }
}

module attributes {stable_mosaic.version = 11 : i64} {
  func.func @_mm_bn_stats_kernel(%arg0: i32, %arg1: memref<512x128xbf16, #tpu.memory_space<vmem>>, %arg2: memref<128x128xbf16, #tpu.memory_space<vmem>>, %arg3: memref<1x128xf32, #tpu.memory_space<vmem>>, %arg4: memref<1x128xf32, #tpu.memory_space<vmem>>, %arg5: memref<1x128xf32, #tpu.memory_space<vmem>>, %arg6: memref<1x128xf32, #tpu.memory_space<vmem>>, %arg7: memref<512x128xbf16, #tpu.memory_space<vmem>>, %arg8: memref<1x1x128xf32, #tpu.memory_space<vmem>>, %arg9: memref<1x1x128xf32, #tpu.memory_space<vmem>>) attributes {dimension_semantics = [#tpu.dimension_semantics<parallel>], iteration_bounds = array<i64: 1>, scalar_prefetch = 0 : i64, scratch_operands = 0 : i64, tpu.core_type = #tpu.core_type<tc>, window_params = [{transform_indices = @transform_0, window_bounds = array<i64: 512, 128>}, {pipeline_mode = #tpu.pipeline_mode<synchronous>, transform_indices = @transform_1, window_bounds = array<i64: 128, 128>}, {pipeline_mode = #tpu.pipeline_mode<synchronous>, transform_indices = @transform_2, window_bounds = array<i64: 1, 128>}, {pipeline_mode = #tpu.pipeline_mode<synchronous>, transform_indices = @transform_3, window_bounds = array<i64: 1, 128>}, {pipeline_mode = #tpu.pipeline_mode<synchronous>, transform_indices = @transform_4, window_bounds = array<i64: 1, 128>}, {pipeline_mode = #tpu.pipeline_mode<synchronous>, transform_indices = @transform_5, window_bounds = array<i64: 1, 128>}, {transform_indices = @transform_6, window_bounds = array<i64: 512, 128>}, {transform_indices = @transform_7, window_bounds = array<i64: 1, 1, 128>}, {transform_indices = @transform_8, window_bounds = array<i64: 1, 1, 128>}]} {
    %c0 = arith.constant 0 : index
    %c0_0 = arith.constant 0 : index
    %0 = vector.load %arg3[%c0, %c0_0] : memref<1x128xf32, #tpu.memory_space<vmem>>, vector<1x128xf32>
    %c0_1 = arith.constant 0 : index
    %c0_2 = arith.constant 0 : index
    %1 = vector.load %arg4[%c0_1, %c0_2] : memref<1x128xf32, #tpu.memory_space<vmem>>, vector<1x128xf32>
    %c0_3 = arith.constant 0 : index
    %c0_4 = arith.constant 0 : index
    %2 = vector.load %arg5[%c0_3, %c0_4] : memref<1x128xf32, #tpu.memory_space<vmem>>, vector<1x128xf32>
    %c0_5 = arith.constant 0 : index
    %c0_6 = arith.constant 0 : index
    %3 = vector.load %arg6[%c0_5, %c0_6] : memref<1x128xf32, #tpu.memory_space<vmem>>, vector<1x128xf32>
    %cst = arith.constant 0.001953125 : f32
    %4 = vector.broadcast %cst : f32 to vector<1x128xf32>
    %5 = arith.mulf %0, %4 : vector<1x128xf32>
    %cst_7 = arith.constant 0.001953125 : f32
    %6 = vector.broadcast %cst_7 : f32 to vector<1x128xf32>
    %7 = arith.mulf %1, %6 : vector<1x128xf32>
    %8 = arith.mulf %5, %5 : vector<1x128xf32>
    %9 = arith.subf %7, %8 : vector<1x128xf32>
    %cst_8 = arith.constant 9.99999974E-6 : f32
    %10 = vector.broadcast %cst_8 : f32 to vector<1x128xf32>
    %11 = arith.addf %9, %10 : vector<1x128xf32>
    %12 = math.rsqrt %11 : vector<1x128xf32>
    %13 = arith.mulf %12, %2 : vector<1x128xf32>
    %14 = arith.mulf %5, %13 : vector<1x128xf32>
    %15 = arith.subf %3, %14 : vector<1x128xf32>
    %c0_9 = arith.constant 0 : index
    %c0_10 = arith.constant 0 : index
    %16 = vector.load %arg1[%c0_9, %c0_10] : memref<512x128xbf16, #tpu.memory_space<vmem>>, vector<512x128xbf16>
    %17 = arith.extf %16 : vector<512x128xbf16> to vector<512x128xf32>
    %18 = vector.broadcast %13 : vector<1x128xf32> to vector<512x128xf32>
    %19 = arith.mulf %17, %18 : vector<512x128xf32>
    %20 = vector.broadcast %15 : vector<1x128xf32> to vector<512x128xf32>
    %21 = arith.addf %19, %20 : vector<512x128xf32>
    %cst_11 = arith.constant 0.000000e+00 : f32
    %22 = vector.broadcast %cst_11 : f32 to vector<512x128xf32>
    %23 = arith.maximumf %21, %22 : vector<512x128xf32>
    %24 = arith.truncf %23 : vector<512x128xf32> to vector<512x128xbf16>
    %c0_12 = arith.constant 0 : index
    %c0_13 = arith.constant 0 : index
    %25 = vector.load %arg2[%c0_12, %c0_13] : memref<128x128xbf16, #tpu.memory_space<vmem>>, vector<128x128xbf16>
    %cst_14 = arith.constant dense<0.000000e+00> : vector<512x128xf32>
    %26 = tpu.matmul %24, %25, %cst_14 {dimension_numbers = #tpu.dot_dimension_numbers<[1], [0], [0], [1], [0, 0, 1, 1], [], []>} : vector<512x128xbf16>, vector<128x128xbf16>, vector<512x128xf32> -> vector<512x128xf32>
    %27 = arith.truncf %26 : vector<512x128xf32> to vector<512x128xbf16>
    %c0_15 = arith.constant 0 : index
    %c0_16 = arith.constant 0 : index
    %28 = vector.load %arg7[%c0_15, %c0_16] : memref<512x128xbf16, #tpu.memory_space<vmem>>, vector<512x128xbf16>
    tpu.vector_store %arg7[%c0_15, %c0_16], %27 {strides = array<i32>} : memref<512x128xbf16, #tpu.memory_space<vmem>>, vector<512x128xbf16>,
    %cst_17 = arith.constant dense<0.000000e+00> : vector<128xf32>
    %29 = vector.multi_reduction <add>, %26, %cst_17 [0] : vector<512x128xf32> to vector<128xf32>
    %30 = vector.shape_cast %29 : vector<128xf32> to vector<1x128xf32>
    %c0_18 = arith.constant 0 : index
    %c0_19 = arith.constant 0 : index
    %c0_20 = arith.constant 0 : index
    %31 = vector.load %arg8[%c0_18, %c0_19, %c0_20] : memref<1x1x128xf32, #tpu.memory_space<vmem>>, vector<1x1x128xf32>
    %32 = vector.shape_cast %31 : vector<1x1x128xf32> to vector<1x128xf32>
    %33 = vector.shape_cast %30 : vector<1x128xf32> to vector<1x1x128xf32>
    tpu.vector_store %arg8[%c0_18, %c0_19, %c0_20], %33 {strides = array<i32>} : memref<1x1x128xf32, #tpu.memory_space<vmem>>, vector<1x1x128xf32>,
    %34 = arith.mulf %26, %26 : vector<512x128xf32>
    %cst_21 = arith.constant dense<0.000000e+00> : vector<128xf32>
    %35 = vector.multi_reduction <add>, %34, %cst_21 [0] : vector<512x128xf32> to vector<128xf32>
    %36 = vector.shape_cast %35 : vector<128xf32> to vector<1x128xf32>
    %c0_22 = arith.constant 0 : index
    %c0_23 = arith.constant 0 : index
    %c0_24 = arith.constant 0 : index
    %37 = vector.load %arg9[%c0_22, %c0_23, %c0_24] : memref<1x1x128xf32, #tpu.memory_space<vmem>>, vector<1x1x128xf32>
    %38 = vector.shape_cast %37 : vector<1x1x128xf32> to vector<1x128xf32>
    %39 = vector.shape_cast %36 : vector<1x128xf32> to vector<1x1x128xf32>
    tpu.vector_store %arg9[%c0_22, %c0_23, %c0_24], %39 {strides = array<i32>} : memref<1x1x128xf32, #tpu.memory_space<vmem>>, vector<1x1x128xf32>,
    return
  }
  func.func @transform_0(%arg0: i32) -> (i32, i32) {
    %c0_i32 = arith.constant 0 : i32
    %c0_i32_0 = arith.constant 0 : i32
    return %arg0, %c0_i32 : i32, i32
  }
  func.func @transform_1(%arg0: i32) -> (i32, i32) {
    %c0_i32 = arith.constant 0 : i32
    %c0_i32_0 = arith.constant 0 : i32
    %c0_i32_1 = arith.constant 0 : i32
    return %c0_i32, %c0_i32_0 : i32, i32
  }
  func.func @transform_2(%arg0: i32) -> (i32, i32) {
    %c0_i32 = arith.constant 0 : i32
    %c0_i32_0 = arith.constant 0 : i32
    %c0_i32_1 = arith.constant 0 : i32
    return %c0_i32, %c0_i32_0 : i32, i32
  }
  func.func @transform_3(%arg0: i32) -> (i32, i32) {
    %c0_i32 = arith.constant 0 : i32
    %c0_i32_0 = arith.constant 0 : i32
    %c0_i32_1 = arith.constant 0 : i32
    return %c0_i32, %c0_i32_0 : i32, i32
  }
  func.func @transform_4(%arg0: i32) -> (i32, i32) {
    %c0_i32 = arith.constant 0 : i32
    %c0_i32_0 = arith.constant 0 : i32
    %c0_i32_1 = arith.constant 0 : i32
    return %c0_i32, %c0_i32_0 : i32, i32
  }
  func.func @transform_5(%arg0: i32) -> (i32, i32) {
    %c0_i32 = arith.constant 0 : i32
    %c0_i32_0 = arith.constant 0 : i32
    %c0_i32_1 = arith.constant 0 : i32
    return %c0_i32, %c0_i32_0 : i32, i32
  }
  func.func @transform_6(%arg0: i32) -> (i32, i32) {
    %c0_i32 = arith.constant 0 : i32
    %c0_i32_0 = arith.constant 0 : i32
    return %arg0, %c0_i32 : i32, i32
  }
  func.func @transform_7(%arg0: i32) -> (i32, i32, i32) {
    %c0_i32 = arith.constant 0 : i32
    %c0_i32_0 = arith.constant 0 : i32
    %c0_i32_1 = arith.constant 0 : i32
    return %arg0, %c0_i32, %c0_i32_0 : i32, i32, i32
  }
  func.func @transform_8(%arg0: i32) -> (i32, i32, i32) {
    %c0_i32 = arith.constant 0 : i32
    %c0_i32_0 = arith.constant 0 : i32
    %c0_i32_1 = arith.constant 0 : i32
    return %arg0, %c0_i32, %c0_i32_0 : i32, i32, i32
  }
}

module attributes {stable_mosaic.version = 11 : i64} {
  func.func @_bn_add_proj_kernel(%arg0: i32, %arg1: memref<512x128xbf16, #tpu.memory_space<vmem>>, %arg2: memref<1x128xf32, #tpu.memory_space<vmem>>, %arg3: memref<1x128xf32, #tpu.memory_space<vmem>>, %arg4: memref<1x128xf32, #tpu.memory_space<vmem>>, %arg5: memref<1x128xf32, #tpu.memory_space<vmem>>, %arg6: memref<512x128xbf16, #tpu.memory_space<vmem>>, %arg7: memref<1x128xf32, #tpu.memory_space<vmem>>, %arg8: memref<1x128xf32, #tpu.memory_space<vmem>>, %arg9: memref<1x128xf32, #tpu.memory_space<vmem>>, %arg10: memref<1x128xf32, #tpu.memory_space<vmem>>, %arg11: memref<512x128xf32, #tpu.memory_space<vmem>>) attributes {dimension_semantics = [#tpu.dimension_semantics<parallel>], iteration_bounds = array<i64: 1>, scalar_prefetch = 0 : i64, scratch_operands = 0 : i64, tpu.core_type = #tpu.core_type<tc>, window_params = [{transform_indices = @transform_0, window_bounds = array<i64: 512, 128>}, {pipeline_mode = #tpu.pipeline_mode<synchronous>, transform_indices = @transform_1, window_bounds = array<i64: 1, 128>}, {pipeline_mode = #tpu.pipeline_mode<synchronous>, transform_indices = @transform_2, window_bounds = array<i64: 1, 128>}, {pipeline_mode = #tpu.pipeline_mode<synchronous>, transform_indices = @transform_3, window_bounds = array<i64: 1, 128>}, {pipeline_mode = #tpu.pipeline_mode<synchronous>, transform_indices = @transform_4, window_bounds = array<i64: 1, 128>}, {transform_indices = @transform_5, window_bounds = array<i64: 512, 128>}, {pipeline_mode = #tpu.pipeline_mode<synchronous>, transform_indices = @transform_6, window_bounds = array<i64: 1, 128>}, {pipeline_mode = #tpu.pipeline_mode<synchronous>, transform_indices = @transform_7, window_bounds = array<i64: 1, 128>}, {pipeline_mode = #tpu.pipeline_mode<synchronous>, transform_indices = @transform_8, window_bounds = array<i64: 1, 128>}, {pipeline_mode = #tpu.pipeline_mode<synchronous>, transform_indices = @transform_9, window_bounds = array<i64: 1, 128>}, {transform_indices = @transform_10, window_bounds = array<i64: 512, 128>}]} {
    %c0 = arith.constant 0 : index
    %c0_0 = arith.constant 0 : index
    %0 = vector.load %arg2[%c0, %c0_0] : memref<1x128xf32, #tpu.memory_space<vmem>>, vector<1x128xf32>
    %c0_1 = arith.constant 0 : index
    %c0_2 = arith.constant 0 : index
    %1 = vector.load %arg3[%c0_1, %c0_2] : memref<1x128xf32, #tpu.memory_space<vmem>>, vector<1x128xf32>
    %c0_3 = arith.constant 0 : index
    %c0_4 = arith.constant 0 : index
    %2 = vector.load %arg4[%c0_3, %c0_4] : memref<1x128xf32, #tpu.memory_space<vmem>>, vector<1x128xf32>
    %c0_5 = arith.constant 0 : index
    %c0_6 = arith.constant 0 : index
    %3 = vector.load %arg5[%c0_5, %c0_6] : memref<1x128xf32, #tpu.memory_space<vmem>>, vector<1x128xf32>
    %cst = arith.constant 0.001953125 : f32
    %4 = vector.broadcast %cst : f32 to vector<1x128xf32>
    %5 = arith.mulf %0, %4 : vector<1x128xf32>
    %cst_7 = arith.constant 0.001953125 : f32
    %6 = vector.broadcast %cst_7 : f32 to vector<1x128xf32>
    %7 = arith.mulf %1, %6 : vector<1x128xf32>
    %8 = arith.mulf %5, %5 : vector<1x128xf32>
    %9 = arith.subf %7, %8 : vector<1x128xf32>
    %cst_8 = arith.constant 9.99999974E-6 : f32
    %10 = vector.broadcast %cst_8 : f32 to vector<1x128xf32>
    %11 = arith.addf %9, %10 : vector<1x128xf32>
    %12 = math.rsqrt %11 : vector<1x128xf32>
    %13 = arith.mulf %12, %2 : vector<1x128xf32>
    %14 = arith.mulf %5, %13 : vector<1x128xf32>
    %15 = arith.subf %3, %14 : vector<1x128xf32>
    %c0_9 = arith.constant 0 : index
    %c0_10 = arith.constant 0 : index
    %16 = vector.load %arg7[%c0_9, %c0_10] : memref<1x128xf32, #tpu.memory_space<vmem>>, vector<1x128xf32>
    %c0_11 = arith.constant 0 : index
    %c0_12 = arith.constant 0 : index
    %17 = vector.load %arg8[%c0_11, %c0_12] : memref<1x128xf32, #tpu.memory_space<vmem>>, vector<1x128xf32>
    %c0_13 = arith.constant 0 : index
    %c0_14 = arith.constant 0 : index
    %18 = vector.load %arg9[%c0_13, %c0_14] : memref<1x128xf32, #tpu.memory_space<vmem>>, vector<1x128xf32>
    %c0_15 = arith.constant 0 : index
    %c0_16 = arith.constant 0 : index
    %19 = vector.load %arg10[%c0_15, %c0_16] : memref<1x128xf32, #tpu.memory_space<vmem>>, vector<1x128xf32>
    %cst_17 = arith.constant 0.001953125 : f32
    %20 = vector.broadcast %cst_17 : f32 to vector<1x128xf32>
    %21 = arith.mulf %16, %20 : vector<1x128xf32>
    %cst_18 = arith.constant 0.001953125 : f32
    %22 = vector.broadcast %cst_18 : f32 to vector<1x128xf32>
    %23 = arith.mulf %17, %22 : vector<1x128xf32>
    %24 = arith.mulf %21, %21 : vector<1x128xf32>
    %25 = arith.subf %23, %24 : vector<1x128xf32>
    %cst_19 = arith.constant 9.99999974E-6 : f32
    %26 = vector.broadcast %cst_19 : f32 to vector<1x128xf32>
    %27 = arith.addf %25, %26 : vector<1x128xf32>
    %28 = math.rsqrt %27 : vector<1x128xf32>
    %29 = arith.mulf %28, %18 : vector<1x128xf32>
    %30 = arith.mulf %21, %29 : vector<1x128xf32>
    %31 = arith.subf %19, %30 : vector<1x128xf32>
    %c0_20 = arith.constant 0 : index
    %c0_21 = arith.constant 0 : index
    %32 = vector.load %arg1[%c0_20, %c0_21] : memref<512x128xbf16, #tpu.memory_space<vmem>>, vector<512x128xbf16>
    %33 = arith.extf %32 : vector<512x128xbf16> to vector<512x128xf32>
    %34 = vector.broadcast %13 : vector<1x128xf32> to vector<512x128xf32>
    %35 = arith.mulf %33, %34 : vector<512x128xf32>
    %36 = vector.broadcast %15 : vector<1x128xf32> to vector<512x128xf32>
    %37 = arith.addf %35, %36 : vector<512x128xf32>
    %c0_22 = arith.constant 0 : index
    %c0_23 = arith.constant 0 : index
    %38 = vector.load %arg6[%c0_22, %c0_23] : memref<512x128xbf16, #tpu.memory_space<vmem>>, vector<512x128xbf16>
    %39 = arith.extf %38 : vector<512x128xbf16> to vector<512x128xf32>
    %40 = vector.broadcast %29 : vector<1x128xf32> to vector<512x128xf32>
    %41 = arith.mulf %39, %40 : vector<512x128xf32>
    %42 = vector.broadcast %31 : vector<1x128xf32> to vector<512x128xf32>
    %43 = arith.addf %41, %42 : vector<512x128xf32>
    %44 = arith.addf %37, %43 : vector<512x128xf32>
    %cst_24 = arith.constant 0.000000e+00 : f32
    %45 = vector.broadcast %cst_24 : f32 to vector<512x128xf32>
    %46 = arith.maximumf %44, %45 : vector<512x128xf32>
    %c0_25 = arith.constant 0 : index
    %c0_26 = arith.constant 0 : index
    %47 = vector.load %arg11[%c0_25, %c0_26] : memref<512x128xf32, #tpu.memory_space<vmem>>, vector<512x128xf32>
    tpu.vector_store %arg11[%c0_25, %c0_26], %46 {strides = array<i32>} : memref<512x128xf32, #tpu.memory_space<vmem>>, vector<512x128xf32>,
    return
  }
  func.func @transform_0(%arg0: i32) -> (i32, i32) {
    %c0_i32 = arith.constant 0 : i32
    %c0_i32_0 = arith.constant 0 : i32
    return %arg0, %c0_i32 : i32, i32
  }
  func.func @transform_1(%arg0: i32) -> (i32, i32) {
    %c0_i32 = arith.constant 0 : i32
    %c0_i32_0 = arith.constant 0 : i32
    %c0_i32_1 = arith.constant 0 : i32
    return %c0_i32, %c0_i32_0 : i32, i32
  }
  func.func @transform_2(%arg0: i32) -> (i32, i32) {
    %c0_i32 = arith.constant 0 : i32
    %c0_i32_0 = arith.constant 0 : i32
    %c0_i32_1 = arith.constant 0 : i32
    return %c0_i32, %c0_i32_0 : i32, i32
  }
  func.func @transform_3(%arg0: i32) -> (i32, i32) {
    %c0_i32 = arith.constant 0 : i32
    %c0_i32_0 = arith.constant 0 : i32
    %c0_i32_1 = arith.constant 0 : i32
    return %c0_i32, %c0_i32_0 : i32, i32
  }
  func.func @transform_4(%arg0: i32) -> (i32, i32) {
    %c0_i32 = arith.constant 0 : i32
    %c0_i32_0 = arith.constant 0 : i32
    %c0_i32_1 = arith.constant 0 : i32
    return %c0_i32, %c0_i32_0 : i32, i32
  }
  func.func @transform_5(%arg0: i32) -> (i32, i32) {
    %c0_i32 = arith.constant 0 : i32
    %c0_i32_0 = arith.constant 0 : i32
    return %arg0, %c0_i32 : i32, i32
  }
  func.func @transform_6(%arg0: i32) -> (i32, i32) {
    %c0_i32 = arith.constant 0 : i32
    %c0_i32_0 = arith.constant 0 : i32
    %c0_i32_1 = arith.constant 0 : i32
    return %c0_i32, %c0_i32_0 : i32, i32
  }
  func.func @transform_7(%arg0: i32) -> (i32, i32) {
    %c0_i32 = arith.constant 0 : i32
    %c0_i32_0 = arith.constant 0 : i32
    %c0_i32_1 = arith.constant 0 : i32
    return %c0_i32, %c0_i32_0 : i32, i32
  }
  func.func @transform_8(%arg0: i32) -> (i32, i32) {
    %c0_i32 = arith.constant 0 : i32
    %c0_i32_0 = arith.constant 0 : i32
    %c0_i32_1 = arith.constant 0 : i32
    return %c0_i32, %c0_i32_0 : i32, i32
  }
  func.func @transform_9(%arg0: i32) -> (i32, i32) {
    %c0_i32 = arith.constant 0 : i32
    %c0_i32_0 = arith.constant 0 : i32
    %c0_i32_1 = arith.constant 0 : i32
    return %c0_i32, %c0_i32_0 : i32, i32
  }
  func.func @transform_10(%arg0: i32) -> (i32, i32) {
    %c0_i32 = arith.constant 0 : i32
    %c0_i32_0 = arith.constant 0 : i32
    return %arg0, %c0_i32 : i32, i32
  }
}

</mosaic_0001>

<bundles_post_ra>
// kernel: bottleneck_forward.7
= control target key start
LH: loop header
LB: loop body
LE: loop exit
PB: predicated region body
PF: predicated region fallthrough
CT: control target
= control target key end

     0   :  { %v162_v0 = vlaneseq  ;;  %s1803_s1 = inlined_call_operand.vmem [shape: f32[1,128], index: 1, kind: input, shape index: {}]   ;;  %s1804_s2 = inlined_call_operand.vmem [shape: f32[1,128], index: 2, kind: input, shape index: {}]   ;;  %s1805_s0 = inlined_call_operand.vmem [shape: bf16[512,128], index: 0, kind: input, shape index: {}]   ;;  %s1806_s3 = inlined_call_operand.vmem [shape: f32[1,128], index: 3, kind: input, shape index: {}]   ;;  %s1807_s4 = inlined_call_operand.vmem [shape: f32[1,128], index: 4, kind: input, shape index: {}]   ;;  %s1808_s5 = inlined_call_operand.vmem [shape: bf16[512,128], index: 5, kind: output, shape index: {}]  }
   0x1   :  { %v20_v1 = vld [vmem:[%s1803_s1] sm:$0x1]  ;;  %v1219_v8 = vld [vmem:[%s1805_s0 + $0x8] sm:$0xff]   ;;  %v1224_v10 = vld [vmem:[%s1805_s0 + $0x10] sm:$0xff]  }
   0x2   :  { %v21_v2 = vld [vmem:[%s1804_s2] sm:$0x1]  ;;  %v1205_v3 = vmul.f32 0.001953125, %v20_v1  ;;  %v1214_v7 = vshrl.u32 %v162_v0, 7  ;;  %v1229_v11 = vld [vmem:[%s1805_s0 + $0x18] sm:$0xff]   ;;  %v1241_v15 = vld [vmem:[%s1805_s0 + $0x28] sm:$0xff]   ;;  %v823_v18 = vunpack.c.l.bf16 %v1219_v8  ;;  %v824_v19 = vunpack.c.h.bf16 %v1219_v8 }
   0x3   :  { %v25_v4 = vmul.f32 0.001953125, %v21_v2  ;;  %v1212_v6 = vld [vmem:[%s1805_s0] sm:$0xff]   ;;  %v1249_v20 = vld [vmem:[%s1805_s0 + $0x30] sm:$0xff]   ;;  %v1254_v21 = vld [vmem:[%s1805_s0 + $0x38] sm:$0xff]   ;;  %v827_v22 = vunpack.c.l.bf16 %v1224_v10  ;;  %v828_v23 = vunpack.c.h.bf16 %v1224_v10  ;;  %v831_v24 = vunpack.c.l.bf16 %v1229_v11 }
   0x4   :  { %v26_v5 = vmul.f32 %v1205_v3, %v1205_v3  ;;  %v819_v12 = vunpack.c.l.bf16 %v1212_v6  ;;  %v820_v13 = vunpack.c.h.bf16 %v1212_v6  ;;  %v1236_v14 = vld [vmem:[%s1805_s0 + $0x20] sm:$0xff]   ;;  %v164_v17 = vsub.s32 0, %v1214_v7  ;;  %v1268_v27 = vld [vmem:[%s1805_s0 + $0x48] sm:$0xff]   ;;  %v1276_v31 = vld [vmem:[%s1805_s0 + $0x50] sm:$0xff]  }
   0x5   :  { %v832_v25 = vunpack.c.h.bf16 %v1229_v11  ;;  %v1263_v26 = vld [vmem:[%s1805_s0 + $0x40] sm:$0xff]   ;;  %v835_v28 = vunpack.c.l.bf16 %v1236_v14  ;;  %v836_v29 = vunpack.c.h.bf16 %v1236_v14  ;;  %v839_v30 = vunpack.c.l.bf16 %v1241_v15  ;;  %v1281_v32 = vld [vmem:[%s1805_s0 + $0x58] sm:$0xff]   ;;  %v1295_v38 = vld [vmem:[%s1805_s0 + $0x68] sm:$0xff]  }
   0x6   :  { %v27_v9 = vsub.f32 %v25_v4, %v26_v5  ;;  %v840_v33 = vunpack.c.h.bf16 %v1241_v15  ;;  %v843_v34 = vunpack.c.l.bf16 %v1249_v20  ;;  %v844_v35 = vunpack.c.h.bf16 %v1249_v20  ;;  %v1290_v37 = vld [vmem:[%s1805_s0 + $0x60] sm:$0xff]   ;;  %v1304_v43 = vld [vmem:[%s1805_s0 + $0x70] sm:$0xff]   ;;  %v1309_v44 = vld [vmem:[%s1805_s0 + $0x78] sm:$0xff]  }
   0x7   :  { %v847_v36 = vunpack.c.l.bf16 %v1254_v21  ;;  %v848_v39 = vunpack.c.h.bf16 %v1254_v21  ;;  %v851_v40 = vunpack.c.l.bf16 %v1263_v26  ;;  %v1318_v49 = vld [vmem:[%s1805_s0 + $0x80] sm:$0xff]   ;;  %v1323_v50 = vld [vmem:[%s1805_s0 + $0x88] sm:$0xff]   ;;  %v1332_v55 = vld [vmem:[%s1805_s0 + $0x90] sm:$0xff]  }
   0x8   :  { %v28_v16 = vadd.f32 1e-05, %v27_v9  ;;  %v1337_v56 = vld [vmem:[%s1805_s0 + $0x98] sm:$0xff]   ;;  %v1346_v61 = vld [vmem:[%s1805_s0 + $0xa0] sm:$0xff]   ;;  %v1351_v62 = vld [vmem:[%s1805_s0 + $0xa8] sm:$0xff]  }
   0x9   :  { %v1360_v4 = vld [vmem:[%s1805_s0 + $0xb0] sm:$0xff]   ;;  %v1365_v5 = vld [vmem:[%s1805_s0 + $0xb8] sm:$0xff]   ;;  %v1374_v2 = vld [vmem:[%s1805_s0 + $0xc0] sm:$0xff]  }
   0xa   :  { %1167 = vrsqrt.f32 %v28_v16  ;;  %v1379_v63 = vld [vmem:[%s1805_s0 + $0xc8] sm:$0xff]   ;;  %v22_v9 = vld [vmem:[%s1806_s3] sm:$0x1]  ;;  %v1391_v59 = vld [vmem:[%s1805_s0 + $0xd0] sm:$0xff]  }
   0xb   :  { %v1400_v0 = vld [vmem:[%s1805_s0 + $0xd8] sm:$0xff]   ;;  %v1405_v60 = vld [vmem:[%s1805_s0 + $0xe0] sm:$0xff]   ;;  %v1414_v53 = vld [vmem:[%s1805_s0 + $0xe8] sm:$0xff]  }
   0xc   :  { %v1422_v58 = vld [vmem:[%s1805_s0 + $0xf0] sm:$0xff]   ;;  %v1427_v54 = vld [vmem:[%s1805_s0 + $0xf8] sm:$0xff]   ;;  %v932_v51 = vunpack.c.h.bf16 %v1405_v60  ;;  %v935_v46 = vunpack.c.l.bf16 %v1414_v53 }
   0xd   :  { %v939_v42 = vunpack.c.l.bf16 %v1422_v58  ;;  %v943_v48 = vunpack.c.l.bf16 %v1427_v54 }
  0x14   :  { %v1168_v1 = vpop.eup %1167 }
  0x15   :  { %v30_v52 = vmul.f32 %v1168_v1, %v22_v9  ;;  %v23_v1 = vld [vmem:[%s1807_s4] sm:$0x1] }
  0x17   :  { %v31_v57 = vmul.f32 %v30_v52, %v1205_v3  ;;  %v1439_v16 = vrot.slane %v30_v52, %v164_v17 }
  0x19   :  { %v32_v41 = vsub.f32 %v23_v1, %v31_v57  ;;  %v167_v3 = vmul.f32 %v819_v12, %v1439_v16  ;;  %v168_v52 = vmul.f32 %v820_v13, %v1439_v16  ;;  %v169_v45 = vmul.f32 %v823_v18, %v1439_v16 }
  0x1a   :  { %v170_v9 = vmul.f32 %v824_v19, %v1439_v16  ;;  %v171_v57 = vmul.f32 %v827_v22, %v1439_v16  ;;  %v172_v12 = vmul.f32 %v828_v23, %v1439_v16  ;;  %v173_v6 = vmul.f32 %v831_v24, %v1439_v16 }
  0x1b   :  { %v1470_v13 = vrot.slane %v32_v41, %v164_v17  ;;  %v174_v8 = vmul.f32 %v832_v25, %v1439_v16  ;;  %v175_v18 = vmul.f32 %v835_v28, %v1439_v16  ;;  %v176_v10 = vmul.f32 %v836_v29, %v1439_v16 }
  0x1c   :  { %v177_v19 = vmul.f32 %v839_v30, %v1439_v16  ;;  %v178_v7 = vmul.f32 %v840_v33, %v1439_v16  ;;  %v179_v11 = vmul.f32 %v843_v34, %v1439_v16  ;;  %v180_v17 = vmul.f32 %v844_v35, %v1439_v16 }
  0x1d   :  { %v237_v22 = vadd.f32 %v1470_v13, %v167_v3  ;;  %v238_v14 = vadd.f32 %v1470_v13, %v168_v52  ;;  %v239_v23 = vadd.f32 %v1470_v13, %v169_v45  ;;  %v240_v24 = vadd.f32 %v1470_v13, %v170_v9 }
  0x1e   :  { %v241_v25 = vadd.f32 %v1470_v13, %v171_v57  ;;  %v242_v15 = vadd.f32 %v1470_v13, %v172_v12  ;;  %v243_v28 = vadd.f32 %v1470_v13, %v173_v6  ;;  %v244_v29 = vadd.f32 %v1470_v13, %v174_v8 }
  0x1f   :  { %v301_v30 = vmax.f32 %v237_v22, 0.0  ;;  %v302_v33 = vmax.f32 %v238_v14, 0.0  ;;  %v303_v20 = vmax.f32 %v239_v23, 0.0  ;;  %v304_v34 = vmax.f32 %v240_v24, 0.0 }
  0x20   :  { %v305_v35 = vmax.f32 %v241_v25, 0.0  ;;  %v306_v41 = vmax.f32 %v242_v15, 0.0  ;;  %v307_v1 = vmax.f32 %v243_v28, 0.0  ;;  %v308_v3 = vmax.f32 %v244_v29, 0.0 }
  0x21   :  { %v948_v52 = vpack.c.bf16 %v302_v33, %v301_v30  ;;  %v953_v45 = vpack.c.bf16 %v304_v34, %v303_v20  ;;  %v245_v9 = vadd.f32 %v1470_v13, %v175_v18  ;;  %v246_v57 = vadd.f32 %v1470_v13, %v176_v10 }
  0x22   :  { %v958_v47 = vpack.c.bf16 %v306_v41, %v305_v35  ;;  %v963_v12 = vpack.c.bf16 %v308_v3, %v307_v1  ;;  %v247_v6 = vadd.f32 %v1470_v13, %v177_v19  ;;  %v248_v8 = vadd.f32 %v1470_v13, %v178_v7 }
  0x23   :  { %949 = vst [vmem:[%s1808_s5] sm:$0xff] %v948_v52   ;;  %1136 = vst [vmem:[%s1808_s5 + $0x8] sm:$0xff] %v953_v45   ;;  %v309_v22 = vmax.f32 %v245_v9, 0.0  ;;  %v310_v14 = vmax.f32 %v246_v57, 0.0  ;;  %v249_v18 = vadd.f32 %v1470_v13, %v179_v11  ;;  %v250_v10 = vadd.f32 %v1470_v13, %v180_v17 }
  0x24   :  { %1137 = vst [vmem:[%s1808_s5 + $0x10] sm:$0xff] %v958_v47   ;;  %1138 = vst [vmem:[%s1808_s5 + $0x18] sm:$0xff] %v963_v12   ;;  %v311_v19 = vmax.f32 %v247_v6, 0.0  ;;  %v312_v7 = vmax.f32 %v248_v8, 0.0  ;;  %v181_v23 = vmul.f32 %v847_v36, %v1439_v16  ;;  %v182_v11 = vmul.f32 %v848_v39, %v1439_v16 }
  0x25   :  { %v968_v24 = vpack.c.bf16 %v310_v14, %v309_v22  ;;  %v313_v17 = vmax.f32 %v249_v18, 0.0  ;;  %v314_v25 = vmax.f32 %v250_v10, 0.0  ;;  %v183_v47 = vmul.f32 %v851_v40, %v1439_v16 }
  0x26   :  { %v973_v15 = vpack.c.bf16 %v312_v7, %v311_v19  ;;  %v251_v28 = vadd.f32 %v1470_v13, %v181_v23  ;;  %v252_v29 = vadd.f32 %v1470_v13, %v182_v11  ;;  %v1809_v30 = vunpack.c.h.bf16 %v1263_v26 }
  0x27   :  { %1139 = vst [vmem:[%s1808_s5 + $0x20] sm:$0xff] %v968_v24   ;;  %v978_v21 = vpack.c.bf16 %v314_v25, %v313_v17  ;;  %v253_v39 = vadd.f32 %v1470_v13, %v183_v47  ;;  %v1810_v33 = vunpack.c.l.bf16 %v1268_v27  ;;  %v1811_v20 = vunpack.c.h.bf16 %v1268_v27 }
  0x28   :  { %v184_v36 = vmul.f32 %v1809_v30, %v1439_v16  ;;  %1140 = vst [vmem:[%s1808_s5 + $0x28] sm:$0xff] %v973_v15   ;;  %v315_v26 = vmax.f32 %v251_v28, 0.0  ;;  %v316_v35 = vmax.f32 %v252_v29, 0.0  ;;  %v1812_v1 = vunpack.c.l.bf16 %v1276_v31 }
  0x29   :  { %v185_v40 = vmul.f32 %v1810_v33, %v1439_v16  ;;  %v186_v34 = vmul.f32 %v1811_v20, %v1439_v16  ;;  %1141 = vst [vmem:[%s1808_s5 + $0x30] sm:$0xff] %v978_v21   ;;  %v317_v52 = vmax.f32 %v253_v39, 0.0  ;;  %v1813_v9 = vunpack.c.h.bf16 %v1276_v31 }
  0x2a   :  { %v254_v41 = vadd.f32 %v1470_v13, %v184_v36  ;;  %v187_v3 = vmul.f32 %v1812_v1, %v1439_v16  ;;  %v983_v12 = vpack.c.bf16 %v316_v35, %v315_v26  ;;  %v1814_v22 = vunpack.c.l.bf16 %v1281_v32 }
  0x2b   :  { %v255_v27 = vadd.f32 %v1470_v13, %v185_v40  ;;  %v256_v45 = vadd.f32 %v1470_v13, %v186_v34  ;;  %v188_v57 = vmul.f32 %v1813_v9, %v1439_v16  ;;  %v1815_v7 = vunpack.c.h.bf16 %v1281_v32 }
  0x2c   :  { %v318_v6 = vmax.f32 %v254_v41, 0.0  ;;  %v257_v8 = vadd.f32 %v1470_v13, %v187_v3  ;;  %v189_v14 = vmul.f32 %v1814_v22, %v1439_v16  ;;  %1142 = vst [vmem:[%s1808_s5 + $0x38] sm:$0xff] %v983_v12   ;;  %v1816_v17 = vunpack.c.l.bf16 %v1290_v37 }
  0x2d   :  { %v319_v18 = vmax.f32 %v255_v27, 0.0  ;;  %v320_v10 = vmax.f32 %v256_v45, 0.0  ;;  %v258_v19 = vadd.f32 %v1470_v13, %v188_v57  ;;  %v190_v23 = vmul.f32 %v1815_v7, %v1439_v16 }
  0x2e   :  { %v988_v31 = vpack.c.bf16 %v318_v6, %v317_v52  ;;  %v321_v11 = vmax.f32 %v257_v8, 0.0  ;;  %v259_v24 = vadd.f32 %v1470_v13, %v189_v14  ;;  %v191_v25 = vmul.f32 %v1816_v17, %v1439_v16 }
  0x2f   :  { %v993_v47 = vpack.c.bf16 %v320_v10, %v319_v18  ;;  %v322_v15 = vmax.f32 %v258_v19, 0.0  ;;  %v260_v28 = vadd.f32 %v1470_v13, %v190_v23  ;;  %v1817_v32 = vunpack.c.h.bf16 %v1290_v37 }
  0x30   :  { %1143 = vst [vmem:[%s1808_s5 + $0x40] sm:$0xff] %v988_v31   ;;  %v323_v30 = vmax.f32 %v259_v24, 0.0  ;;  %v261_v36 = vadd.f32 %v1470_v13, %v191_v25  ;;  %v1818_v21 = vunpack.c.l.bf16 %v1295_v38  ;;  %v1819_v33 = vunpack.c.h.bf16 %v1295_v38 }
  0x31   :  { %v192_v29 = vmul.f32 %v1817_v32, %v1439_v16  ;;  %1144 = vst [vmem:[%s1808_s5 + $0x48] sm:$0xff] %v993_v47   ;;  %v998_v37 = vpack.c.bf16 %v322_v15, %v321_v11  ;;  %v324_v20 = vmax.f32 %v260_v28, 0.0  ;;  %v1820_v26 = vunpack.c.l.bf16 %v1304_v43 }
  0x32   :  { %v193_v39 = vmul.f32 %v1818_v21, %v1439_v16  ;;  %v194_v40 = vmul.f32 %v1819_v33, %v1439_v16  ;;  %v325_v41 = vmax.f32 %v261_v36, 0.0  ;;  %v1821_v38 = vunpack.c.h.bf16 %v1304_v43 }
  0x33   :  { %v262_v34 = vadd.f32 %v1470_v13, %v192_v29  ;;  %v195_v35 = vmul.f32 %v1820_v26, %v1439_v16  ;;  %1145 = vst [vmem:[%s1808_s5 + $0x50] sm:$0xff] %v998_v37   ;;  %v1003_v27 = vpack.c.bf16 %v324_v20, %v323_v30  ;;  %v1822_v57 = vunpack.c.l.bf16 %v1309_v44 }
  0x34   :  { %v263_v1 = vadd.f32 %v1470_v13, %v193_v39  ;;  %v264_v3 = vadd.f32 %v1470_v13, %v194_v40  ;;  %v196_v52 = vmul.f32 %v1821_v38, %v1439_v16  ;;  %v1823_v43 = vunpack.c.h.bf16 %v1309_v44 }
  0x35   :  { %v326_v45 = vmax.f32 %v262_v34, 0.0  ;;  %v265_v9 = vadd.f32 %v1470_v13, %v195_v35  ;;  %v197_v12 = vmul.f32 %v1822_v57, %v1439_v16  ;;  %1146 = vst [vmem:[%s1808_s5 + $0x58] sm:$0xff] %v1003_v27   ;;  %v1824_v7 = vunpack.c.l.bf16 %v1318_v49 }
  0x36   :  { %v327_v6 = vmax.f32 %v263_v1, 0.0  ;;  %v328_v8 = vmax.f32 %v264_v3, 0.0  ;;  %v266_v22 = vadd.f32 %v1470_v13, %v196_v52  ;;  %v198_v14 = vmul.f32 %v1823_v43, %v1439_v16 }
  0x37   :  { %v1008_v18 = vpack.c.bf16 %v326_v45, %v325_v41  ;;  %v329_v10 = vmax.f32 %v265_v9, 0.0  ;;  %v267_v19 = vadd.f32 %v1470_v13, %v197_v12  ;;  %v199_v23 = vmul.f32 %v1824_v7, %v1439_v16 }
  0x38   :  { %v1013_v31 = vpack.c.bf16 %v328_v8, %v327_v6  ;;  %v330_v11 = vmax.f32 %v266_v22, 0.0  ;;  %v268_v24 = vadd.f32 %v1470_v13, %v198_v14  ;;  %v1825_v44 = vunpack.c.h.bf16 %v1318_v49 }
  0x39   :  { %1147 = vst [vmem:[%s1808_s5 + $0x60] sm:$0xff] %v1008_v18   ;;  %v331_v25 = vmax.f32 %v267_v19, 0.0  ;;  %v269_v47 = vadd.f32 %v1470_v13, %v199_v23  ;;  %v1826_v15 = vunpack.c.l.bf16 %v1323_v50  ;;  %v1827_v32 = vunpack.c.h.bf16 %v1323_v50 }
  0x3a   :  { %v200_v17 = vmul.f32 %v1825_v44, %v1439_v16  ;;  %1148 = vst [vmem:[%s1808_s5 + $0x68] sm:$0xff] %v1013_v31   ;;  %v1018_v49 = vpack.c.bf16 %v330_v11, %v329_v10  ;;  %v332_v30 = vmax.f32 %v268_v24, 0.0  ;;  %v1828_v21 = vunpack.c.l.bf16 %v1332_v55 }
  0x3b   :  { %v201_v28 = vmul.f32 %v1826_v15, %v1439_v16  ;;  %v202_v29 = vmul.f32 %v1827_v32, %v1439_v16  ;;  %v333_v33 = vmax.f32 %v269_v47, 0.0  ;;  %v1829_v50 = vunpack.c.h.bf16 %v1332_v55 }
  0x3c   :  { %v270_v36 = vadd.f32 %v1470_v13, %v200_v17  ;;  %v203_v39 = vmul.f32 %v1828_v21, %v1439_v16  ;;  %1149 = vst [vmem:[%s1808_s5 + $0x70] sm:$0xff] %v1018_v49   ;;  %v1023_v34 = vpack.c.bf16 %v332_v30, %v331_v25  ;;  %v1830_v41 = vunpack.c.l.bf16 %v1337_v56 }
  0x3d   :  { %v271_v40 = vadd.f32 %v1470_v13, %v201_v28  ;;  %v272_v37 = vadd.f32 %v1470_v13, %v202_v29  ;;  %v204_v20 = vmul.f32 %v1829_v50, %v1439_v16  ;;  %v1831_v55 = vunpack.c.h.bf16 %v1337_v56 }
  0x3e   :  { %v334_v26 = vmax.f32 %v270_v36, 0.0  ;;  %v273_v35 = vadd.f32 %v1470_v13, %v203_v39  ;;  %v205_v1 = vmul.f32 %v1830_v41, %v1439_v16  ;;  %1150 = vst [vmem:[%s1808_s5 + $0x78] sm:$0xff] %v1023_v34   ;;  %v1832_v12 = vunpack.c.l.bf16 %v1346_v61 }
  0x3f   :  { %v335_v3 = vmax.f32 %v271_v40, 0.0  ;;  %v336_v38 = vmax.f32 %v272_v37, 0.0  ;;  %v274_v52 = vadd.f32 %v1470_v13, %v204_v20  ;;  %v206_v27 = vmul.f32 %v1831_v55, %v1439_v16 }
  0x40   :  { %v1028_v45 = vpack.c.bf16 %v334_v26, %v333_v33  ;;  %v337_v9 = vmax.f32 %v273_v35, 0.0  ;;  %v275_v57 = vadd.f32 %v1470_v13, %v205_v1  ;;  %v207_v6 = vmul.f32 %v1832_v12, %v1439_v16 }
  0x41   :  { %v1033_v8 = vpack.c.bf16 %v336_v38, %v335_v3  ;;  %v338_v22 = vmax.f32 %v274_v52, 0.0  ;;  %v276_v43 = vadd.f32 %v1470_v13, %v206_v27  ;;  %v1833_v56 = vunpack.c.h.bf16 %v1346_v61 }
  0x42   :  { %1151 = vst [vmem:[%s1808_s5 + $0x80] sm:$0xff] %v1028_v45   ;;  %v339_v18 = vmax.f32 %v275_v57, 0.0  ;;  %v277_v10 = vadd.f32 %v1470_v13, %v207_v6  ;;  %v1834_v19 = vunpack.c.l.bf16 %v1351_v62  ;;  %v1835_v23 = vunpack.c.h.bf16 %v1351_v62 }
  0x43   :  { %v208_v14 = vmul.f32 %v1833_v56, %v1439_v16  ;;  %1152 = vst [vmem:[%s1808_s5 + $0x88] sm:$0xff] %v1033_v8   ;;  %v1038_v61 = vpack.c.bf16 %v338_v22, %v337_v9  ;;  %v340_v11 = vmax.f32 %v276_v43, 0.0  ;;  %v1836_v44 = vunpack.c.l.bf16 %v1360_v4 }
  0x44   :  { %v209_v7 = vmul.f32 %v1834_v19, %v1439_v16  ;;  %v210_v31 = vmul.f32 %v1835_v23, %v1439_v16  ;;  %v341_v25 = vmax.f32 %v277_v10, 0.0  ;;  %v1837_v62 = vunpack.c.h.bf16 %v1360_v4 }
  0x45   :  { %v278_v24 = vadd.f32 %v1470_v13, %v208_v14  ;;  %v211_v17 = vmul.f32 %v1836_v44, %v1439_v16  ;;  %1153 = vst [vmem:[%s1808_s5 + $0x90] sm:$0xff] %v1038_v61   ;;  %v1043_v32 = vpack.c.bf16 %v340_v11, %v339_v18  ;;  %v1838_v30 = vunpack.c.l.bf16 %v1365_v5 }
  0x46   :  { %v279_v47 = vadd.f32 %v1470_v13, %v209_v7  ;;  %v280_v15 = vadd.f32 %v1470_v13, %v210_v31  ;;  %v212_v28 = vmul.f32 %v1837_v62, %v1439_v16  ;;  %v1839_v4 = vunpack.c.h.bf16 %v1365_v5 }
  0x47   :  { %v342_v29 = vmax.f32 %v278_v24, 0.0  ;;  %v281_v49 = vadd.f32 %v1470_v13, %v211_v17  ;;  %v213_v36 = vmul.f32 %v1838_v30, %v1439_v16  ;;  %1154 = vst [vmem:[%s1808_s5 + $0x98] sm:$0xff] %v1043_v32   ;;  %v1840_v34 = vunpack.c.l.bf16 %v1374_v2 }
  0x48   :  { %v343_v21 = vmax.f32 %v279_v47, 0.0  ;;  %v344_v39 = vmax.f32 %v280_v15, 0.0  ;;  %v282_v33 = vadd.f32 %v1470_v13, %v212_v28  ;;  %v214_v40 = vmul.f32 %v1839_v4, %v1439_v16 }
  0x49   :  { %v1048_v37 = vpack.c.bf16 %v342_v29, %v341_v25  ;;  %v345_v50 = vmax.f32 %v281_v49, 0.0  ;;  %v283_v20 = vadd.f32 %v1470_v13, %v213_v36  ;;  %v215_v26 = vmul.f32 %v1840_v34, %v1439_v16 }
  0x4a   :  { %v1053_v35 = vpack.c.bf16 %v344_v39, %v343_v21  ;;  %v346_v41 = vmax.f32 %v282_v33, 0.0  ;;  %v284_v1 = vadd.f32 %v1470_v13, %v214_v40  ;;  %v1841_v5 = vunpack.c.h.bf16 %v1374_v2 }
  0x4b   :  { %1155 = vst [vmem:[%s1808_s5 + $0xa0] sm:$0xff] %v1048_v37   ;;  %v347_v38 = vmax.f32 %v283_v20, 0.0  ;;  %v285_v52 = vadd.f32 %v1470_v13, %v215_v26  ;;  %v1842_v55 = vunpack.c.l.bf16 %v1379_v63  ;;  %v1843_v45 = vunpack.c.h.bf16 %v1379_v63 }
  0x4c   :  { %v216_v3 = vmul.f32 %v1841_v5, %v1439_v16  ;;  %1156 = vst [vmem:[%s1808_s5 + $0xa8] sm:$0xff] %v1053_v35   ;;  %v1058_v2 = vpack.c.bf16 %v346_v41, %v345_v50  ;;  %v348_v57 = vmax.f32 %v284_v1, 0.0  ;;  %v1844_v6 = vunpack.c.l.bf16 %v1391_v59 }
  0x4d   :  { %v217_v27 = vmul.f32 %v1842_v55, %v1439_v16  ;;  %v218_v9 = vmul.f32 %v1843_v45, %v1439_v16  ;;  %v349_v22 = vmax.f32 %v285_v52, 0.0  ;;  %v1845_v63 = vunpack.c.h.bf16 %v1391_v59 }
  0x4e   :  { %v286_v12 = vadd.f32 %v1470_v13, %v216_v3  ;;  %v219_v8 = vmul.f32 %v1844_v6, %v1439_v16  ;;  %1157 = vst [vmem:[%s1808_s5 + $0xb0] sm:$0xff] %v1058_v2   ;;  %v1063_v18 = vpack.c.bf16 %v348_v57, %v347_v38  ;;  %v1846_v7 = vunpack.c.l.bf16 %v1400_v0 }
  0x4f   :  { %v287_v43 = vadd.f32 %v1470_v13, %v217_v27  ;;  %v288_v56 = vadd.f32 %v1470_v13, %v218_v9  ;;  %v220_v14 = vmul.f32 %v1845_v63, %v1439_v16  ;;  %v1847_v59 = vunpack.c.h.bf16 %v1400_v0 }
  0x50   :  { %v350_v10 = vmax.f32 %v286_v12, 0.0  ;;  %v289_v19 = vadd.f32 %v1470_v13, %v219_v8  ;;  %v221_v23 = vmul.f32 %v1846_v7, %v1439_v16  ;;  %1158 = vst [vmem:[%s1808_s5 + $0xb8] sm:$0xff] %v1063_v18   ;;  %v1848_v47 = vunpack.c.l.bf16 %v1405_v60 }
  0x51   :  { %v351_v31 = vmax.f32 %v287_v43, 0.0  ;;  %v352_v61 = vmax.f32 %v288_v56, 0.0  ;;  %v290_v11 = vadd.f32 %v1470_v13, %v220_v14  ;;  %v222_v24 = vmul.f32 %v1847_v59, %v1439_v16 }
  0x52   :  { %v1068_v44 = vpack.c.bf16 %v350_v10, %v349_v22  ;;  %v353_v17 = vmax.f32 %v289_v19, 0.0  ;;  %v291_v25 = vadd.f32 %v1470_v13, %v221_v23  ;;  %v223_v15 = vmul.f32 %v1848_v47, %v1439_v16 }
  0x53   :  { %v1073_v62 = vpack.c.bf16 %v352_v61, %v351_v31  ;;  %v354_v28 = vmax.f32 %v290_v11, 0.0  ;;  %v292_v32 = vadd.f32 %v1470_v13, %v222_v24  ;;  %v224_v0 = vmul.f32 %v932_v51, %v1439_v16 }
  0x54   :  { %1159 = vst [vmem:[%s1808_s5 + $0xc0] sm:$0xff] %v1068_v44   ;;  %v355_v29 = vmax.f32 %v291_v25, 0.0  ;;  %v293_v49 = vadd.f32 %v1470_v13, %v223_v15  ;;  %v225_v30 = vmul.f32 %v935_v46, %v1439_v16  ;;  %v1849_v36 = vunpack.c.h.bf16 %v1414_v53 }
  0x55   :  { %1160 = vst [vmem:[%s1808_s5 + $0xc8] sm:$0xff] %v1073_v62   ;;  %v1078_v51 = vpack.c.bf16 %v354_v28, %v353_v17  ;;  %v356_v60 = vmax.f32 %v292_v32, 0.0  ;;  %v294_v39 = vadd.f32 %v1470_v13, %v224_v0  ;;  %v227_v33 = vmul.f32 %v939_v42, %v1439_v16 }
  0x56   :  { %v226_v21 = vmul.f32 %v1849_v36, %v1439_v16  ;;  %v357_v4 = vmax.f32 %v293_v49, 0.0  ;;  %v295_v40 = vadd.f32 %v1470_v13, %v225_v30  ;;  %v1850_v53 = vunpack.c.h.bf16 %v1422_v58 }
  0x57   :  { %1161 = vst [vmem:[%s1808_s5 + $0xd0] sm:$0xff] %v1078_v51   ;;  %v1083_v50 = vpack.c.bf16 %v356_v60, %v355_v29  ;;  %v358_v20 = vmax.f32 %v294_v39, 0.0  ;;  %v297_v34 = vadd.f32 %v1470_v13, %v227_v33  ;;  %v229_v42 = vmul.f32 %v943_v48, %v1439_v16 }
  0x58   :  { %v296_v46 = vadd.f32 %v1470_v13, %v226_v21  ;;  %v228_v37 = vmul.f32 %v1850_v53, %v1439_v16  ;;  %v359_v26 = vmax.f32 %v295_v40, 0.0  ;;  %v1851_v58 = vunpack.c.h.bf16 %v1427_v54 }
  0x59   :  { %1162 = vst [vmem:[%s1808_s5 + $0xd8] sm:$0xff] %v1083_v50   ;;  %v1088_v5 = vpack.c.bf16 %v358_v20, %v357_v4  ;;  %v361_v3 = vmax.f32 %v297_v34, 0.0  ;;  %v299_v38 = vadd.f32 %v1470_v13, %v229_v42 }
  0x5a   :  { %v360_v35 = vmax.f32 %v296_v46, 0.0  ;;  %v298_v41 = vadd.f32 %v1470_v13, %v228_v37  ;;  %v230_v1 = vmul.f32 %v1851_v58, %v1439_v16 }
  0x5b   :  { %1163 = vst [vmem:[%s1808_s5 + $0xe0] sm:$0xff] %v1088_v5   ;;  %v363_v27 = vmax.f32 %v299_v38, 0.0 }
  0x5c   :  { %v1093_v52 = vpack.c.bf16 %v360_v35, %v359_v26  ;;  %v362_v55 = vmax.f32 %v298_v41, 0.0  ;;  %v300_v48 = vadd.f32 %v1470_v13, %v230_v1 }
  0x5e   :  { %1164 = vst [vmem:[%s1808_s5 + $0xe8] sm:$0xff] %v1093_v52   ;;  %v1098_v54 = vpack.c.bf16 %v362_v55, %v361_v3  ;;  %v364_v16 = vmax.f32 %v300_v48, 0.0 }
  0x60   :  { %1165 = vst [vmem:[%s1808_s5 + $0xf0] sm:$0xff] %v1098_v54   ;;  %v1103_v45 = vpack.c.bf16 %v364_v16, %v363_v27 }
  0x62   :  { %1166 = vst [vmem:[%s1808_s5 + $0xf8] sm:$0xff] %v1103_v45  }

// kernel: bottleneck_forward.6
= control target key start
LH: loop header
LB: loop body
LE: loop exit
PB: predicated region body
PF: predicated region fallthrough
CT: control target
= control target key end

     0   :  { %s2134_s1 = inlined_call_operand.vmem [shape: bf16[128,128], index: 1, kind: input, shape index: {}]   ;;  %s2135_s0 = inlined_call_operand.vmem [shape: bf16[512,128], index: 0, kind: input, shape index: {}]   ;;  %s2136_s2 = inlined_call_operand.vmem [shape: bf16[512,128], index: 2, kind: output, shape index: {0}]   ;;  %s2137_s3 = inlined_call_operand.vmem [shape: f32[1,1,128], index: 3, kind: output, shape index: {1}]   ;;  %s2138_s4 = inlined_call_operand.vmem [shape: f32[1,1,128], index: 4, kind: output, shape index: {2}]  }
   0x1   :  { %v1655_v0 = vld [vmem:[%s2134_s1] sm:$0xff]   ;;  %v1656_v1 = vld [vmem:[%s2134_s1 + $0x8] sm:$0xff]   ;;  %v1657_v2 = vld [vmem:[%s2134_s1 + $0x10] sm:$0xff]  }
   0x2   :  { %1559 = vmatprep.subr.bf16.mxu0 %v1655_v0  ;;  %1639 = vmatprep.subr.bf16.mxu1 %v1655_v0  ;;  %v1658_v3 = vld [vmem:[%s2134_s1 + $0x18] sm:$0xff]   ;;  %v1663_v4 = vld [vmem:[%s2135_s0] sm:$0xff]   ;;  %v1660_v6 = vld [vmem:[%s2134_s1 + $0x28] sm:$0xff]  }
   0x3   :  { %1560 = vmatpush3.bf16.msra.mxu0 %v1655_v0  ;;  %1647 = vmatpush3.bf16.msra.mxu1 %v1655_v0  ;;  %v1659_v5 = vld [vmem:[%s2134_s1 + $0x20] sm:$0xff]   ;;  %v1661_v7 = vld [vmem:[%s2134_s1 + $0x30] sm:$0xff]   ;;  %v1662_v8 = vld [vmem:[%s2134_s1 + $0x38] sm:$0xff]  }
   0x4   :  { %1561 = vmatprep.subr.bf16.mxu0 %v1656_v1  ;;  %1640 = vmatprep.subr.bf16.mxu1 %v1656_v1  ;;  %v1679_v9 = vld [vmem:[%s2135_s0 + $0x80] sm:$0xff]   ;;  %v1664_v10 = vld [vmem:[%s2135_s0 + $0x8] sm:$0xff]   ;;  %v1665_v11 = vld [vmem:[%s2135_s0 + $0x10] sm:$0xff]  }
   0x5   :  { %1575 = vmatprep.mubr.bf16.mxu0 %v1663_v4  ;;  %1607 = vmatprep.mubr.bf16.mxu1 %v1679_v9  ;;  %v1680_v12 = vld [vmem:[%s2135_s0 + $0x88] sm:$0xff]   ;;  %v1681_v13 = vld [vmem:[%s2135_s0 + $0x90] sm:$0xff]   ;;  %v1666_v14 = vld [vmem:[%s2135_s0 + $0x18] sm:$0xff]  }
   0x6   :  { %v1667_v15 = vld [vmem:[%s2135_s0 + $0x20] sm:$0xff]   ;;  %v1682_v16 = vld [vmem:[%s2135_s0 + $0x98] sm:$0xff]   ;;  %v1668_v18 = vld [vmem:[%s2135_s0 + $0x28] sm:$0xff]  }
   0x7   :  { %1562 = vmatpush3.bf16.msra.mxu0 %v1656_v1  ;;  %1648 = vmatpush3.bf16.msra.mxu1 %v1656_v1  ;;  %v1683_v17 = vld [vmem:[%s2135_s0 + $0xa0] sm:$0xff]   ;;  %v1684_v19 = vld [vmem:[%s2135_s0 + $0xa8] sm:$0xff]   ;;  %v1669_v20 = vld [vmem:[%s2135_s0 + $0x30] sm:$0xff]  }
   0x8   :  { %1563 = vmatprep.subr.bf16.mxu0 %v1657_v2  ;;  %1641 = vmatprep.subr.bf16.mxu1 %v1657_v2  ;;  %v1685_v21 = vld [vmem:[%s2135_s0 + $0xb0] sm:$0xff]   ;;  %v1670_v22 = vld [vmem:[%s2135_s0 + $0x38] sm:$0xff]   ;;  %v1671_v24 = vld [vmem:[%s2135_s0 + $0x40] sm:$0xff]  }
   0x9   :  { %v1686_v23 = vld [vmem:[%s2135_s0 + $0xb8] sm:$0xff]   ;;  %v1687_v25 = vld [vmem:[%s2135_s0 + $0xc0] sm:$0xff]   ;;  %v1672_v26 = vld [vmem:[%s2135_s0 + $0x48] sm:$0xff]  }
   0xa   :  { %v1688_v27 = vld [vmem:[%s2135_s0 + $0xc8] sm:$0xff]   ;;  %v1673_v28 = vld [vmem:[%s2135_s0 + $0x50] sm:$0xff]   ;;  %v1674_v30 = vld [vmem:[%s2135_s0 + $0x58] sm:$0xff]  }
   0xb   :  { %1564 = vmatpush3.bf16.msra.mxu0 %v1657_v2  ;;  %1649 = vmatpush3.bf16.msra.mxu1 %v1657_v2  ;;  %v1689_v29 = vld [vmem:[%s2135_s0 + $0xd0] sm:$0xff]   ;;  %v1690_v31 = vld [vmem:[%s2135_s0 + $0xd8] sm:$0xff]   ;;  %v1675_v32 = vld [vmem:[%s2135_s0 + $0x60] sm:$0xff]  }
   0xc   :  { %1565 = vmatprep.subr.bf16.mxu0 %v1658_v3  ;;  %1642 = vmatprep.subr.bf16.mxu1 %v1658_v3  ;;  %v1691_v33 = vld [vmem:[%s2135_s0 + $0xe0] sm:$0xff]   ;;  %v1676_v34 = vld [vmem:[%s2135_s0 + $0x68] sm:$0xff]   ;;  %v1677_v36 = vld [vmem:[%s2135_s0 + $0x70] sm:$0xff]  }
   0xd   :  { %v1692_v35 = vld [vmem:[%s2135_s0 + $0xe8] sm:$0xff]   ;;  %v1693_v37 = vld [vmem:[%s2135_s0 + $0xf0] sm:$0xff]   ;;  %v1678_v38 = vld [vmem:[%s2135_s0 + $0x78] sm:$0xff]  }
   0xe   :  { %v1694_v39 = vld [vmem:[%s2135_s0 + $0xf8] sm:$0xff]  }
   0xf   :  { %1566 = vmatpush3.bf16.msra.mxu0 %v1658_v3  ;;  %1650 = vmatpush3.bf16.msra.mxu1 %v1658_v3 }
  0x10   :  { %1567 = vmatprep.subr.bf16.mxu0 %v1659_v5  ;;  %1643 = vmatprep.subr.bf16.mxu1 %v1659_v5 }
  0x13   :  { %1568 = vmatpush3.bf16.msra.mxu0 %v1659_v5  ;;  %1651 = vmatpush3.bf16.msra.mxu1 %v1659_v5 }
  0x14   :  { %1569 = vmatprep.subr.bf16.mxu0 %v1660_v6  ;;  %1644 = vmatprep.subr.bf16.mxu1 %v1660_v6 }
  0x17   :  { %1570 = vmatpush3.bf16.msra.mxu0 %v1660_v6  ;;  %1652 = vmatpush3.bf16.msra.mxu1 %v1660_v6 }
  0x18   :  { %1571 = vmatprep.subr.bf16.mxu0 %v1661_v7  ;;  %1645 = vmatprep.subr.bf16.mxu1 %v1661_v7 }
  0x1b   :  { %1572 = vmatpush3.bf16.msra.mxu0 %v1661_v7  ;;  %1653 = vmatpush3.bf16.msra.mxu1 %v1661_v7 }
  0x1c   :  { %1573 = vmatprep.subr.bf16.mxu0 %v1662_v8  ;;  %1646 = vmatprep.subr.bf16.mxu1 %v1662_v8 }
  0x1f   :  { %1574 = vmatpush3.bf16.msra.mxu0 %v1662_v8  ;;  %1654 = vmatpush3.bf16.msra.mxu1 %v1662_v8 }
  0x22   :  { %1576 = vmatmul.mubr.bf16.vlgmr.msra.gmra.mrb[0].mxu0 %v1664_v10  ;;  %1608 = vmatmul.mubr.bf16.vlgmr.msra.gmra.mrb[0].mxu1 %v1680_v12 }
  0x23   :  { %1579 = vmatprep.mubr.bf16.mxu0 %v1665_v11  ;;  %1611 = vmatprep.mubr.bf16.mxu1 %v1681_v13 }
  0x2a   :  { %1580 = vmatmul.mubr.bf16.gmra.mrb[4].mxu0 %v1666_v14  ;;  %1612 = vmatmul.mubr.bf16.gmra.mrb[4].mxu1 %v1682_v16 }
  0x2b   :  { %1583 = vmatprep.mubr.bf16.mxu0 %v1667_v15  ;;  %1615 = vmatprep.mubr.bf16.mxu1 %v1683_v17 }
  0x32   :  { %1584 = vmatmul.mubr.bf16.gmra.mrb[8].mxu0 %v1668_v18  ;;  %1616 = vmatmul.mubr.bf16.gmra.mrb[8].mxu1 %v1684_v19 }
  0x33   :  { %1587 = vmatprep.mubr.bf16.mxu0 %v1669_v20  ;;  %1619 = vmatprep.mubr.bf16.mxu1 %v1685_v21 }
  0x3a   :  { %1588 = vmatmul.mubr.bf16.gmra.mrb[12].mxu0 %v1670_v22  ;;  %1620 = vmatmul.mubr.bf16.gmra.mrb[12].mxu1 %v1686_v23 }
  0x3b   :  { %1591 = vmatprep.mubr.bf16.mxu0 %v1671_v24  ;;  %1623 = vmatprep.mubr.bf16.mxu1 %v1687_v25 }
  0x42   :  { %1592 = vmatmul.mubr.bf16.gmra.mrb[16].mxu0 %v1672_v26  ;;  %1624 = vmatmul.mubr.bf16.gmra.mrb[16].mxu1 %v1688_v27 }
  0x43   :  { %1595 = vmatprep.mubr.bf16.mxu0 %v1673_v28  ;;  %1627 = vmatprep.mubr.bf16.mxu1 %v1689_v29 }
  0x4a   :  { %1596 = vmatmul.mubr.bf16.gmra.mrb[20].mxu0 %v1674_v30  ;;  %1628 = vmatmul.mubr.bf16.gmra.mrb[20].mxu1 %v1690_v31 }
  0x4b   :  { %1599 = vmatprep.mubr.bf16.mxu0 %v1675_v32  ;;  %1631 = vmatprep.mubr.bf16.mxu1 %v1691_v33 }
  0x52   :  { %1600 = vmatmul.mubr.bf16.gmra.mrb[24].mxu0 %v1676_v34  ;;  %1632 = vmatmul.mubr.bf16.gmra.mrb[24].mxu1 %v1692_v35 }
  0x53   :  { %1603 = vmatprep.mubr.bf16.mxu0 %v1677_v36  ;;  %1635 = vmatprep.mubr.bf16.mxu1 %v1693_v37 }
  0x5a   :  { %1604 = vmatmul.mubr.bf16.gmra.mrb[28].mxu0 %v1678_v38  ;;  %1636 = vmatmul.mubr.bf16.gmra.mrb[28].mxu1 %v1694_v39 }
  0xf5   :  { %v1577_v40 = vpop.f32.mrb[0].mxu0  ;;  %v1840_v41 = vpop.f32.mrb[0].mxu1 }
  0xf6   :  { %v369_v42 = vpop.f32.mrb[1].mxu0  ;;  %v1842_v43 = vpop.f32.mrb[1].mxu1  ;;  %v1016_v55 = vmul.f32 %v1577_v40, %v1577_v40 }
  0xf7   :  { %v1578_v44 = vpop.f32.mrb[2].mxu0  ;;  %v1844_v45 = vpop.f32.mrb[2].mxu1  ;;  %v1014_v46 = vmul.f32 %v369_v42, %v369_v42 }
  0xf8   :  { %v1336_v47 = vpack.c.bf16 %v1578_v44, %v1577_v40  ;;  %v372_v48 = vpop.f32.mrb[3].mxu0  ;;  %v1416_v49 = vpack.c.bf16 %v1844_v45, %v1840_v41  ;;  %v1848_v50 = vpop.f32.mrb[3].mxu1  ;;  %v1017_v58 = vmul.f32 %v1578_v44, %v1578_v44 }
  0xf9   :  { %v1331_v51 = vpack.c.bf16 %v372_v48, %v369_v42  ;;  %v944_v52 = vadd.f32 %v372_v48, %v369_v42  ;;  %v1015_v53 = vmul.f32 %v372_v48, %v372_v48  ;;  %v1411_v54 = vpack.c.bf16 %v1848_v50, %v1842_v43 }
  0xfa   :  { %1488 = vst [vmem:[%s2136_s2 + $0x8] sm:$0xff] %v1336_v47   ;;  %1504 = vst [vmem:[%s2136_s2 + $0x88] sm:$0xff] %v1416_v49  }
  0xfb   :  { %1332 = vst [vmem:[%s2136_s2] sm:$0xff] %v1331_v51   ;;  %v945_v56 = vadd.f32 %v1577_v40, %v944_v52  ;;  %v1078_v57 = vadd.f32 %v1015_v53, %v1014_v46  ;;  %1503 = vst [vmem:[%s2136_s2 + $0x80] sm:$0xff] %v1411_v54  }
  0xfd   :  { %v1079_v59 = vadd.f32 %v1078_v57, %v1016_v55  ;;  %v1581_v60 = vpop.f32.mrb[4].mxu0  ;;  %v946_v61 = vadd.f32 %v1578_v44, %v945_v56  ;;  %v1864_v62 = vpop.f32.mrb[4].mxu1 }
  0xfe   :  { %v385_v63 = vpop.f32.mrb[5].mxu0  ;;  %v1866_v0 = vpop.f32.mrb[5].mxu1  ;;  %v1020_v15 = vmul.f32 %v1581_v60, %v1581_v60 }
  0xff   :  { %v947_v1 = vadd.f32 %v946_v61, %v385_v63  ;;  %v1018_v2 = vmul.f32 %v385_v63, %v385_v63  ;;  %v1080_v3 = vadd.f32 %v1079_v59, %v1017_v58  ;;  %v1582_v4 = vpop.f32.mrb[6].mxu0  ;;  %v1868_v5 = vpop.f32.mrb[6].mxu1 }
 0x100   :  { %v1346_v6 = vpack.c.bf16 %v1582_v4, %v1581_v60  ;;  %v388_v7 = vpop.f32.mrb[7].mxu0  ;;  %v1426_v8 = vpack.c.bf16 %v1868_v5, %v1864_v62  ;;  %v1872_v9 = vpop.f32.mrb[7].mxu1  ;;  %v1021_v18 = vmul.f32 %v1582_v4, %v1582_v4 }
 0x101   :  { %v1081_v10 = vadd.f32 %v1080_v3, %v1018_v2  ;;  %v1341_v11 = vpack.c.bf16 %v388_v7, %v385_v63  ;;  %v948_v12 = vadd.f32 %v947_v1, %v388_v7  ;;  %v1019_v13 = vmul.f32 %v388_v7, %v388_v7 }
 0x102   :  { %1490 = vst [vmem:[%s2136_s2 + $0x18] sm:$0xff] %v1346_v6   ;;  %1506 = vst [vmem:[%s2136_s2 + $0x98] sm:$0xff] %v1426_v8   ;;  %v1421_v14 = vpack.c.bf16 %v1872_v9, %v1866_v0 }
 0x103   :  { %1489 = vst [vmem:[%s2136_s2 + $0x10] sm:$0xff] %v1341_v11   ;;  %v949_v16 = vadd.f32 %v1581_v60, %v948_v12  ;;  %v1082_v17 = vadd.f32 %v1081_v10, %v1019_v13 }
 0x104   :  { %1505 = vst [vmem:[%s2136_s2 + $0x90] sm:$0xff] %v1421_v14  }
 0x105   :  { %v1083_v19 = vadd.f32 %v1082_v17, %v1020_v15  ;;  %v1585_v20 = vpop.f32.mrb[8].mxu0  ;;  %v950_v21 = vadd.f32 %v1582_v4, %v949_v16  ;;  %v1888_v22 = vpop.f32.mrb[8].mxu1 }
 0x106   :  { %v401_v23 = vpop.f32.mrb[9].mxu0  ;;  %v1890_v24 = vpop.f32.mrb[9].mxu1  ;;  %v1024_v39 = vmul.f32 %v1585_v20, %v1585_v20 }
 0x107   :  { %v951_v25 = vadd.f32 %v950_v21, %v401_v23  ;;  %v1022_v26 = vmul.f32 %v401_v23, %v401_v23  ;;  %v1084_v27 = vadd.f32 %v1083_v19, %v1021_v18  ;;  %v1586_v28 = vpop.f32.mrb[10].mxu0  ;;  %v1892_v29 = vpop.f32.mrb[10].mxu1 }
 0x108   :  { %v1356_v30 = vpack.c.bf16 %v1586_v28, %v1585_v20  ;;  %v404_v31 = vpop.f32.mrb[11].mxu0  ;;  %v1436_v32 = vpack.c.bf16 %v1892_v29, %v1888_v22  ;;  %v1896_v33 = vpop.f32.mrb[11].mxu1  ;;  %v1025_v44 = vmul.f32 %v1586_v28, %v1586_v28 }
 0x109   :  { %v1085_v34 = vadd.f32 %v1084_v27, %v1022_v26  ;;  %v1351_v35 = vpack.c.bf16 %v404_v31, %v401_v23  ;;  %v952_v36 = vadd.f32 %v951_v25, %v404_v31  ;;  %v1023_v37 = vmul.f32 %v404_v31, %v404_v31 }
 0x10a   :  { %1492 = vst [vmem:[%s2136_s2 + $0x28] sm:$0xff] %v1356_v30   ;;  %1508 = vst [vmem:[%s2136_s2 + $0xa8] sm:$0xff] %v1436_v32   ;;  %v1431_v38 = vpack.c.bf16 %v1896_v33, %v1890_v24 }
 0x10b   :  { %1491 = vst [vmem:[%s2136_s2 + $0x20] sm:$0xff] %v1351_v35   ;;  %v953_v40 = vadd.f32 %v1585_v20, %v952_v36  ;;  %v1086_v42 = vadd.f32 %v1085_v34, %v1023_v37 }
 0x10c   :  { %1507 = vst [vmem:[%s2136_s2 + $0xa0] sm:$0xff] %v1431_v38  }
 0x10d   :  { %v1087_v46 = vadd.f32 %v1086_v42, %v1024_v39  ;;  %v1589_v47 = vpop.f32.mrb[12].mxu0  ;;  %v954_v48 = vadd.f32 %v1586_v28, %v953_v40  ;;  %v1912_v49 = vpop.f32.mrb[12].mxu1 }
 0x10e   :  { %v417_v51 = vpop.f32.mrb[13].mxu0  ;;  %v1914_v52 = vpop.f32.mrb[13].mxu1  ;;  %v1028_v6 = vmul.f32 %v1589_v47, %v1589_v47 }
 0x10f   :  { %v955_v53 = vadd.f32 %v954_v48, %v417_v51  ;;  %v1026_v54 = vmul.f32 %v417_v51, %v417_v51  ;;  %v1088_v55 = vadd.f32 %v1087_v46, %v1025_v44  ;;  %v1590_v56 = vpop.f32.mrb[14].mxu0  ;;  %v1916_v57 = vpop.f32.mrb[14].mxu1 }
 0x110   :  { %v1366_v58 = vpack.c.bf16 %v1590_v56, %v1589_v47  ;;  %v420_v59 = vpop.f32.mrb[15].mxu0  ;;  %v1446_v60 = vpack.c.bf16 %v1916_v57, %v1912_v49  ;;  %v1920_v61 = vpop.f32.mrb[15].mxu1  ;;  %v1029_v10 = vmul.f32 %v1590_v56, %v1590_v56 }
 0x111   :  { %v1089_v63 = vadd.f32 %v1088_v55, %v1026_v54  ;;  %v1361_v1 = vpack.c.bf16 %v420_v59, %v417_v51  ;;  %v956_v2 = vadd.f32 %v955_v53, %v420_v59  ;;  %v1027_v3 = vmul.f32 %v420_v59, %v420_v59 }
 0x112   :  { %1494 = vst [vmem:[%s2136_s2 + $0x38] sm:$0xff] %v1366_v58   ;;  %1510 = vst [vmem:[%s2136_s2 + $0xb8] sm:$0xff] %v1446_v60   ;;  %v1441_v4 = vpack.c.bf16 %v1920_v61, %v1914_v52 }
 0x113   :  { %1493 = vst [vmem:[%s2136_s2 + $0x30] sm:$0xff] %v1361_v1   ;;  %v957_v7 = vadd.f32 %v1589_v47, %v956_v2  ;;  %v1090_v8 = vadd.f32 %v1089_v63, %v1027_v3 }
 0x114   :  { %1509 = vst [vmem:[%s2136_s2 + $0xb0] sm:$0xff] %v1441_v4  }
 0x115   :  { %v1091_v11 = vadd.f32 %v1090_v8, %v1028_v6  ;;  %v1593_v12 = vpop.f32.mrb[16].mxu0  ;;  %v958_v13 = vadd.f32 %v1590_v56, %v957_v7  ;;  %v1936_v14 = vpop.f32.mrb[16].mxu1 }
 0x116   :  { %v433_v15 = vpop.f32.mrb[17].mxu0  ;;  %v1938_v16 = vpop.f32.mrb[17].mxu1  ;;  %v1032_v35 = vmul.f32 %v1593_v12, %v1593_v12 }
 0x117   :  { %v959_v17 = vadd.f32 %v958_v13, %v433_v15  ;;  %v1030_v18 = vmul.f32 %v433_v15, %v433_v15  ;;  %v1092_v19 = vadd.f32 %v1091_v11, %v1029_v10  ;;  %v1594_v20 = vpop.f32.mrb[18].mxu0  ;;  %v1940_v21 = vpop.f32.mrb[18].mxu1 }
 0x118   :  { %v1376_v23 = vpack.c.bf16 %v1594_v20, %v1593_v12  ;;  %v436_v25 = vpop.f32.mrb[19].mxu0  ;;  %v1456_v26 = vpack.c.bf16 %v1940_v21, %v1936_v14  ;;  %v1944_v27 = vpop.f32.mrb[19].mxu1  ;;  %v1033_v38 = vmul.f32 %v1594_v20, %v1594_v20 }
 0x119   :  { %v1093_v28 = vadd.f32 %v1092_v19, %v1030_v18  ;;  %v1371_v30 = vpack.c.bf16 %v436_v25, %v433_v15  ;;  %v960_v31 = vadd.f32 %v959_v17, %v436_v25  ;;  %v1031_v32 = vmul.f32 %v436_v25, %v436_v25 }
 0x11a   :  { %1496 = vst [vmem:[%s2136_s2 + $0x48] sm:$0xff] %v1376_v23   ;;  %1512 = vst [vmem:[%s2136_s2 + $0xc8] sm:$0xff] %v1456_v26   ;;  %v1451_v34 = vpack.c.bf16 %v1944_v27, %v1938_v16 }
 0x11b   :  { %1495 = vst [vmem:[%s2136_s2 + $0x40] sm:$0xff] %v1371_v30   ;;  %v961_v36 = vadd.f32 %v1593_v12, %v960_v31  ;;  %v1094_v37 = vadd.f32 %v1093_v28, %v1031_v32 }
 0x11c   :  { %1511 = vst [vmem:[%s2136_s2 + $0xc0] sm:$0xff] %v1451_v34  }
 0x11d   :  { %v1095_v39 = vadd.f32 %v1094_v37, %v1032_v35  ;;  %v1597_v40 = vpop.f32.mrb[20].mxu0  ;;  %v962_v42 = vadd.f32 %v1594_v20, %v961_v36  ;;  %v1960_v44 = vpop.f32.mrb[20].mxu1 }
 0x11e   :  { %v449_v46 = vpop.f32.mrb[21].mxu0  ;;  %v1962_v47 = vpop.f32.mrb[21].mxu1  ;;  %v1036_v6 = vmul.f32 %v1597_v40, %v1597_v40 }
 0x11f   :  { %v963_v48 = vadd.f32 %v962_v42, %v449_v46  ;;  %v1034_v51 = vmul.f32 %v449_v46, %v449_v46  ;;  %v1096_v53 = vadd.f32 %v1095_v39, %v1033_v38  ;;  %v1598_v54 = vpop.f32.mrb[22].mxu0  ;;  %v1964_v55 = vpop.f32.mrb[22].mxu1 }
 0x120   :  { %v1386_v56 = vpack.c.bf16 %v1598_v54, %v1597_v40  ;;  %v452_v58 = vpop.f32.mrb[23].mxu0  ;;  %v1466_v59 = vpack.c.bf16 %v1964_v55, %v1960_v44  ;;  %v1968_v60 = vpop.f32.mrb[23].mxu1  ;;  %v1037_v10 = vmul.f32 %v1598_v54, %v1598_v54 }
 0x121   :  { %v1097_v63 = vadd.f32 %v1096_v53, %v1034_v51  ;;  %v1381_v1 = vpack.c.bf16 %v452_v58, %v449_v46  ;;  %v964_v2 = vadd.f32 %v963_v48, %v452_v58  ;;  %v1035_v3 = vmul.f32 %v452_v58, %v452_v58 }
 0x122   :  { %1498 = vst [vmem:[%s2136_s2 + $0x58] sm:$0xff] %v1386_v56   ;;  %1514 = vst [vmem:[%s2136_s2 + $0xd8] sm:$0xff] %v1466_v59   ;;  %v1461_v4 = vpack.c.bf16 %v1968_v60, %v1962_v47 }
 0x123   :  { %1497 = vst [vmem:[%s2136_s2 + $0x50] sm:$0xff] %v1381_v1   ;;  %v965_v7 = vadd.f32 %v1597_v40, %v964_v2  ;;  %v1098_v8 = vadd.f32 %v1097_v63, %v1035_v3 }
 0x124   :  { %1513 = vst [vmem:[%s2136_s2 + $0xd0] sm:$0xff] %v1461_v4  }
 0x125   :  { %v1099_v11 = vadd.f32 %v1098_v8, %v1036_v6  ;;  %v1601_v12 = vpop.f32.mrb[24].mxu0  ;;  %v966_v13 = vadd.f32 %v1598_v54, %v965_v7  ;;  %v1984_v15 = vpop.f32.mrb[24].mxu1 }
 0x126   :  { %v465_v17 = vpop.f32.mrb[25].mxu0  ;;  %v1986_v18 = vpop.f32.mrb[25].mxu1  ;;  %v1040_v39 = vmul.f32 %v1601_v12, %v1601_v12 }
 0x127   :  { %v967_v19 = vadd.f32 %v966_v13, %v465_v17  ;;  %v1038_v20 = vmul.f32 %v465_v17, %v465_v17  ;;  %v1100_v23 = vadd.f32 %v1099_v11, %v1037_v10  ;;  %v1602_v25 = vpop.f32.mrb[26].mxu0  ;;  %v1988_v26 = vpop.f32.mrb[26].mxu1 }
 0x128   :  { %v1396_v28 = vpack.c.bf16 %v1602_v25, %v1601_v12  ;;  %v468_v30 = vpop.f32.mrb[27].mxu0  ;;  %v1476_v31 = vpack.c.bf16 %v1988_v26, %v1984_v15  ;;  %v1992_v32 = vpop.f32.mrb[27].mxu1  ;;  %v1041_v46 = vmul.f32 %v1602_v25, %v1602_v25 }
 0x129   :  { %v1101_v34 = vadd.f32 %v1100_v23, %v1038_v20  ;;  %v1391_v35 = vpack.c.bf16 %v468_v30, %v465_v17  ;;  %v968_v36 = vadd.f32 %v967_v19, %v468_v30  ;;  %v1039_v37 = vmul.f32 %v468_v30, %v468_v30 }
 0x12a   :  { %1500 = vst [vmem:[%s2136_s2 + $0x68] sm:$0xff] %v1396_v28   ;;  %1516 = vst [vmem:[%s2136_s2 + $0xe8] sm:$0xff] %v1476_v31   ;;  %v1471_v38 = vpack.c.bf16 %v1992_v32, %v1986_v18  ;;  %v1046_v31 = vmul.f32 %v1842_v43, %v1842_v43 }
 0x12b   :  { %1499 = vst [vmem:[%s2136_s2 + $0x60] sm:$0xff] %v1391_v35   ;;  %v969_v40 = vadd.f32 %v1601_v12, %v968_v36  ;;  %v1102_v42 = vadd.f32 %v1101_v34, %v1039_v37 }
 0x12c   :  { %1515 = vst [vmem:[%s2136_s2 + $0xe0] sm:$0xff] %v1471_v38   ;;  %v1047_v38 = vmul.f32 %v1848_v50, %v1848_v50 }
 0x12d   :  { %v1103_v48 = vadd.f32 %v1102_v42, %v1040_v39  ;;  %v1605_v51 = vpop.f32.mrb[28].mxu0  ;;  %v970_v53 = vadd.f32 %v1602_v25, %v969_v40  ;;  %v2008_v54 = vpop.f32.mrb[28].mxu1  ;;  %v1048_v39 = vmul.f32 %v1840_v41, %v1840_v41 }
 0x12e   :  { %v481_v56 = vpop.f32.mrb[29].mxu0  ;;  %v2010_v58 = vpop.f32.mrb[29].mxu1  ;;  %v1044_v19 = vmul.f32 %v1605_v51, %v1605_v51 }
 0x12f   :  { %v971_v59 = vadd.f32 %v970_v53, %v481_v56  ;;  %v1042_v63 = vmul.f32 %v481_v56, %v481_v56  ;;  %v1104_v1 = vadd.f32 %v1103_v48, %v1041_v46  ;;  %v1606_v2 = vpop.f32.mrb[30].mxu0  ;;  %v2012_v3 = vpop.f32.mrb[30].mxu1  ;;  %v1049_v46 = vmul.f32 %v1844_v45, %v1844_v45 }
 0x130   :  { %v1406_v4 = vpack.c.bf16 %v1606_v2, %v1605_v51  ;;  %v484_v6 = vpop.f32.mrb[31].mxu0  ;;  %v1486_v7 = vpack.c.bf16 %v2012_v3, %v2008_v54  ;;  %v2016_v8 = vpop.f32.mrb[31].mxu1  ;;  %v1045_v25 = vmul.f32 %v1606_v2, %v1606_v2 }
 0x131   :  { %v1105_v10 = vadd.f32 %v1104_v1, %v1042_v63  ;;  %v1401_v11 = vpack.c.bf16 %v484_v6, %v481_v56  ;;  %v972_v12 = vadd.f32 %v971_v59, %v484_v6  ;;  %v1043_v13 = vmul.f32 %v484_v6, %v484_v6 }
 0x132   :  { %1502 = vst [vmem:[%s2136_s2 + $0x78] sm:$0xff] %v1406_v4   ;;  %1518 = vst [vmem:[%s2136_s2 + $0xf8] sm:$0xff] %v1486_v7   ;;  %v1481_v17 = vpack.c.bf16 %v2016_v8, %v2010_v58  ;;  %v1051_v63 = vmul.f32 %v1872_v9, %v1872_v9 }
 0x133   :  { %1501 = vst [vmem:[%s2136_s2 + $0x70] sm:$0xff] %v1401_v11   ;;  %v973_v20 = vadd.f32 %v1605_v51, %v972_v12  ;;  %v1106_v23 = vadd.f32 %v1105_v10, %v1043_v13  ;;  %v1055_v12 = vmul.f32 %v1896_v33, %v1896_v33 }
 0x134   :  { %1517 = vst [vmem:[%s2136_s2 + $0xf0] sm:$0xff] %v1481_v17  }
 0x135   :  { %v1107_v28 = vadd.f32 %v1106_v23, %v1044_v19  ;;  %v974_v30 = vadd.f32 %v1606_v2, %v973_v20 }
 0x137   :  { %v975_v34 = vadd.f32 %v974_v30, %v1842_v43  ;;  %v1108_v35 = vadd.f32 %v1107_v28, %v1045_v25  ;;  %v1050_v43 = vmul.f32 %v1866_v0, %v1866_v0  ;;  %v1059_v30 = vmul.f32 %v1920_v61, %v1920_v61 }
 0x139   :  { %v1109_v36 = vadd.f32 %v1108_v35, %v1046_v31  ;;  %v976_v37 = vadd.f32 %v975_v34, %v1848_v50 }
 0x13b   :  { %v977_v40 = vadd.f32 %v1840_v41, %v976_v37  ;;  %v1110_v42 = vadd.f32 %v1109_v36, %v1047_v38  ;;  %v1052_v41 = vmul.f32 %v1864_v62, %v1864_v62 }
 0x13d   :  { %v1111_v48 = vadd.f32 %v1110_v42, %v1048_v39  ;;  %v978_v51 = vadd.f32 %v1844_v45, %v977_v40  ;;  %v1053_v45 = vmul.f32 %v1868_v5, %v1868_v5  ;;  %v1063_v40 = vmul.f32 %v1944_v27, %v1944_v27 }
 0x13f   :  { %v979_v53 = vadd.f32 %v978_v51, %v1866_v0  ;;  %v1112_v56 = vadd.f32 %v1111_v48, %v1049_v46  ;;  %v1054_v0 = vmul.f32 %v1890_v24, %v1890_v24 }
 0x141   :  { %v1113_v59 = vadd.f32 %v1112_v56, %v1050_v43  ;;  %v980_v50 = vadd.f32 %v979_v53, %v1872_v9 }
 0x143   :  { %v981_v1 = vadd.f32 %v1864_v62, %v980_v50  ;;  %v1114_v2 = vadd.f32 %v1113_v59, %v1051_v63  ;;  %v1056_v62 = vmul.f32 %v1888_v22, %v1888_v22  ;;  %v1067_v59 = vmul.f32 %v1968_v60, %v1968_v60 }
 0x145   :  { %v1115_v4 = vadd.f32 %v1114_v2, %v1052_v41  ;;  %v982_v6 = vadd.f32 %v1868_v5, %v981_v1  ;;  %v1057_v5 = vmul.f32 %v1892_v29, %v1892_v29 }
 0x147   :  { %v983_v7 = vadd.f32 %v982_v6, %v1890_v24  ;;  %v1116_v10 = vadd.f32 %v1115_v4, %v1053_v45  ;;  %v1058_v24 = vmul.f32 %v1914_v52, %v1914_v52  ;;  %v1071_v6 = vmul.f32 %v1992_v32, %v1992_v32 }
 0x149   :  { %v1117_v11 = vadd.f32 %v1116_v10, %v1054_v0  ;;  %v984_v9 = vadd.f32 %v983_v7, %v1896_v33 }
 0x14b   :  { %v985_v13 = vadd.f32 %v1888_v22, %v984_v9  ;;  %v1118_v17 = vadd.f32 %v1117_v11, %v1055_v12  ;;  %v1060_v22 = vmul.f32 %v1912_v49, %v1912_v49 }
 0x14d   :  { %v1119_v19 = vadd.f32 %v1118_v17, %v1056_v62  ;;  %v986_v20 = vadd.f32 %v1892_v29, %v985_v13  ;;  %v1061_v29 = vmul.f32 %v1916_v57, %v1916_v57  ;;  %v1075_v13 = vmul.f32 %v2016_v8, %v2016_v8 }
 0x14f   :  { %v987_v23 = vadd.f32 %v986_v20, %v1914_v52  ;;  %v1120_v25 = vadd.f32 %v1119_v19, %v1057_v5  ;;  %v1062_v52 = vmul.f32 %v1938_v16, %v1938_v16 }
 0x151   :  { %v1121_v28 = vadd.f32 %v1120_v25, %v1058_v24  ;;  %v988_v33 = vadd.f32 %v987_v23, %v1920_v61 }
 0x153   :  { %v989_v31 = vadd.f32 %v1912_v49, %v988_v33  ;;  %v1122_v34 = vadd.f32 %v1121_v28, %v1059_v30  ;;  %v1064_v49 = vmul.f32 %v1936_v14, %v1936_v14 }
 0x155   :  { %v1123_v35 = vadd.f32 %v1122_v34, %v1060_v22  ;;  %v990_v36 = vadd.f32 %v1916_v57, %v989_v31  ;;  %v1065_v57 = vmul.f32 %v1940_v21, %v1940_v21 }
 0x157   :  { %v991_v37 = vadd.f32 %v990_v36, %v1938_v16  ;;  %v1124_v38 = vadd.f32 %v1123_v35, %v1061_v29  ;;  %v1066_v16 = vmul.f32 %v1962_v47, %v1962_v47 }
 0x159   :  { %v1125_v39 = vadd.f32 %v1124_v38, %v1062_v52  ;;  %v992_v61 = vadd.f32 %v991_v37, %v1944_v27 }
 0x15b   :  { %v993_v42 = vadd.f32 %v1936_v14, %v992_v61  ;;  %v1126_v46 = vadd.f32 %v1125_v39, %v1063_v40  ;;  %v1068_v14 = vmul.f32 %v1960_v44, %v1960_v44 }
 0x15d   :  { %v1127_v48 = vadd.f32 %v1126_v46, %v1064_v49  ;;  %v994_v51 = vadd.f32 %v1940_v21, %v993_v42  ;;  %v1069_v21 = vmul.f32 %v1964_v55, %v1964_v55 }
 0x15f   :  { %v995_v43 = vadd.f32 %v994_v51, %v1962_v47  ;;  %v1128_v53 = vadd.f32 %v1127_v48, %v1065_v57  ;;  %v1070_v47 = vmul.f32 %v1986_v18, %v1986_v18 }
 0x161   :  { %v1129_v56 = vadd.f32 %v1128_v53, %v1066_v16  ;;  %v996_v27 = vadd.f32 %v995_v43, %v1968_v60 }
 0x163   :  { %v997_v50 = vadd.f32 %v1960_v44, %v996_v27  ;;  %v1130_v63 = vadd.f32 %v1129_v56, %v1067_v59  ;;  %v1072_v44 = vmul.f32 %v1984_v15, %v1984_v15 }
 0x165   :  { %v1131_v41 = vadd.f32 %v1130_v63, %v1068_v14  ;;  %v998_v1 = vadd.f32 %v1964_v55, %v997_v50  ;;  %v1073_v55 = vmul.f32 %v1988_v26, %v1988_v26 }
 0x167   :  { %v999_v2 = vadd.f32 %v998_v1, %v1986_v18  ;;  %v1132_v45 = vadd.f32 %v1131_v41, %v1069_v21  ;;  %v1074_v18 = vmul.f32 %v2010_v58, %v2010_v58 }
 0x169   :  { %v1133_v4 = vadd.f32 %v1132_v45, %v1070_v47  ;;  %v1000_v60 = vadd.f32 %v999_v2, %v1992_v32 }
 0x16b   :  { %v1001_v0 = vadd.f32 %v1984_v15, %v1000_v60  ;;  %v1134_v7 = vadd.f32 %v1133_v4, %v1071_v6  ;;  %v1076_v15 = vmul.f32 %v2008_v54, %v2008_v54 }
 0x16d   :  { %v1135_v10 = vadd.f32 %v1134_v7, %v1072_v44  ;;  %v1002_v11 = vadd.f32 %v1988_v26, %v1001_v0  ;;  %v1077_v26 = vmul.f32 %v2012_v3, %v2012_v3 }
 0x16f   :  { %v1003_v9 = vadd.f32 %v1002_v11, %v2010_v58  ;;  %v1136_v12 = vadd.f32 %v1135_v10, %v1073_v55 }
 0x171   :  { %v1137_v62 = vadd.f32 %v1136_v12, %v1074_v18  ;;  %v1004_v32 = vadd.f32 %v1003_v9, %v2016_v8 }
 0x173   :  { %v1005_v17 = vadd.f32 %v2008_v54, %v1004_v32  ;;  %v1138_v5 = vadd.f32 %v1137_v62, %v1075_v13 }
 0x175   :  { %v1006_v19 = vadd.f32 %v2012_v3, %v1005_v17  ;;  %v1139_v20 = vadd.f32 %v1138_v5, %v1076_v15 }
 0x177   :  { %v1007_v58 = vrot.slane %v1006_v19, 4  ;;  %v1140_v24 = vadd.f32 %v1139_v20, %v1077_v26 }
 0x179   :  { %v1008_v23 = vadd.f32 %v1007_v58, %v1006_v19  ;;  %v1141_v25 = vrot.slane %v1140_v24, 4 }
 0x17b   :  { %v1009_v28 = vrot.slane %v1008_v23, 2  ;;  %v1142_v33 = vadd.f32 %v1141_v25, %v1140_v24 }
 0x17d   :  { %v1010_v30 = vadd.f32 %v1009_v28, %v1008_v23  ;;  %v1143_v8 = vrot.slane %v1142_v33, 2 }
 0x17f   :  { %v1011_v22 = vrot.slane %v1010_v30, 1  ;;  %v1144_v31 = vadd.f32 %v1143_v8, %v1142_v33 }
 0x181   :  { %v1012_v34 = vadd.f32 %v1011_v22, %v1010_v30  ;;  %v1145_v29 = vrot.slane %v1144_v31, 1 }
 0x183   :  { %1013 = vst [vmem:[%s2137_s3] sm:$0x1] %v1012_v34  ;;  %v1146_v54 = vadd.f32 %v1145_v29, %v1144_v31 }
 0x185   :  { %1147 = vst [vmem:[%s2138_s4] sm:$0x1] %v1146_v54 }

// kernel: bottleneck_forward.11
= control target key start
LH: loop header
LB: loop body
LE: loop exit
PB: predicated region body
PF: predicated region fallthrough
CT: control target
= control target key end

     0   :  { %v190_v0 = vlaneseq  ;;  %s2130_s1 = inlined_call_operand.vmem [shape: f32[1,128], index: 1, kind: input, shape index: {}]   ;;  %s2131_s2 = inlined_call_operand.vmem [shape: f32[1,128], index: 2, kind: input, shape index: {}]   ;;  %s2132_s6 = inlined_call_operand.vmem [shape: f32[1,128], index: 6, kind: input, shape index: {}]   ;;  %s2133_s7 = inlined_call_operand.vmem [shape: f32[1,128], index: 7, kind: input, shape index: {}]   ;;  %s2134_s0 = inlined_call_operand.vmem [shape: bf16[512,128], index: 0, kind: input, shape index: {}]   ;;  %s2135_s5 = inlined_call_operand.vmem [shape: bf16[512,128], index: 5, kind: input, shape index: {}]   ;;  %s2136_s3 = inlined_call_operand.vmem [shape: f32[1,128], index: 3, kind: input, shape index: {}]   ;;  %s2137_s8 = inlined_call_operand.vmem [shape: f32[1,128], index: 8, kind: input, shape index: {}]   ;;  %s2138_s4 = inlined_call_operand.vmem [shape: f32[1,128], index: 4, kind: input, shape index: {}]   ;;  %s2139_s9 = inlined_call_operand.vmem [shape: f32[1,128], index: 9, kind: input, shape index: {}]   ;;  %s2140_s10 = inlined_call_operand.vmem [shape: f32[512,128], index: 10, kind: output, shape index: {}]  }
   0x1   :  { %v35_v1 = vld [vmem:[%s2130_s1] sm:$0x1]  ;;  %v1201_v13 = vld [vmem:[%s2134_s0 + $0x8] sm:$0xff]   ;;  %v1215_v19 = vld [vmem:[%s2134_s0 + $0x10] sm:$0xff]  }
   0x2   :  { %v36_v2 = vld [vmem:[%s2131_s2] sm:$0x1]  ;;  %v1176_v3 = vmul.f32 0.001953125, %v35_v1  ;;  %v191_v11 = vshrl.u32 %v190_v0, 7  ;;  %v1210_v18 = vld [vmem:[%s2135_s5 + $0x8] sm:$0xff]   ;;  %v1220_v20 = vld [vmem:[%s2135_s5 + $0x10] sm:$0xff]   ;;  %v799_v24 = vunpack.c.l.bf16 %v1201_v13  ;;  %v800_v28 = vunpack.c.h.bf16 %v1201_v13 }
   0x3   :  { %v40_v4 = vmul.f32 0.001953125, %v36_v2  ;;  %v48_v5 = vld [vmem:[%s2132_s6] sm:$0x1]  ;;  %v1230_v25 = vld [vmem:[%s2134_s0 + $0x18] sm:$0xff]   ;;  %v927_v27 = vunpack.c.l.bf16 %v1210_v18  ;;  %v928_v29 = vunpack.c.h.bf16 %v1210_v18  ;;  %v803_v30 = vunpack.c.l.bf16 %v1215_v19  ;;  %v1256_v37 = vld [vmem:[%s2134_s0 + $0x28] sm:$0xff]  }
   0x4   :  { %v49_v6 = vld [vmem:[%s2133_s7] sm:$0x1]  ;;  %v41_v7 = vmul.f32 %v1176_v3, %v1176_v3  ;;  %v1186_v8 = vmul.f32 0.001953125, %v48_v5  ;;  %v1224_v23 = vsub.s32 0, %v191_v11  ;;  %v1235_v26 = vld [vmem:[%s2135_s5 + $0x18] sm:$0xff]   ;;  %v931_v34 = vunpack.c.l.bf16 %v1220_v20  ;;  %v1265_v42 = vld [vmem:[%s2135_s5 + $0x28] sm:$0xff]  }
   0x5   :  { %v53_v9 = vmul.f32 0.001953125, %v49_v6  ;;  %v1191_v10 = vld [vmem:[%s2134_s0] sm:$0xff]   ;;  %v804_v35 = vunpack.c.h.bf16 %v1215_v19  ;;  %v932_v38 = vunpack.c.h.bf16 %v1220_v20  ;;  %v807_v39 = vunpack.c.l.bf16 %v1230_v25  ;;  %v1272_v46 = vld [vmem:[%s2134_s0 + $0x30] sm:$0xff]   ;;  %v1286_v52 = vld [vmem:[%s2134_s0 + $0x38] sm:$0xff]  }
   0x6   :  { %v1196_v12 = vld [vmem:[%s2135_s5] sm:$0xff]   ;;  %v795_v14 = vunpack.c.l.bf16 %v1191_v10  ;;  %v796_v16 = vunpack.c.h.bf16 %v1191_v10  ;;  %v42_v21 = vsub.f32 %v40_v4, %v41_v7  ;;  %v54_v22 = vmul.f32 %v1186_v8, %v1186_v8  ;;  %v1277_v47 = vld [vmem:[%s2135_s5 + $0x30] sm:$0xff]   ;;  %v1291_v53 = vld [vmem:[%s2135_s5 + $0x38] sm:$0xff]  }
   0x7   :  { %v923_v15 = vunpack.c.l.bf16 %v1196_v12  ;;  %v924_v17 = vunpack.c.h.bf16 %v1196_v12  ;;  %v1244_v31 = vld [vmem:[%s2134_s0 + $0x20] sm:$0xff]   ;;  %v1313_v63 = vld [vmem:[%s2134_s0 + $0x48] sm:$0xff]   ;;  %v1327_v6 = vld [vmem:[%s2134_s0 + $0x50] sm:$0xff]   ;;  %v2141_v20 = vunpack.c.l.bf16 %v1235_v26 }
   0x8   :  { %v43_v32 = vadd.f32 1e-05, %v42_v21  ;;  %v55_v33 = vsub.f32 %v53_v9, %v54_v22  ;;  %v1251_v36 = vld [vmem:[%s2135_s5 + $0x20] sm:$0xff]   ;;  %v1318_v0 = vld [vmem:[%s2135_s5 + $0x48] sm:$0xff]   ;;  %v1332_v7 = vld [vmem:[%s2135_s5 + $0x50] sm:$0xff]  }
   0x9   :  { %v1299_v57 = vld [vmem:[%s2134_s0 + $0x40] sm:$0xff]   ;;  %v1369_v21 = vld [vmem:[%s2134_s0 + $0x68] sm:$0xff]   ;;  %v1386_v62 = vld [vmem:[%s2134_s0 + $0x70] sm:$0xff]  }
   0xa   :  { %1111 = vrsqrt.f32 %v43_v32  ;;  %v56_v43 = vadd.f32 1e-05, %v55_v33  ;;  %v1304_v58 = vld [vmem:[%s2135_s5 + $0x40] sm:$0xff]   ;;  %v1341_v32 = vld [vmem:[%s2134_s0 + $0x58] sm:$0xff]   ;;  %v1374_v2 = vld [vmem:[%s2135_s5 + $0x68] sm:$0xff]  }
   0xb   :  { %v1346_v33 = vld [vmem:[%s2135_s5 + $0x58] sm:$0xff]   ;;  %v1355_v22 = vld [vmem:[%s2134_s0 + $0x60] sm:$0xff]   ;;  %v1391_v61 = vld [vmem:[%s2135_s5 + $0x70] sm:$0xff]  }
   0xc   :  { %1113 = vrsqrt.f32 %v56_v43  ;;  %v1360_v5 = vld [vmem:[%s2135_s5 + $0x60] sm:$0xff]   ;;  %v1400_v1 = vld [vmem:[%s2134_s0 + $0x78] sm:$0xff]  }
   0xd   :  { %v37_v4 = vld [vmem:[%s2136_s3] sm:$0x1]  ;;  %v1405_v59 = vld [vmem:[%s2135_s5 + $0x78] sm:$0xff]  }
   0xe   :  { %v50_v60 = vld [vmem:[%s2137_s8] sm:$0x1]  ;;  %v984_v44 = vunpack.c.h.bf16 %v1405_v59 }
   0xf   :  { %v1420_v48 = vld [vmem:[%s2134_s0 + $0x80] sm:$0xff]  }
  0x10   :  { %v1425_v9 = vld [vmem:[%s2135_s5 + $0x80] sm:$0xff]  }
  0x11   :  { %v51_v41 = vld [vmem:[%s2139_s9] sm:$0x1] }
  0x14   :  { %v1112_v56 = vpop.eup %1111 }
  0x15   :  { %v45_v54 = vmul.f32 %v1112_v56, %v37_v4  ;;  %v38_v56 = vld [vmem:[%s2138_s4] sm:$0x1]  ;;  %v859_v4 = vunpack.c.l.bf16 %v1420_v48 }
  0x16   :  { %v1114_v11 = vpop.eup %1113 }
  0x17   :  { %v46_v55 = vmul.f32 %v45_v54, %v1176_v3  ;;  %v58_v43 = vmul.f32 %v1114_v11, %v50_v60  ;;  %v1436_v45 = vrot.slane %v45_v54, %v1224_v23 }
  0x19   :  { %v47_v40 = vsub.f32 %v38_v56, %v46_v55  ;;  %v59_v3 = vmul.f32 %v58_v43, %v1186_v8  ;;  %v195_v54 = vmul.f32 %v795_v14, %v1436_v45  ;;  %v1451_v60 = vrot.slane %v58_v43, %v1224_v23 }
  0x1a   :  { %v196_v11 = vmul.f32 %v796_v16, %v1436_v45  ;;  %v197_v49 = vmul.f32 %v799_v24, %v1436_v45  ;;  %v198_v55 = vmul.f32 %v800_v28, %v1436_v45  ;;  %v199_v8 = vmul.f32 %v803_v30, %v1436_v45 }
  0x1b   :  { %v60_v14 = vsub.f32 %v51_v41, %v59_v3  ;;  %v1466_v43 = vrot.slane %v47_v40, %v1224_v23  ;;  %v463_v10 = vmul.f32 %v923_v15, %v1451_v60  ;;  %v464_v16 = vmul.f32 %v924_v17, %v1451_v60 }
  0x1c   :  { %v465_v13 = vmul.f32 %v927_v27, %v1451_v60  ;;  %v466_v24 = vmul.f32 %v928_v29, %v1451_v60  ;;  %v467_v28 = vmul.f32 %v931_v34, %v1451_v60  ;;  %v200_v15 = vmul.f32 %v804_v35, %v1436_v45 }
  0x1d   :  { %v265_v30 = vadd.f32 %v1466_v43, %v195_v54  ;;  %v1488_v12 = vrot.slane %v60_v14, %v1224_v23  ;;  %v266_v17 = vadd.f32 %v1466_v43, %v196_v11  ;;  %v267_v27 = vadd.f32 %v1466_v43, %v197_v49 }
  0x1e   :  { %v268_v18 = vadd.f32 %v1466_v43, %v198_v55  ;;  %v269_v29 = vadd.f32 %v1466_v43, %v199_v8  ;;  %v270_v40 = vadd.f32 %v1466_v43, %v200_v15  ;;  %v468_v19 = vmul.f32 %v932_v38, %v1451_v60 }
  0x1f   :  { %v533_v34 = vadd.f32 %v1488_v12, %v463_v10  ;;  %v534_v35 = vadd.f32 %v1488_v12, %v464_v16  ;;  %v535_v23 = vadd.f32 %v1488_v12, %v465_v13  ;;  %v536_v41 = vadd.f32 %v1488_v12, %v466_v24 }
  0x20   :  { %v537_v49 = vadd.f32 %v1488_v12, %v467_v28  ;;  %v538_v56 = vadd.f32 %v1488_v12, %v468_v19  ;;  %v201_v3 = vmul.f32 %v807_v39, %v1436_v45  ;;  %v469_v38 = vmul.f32 %v2141_v20, %v1451_v60 }
  0x21   :  { %v597_v54 = vadd.f32 %v533_v34, %v265_v30  ;;  %v598_v11 = vadd.f32 %v534_v35, %v266_v17  ;;  %v599_v55 = vadd.f32 %v535_v23, %v267_v27  ;;  %v600_v8 = vadd.f32 %v536_v41, %v268_v18 }
  0x22   :  { %v601_v14 = vadd.f32 %v537_v49, %v269_v29  ;;  %v602_v10 = vadd.f32 %v538_v56, %v270_v40  ;;  %v271_v16 = vadd.f32 %v1466_v43, %v201_v3  ;;  %v539_v13 = vadd.f32 %v1488_v12, %v469_v38 }
  0x23   :  { %v661_v24 = vmax.f32 %v597_v54, 0.0  ;;  %v662_v28 = vmax.f32 %v598_v11, 0.0  ;;  %v663_v15 = vmax.f32 %v599_v55, 0.0  ;;  %v664_v19 = vmax.f32 %v600_v8, 0.0 }
  0x24   :  { %v665_v51 = vmax.f32 %v601_v14, 0.0  ;;  %v666_v39 = vmax.f32 %v602_v10, 0.0  ;;  %v603_v50 = vadd.f32 %v539_v13, %v271_v16  ;;  %v2142_v20 = vunpack.c.h.bf16 %v1230_v25 }
  0x25   :  { %725 = vst [vmem:[%s2140_s10] sm:$0xff] %v661_v24  ;;  %726 = vst [vmem:[%s2140_s10 + $0x8] sm:$0xff] %v662_v28  ;;  %v2143_v25 = vunpack.c.h.bf16 %v1235_v26  ;;  %v2144_v27 = vunpack.c.l.bf16 %v1244_v31  ;;  %v2145_v29 = vunpack.c.l.bf16 %v1251_v36  ;;  %v2146_v34 = vunpack.c.h.bf16 %v1244_v31 }
  0x26   :  { %v202_v30 = vmul.f32 %v2142_v20, %v1436_v45  ;;  %727 = vst [vmem:[%s2140_s10 + $0x10] sm:$0xff] %v663_v15  ;;  %728 = vst [vmem:[%s2140_s10 + $0x18] sm:$0xff] %v664_v19  ;;  %v667_v26 = vmax.f32 %v603_v50, 0.0  ;;  %v2147_v41 = vunpack.c.h.bf16 %v1251_v36  ;;  %v2148_v56 = vunpack.c.l.bf16 %v1256_v37 }
  0x27   :  { %v470_v17 = vmul.f32 %v2143_v25, %v1451_v60  ;;  %v203_v18 = vmul.f32 %v2144_v27, %v1436_v45  ;;  %v471_v40 = vmul.f32 %v2145_v29, %v1451_v60  ;;  %v204_v35 = vmul.f32 %v2146_v34, %v1436_v45  ;;  %729 = vst [vmem:[%s2140_s10 + $0x20] sm:$0xff] %v665_v51 }
  0x28   :  { %730 = vst [vmem:[%s2140_s10 + $0x28] sm:$0xff] %v666_v39  ;;  %v272_v23 = vadd.f32 %v1466_v43, %v202_v30  ;;  %v472_v49 = vmul.f32 %v2147_v41, %v1451_v60  ;;  %v205_v31 = vmul.f32 %v2148_v56, %v1436_v45  ;;  %731 = vst [vmem:[%s2140_s10 + $0x30] sm:$0xff] %v667_v26  ;;  %v2149_v11 = vunpack.c.l.bf16 %v1265_v42 }
  0x29   :  { %v540_v3 = vadd.f32 %v1488_v12, %v470_v17  ;;  %v273_v38 = vadd.f32 %v1466_v43, %v203_v18  ;;  %v541_v51 = vadd.f32 %v1488_v12, %v471_v40  ;;  %v274_v54 = vadd.f32 %v1466_v43, %v204_v35 }
  0x2a   :  { %v542_v50 = vadd.f32 %v1488_v12, %v472_v49  ;;  %v275_v36 = vadd.f32 %v1466_v43, %v205_v31  ;;  %v473_v55 = vmul.f32 %v2149_v11, %v1451_v60  ;;  %v2150_v8 = vunpack.c.h.bf16 %v1256_v37 }
  0x2b   :  { %v604_v10 = vadd.f32 %v540_v3, %v272_v23  ;;  %v605_v16 = vadd.f32 %v541_v51, %v273_v38  ;;  %v2151_v13 = vunpack.c.h.bf16 %v1265_v42  ;;  %v2152_v28 = vunpack.c.l.bf16 %v1272_v46 }
  0x2c   :  { %v206_v14 = vmul.f32 %v2150_v8, %v1436_v45  ;;  %v606_v19 = vadd.f32 %v542_v50, %v274_v54  ;;  %v543_v39 = vadd.f32 %v1488_v12, %v473_v55  ;;  %v2153_v30 = vunpack.c.l.bf16 %v1277_v47 }
  0x2d   :  { %v474_v24 = vmul.f32 %v2151_v13, %v1451_v60  ;;  %v207_v15 = vmul.f32 %v2152_v28, %v1436_v45  ;;  %v668_v25 = vmax.f32 %v604_v10, 0.0  ;;  %v669_v17 = vmax.f32 %v605_v16, 0.0 }
  0x2e   :  { %v276_v20 = vadd.f32 %v1466_v43, %v206_v14  ;;  %v475_v37 = vmul.f32 %v2153_v30, %v1451_v60  ;;  %v670_v18 = vmax.f32 %v606_v19, 0.0  ;;  %v607_v29 = vadd.f32 %v543_v39, %v275_v36 }
  0x2f   :  { %v544_v27 = vadd.f32 %v1488_v12, %v474_v24  ;;  %v277_v42 = vadd.f32 %v1466_v43, %v207_v15  ;;  %v2154_v34 = vunpack.c.h.bf16 %v1272_v46  ;;  %732 = vst [vmem:[%s2140_s10 + $0x38] sm:$0xff] %v668_v25  ;;  %733 = vst [vmem:[%s2140_s10 + $0x40] sm:$0xff] %v669_v17  ;;  %v2155_v23 = vunpack.c.h.bf16 %v1277_v47 }
  0x30   :  { %v545_v40 = vadd.f32 %v1488_v12, %v475_v37  ;;  %v2156_v49 = vunpack.c.l.bf16 %v1286_v52  ;;  %v2157_v46 = vunpack.c.l.bf16 %v1291_v53  ;;  %734 = vst [vmem:[%s2140_s10 + $0x48] sm:$0xff] %v670_v18  ;;  %v671_v3 = vmax.f32 %v607_v29, 0.0 }
  0x31   :  { %v208_v35 = vmul.f32 %v2154_v34, %v1436_v45  ;;  %v608_v26 = vadd.f32 %v544_v27, %v276_v20  ;;  %v476_v41 = vmul.f32 %v2155_v23, %v1451_v60  ;;  %v2158_v47 = vunpack.c.h.bf16 %v1286_v52 }
  0x32   :  { %v209_v56 = vmul.f32 %v2156_v49, %v1436_v45  ;;  %v477_v31 = vmul.f32 %v2157_v46, %v1451_v60  ;;  %v609_v38 = vadd.f32 %v545_v40, %v277_v42  ;;  %735 = vst [vmem:[%s2140_s10 + $0x50] sm:$0xff] %v671_v3  ;;  %v2159_v10 = vunpack.c.h.bf16 %v1291_v53 }
  0x33   :  { %v278_v51 = vadd.f32 %v1466_v43, %v208_v35  ;;  %v210_v54 = vmul.f32 %v2158_v47, %v1436_v45  ;;  %v672_v50 = vmax.f32 %v608_v26, 0.0  ;;  %v546_v36 = vadd.f32 %v1488_v12, %v476_v41 }
  0x34   :  { %v279_v11 = vadd.f32 %v1466_v43, %v209_v56  ;;  %v547_v55 = vadd.f32 %v1488_v12, %v477_v31  ;;  %v673_v8 = vmax.f32 %v609_v38, 0.0  ;;  %v478_v16 = vmul.f32 %v2159_v10, %v1451_v60 }
  0x35   :  { %v280_v14 = vadd.f32 %v1466_v43, %v210_v54  ;;  %v2160_v52 = vunpack.c.l.bf16 %v1299_v57  ;;  %736 = vst [vmem:[%s2140_s10 + $0x58] sm:$0xff] %v672_v50  ;;  %v610_v24 = vadd.f32 %v546_v36, %v278_v51  ;;  %v2161_v15 = vunpack.c.l.bf16 %v1304_v58 }
  0x36   :  { %v611_v28 = vadd.f32 %v547_v55, %v279_v11  ;;  %v2162_v39 = vunpack.c.h.bf16 %v1299_v57  ;;  %737 = vst [vmem:[%s2140_s10 + $0x60] sm:$0xff] %v673_v8  ;;  %v548_v53 = vadd.f32 %v1488_v12, %v478_v16  ;;  %v2163_v37 = vunpack.c.h.bf16 %v1304_v58 }
  0x37   :  { %v211_v13 = vmul.f32 %v2160_v52, %v1436_v45  ;;  %v479_v19 = vmul.f32 %v2161_v15, %v1451_v60  ;;  %v2164_v17 = vunpack.c.l.bf16 %v1313_v63  ;;  %v674_v42 = vmax.f32 %v610_v24, 0.0 }
  0x38   :  { %v212_v20 = vmul.f32 %v2162_v39, %v1436_v45  ;;  %v480_v25 = vmul.f32 %v2163_v37, %v1451_v60  ;;  %v675_v18 = vmax.f32 %v611_v28, 0.0  ;;  %v612_v40 = vadd.f32 %v548_v53, %v280_v14 }
  0x39   :  { %v281_v30 = vadd.f32 %v1466_v43, %v211_v13  ;;  %v213_v27 = vmul.f32 %v2164_v17, %v1436_v45  ;;  %v549_v57 = vadd.f32 %v1488_v12, %v479_v19  ;;  %v2165_v26 = vunpack.c.l.bf16 %v1318_v0  ;;  %738 = vst [vmem:[%s2140_s10 + $0x68] sm:$0xff] %v674_v42 }
  0x3a   :  { %v282_v29 = vadd.f32 %v1466_v43, %v212_v20  ;;  %v550_v34 = vadd.f32 %v1488_v12, %v480_v25  ;;  %739 = vst [vmem:[%s2140_s10 + $0x70] sm:$0xff] %v675_v18  ;;  %v2166_v41 = vunpack.c.h.bf16 %v1313_v63  ;;  %v2167_v56 = vunpack.c.h.bf16 %v1318_v0 }
  0x3b   :  { %v283_v35 = vadd.f32 %v1466_v43, %v213_v27  ;;  %v481_v58 = vmul.f32 %v2165_v26, %v1451_v60  ;;  %v613_v23 = vadd.f32 %v549_v57, %v281_v30  ;;  %v2168_v31 = vunpack.c.l.bf16 %v1327_v6 }
  0x3c   :  { %v214_v49 = vmul.f32 %v2166_v41, %v1436_v45  ;;  %v482_v46 = vmul.f32 %v2167_v56, %v1451_v60  ;;  %v676_v38 = vmax.f32 %v612_v40, 0.0  ;;  %v614_v51 = vadd.f32 %v550_v34, %v282_v29 }
  0x3d   :  { %v215_v3 = vmul.f32 %v2168_v31, %v1436_v45  ;;  %v551_v47 = vadd.f32 %v1488_v12, %v481_v58  ;;  %v2169_v54 = vunpack.c.l.bf16 %v1332_v7  ;;  %v677_v36 = vmax.f32 %v613_v23, 0.0 }
  0x3e   :  { %v284_v63 = vadd.f32 %v1466_v43, %v214_v49  ;;  %v552_v11 = vadd.f32 %v1488_v12, %v482_v46  ;;  %740 = vst [vmem:[%s2140_s10 + $0x78] sm:$0xff] %v676_v38  ;;  %v678_v55 = vmax.f32 %v614_v51, 0.0  ;;  %v2170_v10 = vunpack.c.h.bf16 %v1327_v6 }
  0x3f   :  { %v483_v50 = vmul.f32 %v2169_v54, %v1451_v60  ;;  %v285_v0 = vadd.f32 %v1466_v43, %v215_v3  ;;  %v615_v8 = vadd.f32 %v551_v47, %v283_v35  ;;  %741 = vst [vmem:[%s2140_s10 + $0x80] sm:$0xff] %v677_v36  ;;  %v2171_v13 = vunpack.c.h.bf16 %v1332_v7 }
  0x40   :  { %v216_v16 = vmul.f32 %v2170_v10, %v1436_v45  ;;  %v616_v52 = vadd.f32 %v552_v11, %v284_v63  ;;  %v2172_v28 = vunpack.c.l.bf16 %v1341_v32  ;;  %v2173_v19 = vunpack.c.l.bf16 %v1346_v33  ;;  %742 = vst [vmem:[%s2140_s10 + $0x88] sm:$0xff] %v678_v55 }
  0x41   :  { %v553_v14 = vadd.f32 %v1488_v12, %v483_v50  ;;  %v484_v24 = vmul.f32 %v2171_v13, %v1451_v60  ;;  %v679_v6 = vmax.f32 %v615_v8, 0.0  ;;  %v2174_v7 = vunpack.c.h.bf16 %v1341_v32 }
  0x42   :  { %v217_v15 = vmul.f32 %v2172_v28, %v1436_v45  ;;  %v485_v39 = vmul.f32 %v2173_v19, %v1451_v60  ;;  %v286_v53 = vadd.f32 %v1466_v43, %v216_v16  ;;  %v680_v37 = vmax.f32 %v616_v52, 0.0 }
  0x43   :  { %v617_v20 = vadd.f32 %v553_v14, %v285_v0  ;;  %v218_v30 = vmul.f32 %v2174_v7, %v1436_v45  ;;  %v554_v25 = vadd.f32 %v1488_v12, %v484_v24  ;;  %743 = vst [vmem:[%s2140_s10 + $0x90] sm:$0xff] %v679_v6  ;;  %v2175_v57 = vunpack.c.h.bf16 %v1346_v33 }
  0x44   :  { %v287_v17 = vadd.f32 %v1466_v43, %v217_v15  ;;  %v555_v27 = vadd.f32 %v1488_v12, %v485_v39  ;;  %v2176_v32 = vunpack.c.l.bf16 %v1355_v22  ;;  %744 = vst [vmem:[%s2140_s10 + $0x98] sm:$0xff] %v680_v37  ;;  %v2177_v26 = vunpack.c.l.bf16 %v1360_v5 }
  0x45   :  { %v681_v42 = vmax.f32 %v617_v20, 0.0  ;;  %v288_v18 = vadd.f32 %v1466_v43, %v218_v30  ;;  %v486_v29 = vmul.f32 %v2175_v57, %v1451_v60  ;;  %v618_v34 = vadd.f32 %v554_v25, %v286_v53 }
  0x46   :  { %v219_v40 = vmul.f32 %v2176_v32, %v1436_v45  ;;  %v619_v35 = vadd.f32 %v555_v27, %v287_v17  ;;  %v487_v58 = vmul.f32 %v2177_v26, %v1451_v60  ;;  %v2178_v23 = vunpack.c.h.bf16 %v1355_v22 }
  0x47   :  { %745 = vst [vmem:[%s2140_s10 + $0xa0] sm:$0xff] %v681_v42  ;;  %v556_v33 = vadd.f32 %v1488_v12, %v486_v29  ;;  %v2179_v56 = vunpack.c.h.bf16 %v1360_v5  ;;  %v2180_v31 = vunpack.c.l.bf16 %v1369_v21  ;;  %v682_v38 = vmax.f32 %v618_v34, 0.0 }
  0x48   :  { %v220_v41 = vmul.f32 %v2178_v23, %v1436_v45  ;;  %v289_v49 = vadd.f32 %v1466_v43, %v219_v40  ;;  %v683_v51 = vmax.f32 %v619_v35, 0.0  ;;  %v557_v22 = vadd.f32 %v1488_v12, %v487_v58  ;;  %v1065_v23 = vld [vmem:[%s2134_s0 + $0x88] sm:$0xff]  }
  0x49   :  { %v488_v46 = vmul.f32 %v2179_v56, %v1451_v60  ;;  %v221_v3 = vmul.f32 %v2180_v31, %v1436_v45  ;;  %v620_v54 = vadd.f32 %v556_v33, %v288_v18  ;;  %v2181_v63 = vunpack.c.l.bf16 %v1374_v2  ;;  %746 = vst [vmem:[%s2140_s10 + $0xa8] sm:$0xff] %v682_v38 }
  0x4a   :  { %v290_v47 = vadd.f32 %v1466_v43, %v220_v41  ;;  %747 = vst [vmem:[%s2140_s10 + $0xb0] sm:$0xff] %v683_v51  ;;  %v621_v11 = vadd.f32 %v557_v22, %v289_v49  ;;  %v2182_v0 = vunpack.c.h.bf16 %v1369_v21  ;;  %v2183_v8 = vunpack.c.h.bf16 %v1374_v2 }
  0x4b   :  { %v558_v50 = vadd.f32 %v1488_v12, %v488_v46  ;;  %v291_v36 = vadd.f32 %v1466_v43, %v221_v3  ;;  %v489_v5 = vmul.f32 %v2181_v63, %v1451_v60  ;;  %v2184_v10 = vunpack.c.l.bf16 %v1386_v62 }
  0x4c   :  { %v222_v55 = vmul.f32 %v2182_v0, %v1436_v45  ;;  %v490_v14 = vmul.f32 %v2183_v8, %v1451_v60  ;;  %v684_v52 = vmax.f32 %v620_v54, 0.0  ;;  %v2185_v28 = vunpack.c.l.bf16 %v1391_v61 }
  0x4d   :  { %v223_v16 = vmul.f32 %v2184_v10, %v1436_v45  ;;  %v622_v13 = vadd.f32 %v558_v50, %v290_v47  ;;  %v559_v24 = vadd.f32 %v1488_v12, %v489_v5  ;;  %v685_v19 = vmax.f32 %v621_v11, 0.0 }
  0x4e   :  { %v491_v15 = vmul.f32 %v2185_v28, %v1451_v60  ;;  %v292_v21 = vadd.f32 %v1466_v43, %v222_v55  ;;  %v560_v39 = vadd.f32 %v1488_v12, %v490_v14  ;;  %748 = vst [vmem:[%s2140_s10 + $0xb8] sm:$0xff] %v684_v52  ;;  %v2186_v7 = vunpack.c.h.bf16 %v1386_v62  ;;  %v1097_v52 = vld [vmem:[%s2135_s5 + $0x90] sm:$0xff]  }
  0x4f   :  { %v293_v2 = vadd.f32 %v1466_v43, %v223_v16  ;;  %v686_v6 = vmax.f32 %v622_v13, 0.0  ;;  %v623_v20 = vadd.f32 %v559_v24, %v291_v36  ;;  %749 = vst [vmem:[%s2140_s10 + $0xc0] sm:$0xff] %v685_v19  ;;  %v2187_v25 = vunpack.c.h.bf16 %v1391_v61 }
  0x50   :  { %v561_v53 = vadd.f32 %v1488_v12, %v491_v15  ;;  %v224_v30 = vmul.f32 %v2186_v7, %v1436_v45  ;;  %v624_v37 = vadd.f32 %v560_v39, %v292_v21  ;;  %v2188_v27 = vunpack.c.l.bf16 %v1400_v1 }
  0x51   :  { %v492_v17 = vmul.f32 %v2187_v25, %v1451_v60  ;;  %v2189_v18 = vunpack.c.l.bf16 %v1405_v59  ;;  %750 = vst [vmem:[%s2140_s10 + $0xc8] sm:$0xff] %v686_v6  ;;  %v687_v62 = vmax.f32 %v623_v20, 0.0  ;;  %v2190_v61 = vunpack.c.h.bf16 %v1400_v1  ;;  %v1067_v6 = vld [vmem:[%s2134_s0 + $0x98] sm:$0xff]  }
  0x52   :  { %v225_v42 = vmul.f32 %v2188_v27, %v1436_v45  ;;  %v625_v29 = vadd.f32 %v561_v53, %v293_v2  ;;  %v294_v32 = vadd.f32 %v1466_v43, %v224_v30  ;;  %v688_v34 = vmax.f32 %v624_v37, 0.0  ;;  %v1098_v37 = vld [vmem:[%s2135_s5 + $0x98] sm:$0xff]  }
  0x53   :  { %v493_v57 = vmul.f32 %v2189_v18, %v1451_v60  ;;  %v226_v40 = vmul.f32 %v2190_v61, %v1436_v45  ;;  %v562_v35 = vadd.f32 %v1488_v12, %v492_v17  ;;  %751 = vst [vmem:[%s2140_s10 + $0xd0] sm:$0xff] %v687_v62  ;;  %v494_v1 = vmul.f32 %v984_v44, %v1451_v60  ;;  %v1096_v44 = vld [vmem:[%s2135_s5 + $0x88] sm:$0xff]  }
  0x54   :  { %v295_v26 = vadd.f32 %v1466_v43, %v225_v42  ;;  %v689_v41 = vmax.f32 %v625_v29, 0.0  ;;  %v227_v49 = vmul.f32 %v859_v4, %v1436_v45  ;;  %752 = vst [vmem:[%s2140_s10 + $0xd8] sm:$0xff] %v688_v34  ;;  %v2191_v31 = vunpack.c.l.bf16 %v1425_v9 }
  0x55   :  { %v563_v58 = vadd.f32 %v1488_v12, %v493_v57  ;;  %v296_v33 = vadd.f32 %v1466_v43, %v226_v40  ;;  %v626_v56 = vadd.f32 %v562_v35, %v294_v32  ;;  %v2192_v38 = vunpack.c.h.bf16 %v1420_v48  ;;  %v1066_v48 = vld [vmem:[%s2134_s0 + $0x90] sm:$0xff]   ;;  %v1068_v35 = vld [vmem:[%s2134_s0 + $0xa0] sm:$0xff]  }
  0x56   :  { %v495_v3 = vmul.f32 %v2191_v31, %v1451_v60  ;;  %753 = vst [vmem:[%s2140_s10 + $0xe0] sm:$0xff] %v689_v41  ;;  %v564_v59 = vadd.f32 %v1488_v12, %v494_v1  ;;  %v297_v4 = vadd.f32 %v1466_v43, %v227_v49  ;;  %v2193_v22 = vunpack.c.h.bf16 %v1425_v9 }
  0x57   :  { %v627_v46 = vadd.f32 %v563_v58, %v295_v26  ;;  %v228_v51 = vmul.f32 %v2192_v38, %v1436_v45  ;;  %v863_v54 = vunpack.c.l.bf16 %v1065_v23  ;;  %v690_v50 = vmax.f32 %v626_v56, 0.0 }
  0x58   :  { %v496_v47 = vmul.f32 %v2193_v22, %v1451_v60  ;;  %v565_v63 = vadd.f32 %v1488_v12, %v495_v3  ;;  %v628_v11 = vadd.f32 %v564_v59, %v296_v33  ;;  %v991_v8 = vunpack.c.l.bf16 %v1096_v44  ;;  %v1099_v33 = vld [vmem:[%s2135_s5 + $0xa0] sm:$0xff]  }
  0x59   :  { %v691_v36 = vmax.f32 %v627_v46, 0.0  ;;  %v298_v5 = vadd.f32 %v1466_v43, %v228_v51  ;;  %v229_v55 = vmul.f32 %v863_v54, %v1436_v45  ;;  %754 = vst [vmem:[%s2140_s10 + $0xe8] sm:$0xff] %v690_v50  ;;  %v864_v14 = vunpack.c.h.bf16 %v1065_v23 }
  0x5a   :  { %v566_v0 = vadd.f32 %v1488_v12, %v496_v47  ;;  %v629_v9 = vadd.f32 %v565_v63, %v297_v4  ;;  %v992_v10 = vunpack.c.h.bf16 %v1096_v44  ;;  %v867_v16 = vunpack.c.l.bf16 %v1066_v48  ;;  %v1069_v47 = vld [vmem:[%s2134_s0 + $0xa8] sm:$0xff]  }
  0x5b   :  { %755 = vst [vmem:[%s2140_s10 + $0xf0] sm:$0xff] %v691_v36  ;;  %v692_v13 = vmax.f32 %v628_v11, 0.0  ;;  %v299_v28 = vadd.f32 %v1466_v43, %v229_v55  ;;  %v497_v15 = vmul.f32 %v991_v8, %v1451_v60  ;;  %v230_v21 = vmul.f32 %v864_v14, %v1436_v45  ;;  %v1100_v63 = vld [vmem:[%s2135_s5 + $0xa8] sm:$0xff]  }
  0x5c   :  { %v630_v24 = vadd.f32 %v566_v0, %v298_v5  ;;  %v693_v19 = vmax.f32 %v629_v9, 0.0  ;;  %v498_v39 = vmul.f32 %v992_v10, %v1451_v60  ;;  %v231_v2 = vmul.f32 %v867_v16, %v1436_v45 }
  0x5d   :  { %756 = vst [vmem:[%s2140_s10 + $0xf8] sm:$0xff] %v692_v13  ;;  %v567_v53 = vadd.f32 %v1488_v12, %v497_v15  ;;  %v995_v7 = vunpack.c.l.bf16 %v1097_v52  ;;  %v868_v30 = vunpack.c.h.bf16 %v1066_v48  ;;  %v300_v25 = vadd.f32 %v1466_v43, %v230_v21 }
  0x5e   :  { %v694_v20 = vmax.f32 %v630_v24, 0.0  ;;  %757 = vst [vmem:[%s2140_s10 + $0x100] sm:$0xff] %v693_v19  ;;  %v568_v17 = vadd.f32 %v1488_v12, %v498_v39  ;;  %v301_v27 = vadd.f32 %v1466_v43, %v231_v2  ;;  %v996_v42 = vunpack.c.h.bf16 %v1097_v52 }
  0x5f   :  { %v631_v18 = vadd.f32 %v567_v53, %v299_v28  ;;  %v499_v57 = vmul.f32 %v995_v7, %v1451_v60  ;;  %v232_v62 = vmul.f32 %v868_v30, %v1436_v45  ;;  %v871_v29 = vunpack.c.l.bf16 %v1067_v6  ;;  %v1070_v28 = vld [vmem:[%s2134_s0 + $0xb0] sm:$0xff]  }
  0x60   :  { %758 = vst [vmem:[%s2140_s10 + $0x108] sm:$0xff] %v694_v20  ;;  %v632_v32 = vadd.f32 %v568_v17, %v300_v25  ;;  %v500_v61 = vmul.f32 %v996_v42, %v1451_v60  ;;  %v999_v40 = vunpack.c.l.bf16 %v1098_v37  ;;  %v872_v34 = vunpack.c.h.bf16 %v1067_v6  ;;  %v1101_v7 = vld [vmem:[%s2135_s5 + $0xb0] sm:$0xff]  }
  0x61   :  { %v695_v26 = vmax.f32 %v631_v18, 0.0  ;;  %v569_v58 = vadd.f32 %v1488_v12, %v499_v57  ;;  %v302_v23 = vadd.f32 %v1466_v43, %v232_v62  ;;  %v233_v41 = vmul.f32 %v871_v29, %v1436_v45  ;;  %v1071_v62 = vld [vmem:[%s2134_s0 + $0xb8] sm:$0xff]  }
  0x62   :  { %v696_v1 = vmax.f32 %v632_v32, 0.0  ;;  %v570_v49 = vadd.f32 %v1488_v12, %v500_v61  ;;  %v501_v56 = vmul.f32 %v999_v40, %v1451_v60  ;;  %v234_v46 = vmul.f32 %v872_v34, %v1436_v45  ;;  %v1102_v34 = vld [vmem:[%s2135_s5 + $0xb8] sm:$0xff]  }
  0x63   :  { %759 = vst [vmem:[%s2140_s10 + $0x110] sm:$0xff] %v695_v26  ;;  %v633_v31 = vadd.f32 %v569_v58, %v301_v27  ;;  %v303_v3 = vadd.f32 %v1466_v43, %v233_v41  ;;  %v1000_v38 = vunpack.c.h.bf16 %v1098_v37  ;;  %v875_v51 = vunpack.c.l.bf16 %v1068_v35 }
  0x64   :  { %760 = vst [vmem:[%s2140_s10 + $0x118] sm:$0xff] %v696_v1  ;;  %v634_v44 = vadd.f32 %v570_v49, %v302_v23  ;;  %v571_v59 = vadd.f32 %v1488_v12, %v501_v56  ;;  %v304_v4 = vadd.f32 %v1466_v43, %v234_v46  ;;  %v1003_v22 = vunpack.c.l.bf16 %v1099_v33 }
  0x65   :  { %v697_v54 = vmax.f32 %v633_v31, 0.0  ;;  %v502_v48 = vmul.f32 %v1000_v38, %v1451_v60  ;;  %v235_v50 = vmul.f32 %v875_v51, %v1436_v45  ;;  %v876_v36 = vunpack.c.h.bf16 %v1068_v35  ;;  %v1072_v38 = vld [vmem:[%s2134_s0 + $0xc0] sm:$0xff]  }
  0x66   :  { %v698_v5 = vmax.f32 %v634_v44, 0.0  ;;  %v635_v11 = vadd.f32 %v571_v59, %v303_v3  ;;  %v503_v0 = vmul.f32 %v1003_v22, %v1451_v60  ;;  %v1004_v55 = vunpack.c.h.bf16 %v1099_v33  ;;  %v1103_v22 = vld [vmem:[%s2135_s5 + $0xc0] sm:$0xff]  }
  0x67   :  { %761 = vst [vmem:[%s2140_s10 + $0x120] sm:$0xff] %v697_v54  ;;  %v572_v8 = vadd.f32 %v1488_v12, %v502_v48  ;;  %v305_v9 = vadd.f32 %v1466_v43, %v235_v50  ;;  %v236_v14 = vmul.f32 %v876_v36, %v1436_v45  ;;  %v879_v10 = vunpack.c.l.bf16 %v1069_v47 }
  0x68   :  { %762 = vst [vmem:[%s2140_s10 + $0x128] sm:$0xff] %v698_v5  ;;  %v699_v16 = vmax.f32 %v635_v11, 0.0  ;;  %v573_v52 = vadd.f32 %v1488_v12, %v503_v0  ;;  %v504_v13 = vmul.f32 %v1004_v55, %v1451_v60  ;;  %v1007_v24 = vunpack.c.l.bf16 %v1100_v63 }
  0x69   :  { %v636_v15 = vadd.f32 %v572_v8, %v304_v4  ;;  %v306_v19 = vadd.f32 %v1466_v43, %v236_v14  ;;  %v237_v21 = vmul.f32 %v879_v10, %v1436_v45  ;;  %v880_v39 = vunpack.c.h.bf16 %v1069_v47  ;;  %v1073_v14 = vld [vmem:[%s2134_s0 + $0xc8] sm:$0xff]  }
  0x6a   :  { %763 = vst [vmem:[%s2140_s10 + $0x130] sm:$0xff] %v699_v16  ;;  %v637_v2 = vadd.f32 %v573_v52, %v305_v9  ;;  %v574_v6 = vadd.f32 %v1488_v12, %v504_v13  ;;  %v505_v20 = vmul.f32 %v1007_v24, %v1451_v60  ;;  %v1008_v53 = vunpack.c.h.bf16 %v1100_v63  ;;  %v1104_v24 = vld [vmem:[%s2135_s5 + $0xc8] sm:$0xff]  }
  0x6b   :  { %v700_v30 = vmax.f32 %v636_v15, 0.0  ;;  %v307_v37 = vadd.f32 %v1466_v43, %v237_v21  ;;  %v238_v25 = vmul.f32 %v880_v39, %v1436_v45  ;;  %v883_v17 = vunpack.c.l.bf16 %v1070_v28 }
  0x6c   :  { %v701_v27 = vmax.f32 %v637_v2, 0.0  ;;  %v638_v42 = vadd.f32 %v574_v6, %v306_v19  ;;  %v575_v18 = vadd.f32 %v1488_v12, %v505_v20  ;;  %v506_v57 = vmul.f32 %v1008_v53, %v1451_v60 }
  0x6d   :  { %764 = vst [vmem:[%s2140_s10 + $0x138] sm:$0xff] %v700_v30  ;;  %v308_v29 = vadd.f32 %v1466_v43, %v238_v25  ;;  %v239_v32 = vmul.f32 %v883_v17, %v1436_v45  ;;  %v1011_v61 = vunpack.c.l.bf16 %v1101_v7  ;;  %v884_v40 = vunpack.c.h.bf16 %v1070_v28  ;;  %v1074_v25 = vld [vmem:[%s2134_s0 + $0xd0] sm:$0xff]  }
  0x6e   :  { %765 = vst [vmem:[%s2140_s10 + $0x140] sm:$0xff] %v701_v27  ;;  %v702_v35 = vmax.f32 %v638_v42, 0.0  ;;  %v639_v26 = vadd.f32 %v575_v18, %v307_v37  ;;  %v576_v58 = vadd.f32 %v1488_v12, %v506_v57  ;;  %v1012_v23 = vunpack.c.h.bf16 %v1101_v7  ;;  %v1105_v57 = vld [vmem:[%s2135_s5 + $0xd0] sm:$0xff]  }
  0x6f   :  { %v309_v41 = vadd.f32 %v1466_v43, %v239_v32  ;;  %v507_v33 = vmul.f32 %v1011_v61, %v1451_v60  ;;  %v240_v1 = vmul.f32 %v884_v40, %v1436_v45  ;;  %v887_v49 = vunpack.c.l.bf16 %v1071_v62 }
  0x70   :  { %766 = vst [vmem:[%s2140_s10 + $0x148] sm:$0xff] %v702_v35  ;;  %v703_v56 = vmax.f32 %v639_v26, 0.0  ;;  %v640_v46 = vadd.f32 %v576_v58, %v308_v29  ;;  %v508_v31 = vmul.f32 %v1012_v23, %v1451_v60  ;;  %v1015_v3 = vunpack.c.l.bf16 %v1102_v34 }
  0x71   :  { %v577_v51 = vadd.f32 %v1488_v12, %v507_v33  ;;  %v310_v44 = vadd.f32 %v1466_v43, %v240_v1  ;;  %v241_v59 = vmul.f32 %v887_v49, %v1436_v45  ;;  %v888_v4 = vunpack.c.h.bf16 %v1071_v62  ;;  %v1075_v1 = vld [vmem:[%s2134_s0 + $0xd8] sm:$0xff]  }
  0x72   :  { %767 = vst [vmem:[%s2140_s10 + $0x150] sm:$0xff] %v703_v56  ;;  %v704_v47 = vmax.f32 %v640_v46, 0.0  ;;  %v578_v54 = vadd.f32 %v1488_v12, %v508_v31  ;;  %v509_v48 = vmul.f32 %v1015_v3, %v1451_v60  ;;  %v1016_v50 = vunpack.c.h.bf16 %v1102_v34 }
  0x73   :  { %v641_v36 = vadd.f32 %v577_v51, %v309_v41  ;;  %v311_v63 = vadd.f32 %v1466_v43, %v241_v59  ;;  %v242_v5 = vmul.f32 %v888_v4, %v1436_v45  ;;  %v891_v11 = vunpack.c.l.bf16 %v1072_v38  ;;  %v1106_v59 = vld [vmem:[%s2135_s5 + $0xd8] sm:$0xff]  }
  0x74   :  { %768 = vst [vmem:[%s2140_s10 + $0x158] sm:$0xff] %v704_v47  ;;  %v642_v0 = vadd.f32 %v578_v54, %v310_v44  ;;  %v579_v55 = vadd.f32 %v1488_v12, %v509_v48  ;;  %v510_v8 = vmul.f32 %v1016_v50, %v1451_v60  ;;  %v1019_v9 = vunpack.c.l.bf16 %v1103_v22 }
  0x75   :  { %v705_v10 = vmax.f32 %v641_v36, 0.0  ;;  %v312_v16 = vadd.f32 %v1466_v43, %v242_v5  ;;  %v243_v52 = vmul.f32 %v891_v11, %v1436_v45  ;;  %v892_v13 = vunpack.c.h.bf16 %v1072_v38  ;;  %v1076_v5 = vld [vmem:[%s2134_s0 + $0xe0] sm:$0xff]  }
  0x76   :  { %v706_v28 = vmax.f32 %v642_v0, 0.0  ;;  %v643_v15 = vadd.f32 %v579_v55, %v311_v63  ;;  %v580_v19 = vadd.f32 %v1488_v12, %v510_v8  ;;  %v511_v21 = vmul.f32 %v1019_v9, %v1451_v60  ;;  %v1107_v9 = vld [vmem:[%s2135_s5 + $0xe0] sm:$0xff]  }
  0x77   :  { %769 = vst [vmem:[%s2140_s10 + $0x160] sm:$0xff] %v705_v10  ;;  %v313_v39 = vadd.f32 %v1466_v43, %v243_v52  ;;  %v244_v2 = vmul.f32 %v892_v13, %v1436_v45  ;;  %v1020_v6 = vunpack.c.h.bf16 %v1103_v22  ;;  %v895_v20 = vunpack.c.l.bf16 %v1073_v14 }
  0x78   :  { %770 = vst [vmem:[%s2140_s10 + $0x168] sm:$0xff] %v706_v28  ;;  %v707_v53 = vmax.f32 %v643_v15, 0.0  ;;  %v644_v7 = vadd.f32 %v580_v19, %v312_v16  ;;  %v581_v30 = vadd.f32 %v1488_v12, %v511_v21  ;;  %v1023_v37 = vunpack.c.l.bf16 %v1104_v24 }
  0x79   :  { %v314_v17 = vadd.f32 %v1466_v43, %v244_v2  ;;  %v512_v27 = vmul.f32 %v1020_v6, %v1451_v60  ;;  %v245_v42 = vmul.f32 %v895_v20, %v1436_v45  ;;  %v896_v18 = vunpack.c.h.bf16 %v1073_v14  ;;  %v1077_v6 = vld [vmem:[%s2134_s0 + $0xe8] sm:$0xff]  }
  0x7a   :  { %771 = vst [vmem:[%s2140_s10 + $0x170] sm:$0xff] %v707_v53  ;;  %v708_v62 = vmax.f32 %v644_v7, 0.0  ;;  %v645_v29 = vadd.f32 %v581_v30, %v313_v39  ;;  %v513_v32 = vmul.f32 %v1023_v37, %v1451_v60  ;;  %v1024_v61 = vunpack.c.h.bf16 %v1104_v24  ;;  %v1108_v37 = vld [vmem:[%s2135_s5 + $0xe8] sm:$0xff]  }
  0x7b   :  { %v582_v40 = vadd.f32 %v1488_v12, %v512_v27  ;;  %v315_v34 = vadd.f32 %v1466_v43, %v245_v42  ;;  %v246_v35 = vmul.f32 %v896_v18, %v1436_v45  ;;  %v899_v26 = vunpack.c.l.bf16 %v1074_v25 }
  0x7c   :  { %772 = vst [vmem:[%s2140_s10 + $0x178] sm:$0xff] %v708_v62  ;;  %v709_v58 = vmax.f32 %v645_v29, 0.0  ;;  %v583_v23 = vadd.f32 %v1488_v12, %v513_v32  ;;  %v514_v41 = vmul.f32 %v1024_v61, %v1451_v60  ;;  %v1027_v33 = vunpack.c.l.bf16 %v1105_v57 }
  0x7d   :  { %v646_v49 = vadd.f32 %v582_v40, %v314_v17  ;;  %v316_v56 = vadd.f32 %v1466_v43, %v246_v35  ;;  %v247_v46 = vmul.f32 %v899_v26, %v1436_v45  ;;  %v900_v31 = vunpack.c.h.bf16 %v1074_v25  ;;  %v1078_v35 = vld [vmem:[%s2134_s0 + $0xf0] sm:$0xff]  }
  0x7e   :  { %773 = vst [vmem:[%s2140_s10 + $0x180] sm:$0xff] %v709_v58  ;;  %v647_v3 = vadd.f32 %v583_v23, %v315_v34  ;;  %v584_v38 = vadd.f32 %v1488_v12, %v514_v41  ;;  %v515_v51 = vmul.f32 %v1027_v33, %v1451_v60  ;;  %v1028_v44 = vunpack.c.h.bf16 %v1105_v57  ;;  %v1109_v33 = vld [vmem:[%s2135_s5 + $0xf0] sm:$0xff]  }
  0x7f   :  { %v710_v4 = vmax.f32 %v646_v49, 0.0  ;;  %v317_v22 = vadd.f32 %v1466_v43, %v247_v46  ;;  %v248_v47 = vmul.f32 %v900_v31, %v1436_v45  ;;  %v903_v54 = vunpack.c.l.bf16 %v1075_v1 }
  0x80   :  { %v711_v48 = vmax.f32 %v647_v3, 0.0  ;;  %v648_v50 = vadd.f32 %v584_v38, %v316_v56  ;;  %v585_v36 = vadd.f32 %v1488_v12, %v515_v51  ;;  %v516_v63 = vmul.f32 %v1028_v44, %v1451_v60 }
  0x81   :  { %774 = vst [vmem:[%s2140_s10 + $0x188] sm:$0xff] %v710_v4  ;;  %v318_v11 = vadd.f32 %v1466_v43, %v248_v47  ;;  %v249_v0 = vmul.f32 %v903_v54, %v1436_v45  ;;  %v1031_v55 = vunpack.c.l.bf16 %v1106_v59  ;;  %v904_v8 = vunpack.c.h.bf16 %v1075_v1  ;;  %v1079_v47 = vld [vmem:[%s2134_s0 + $0xf8] sm:$0xff]  }
  0x82   :  { %775 = vst [vmem:[%s2140_s10 + $0x190] sm:$0xff] %v711_v48  ;;  %v712_v14 = vmax.f32 %v648_v50, 0.0  ;;  %v649_v10 = vadd.f32 %v585_v36, %v317_v22  ;;  %v586_v16 = vadd.f32 %v1488_v12, %v516_v63  ;;  %v1032_v52 = vunpack.c.h.bf16 %v1106_v59  ;;  %v1110_v63 = vld [vmem:[%s2135_s5 + $0xf8] sm:$0xff]  }
  0x83   :  { %v319_v13 = vadd.f32 %v1466_v43, %v249_v0  ;;  %v517_v24 = vmul.f32 %v1031_v55, %v1451_v60  ;;  %v250_v28 = vmul.f32 %v904_v8, %v1436_v45  ;;  %v907_v15 = vunpack.c.l.bf16 %v1076_v5 }
  0x84   :  { %776 = vst [vmem:[%s2140_s10 + $0x198] sm:$0xff] %v712_v14  ;;  %v713_v19 = vmax.f32 %v649_v10, 0.0  ;;  %v650_v21 = vadd.f32 %v586_v16, %v318_v11  ;;  %v518_v39 = vmul.f32 %v1032_v52, %v1451_v60  ;;  %v1035_v2 = vunpack.c.l.bf16 %v1107_v9 }
  0x85   :  { %v587_v20 = vadd.f32 %v1488_v12, %v517_v24  ;;  %v320_v53 = vadd.f32 %v1466_v43, %v250_v28  ;;  %v251_v7 = vmul.f32 %v907_v15, %v1436_v45  ;;  %v908_v30 = vunpack.c.h.bf16 %v1076_v5 }
  0x86   :  { %777 = vst [vmem:[%s2140_s10 + $0x1a0] sm:$0xff] %v713_v19  ;;  %v714_v25 = vmax.f32 %v650_v21, 0.0  ;;  %v588_v17 = vadd.f32 %v1488_v12, %v518_v39  ;;  %v519_v27 = vmul.f32 %v1035_v2, %v1451_v60  ;;  %v1036_v42 = vunpack.c.h.bf16 %v1107_v9 }
  0x87   :  { %v651_v18 = vadd.f32 %v587_v20, %v319_v13  ;;  %v321_v57 = vadd.f32 %v1466_v43, %v251_v7  ;;  %v252_v62 = vmul.f32 %v908_v30, %v1436_v45  ;;  %v911_v29 = vunpack.c.l.bf16 %v1077_v6 }
  0x88   :  { %778 = vst [vmem:[%s2140_s10 + $0x1a8] sm:$0xff] %v714_v25  ;;  %v652_v32 = vadd.f32 %v588_v17, %v320_v53  ;;  %v589_v61 = vadd.f32 %v1488_v12, %v519_v27  ;;  %v520_v40 = vmul.f32 %v1036_v42, %v1451_v60  ;;  %v1039_v34 = vunpack.c.l.bf16 %v1108_v37 }
  0x89   :  { %v715_v26 = vmax.f32 %v651_v18, 0.0  ;;  %v322_v58 = vadd.f32 %v1466_v43, %v252_v62  ;;  %v253_v23 = vmul.f32 %v911_v29, %v1436_v45  ;;  %v912_v41 = vunpack.c.h.bf16 %v1077_v6 }
  0x8a   :  { %v716_v1 = vmax.f32 %v652_v32, 0.0  ;;  %v653_v49 = vadd.f32 %v589_v61, %v321_v57  ;;  %v590_v56 = vadd.f32 %v1488_v12, %v520_v40  ;;  %v521_v46 = vmul.f32 %v1039_v34, %v1451_v60 }
  0x8b   :  { %779 = vst [vmem:[%s2140_s10 + $0x1b0] sm:$0xff] %v715_v26  ;;  %v323_v31 = vadd.f32 %v1466_v43, %v253_v23  ;;  %v254_v3 = vmul.f32 %v912_v41, %v1436_v45  ;;  %v1040_v38 = vunpack.c.h.bf16 %v1108_v37  ;;  %v915_v51 = vunpack.c.l.bf16 %v1078_v35 }
  0x8c   :  { %780 = vst [vmem:[%s2140_s10 + $0x1b8] sm:$0xff] %v716_v1  ;;  %v717_v44 = vmax.f32 %v653_v49, 0.0  ;;  %v654_v59 = vadd.f32 %v590_v56, %v322_v58  ;;  %v591_v4 = vadd.f32 %v1488_v12, %v521_v46  ;;  %v1043_v22 = vunpack.c.l.bf16 %v1109_v33 }
  0x8d   :  { %v324_v54 = vadd.f32 %v1466_v43, %v254_v3  ;;  %v522_v48 = vmul.f32 %v1040_v38, %v1451_v60  ;;  %v255_v50 = vmul.f32 %v915_v51, %v1436_v45  ;;  %v916_v36 = vunpack.c.h.bf16 %v1078_v35 }
  0x8e   :  { %781 = vst [vmem:[%s2140_s10 + $0x1c0] sm:$0xff] %v717_v44  ;;  %v718_v5 = vmax.f32 %v654_v59, 0.0  ;;  %v655_v11 = vadd.f32 %v591_v4, %v323_v31  ;;  %v523_v0 = vmul.f32 %v1043_v22, %v1451_v60  ;;  %v1044_v55 = vunpack.c.h.bf16 %v1109_v33 }
  0x8f   :  { %v592_v8 = vadd.f32 %v1488_v12, %v522_v48  ;;  %v325_v9 = vadd.f32 %v1466_v43, %v255_v50  ;;  %v256_v14 = vmul.f32 %v916_v36, %v1436_v45  ;;  %v919_v10 = vunpack.c.l.bf16 %v1079_v47 }
  0x90   :  { %782 = vst [vmem:[%s2140_s10 + $0x1c8] sm:$0xff] %v718_v5  ;;  %v719_v16 = vmax.f32 %v655_v11, 0.0  ;;  %v593_v52 = vadd.f32 %v1488_v12, %v523_v0  ;;  %v524_v13 = vmul.f32 %v1044_v55, %v1451_v60  ;;  %v1047_v24 = vunpack.c.l.bf16 %v1110_v63 }
  0x91   :  { %v656_v28 = vadd.f32 %v592_v8, %v324_v54  ;;  %v326_v15 = vadd.f32 %v1466_v43, %v256_v14  ;;  %v257_v19 = vmul.f32 %v919_v10, %v1436_v45  ;;  %v920_v21 = vunpack.c.h.bf16 %v1079_v47 }
  0x92   :  { %783 = vst [vmem:[%s2140_s10 + $0x1d0] sm:$0xff] %v719_v16  ;;  %v657_v39 = vadd.f32 %v593_v52, %v325_v9  ;;  %v594_v2 = vadd.f32 %v1488_v12, %v524_v13  ;;  %v525_v6 = vmul.f32 %v1047_v24, %v1451_v60  ;;  %v1048_v20 = vunpack.c.h.bf16 %v1110_v63 }
  0x93   :  { %v720_v53 = vmax.f32 %v656_v28, 0.0  ;;  %v327_v7 = vadd.f32 %v1466_v43, %v257_v19  ;;  %v258_v30 = vmul.f32 %v920_v21, %v1436_v45 }
  0x94   :  { %v721_v37 = vmax.f32 %v657_v39, 0.0  ;;  %v658_v25 = vadd.f32 %v594_v2, %v326_v15  ;;  %v595_v17 = vadd.f32 %v1488_v12, %v525_v6  ;;  %v526_v27 = vmul.f32 %v1048_v20, %v1451_v60 }
  0x95   :  { %784 = vst [vmem:[%s2140_s10 + $0x1d8] sm:$0xff] %v720_v53  ;;  %v328_v42 = vadd.f32 %v1466_v43, %v258_v30 }
  0x96   :  { %785 = vst [vmem:[%s2140_s10 + $0x1e0] sm:$0xff] %v721_v37  ;;  %v722_v18 = vmax.f32 %v658_v25, 0.0  ;;  %v659_v57 = vadd.f32 %v595_v17, %v327_v7  ;;  %v596_v45 = vadd.f32 %v1488_v12, %v526_v27 }
  0x98   :  { %786 = vst [vmem:[%s2140_s10 + $0x1e8] sm:$0xff] %v722_v18  ;;  %v723_v62 = vmax.f32 %v659_v57, 0.0  ;;  %v660_v60 = vadd.f32 %v596_v45, %v328_v42 }
  0x9a   :  { %787 = vst [vmem:[%s2140_s10 + $0x1f0] sm:$0xff] %v723_v62  ;;  %v724_v29 = vmax.f32 %v660_v60, 0.0 }
  0x9c   :  { %788 = vst [vmem:[%s2140_s10 + $0x1f8] sm:$0xff] %v724_v29 }

// kernel: bottleneck_forward.9
= control target key start
LH: loop header
LB: loop body
LE: loop exit
PB: predicated region body
PF: predicated region fallthrough
CT: control target
= control target key end

     0   :  { %v169_v9 = vlaneseq  ;;  %s2835_s1 = inlined_call_operand.vmem [shape: bf16[128,128], index: 1, kind: input, shape index: {}]   ;;  %s2836_s2 = inlined_call_operand.vmem [shape: f32[1,128], index: 2, kind: input, shape index: {}]   ;;  %s2837_s3 = inlined_call_operand.vmem [shape: f32[1,128], index: 3, kind: input, shape index: {}]   ;;  %s2838_s0 = inlined_call_operand.vmem [shape: bf16[512,128], index: 0, kind: input, shape index: {}]   ;;  %s2839_s4 = inlined_call_operand.vmem [shape: f32[1,128], index: 4, kind: input, shape index: {}]   ;;  %s2840_s5 = inlined_call_operand.vmem [shape: f32[1,128], index: 5, kind: input, shape index: {}]   ;;  %s2841_s6 = inlined_call_operand.vmem [shape: bf16[512,128], index: 6, kind: output, shape index: {0}]   ;;  %s2842_s7 = inlined_call_operand.vmem [shape: f32[1,1,128], index: 7, kind: output, shape index: {1}]   ;;  %s2843_s8 = inlined_call_operand.vmem [shape: f32[1,1,128], index: 8, kind: output, shape index: {2}]  }
   0x1   :  { %v1915_v0 = vld [vmem:[%s2835_s1] sm:$0xff]   ;;  %v1916_v1 = vld [vmem:[%s2835_s1 + $0x8] sm:$0xff]   ;;  %v1917_v2 = vld [vmem:[%s2835_s1 + $0x10] sm:$0xff]  }
   0x2   :  { %1819 = vmatprep.subr.bf16.mxu0 %v1915_v0  ;;  %1899 = vmatprep.subr.bf16.mxu1 %v1915_v0  ;;  %v1918_v3 = vld [vmem:[%s2835_s1 + $0x18] sm:$0xff]   ;;  %v27_v4 = vld [vmem:[%s2836_s2] sm:$0x1]  ;;  %v1995_v13 = vshrl.u32 %v169_v9, 7  ;;  %v1920_v14 = vld [vmem:[%s2835_s1 + $0x28] sm:$0xff]  }
   0x3   :  { %1820 = vmatpush3.bf16.msra.mxu0 %v1915_v0  ;;  %1907 = vmatpush3.bf16.msra.mxu1 %v1915_v0  ;;  %v28_v5 = vld [vmem:[%s2837_s3] sm:$0x1]  ;;  %v1988_v6 = vmul.f32 0.001953125, %v27_v4  ;;  %v2008_v16 = vld [vmem:[%s2838_s0 + $0x8] sm:$0xff]   ;;  %v2013_v17 = vld [vmem:[%s2838_s0 + $0x10] sm:$0xff]  }
   0x4   :  { %1821 = vmatprep.subr.bf16.mxu0 %v1916_v1  ;;  %1900 = vmatprep.subr.bf16.mxu1 %v1916_v1  ;;  %v32_v7 = vmul.f32 0.001953125, %v28_v5  ;;  %v1919_v10 = vld [vmem:[%s2835_s1 + $0x20] sm:$0xff]   ;;  %v2018_v18 = vld [vmem:[%s2838_s0 + $0x18] sm:$0xff]   ;;  %v2028_v20 = vld [vmem:[%s2838_s0 + $0x28] sm:$0xff]   ;;  %v171_v23 = vsub.s32 0, %v1995_v13  ;;  %v1435_v24 = vunpack.c.l.bf16 %v2008_v16  ;;  %v1436_v28 = vunpack.c.h.bf16 %v2008_v16 }
   0x5   :  { %v33_v8 = vmul.f32 %v1988_v6, %v1988_v6  ;;  %v2003_v15 = vld [vmem:[%s2838_s0] sm:$0xff]   ;;  %v2037_v25 = vld [vmem:[%s2838_s0 + $0x30] sm:$0xff]   ;;  %v2042_v26 = vld [vmem:[%s2838_s0 + $0x38] sm:$0xff]   ;;  %v1439_v29 = vunpack.c.l.bf16 %v2013_v17  ;;  %v1440_v30 = vunpack.c.h.bf16 %v2013_v17  ;;  %v1443_v31 = vunpack.c.l.bf16 %v2018_v18 }
   0x6   :  { %v2023_v19 = vld [vmem:[%s2838_s0 + $0x20] sm:$0xff]   ;;  %v1431_v21 = vunpack.c.l.bf16 %v2003_v15  ;;  %v1432_v22 = vunpack.c.h.bf16 %v2003_v15  ;;  %v1921_v27 = vld [vmem:[%s2835_s1 + $0x30] sm:$0xff]   ;;  %v2059_v33 = vld [vmem:[%s2838_s0 + $0x48] sm:$0xff]   ;;  %v1444_v34 = vunpack.c.h.bf16 %v2018_v18  ;;  %v1451_v37 = vunpack.c.l.bf16 %v2028_v20 }
   0x7   :  { %1822 = vmatpush3.bf16.msra.mxu0 %v1916_v1  ;;  %1908 = vmatpush3.bf16.msra.mxu1 %v1916_v1  ;;  %v34_v11 = vsub.f32 %v32_v7, %v33_v8  ;;  %v2054_v32 = vld [vmem:[%s2838_s0 + $0x40] sm:$0xff]   ;;  %v1447_v35 = vunpack.c.l.bf16 %v2023_v19  ;;  %v1448_v36 = vunpack.c.h.bf16 %v2023_v19  ;;  %v2068_v38 = vld [vmem:[%s2838_s0 + $0x50] sm:$0xff]   ;;  %v2073_v39 = vld [vmem:[%s2838_s0 + $0x58] sm:$0xff]   ;;  %v1452_v40 = vunpack.c.h.bf16 %v2028_v20 }
   0x8   :  { %1823 = vmatprep.subr.bf16.mxu0 %v1917_v2  ;;  %1901 = vmatprep.subr.bf16.mxu1 %v1917_v2  ;;  %v1455_v41 = vunpack.c.l.bf16 %v2037_v25  ;;  %v1456_v42 = vunpack.c.h.bf16 %v2037_v25  ;;  %v1459_v43 = vunpack.c.l.bf16 %v2042_v26  ;;  %v2082_v44 = vld [vmem:[%s2838_s0 + $0x60] sm:$0xff]   ;;  %v2087_v45 = vld [vmem:[%s2838_s0 + $0x68] sm:$0xff]   ;;  %v1460_v46 = vunpack.c.h.bf16 %v2042_v26  ;;  %v2096_v50 = vld [vmem:[%s2838_s0 + $0x70] sm:$0xff]  }
   0x9   :  { %v35_v12 = vadd.f32 1e-05, %v34_v11  ;;  %v1463_v47 = vunpack.c.l.bf16 %v2054_v32  ;;  %v1464_v48 = vunpack.c.h.bf16 %v2054_v32  ;;  %v1467_v49 = vunpack.c.l.bf16 %v2059_v33  ;;  %v2101_v51 = vld [vmem:[%s2838_s0 + $0x78] sm:$0xff]   ;;  %v2113_v57 = vld [vmem:[%s2838_s0 + $0x80] sm:$0xff]   ;;  %v2118_v58 = vld [vmem:[%s2838_s0 + $0x88] sm:$0xff]  }
   0xa   :  { %v1922_v52 = vld [vmem:[%s2835_s1 + $0x38] sm:$0xff]   ;;  %v1468_v53 = vunpack.c.h.bf16 %v2059_v33  ;;  %v1471_v54 = vunpack.c.l.bf16 %v2068_v38  ;;  %v1472_v55 = vunpack.c.h.bf16 %v2068_v38  ;;  %v1475_v56 = vunpack.c.l.bf16 %v2073_v39  ;;  %v29_v59 = vld [vmem:[%s2839_s4] sm:$0x1]  ;;  %v2130_v0 = vld [vmem:[%s2838_s0 + $0x90] sm:$0xff]  }
   0xb   :  { %1824 = vmatpush3.bf16.msra.mxu0 %v1917_v2  ;;  %1909 = vmatpush3.bf16.msra.mxu1 %v1917_v2  ;;  %1923 = vrsqrt.f32 %v35_v12  ;;  %v1476_v60 = vunpack.c.h.bf16 %v2073_v39  ;;  %v1479_v61 = vunpack.c.l.bf16 %v2082_v44  ;;  %v1480_v62 = vunpack.c.h.bf16 %v2082_v44  ;;  %v2139_v5 = vld [vmem:[%s2838_s0 + $0x98] sm:$0xff]   ;;  %v2144_v7 = vld [vmem:[%s2838_s0 + $0xa0] sm:$0xff]   ;;  %v2161_v11 = vld [vmem:[%s2838_s0 + $0xb0] sm:$0xff]  }
   0xc   :  { %1825 = vmatprep.subr.bf16.mxu0 %v1918_v3  ;;  %1902 = vmatprep.subr.bf16.mxu1 %v1918_v3  ;;  %v2166_v12 = vld [vmem:[%s2838_s0 + $0xb8] sm:$0xff]   ;;  %v2307_v32 = vld [vmem:[%s2838_s0 + $0xf0] sm:$0xff]   ;;  %v2844_v44 = vunpack.c.l.bf16 %v2087_v45 }
   0xf   :  { %1826 = vmatpush3.bf16.msra.mxu0 %v1918_v3  ;;  %1910 = vmatpush3.bf16.msra.mxu1 %v1918_v3  ;;  %v2203_v3 = vld [vmem:[%s2838_s0 + $0xc8] sm:$0xff]  }
  0x10   :  { %1827 = vmatprep.subr.bf16.mxu0 %v1919_v10  ;;  %1903 = vmatprep.subr.bf16.mxu1 %v1919_v10 }
  0x13   :  { %1828 = vmatpush3.bf16.msra.mxu0 %v1919_v10  ;;  %1911 = vmatpush3.bf16.msra.mxu1 %v1919_v10 }
  0x14   :  { %1829 = vmatprep.subr.bf16.mxu0 %v1920_v14  ;;  %1904 = vmatprep.subr.bf16.mxu1 %v1920_v14 }
  0x15   :  { %v1924_v8 = vpop.eup %1923 }
  0x16   :  { %v37_v4 = vmul.f32 %v1924_v8, %v29_v59  ;;  %v30_v59 = vld [vmem:[%s2840_s5] sm:$0x1] }
  0x17   :  { %1830 = vmatpush3.bf16.msra.mxu0 %v1920_v14  ;;  %1912 = vmatpush3.bf16.msra.mxu1 %v1920_v14  ;;  %v2153_v14 = vld [vmem:[%s2838_s0 + $0xa8] sm:$0xff]  }
  0x18   :  { %1831 = vmatprep.subr.bf16.mxu0 %v1921_v27  ;;  %1905 = vmatprep.subr.bf16.mxu1 %v1921_v27  ;;  %v38_v2 = vmul.f32 %v37_v4, %v1988_v6  ;;  %v2178_v10 = vrot.slane %v37_v4, %v171_v23  ;;  %v1515_v1 = vunpack.c.l.bf16 %v2153_v14  ;;  %v2189_v6 = vld [vmem:[%s2838_s0 + $0xc0] sm:$0xff]  }
  0x1a   :  { %v39_v4 = vsub.f32 %v30_v59, %v38_v2  ;;  %v174_v63 = vmul.f32 %v1431_v21, %v2178_v10  ;;  %v176_v9 = vmul.f32 %v1435_v24, %v2178_v10  ;;  %v177_v2 = vmul.f32 %v1436_v28, %v2178_v10 }
  0x1b   :  { %1832 = vmatpush3.bf16.msra.mxu0 %v1921_v27  ;;  %1913 = vmatpush3.bf16.msra.mxu1 %v1921_v27  ;;  %v178_v21 = vmul.f32 %v1439_v29, %v2178_v10  ;;  %v179_v15 = vmul.f32 %v1440_v30, %v2178_v10  ;;  %v181_v16 = vmul.f32 %v1444_v34, %v2178_v10 }
  0x1c   :  { %1833 = vmatprep.subr.bf16.mxu0 %v1922_v52  ;;  %1906 = vmatprep.subr.bf16.mxu1 %v1922_v52  ;;  %v2219_v24 = vrot.slane %v39_v4, %v171_v23  ;;  %v182_v17 = vmul.f32 %v1447_v35, %v2178_v10  ;;  %v183_v30 = vmul.f32 %v1448_v36, %v2178_v10  ;;  %v2241_v35 = vld [vmem:[%s2838_s0 + $0xd0] sm:$0xff]  }
  0x1d   :  { %v1535_v27 = vunpack.c.l.bf16 %v2241_v35  ;;  %v187_v20 = vmul.f32 %v1456_v42, %v2178_v10  ;;  %v191_v25 = vmul.f32 %v1464_v48, %v2178_v10  ;;  %v197_v38 = vmul.f32 %v1476_v60, %v2178_v10  ;;  %v2341_v60 = vld [vmem:[%s2838_s0 + $0xf8] sm:$0xff]  }
  0x1e   :  { %v246_v34 = vadd.f32 %v2219_v24, %v176_v9  ;;  %v247_v59 = vadd.f32 %v2219_v24, %v177_v2  ;;  %v248_v19 = vadd.f32 %v2219_v24, %v178_v21  ;;  %v249_v36 = vadd.f32 %v2219_v24, %v179_v15  ;;  %v2250_v9 = vld [vmem:[%s2838_s0 + $0xd8] sm:$0xff]   ;;  %v2257_v15 = vld [vmem:[%s2838_s0 + $0xe0] sm:$0xff]  }
  0x1f   :  { %1834 = vmatpush3.bf16.msra.mxu0 %v1922_v52  ;;  %1914 = vmatpush3.bf16.msra.mxu1 %v1922_v52  ;;  %v175_v52 = vmul.f32 %v1432_v22, %v2178_v10  ;;  %v180_v22 = vmul.f32 %v1443_v31, %v2178_v10  ;;  %v244_v31 = vadd.f32 %v2219_v24, %v174_v63 }
  0x20   :  { %v251_v23 = vadd.f32 %v2219_v24, %v181_v16  ;;  %v311_v29 = vmax.f32 %v247_v59, 0.0  ;;  %v312_v2 = vmax.f32 %v248_v19, 0.0  ;;  %v313_v28 = vmax.f32 %v249_v36, 0.0 }
  0x21   :  { %v245_v18 = vadd.f32 %v2219_v24, %v175_v52  ;;  %v250_v4 = vadd.f32 %v2219_v24, %v180_v22  ;;  %v308_v63 = vmax.f32 %v244_v31, 0.0  ;;  %v310_v52 = vmax.f32 %v246_v34, 0.0 }
  0x22   :  { %v252_v31 = vadd.f32 %v2219_v24, %v182_v17  ;;  %v374_v34 = vpack.c.bf16 %v313_v28, %v312_v2  ;;  %v315_v8 = vmax.f32 %v251_v23, 0.0  ;;  %v1539_v19 = vunpack.c.l.bf16 %v2250_v9  ;;  %v2273_v28 = vld [vmem:[%s2838_s0 + $0xe8] sm:$0xff]  }
  0x23   :  { %v309_v13 = vmax.f32 %v245_v18, 0.0  ;;  %v373_v16 = vpack.c.bf16 %v311_v29, %v310_v52  ;;  %v253_v18 = vadd.f32 %v2219_v24, %v183_v30  ;;  %v314_v59 = vmax.f32 %v250_v4, 0.0 }
  0x24   :  { %v184_v36 = vmul.f32 %v1451_v37, %v2178_v10  ;;  %v185_v21 = vmul.f32 %v1452_v40, %v2178_v10  ;;  %v1540_v29 = vunpack.c.h.bf16 %v2250_v9  ;;  %v1543_v17 = vunpack.c.l.bf16 %v2257_v15 }
  0x25   :  { %v372_v22 = vpack.c.bf16 %v309_v13, %v308_v63  ;;  %v316_v30 = vmax.f32 %v252_v31, 0.0  ;;  %v317_v13 = vmax.f32 %v253_v18, 0.0  ;;  %v186_v37 = vmul.f32 %v1455_v41, %v2178_v10 }
  0x26   :  { %v188_v40 = vmul.f32 %v1459_v43, %v2178_v10  ;;  %v189_v23 = vmul.f32 %v1460_v46, %v2178_v10  ;;  %v190_v4 = vmul.f32 %v1463_v47, %v2178_v10  ;;  %v1544_v63 = vunpack.c.h.bf16 %v2257_v15 }
  0x27   :  { %1835 = vmatprep.mubr.bf16.mxu0 %v372_v22  ;;  %v375_v41 = vpack.c.bf16 %v315_v8, %v314_v59  ;;  %v1547_v42 = vunpack.c.l.bf16 %v2273_v28  ;;  %v1548_v52 = vunpack.c.h.bf16 %v2273_v28  ;;  %v254_v43 = vadd.f32 %v2219_v24, %v184_v36 }
  0x28   :  { %1836 = vmatmul.mubr.bf16.vlgmr.msra.gmra.mrb[0].mxu0 %v373_v16  ;;  %v255_v26 = vadd.f32 %v2219_v24, %v185_v21  ;;  %v192_v46 = vmul.f32 %v1467_v49, %v2178_v10  ;;  %v193_v47 = vmul.f32 %v1468_v53, %v2178_v10  ;;  %v376_v48 = vpack.c.bf16 %v317_v13, %v316_v30 }
  0x29   :  { %1839 = vmatprep.mubr.bf16.mxu0 %v374_v34  ;;  %v256_v8 = vadd.f32 %v2219_v24, %v186_v37  ;;  %v257_v2 = vadd.f32 %v2219_v24, %v187_v20  ;;  %v194_v21 = vmul.f32 %v1471_v54, %v2178_v10  ;;  %v258_v49 = vadd.f32 %v2219_v24, %v188_v40 }
  0x2a   :  { %v259_v22 = vadd.f32 %v2219_v24, %v189_v23  ;;  %v260_v33 = vadd.f32 %v2219_v24, %v190_v4  ;;  %v195_v53 = vmul.f32 %v1472_v55, %v2178_v10  ;;  %v261_v16 = vadd.f32 %v2219_v24, %v191_v25 }
  0x2b   :  { %v262_v31 = vadd.f32 %v2219_v24, %v192_v46  ;;  %v263_v18 = vadd.f32 %v2219_v24, %v193_v47  ;;  %v1551_v34 = vunpack.c.l.bf16 %v2307_v32  ;;  %v264_v54 = vadd.f32 %v2219_v24, %v194_v21 }
  0x2c   :  { %v265_v59 = vadd.f32 %v2219_v24, %v195_v53  ;;  %v196_v36 = vmul.f32 %v1475_v56, %v2178_v10  ;;  %v318_v55 = vmax.f32 %v254_v43, 0.0  ;;  %v319_v30 = vmax.f32 %v255_v26, 0.0 }
  0x2d   :  { %v320_v13 = vmax.f32 %v256_v8, 0.0  ;;  %v198_v37 = vmul.f32 %v1479_v61, %v2178_v10  ;;  %v321_v20 = vmax.f32 %v257_v2, 0.0  ;;  %v322_v40 = vmax.f32 %v258_v49, 0.0 }
  0x2e   :  { %v323_v23 = vmax.f32 %v259_v22, 0.0  ;;  %v324_v4 = vmax.f32 %v260_v33, 0.0  ;;  %v325_v25 = vmax.f32 %v261_v16, 0.0  ;;  %v326_v46 = vmax.f32 %v262_v31, 0.0 }
  0x2f   :  { %v327_v56 = vmax.f32 %v263_v18, 0.0  ;;  %v199_v39 = vmul.f32 %v1480_v62, %v2178_v10  ;;  %v329_v43 = vmax.f32 %v265_v59, 0.0  ;;  %v2344_v61 = vadd.f32 %v2219_v24, %v196_v36 }
  0x30   :  { %1840 = vmatmul.mubr.bf16.gmra.mrb[4].mxu0 %v375_v41  ;;  %v328_v41 = vmax.f32 %v264_v54, 0.0  ;;  %v2347_v26 = vadd.f32 %v2219_v24, %v197_v38  ;;  %v377_v47 = vpack.c.bf16 %v319_v30, %v318_v55  ;;  %v200_v62 = vmul.f32 %v2844_v44, %v2178_v10 }
  0x31   :  { %1843 = vmatprep.mubr.bf16.mxu0 %v376_v48  ;;  %v2350_v48 = vadd.f32 %v2219_v24, %v198_v37  ;;  %v1552_v8 = vunpack.c.h.bf16 %v2307_v32  ;;  %v378_v2 = vpack.c.bf16 %v321_v20, %v320_v13  ;;  %v2845_v21 = vunpack.c.h.bf16 %v2087_v45 }
  0x32   :  { %v1555_v22 = vunpack.c.l.bf16 %v2341_v60  ;;  %v1556_v33 = vunpack.c.h.bf16 %v2341_v60  ;;  %v379_v53 = vpack.c.bf16 %v323_v23, %v322_v40  ;;  %v380_v16 = vpack.c.bf16 %v325_v25, %v324_v4 }
  0x33   :  { %v201_v49 = vmul.f32 %v2845_v21, %v2178_v10  ;;  %v2361_v31 = vpack.c.bf16 %v327_v56, %v326_v46  ;;  %v2364_v18 = vadd.f32 %v2219_v24, %v199_v39  ;;  %v2366_v54 = vpack.c.bf16 %v329_v43, %v328_v41 }
  0x34   :  { %v330_v59 = vmax.f32 %v2344_v61, 0.0  ;;  %v331_v36 = vmax.f32 %v2347_v26, 0.0  ;;  %v2846_v45 = vunpack.c.l.bf16 %v2113_v57  ;;  %v332_v55 = vmax.f32 %v2350_v48, 0.0 }
  0x35   :  { %v2375_v30 = vadd.f32 %v2219_v24, %v200_v62  ;;  %v2847_v13 = vunpack.c.l.bf16 %v2096_v50  ;;  %v2848_v20 = vunpack.c.h.bf16 %v2113_v57  ;;  %v2384_v23 = vadd.f32 %v2219_v24, %v201_v49 }
  0x36   :  { %v206_v38 = vmul.f32 %v2846_v45, %v2178_v10  ;;  %v2849_v25 = vunpack.c.l.bf16 %v2118_v58  ;;  %v2850_v56 = vunpack.c.h.bf16 %v2118_v58  ;;  %v333_v41 = vmax.f32 %v2364_v18, 0.0 }
  0x37   :  { %v202_v37 = vmul.f32 %v2847_v13, %v2178_v10  ;;  %v207_v40 = vmul.f32 %v2848_v20, %v2178_v10  ;;  %v2851_v57 = vunpack.c.h.bf16 %v2096_v50  ;;  %v2852_v44 = vunpack.c.l.bf16 %v2130_v0 }
  0x38   :  { %1844 = vmatmul.mubr.bf16.gmra.mrb[8].mxu0 %v377_v47  ;;  %v276_v4 = vadd.f32 %v2219_v24, %v206_v38  ;;  %v208_v46 = vmul.f32 %v2849_v25, %v2178_v10  ;;  %v209_v39 = vmul.f32 %v2850_v56, %v2178_v10  ;;  %v2853_v58 = vunpack.c.h.bf16 %v2130_v0 }
  0x39   :  { %1847 = vmatprep.mubr.bf16.mxu0 %v378_v2  ;;  %v203_v43 = vmul.f32 %v2851_v57, %v2178_v10  ;;  %v277_v47 = vadd.f32 %v2219_v24, %v207_v40  ;;  %v210_v62 = vmul.f32 %v2852_v44, %v2178_v10  ;;  %v2407_v18 = vadd.f32 %v2219_v24, %v202_v37 }
  0x3a   :  { %v340_v2 = vmax.f32 %v276_v4, 0.0  ;;  %v278_v21 = vadd.f32 %v2219_v24, %v208_v46  ;;  %v279_v49 = vadd.f32 %v2219_v24, %v209_v39  ;;  %v211_v45 = vmul.f32 %v2853_v58, %v2178_v10 }
  0x3b   :  { %v341_v50 = vmax.f32 %v277_v47, 0.0  ;;  %v280_v38 = vadd.f32 %v2219_v24, %v210_v62  ;;  %v2854_v13 = vunpack.c.l.bf16 %v2139_v5  ;;  %v2855_v46 = vunpack.c.h.bf16 %v2139_v5 }
  0x3c   :  { %v342_v40 = vmax.f32 %v278_v21, 0.0  ;;  %v343_v4 = vmax.f32 %v279_v49, 0.0  ;;  %v281_v25 = vadd.f32 %v2219_v24, %v211_v45  ;;  %v2856_v57 = vunpack.c.l.bf16 %v2144_v7 }
  0x3d   :  { %v212_v20 = vmul.f32 %v2854_v13, %v2178_v10  ;;  %v213_v56 = vmul.f32 %v2855_v46, %v2178_v10  ;;  %v388_v0 = vpack.c.bf16 %v341_v50, %v340_v2  ;;  %v344_v39 = vmax.f32 %v280_v38, 0.0 }
  0x3e   :  { %v214_v47 = vmul.f32 %v2856_v57, %v2178_v10  ;;  %v389_v44 = vpack.c.bf16 %v343_v4, %v342_v40  ;;  %v345_v62 = vmax.f32 %v281_v25, 0.0  ;;  %v2857_v21 = vunpack.c.h.bf16 %v2144_v7 }
  0x3f   :  { %v282_v37 = vadd.f32 %v2219_v24, %v212_v20  ;;  %v283_v58 = vadd.f32 %v2219_v24, %v213_v56  ;;  %1867 = vmatprep.mubr.bf16.mxu1 %v388_v0  ;;  %v216_v45 = vmul.f32 %v1515_v1, %v2178_v10  ;;  %v2858_v50 = vunpack.c.h.bf16 %v2153_v14 }
  0x40   :  { %v215_v49 = vmul.f32 %v2857_v21, %v2178_v10  ;;  %1848 = vmatmul.mubr.bf16.gmra.mrb[12].mxu0 %v379_v53  ;;  %v284_v2 = vadd.f32 %v2219_v24, %v214_v47  ;;  %1868 = vmatmul.mubr.bf16.vlgmr.msra.gmra.mrb[0].mxu1 %v389_v44  ;;  %v390_v13 = vpack.c.bf16 %v345_v62, %v344_v39  ;;  %v2859_v53 = vunpack.c.l.bf16 %v2161_v11 }
  0x41   :  { %v346_v5 = vmax.f32 %v282_v37, 0.0  ;;  %v217_v38 = vmul.f32 %v2858_v50, %v2178_v10  ;;  %1851 = vmatprep.mubr.bf16.mxu0 %v380_v16  ;;  %v347_v20 = vmax.f32 %v283_v58, 0.0  ;;  %v286_v25 = vadd.f32 %v2219_v24, %v216_v45 }
  0x42   :  { %v285_v7 = vadd.f32 %v2219_v24, %v215_v49  ;;  %v218_v40 = vmul.f32 %v2859_v53, %v2178_v10  ;;  %v348_v4 = vmax.f32 %v284_v2, 0.0  ;;  %v2860_v1 = vunpack.c.h.bf16 %v2161_v11  ;;  %1871 = vmatprep.mubr.bf16.mxu1 %v390_v13 }
  0x43   :  { %v287_v46 = vadd.f32 %v2219_v24, %v217_v38  ;;  %v2861_v16 = vunpack.c.l.bf16 %v2101_v51  ;;  %v2862_v37 = vunpack.c.l.bf16 %v2166_v12  ;;  %v334_v47 = vmax.f32 %v2375_v30, 0.0 }
  0x44   :  { %v219_v14 = vmul.f32 %v2860_v1, %v2178_v10  ;;  %v349_v0 = vmax.f32 %v285_v7, 0.0  ;;  %v288_v39 = vadd.f32 %v2219_v24, %v218_v40  ;;  %v335_v44 = vmax.f32 %v2384_v23, 0.0 }
  0x45   :  { %v204_v56 = vmul.f32 %v2861_v16, %v2178_v10  ;;  %v220_v57 = vmul.f32 %v2862_v37, %v2178_v10  ;;  %v2863_v11 = vunpack.c.h.bf16 %v2166_v12  ;;  %v2455_v21 = vadd.f32 %v2219_v24, %v203_v43 }
  0x46   :  { %v289_v62 = vadd.f32 %v2219_v24, %v219_v14  ;;  %v2864_v49 = vunpack.c.h.bf16 %v2101_v51  ;;  %v391_v45 = vpack.c.bf16 %v347_v20, %v346_v5  ;;  %v2865_v50 = vunpack.c.l.bf16 %v2189_v6 }
  0x47   :  { %v221_v58 = vmul.f32 %v2863_v11, %v2178_v10  ;;  %v392_v38 = vpack.c.bf16 %v349_v0, %v348_v4  ;;  %v350_v23 = vmax.f32 %v286_v25, 0.0  ;;  %v351_v13 = vmax.f32 %v287_v46, 0.0 }
  0x48   :  { %v205_v2 = vmul.f32 %v2864_v49, %v2178_v10  ;;  %v222_v30 = vmul.f32 %v2865_v50, %v2178_v10  ;;  %v2464_v7 = vadd.f32 %v2219_v24, %v220_v57  ;;  %v383_v12 = vpack.c.bf16 %v331_v36, %v330_v59  ;;  %1852 = vmatmul.mubr.bf16.gmra.mrb[16].mxu0 %v2361_v31 }
  0x49   :  { %v352_v43 = vmax.f32 %v288_v39, 0.0  ;;  %v353_v53 = vmax.f32 %v289_v62, 0.0  ;;  %v2866_v51 = vunpack.c.h.bf16 %v2189_v6  ;;  %v384_v20 = vpack.c.bf16 %v333_v41, %v332_v55  ;;  %1855 = vmatprep.mubr.bf16.mxu0 %v2366_v54  ;;  %1872 = vmatmul.mubr.bf16.gmra.mrb[4].mxu1 %v391_v45 }
  0x4a   :  { %v336_v40 = vmax.f32 %v2407_v18, 0.0  ;;  %v2478_v4 = vadd.f32 %v2219_v24, %v204_v56  ;;  %v291_v61 = vadd.f32 %v2219_v24, %v221_v58  ;;  %v385_v26 = vpack.c.bf16 %v335_v44, %v334_v47  ;;  %1875 = vmatprep.mubr.bf16.mxu1 %v392_v38 }
  0x4b   :  { %v223_v5 = vmul.f32 %v2866_v51, %v2178_v10  ;;  %v337_v59 = vmax.f32 %v2455_v21, 0.0  ;;  %v2484_v6 = vadd.f32 %v2219_v24, %v205_v2  ;;  %v292_v31 = vadd.f32 %v2219_v24, %v222_v30 }
  0x4c   :  { %v393_v48 = vpack.c.bf16 %v351_v13, %v350_v23  ;;  %v354_v36 = vmax.f32 %v2464_v7, 0.0  ;;  %v2867_v55 = vunpack.c.l.bf16 %v2203_v3  ;;  %v228_v54 = vmul.f32 %v1539_v19, %v2178_v10 }
  0x4d   :  { %v394_v18 = vpack.c.bf16 %v353_v53, %v352_v43  ;;  %v293_v25 = vadd.f32 %v2219_v24, %v223_v5  ;;  %v2868_v46 = vunpack.c.h.bf16 %v2203_v3  ;;  %v229_v14 = vmul.f32 %v1540_v29, %v2178_v10 }
  0x4e   :  { %v224_v41 = vmul.f32 %v2867_v55, %v2178_v10  ;;  %v355_v16 = vmax.f32 %v291_v61, 0.0  ;;  %v226_v56 = vmul.f32 %v1535_v27, %v2178_v10  ;;  %v298_v0 = vadd.f32 %v2219_v24, %v228_v54 }
  0x4f   :  { %v225_v1 = vmul.f32 %v2868_v46, %v2178_v10  ;;  %v230_v19 = vmul.f32 %v1543_v17, %v2178_v10  ;;  %v356_v39 = vmax.f32 %v292_v31, 0.0  ;;  %v2869_v3 = vunpack.c.h.bf16 %v2241_v35 }
  0x50   :  { %v299_v57 = vadd.f32 %v2219_v24, %v229_v14  ;;  %v231_v9 = vmul.f32 %v1544_v63, %v2178_v10  ;;  %v362_v29 = vmax.f32 %v298_v0, 0.0  ;;  %v232_v47 = vmul.f32 %v1547_v42, %v2178_v10  ;;  %1856 = vmatmul.mubr.bf16.gmra.mrb[20].mxu0 %v383_v12 }
  0x51   :  { %v227_v37 = vmul.f32 %v2869_v3, %v2178_v10  ;;  %v300_v27 = vadd.f32 %v2219_v24, %v230_v19  ;;  %v233_v17 = vmul.f32 %v1548_v52, %v2178_v10  ;;  %v357_v44 = vmax.f32 %v293_v25, 0.0  ;;  %1859 = vmatprep.mubr.bf16.mxu0 %v384_v20  ;;  %1876 = vmatmul.mubr.bf16.gmra.mrb[8].mxu1 %v393_v48 }
  0x52   :  { %v363_v35 = vmax.f32 %v299_v57, 0.0  ;;  %v301_v62 = vadd.f32 %v2219_v24, %v231_v9  ;;  %v234_v15 = vmul.f32 %v1551_v34, %v2178_v10  ;;  %v302_v11 = vadd.f32 %v2219_v24, %v232_v47  ;;  %1879 = vmatprep.mubr.bf16.mxu1 %v394_v18 }
  0x53   :  { %v364_v63 = vmax.f32 %v300_v27, 0.0  ;;  %v303_v58 = vadd.f32 %v2219_v24, %v233_v17  ;;  %v235_v42 = vmul.f32 %v1552_v8, %v2178_v10  ;;  %v236_v34 = vmul.f32 %v1555_v22, %v2178_v10 }
  0x54   :  { %v399_v28 = vpack.c.bf16 %v363_v35, %v362_v29  ;;  %v365_v52 = vmax.f32 %v301_v62, 0.0  ;;  %v304_v21 = vadd.f32 %v2219_v24, %v234_v15  ;;  %v366_v49 = vmax.f32 %v302_v11, 0.0 }
  0x55   :  { %v367_v2 = vmax.f32 %v303_v58, 0.0  ;;  %v305_v45 = vadd.f32 %v2219_v24, %v235_v42  ;;  %v237_v32 = vmul.f32 %v1556_v33, %v2178_v10  ;;  %v386_v8 = vpack.c.bf16 %v337_v59, %v336_v40 }
  0x56   :  { %v400_v50 = vpack.c.bf16 %v365_v52, %v364_v63  ;;  %v368_v30 = vmax.f32 %v304_v21, 0.0  ;;  %v306_v38 = vadd.f32 %v2219_v24, %v236_v34  ;;  %v294_v23 = vadd.f32 %v2219_v24, %v224_v41 }
  0x57   :  { %v401_v13 = vpack.c.bf16 %v367_v2, %v366_v49  ;;  %v369_v7 = vmax.f32 %v305_v45, 0.0  ;;  %v307_v22 = vadd.f32 %v2219_v24, %v237_v32  ;;  %v395_v12 = vpack.c.bf16 %v355_v16, %v354_v36 }
  0x58   :  { %v295_v43 = vadd.f32 %v2219_v24, %v225_v1  ;;  %v296_v53 = vadd.f32 %v2219_v24, %v226_v56  ;;  %v370_v51 = vmax.f32 %v306_v38, 0.0  ;;  %v396_v5 = vpack.c.bf16 %v357_v44, %v356_v39  ;;  %1860 = vmatmul.mubr.bf16.gmra.mrb[24].mxu0 %v385_v26 }
  0x59   :  { %v297_v10 = vadd.f32 %v2219_v24, %v227_v37  ;;  %v402_v60 = vpack.c.bf16 %v369_v7, %v368_v30  ;;  %v371_v33 = vmax.f32 %v307_v22, 0.0  ;;  %v338_v20 = vmax.f32 %v2478_v4, 0.0  ;;  %1863 = vmatprep.mubr.bf16.mxu0 %v386_v8  ;;  %1880 = vmatmul.mubr.bf16.gmra.mrb[12].mxu1 %v395_v12 }
  0x5a   :  { %v339_v40 = vmax.f32 %v2484_v6, 0.0  ;;  %v358_v59 = vmax.f32 %v294_v23, 0.0  ;;  %v359_v31 = vmax.f32 %v295_v43, 0.0  ;;  %1883 = vmatprep.mubr.bf16.mxu1 %v396_v5  ;;  %v360_v48 = vmax.f32 %v296_v53, 0.0 }
  0x5b   :  { %v403_v61 = vpack.c.bf16 %v371_v33, %v370_v51  ;;  %v361_v36 = vmax.f32 %v297_v10, 0.0 }
  0x5c   :  { %v387_v55 = vpack.c.bf16 %v339_v40, %v338_v20  ;;  %v397_v41 = vpack.c.bf16 %v359_v31, %v358_v59 }
  0x5d   :  { %v398_v54 = vpack.c.bf16 %v361_v36, %v360_v48 }
  0x60   :  { %1864 = vmatmul.mubr.bf16.gmra.mrb[28].mxu0 %v387_v55 }
  0x61   :  { %1884 = vmatmul.mubr.bf16.gmra.mrb[16].mxu1 %v397_v41 }
  0x62   :  { %1887 = vmatprep.mubr.bf16.mxu1 %v398_v54 }
  0x69   :  { %1888 = vmatmul.mubr.bf16.gmra.mrb[20].mxu1 %v399_v28 }
  0x6a   :  { %1891 = vmatprep.mubr.bf16.mxu1 %v400_v50 }
  0x71   :  { %1892 = vmatmul.mubr.bf16.gmra.mrb[24].mxu1 %v401_v13 }
  0x72   :  { %1895 = vmatprep.mubr.bf16.mxu1 %v402_v60 }
  0x79   :  { %1896 = vmatmul.mubr.bf16.gmra.mrb[28].mxu1 %v403_v61 }
  0xfb   :  { %v1837_v24 = vpop.f32.mrb[0].mxu0 }
  0xfc   :  { %v502_v4 = vpop.f32.mrb[1].mxu0  ;;  %v1149_v16 = vmul.f32 %v1837_v24, %v1837_v24 }
  0xfd   :  { %v1838_v26 = vpop.f32.mrb[2].mxu0  ;;  %v1147_v25 = vmul.f32 %v502_v4, %v502_v4 }
  0xfe   :  { %v1565_v6 = vpack.c.bf16 %v1838_v26, %v1837_v24  ;;  %v505_v18 = vpop.f32.mrb[3].mxu0  ;;  %v1150_v19 = vmul.f32 %v1838_v26, %v1838_v26 }
  0xff   :  { %v1560_v46 = vpack.c.bf16 %v505_v18, %v502_v4  ;;  %v1077_v1 = vadd.f32 %v505_v18, %v502_v4  ;;  %v1148_v14 = vmul.f32 %v505_v18, %v505_v18 }
 0x100   :  { %1748 = vst [vmem:[%s2841_s6 + $0x8] sm:$0xff] %v1565_v6  }
 0x101   :  { %1561 = vst [vmem:[%s2841_s6] sm:$0xff] %v1560_v46   ;;  %v1078_v56 = vadd.f32 %v1837_v24, %v1077_v1  ;;  %v1211_v0 = vadd.f32 %v1148_v14, %v1147_v25 }
 0x103   :  { %v1212_v39 = vadd.f32 %v1211_v0, %v1149_v16  ;;  %v1841_v3 = vpop.f32.mrb[4].mxu0  ;;  %v1079_v37 = vadd.f32 %v1838_v26, %v1078_v56 }
 0x104   :  { %v518_v57 = vpop.f32.mrb[5].mxu0  ;;  %v1153_v11 = vmul.f32 %v1841_v3, %v1841_v3 }
 0x105   :  { %v1080_v9 = vadd.f32 %v1079_v37, %v518_v57  ;;  %v1151_v29 = vmul.f32 %v518_v57, %v518_v57  ;;  %v1213_v27 = vadd.f32 %v1212_v39, %v1150_v19  ;;  %v1842_v47 = vpop.f32.mrb[6].mxu0 }
 0x106   :  { %v1575_v17 = vpack.c.bf16 %v1842_v47, %v1841_v3  ;;  %v521_v44 = vpop.f32.mrb[7].mxu0  ;;  %v1154_v28 = vmul.f32 %v1842_v47, %v1842_v47 }
 0x107   :  { %v1214_v35 = vadd.f32 %v1213_v27, %v1151_v29  ;;  %v1570_v62 = vpack.c.bf16 %v521_v44, %v518_v57  ;;  %v1081_v15 = vadd.f32 %v1080_v9, %v521_v44  ;;  %v1152_v63 = vmul.f32 %v521_v44, %v521_v44 }
 0x108   :  { %1750 = vst [vmem:[%s2841_s6 + $0x18] sm:$0xff] %v1575_v17  }
 0x109   :  { %1749 = vst [vmem:[%s2841_s6 + $0x10] sm:$0xff] %v1570_v62   ;;  %v1082_v58 = vadd.f32 %v1841_v3, %v1081_v15  ;;  %v1215_v42 = vadd.f32 %v1214_v35, %v1152_v63 }
 0x10b   :  { %v1216_v52 = vadd.f32 %v1215_v42, %v1153_v11  ;;  %v1845_v21 = vpop.f32.mrb[8].mxu0  ;;  %v1083_v34 = vadd.f32 %v1842_v47, %v1082_v58 }
 0x10c   :  { %v534_v49 = vpop.f32.mrb[9].mxu0  ;;  %v1157_v22 = vmul.f32 %v1845_v21, %v1845_v21 }
 0x10d   :  { %v1084_v2 = vadd.f32 %v1083_v34, %v534_v49  ;;  %v1155_v45 = vmul.f32 %v534_v49, %v534_v49  ;;  %v1217_v32 = vadd.f32 %v1216_v52, %v1154_v28  ;;  %v1846_v8 = vpop.f32.mrb[10].mxu0 }
 0x10e   :  { %v1585_v50 = vpack.c.bf16 %v1846_v8, %v1845_v21  ;;  %v537_v30 = vpop.f32.mrb[11].mxu0  ;;  %v1158_v53 = vmul.f32 %v1846_v8, %v1846_v8 }
 0x10f   :  { %v1218_v38 = vadd.f32 %v1217_v32, %v1155_v45  ;;  %v1580_v23 = vpack.c.bf16 %v537_v30, %v534_v49  ;;  %v1085_v13 = vadd.f32 %v1084_v2, %v537_v30  ;;  %v1156_v7 = vmul.f32 %v537_v30, %v537_v30 }
 0x110   :  { %1752 = vst [vmem:[%s2841_s6 + $0x28] sm:$0xff] %v1585_v50  }
 0x111   :  { %1751 = vst [vmem:[%s2841_s6 + $0x20] sm:$0xff] %v1580_v23   ;;  %v1086_v12 = vadd.f32 %v1845_v21, %v1085_v13  ;;  %v1219_v43 = vadd.f32 %v1218_v38, %v1156_v7 }
 0x113   :  { %v1220_v51 = vadd.f32 %v1219_v43, %v1157_v22  ;;  %v1849_v5 = vpop.f32.mrb[12].mxu0  ;;  %v1087_v10 = vadd.f32 %v1846_v8, %v1086_v12  ;;  %v2565_v33 = vpop.f32.mrb[0].mxu1 }
 0x114   :  { %v550_v60 = vpop.f32.mrb[13].mxu0  ;;  %v2567_v31 = vpop.f32.mrb[1].mxu1  ;;  %v1161_v25 = vmul.f32 %v1849_v5, %v1849_v5 }
 0x115   :  { %v1088_v20 = vadd.f32 %v1087_v10, %v550_v60  ;;  %v1159_v40 = vmul.f32 %v550_v60, %v550_v60  ;;  %v1221_v61 = vadd.f32 %v1220_v51, %v1158_v53  ;;  %v1850_v59 = vpop.f32.mrb[14].mxu0  ;;  %v2569_v55 = vpop.f32.mrb[2].mxu1 }
 0x116   :  { %v1595_v48 = vpack.c.bf16 %v1850_v59, %v1849_v5  ;;  %v553_v36 = vpop.f32.mrb[15].mxu0  ;;  %v2571_v26 = vpop.f32.mrb[3].mxu1  ;;  %v1645_v6 = vpack.c.bf16 %v2569_v55, %v2565_v33  ;;  %v1162_v14 = vmul.f32 %v1850_v59, %v1850_v59 }
 0x117   :  { %v1222_v41 = vadd.f32 %v1221_v61, %v1159_v40  ;;  %v1590_v54 = vpack.c.bf16 %v553_v36, %v550_v60  ;;  %v1089_v24 = vadd.f32 %v1088_v20, %v553_v36  ;;  %v1160_v4 = vmul.f32 %v553_v36, %v553_v36 }
 0x118   :  { %1754 = vst [vmem:[%s2841_s6 + $0x38] sm:$0xff] %v1595_v48   ;;  %v1640_v18 = vpack.c.bf16 %v2571_v26, %v2567_v31  ;;  %1764 = vst [vmem:[%s2841_s6 + $0x88] sm:$0xff] %v1645_v6  }
 0x119   :  { %1753 = vst [vmem:[%s2841_s6 + $0x30] sm:$0xff] %v1590_v54   ;;  %v1090_v46 = vadd.f32 %v1849_v5, %v1089_v24  ;;  %v1223_v1 = vadd.f32 %v1222_v41, %v1160_v4 }
 0x11a   :  { %1763 = vst [vmem:[%s2841_s6 + $0x80] sm:$0xff] %v1640_v18  }
 0x11b   :  { %v1224_v16 = vadd.f32 %v1223_v1, %v1161_v25  ;;  %v1853_v56 = vpop.f32.mrb[16].mxu0  ;;  %v1091_v0 = vadd.f32 %v1850_v59, %v1090_v46 }
 0x11c   :  { %v566_v19 = vpop.f32.mrb[17].mxu0  ;;  %v2589_v39 = vpop.f32.mrb[4].mxu1  ;;  %v1165_v42 = vmul.f32 %v1853_v56, %v1853_v56 }
 0x11d   :  { %v1092_v3 = vadd.f32 %v1091_v0, %v566_v19  ;;  %v1163_v37 = vmul.f32 %v566_v19, %v566_v19  ;;  %v1225_v57 = vadd.f32 %v1224_v16, %v1162_v14  ;;  %v1854_v9 = vpop.f32.mrb[18].mxu0  ;;  %v2591_v29 = vpop.f32.mrb[5].mxu1 }
 0x11e   :  { %v1605_v27 = vpack.c.bf16 %v1854_v9, %v1853_v56  ;;  %v569_v47 = vpop.f32.mrb[19].mxu0  ;;  %v2593_v17 = vpop.f32.mrb[6].mxu1  ;;  %v1166_v21 = vmul.f32 %v1854_v9, %v1854_v9 }
 0x11f   :  { %v1226_v44 = vadd.f32 %v1225_v57, %v1163_v37  ;;  %v1600_v35 = vpack.c.bf16 %v569_v47, %v566_v19  ;;  %v1093_v62 = vadd.f32 %v1092_v3, %v569_v47  ;;  %v1164_v15 = vmul.f32 %v569_v47, %v569_v47  ;;  %v2595_v63 = vpop.f32.mrb[7].mxu1 }
 0x120   :  { %1756 = vst [vmem:[%s2841_s6 + $0x48] sm:$0xff] %v1605_v27   ;;  %v1655_v11 = vpack.c.bf16 %v2593_v17, %v2589_v39  ;;  %v1650_v58 = vpack.c.bf16 %v2595_v63, %v2591_v29 }
 0x121   :  { %1755 = vst [vmem:[%s2841_s6 + $0x40] sm:$0xff] %v1600_v35   ;;  %v1094_v28 = vadd.f32 %v1853_v56, %v1093_v62  ;;  %v1227_v52 = vadd.f32 %v1226_v44, %v1164_v15 }
 0x122   :  { %1766 = vst [vmem:[%s2841_s6 + $0x98] sm:$0xff] %v1655_v11   ;;  %1765 = vst [vmem:[%s2841_s6 + $0x90] sm:$0xff] %v1650_v58  }
 0x123   :  { %v1228_v34 = vadd.f32 %v1227_v52, %v1165_v42  ;;  %v1857_v49 = vpop.f32.mrb[20].mxu0  ;;  %v1095_v2 = vadd.f32 %v1854_v9, %v1094_v28 }
 0x124   :  { %v582_v45 = vpop.f32.mrb[21].mxu0  ;;  %v2613_v32 = vpop.f32.mrb[8].mxu1  ;;  %v1169_v20 = vmul.f32 %v1857_v49, %v1857_v49 }
 0x125   :  { %v1096_v8 = vadd.f32 %v1095_v2, %v582_v45  ;;  %v1167_v50 = vmul.f32 %v582_v45, %v582_v45  ;;  %v1229_v30 = vadd.f32 %v1228_v34, %v1166_v21  ;;  %v1858_v38 = vpop.f32.mrb[22].mxu0  ;;  %v2615_v23 = vpop.f32.mrb[9].mxu1 }
 0x126   :  { %v1615_v13 = vpack.c.bf16 %v1858_v38, %v1857_v49  ;;  %v585_v7 = vpop.f32.mrb[23].mxu0  ;;  %v2617_v22 = vpop.f32.mrb[10].mxu1  ;;  %v1170_v59 = vmul.f32 %v1858_v38, %v1858_v38 }
 0x127   :  { %v1230_v12 = vadd.f32 %v1229_v30, %v1167_v50  ;;  %v1610_v43 = vpack.c.bf16 %v585_v7, %v582_v45  ;;  %v1097_v53 = vadd.f32 %v1096_v8, %v585_v7  ;;  %v1168_v51 = vmul.f32 %v585_v7, %v585_v7  ;;  %v2619_v5 = vpop.f32.mrb[11].mxu1 }
 0x128   :  { %1758 = vst [vmem:[%s2841_s6 + $0x58] sm:$0xff] %v1615_v13   ;;  %v1665_v10 = vpack.c.bf16 %v2617_v22, %v2613_v32  ;;  %v1660_v60 = vpack.c.bf16 %v2619_v5, %v2615_v23 }
 0x129   :  { %1757 = vst [vmem:[%s2841_s6 + $0x50] sm:$0xff] %v1610_v43   ;;  %v1098_v40 = vadd.f32 %v1857_v49, %v1097_v53  ;;  %v1231_v61 = vadd.f32 %v1230_v12, %v1168_v51 }
 0x12a   :  { %1768 = vst [vmem:[%s2841_s6 + $0xa8] sm:$0xff] %v1665_v10   ;;  %1767 = vst [vmem:[%s2841_s6 + $0xa0] sm:$0xff] %v1660_v60  }
 0x12b   :  { %v1232_v48 = vadd.f32 %v1231_v61, %v1169_v20  ;;  %v1861_v36 = vpop.f32.mrb[24].mxu0  ;;  %v1099_v41 = vadd.f32 %v1858_v38, %v1098_v40  ;;  %v1179_v61 = vmul.f32 %v2567_v31, %v2567_v31 }
 0x12c   :  { %v598_v54 = vpop.f32.mrb[25].mxu0  ;;  %v2637_v24 = vpop.f32.mrb[12].mxu1  ;;  %v1173_v27 = vmul.f32 %v1861_v36, %v1861_v36 }
 0x12d   :  { %v1100_v4 = vadd.f32 %v1099_v41, %v598_v54  ;;  %v1171_v6 = vmul.f32 %v598_v54, %v598_v54  ;;  %v1233_v18 = vadd.f32 %v1232_v48, %v1170_v59  ;;  %v1862_v25 = vpop.f32.mrb[26].mxu0  ;;  %v2639_v46 = vpop.f32.mrb[13].mxu1 }
 0x12e   :  { %v1625_v1 = vpack.c.bf16 %v1862_v25, %v1861_v36  ;;  %v601_v14 = vpop.f32.mrb[27].mxu0  ;;  %v2641_v16 = vpop.f32.mrb[14].mxu1  ;;  %v1174_v35 = vmul.f32 %v1862_v25, %v1862_v25 }
 0x12f   :  { %v1234_v56 = vadd.f32 %v1233_v18, %v1171_v6  ;;  %v1620_v0 = vpack.c.bf16 %v601_v14, %v598_v54  ;;  %v1101_v19 = vadd.f32 %v1100_v4, %v601_v14  ;;  %v1172_v3 = vmul.f32 %v601_v14, %v601_v14  ;;  %v2643_v37 = vpop.f32.mrb[15].mxu1 }
 0x130   :  { %1760 = vst [vmem:[%s2841_s6 + $0x68] sm:$0xff] %v1625_v1   ;;  %v1675_v57 = vpack.c.bf16 %v2641_v16, %v2637_v24  ;;  %v1670_v9 = vpack.c.bf16 %v2643_v37, %v2639_v46  ;;  %v1180_v18 = vmul.f32 %v2571_v26, %v2571_v26 }
 0x131   :  { %1759 = vst [vmem:[%s2841_s6 + $0x60] sm:$0xff] %v1620_v0   ;;  %v1102_v47 = vadd.f32 %v1861_v36, %v1101_v19  ;;  %v1235_v44 = vadd.f32 %v1234_v56, %v1172_v3 }
 0x132   :  { %1770 = vst [vmem:[%s2841_s6 + $0xb8] sm:$0xff] %v1675_v57   ;;  %1769 = vst [vmem:[%s2841_s6 + $0xb0] sm:$0xff] %v1670_v9   ;;  %v1183_v57 = vmul.f32 %v2591_v29, %v2591_v29 }
 0x133   :  { %v1236_v62 = vadd.f32 %v1235_v44, %v1173_v27  ;;  %v1865_v15 = vpop.f32.mrb[28].mxu0  ;;  %v1103_v11 = vadd.f32 %v1862_v25, %v1102_v47 }
 0x134   :  { %v614_v58 = vpop.f32.mrb[29].mxu0  ;;  %v2661_v42 = vpop.f32.mrb[16].mxu1  ;;  %v1177_v53 = vmul.f32 %v1865_v15, %v1865_v15 }
 0x135   :  { %v1104_v28 = vadd.f32 %v1103_v11, %v614_v58  ;;  %v1175_v52 = vmul.f32 %v614_v58, %v614_v58  ;;  %v1237_v21 = vadd.f32 %v1236_v62, %v1174_v35  ;;  %v1866_v34 = vpop.f32.mrb[30].mxu0  ;;  %v2663_v49 = vpop.f32.mrb[17].mxu1 }
 0x136   :  { %v1635_v2 = vpack.c.bf16 %v1866_v34, %v1865_v15  ;;  %v617_v45 = vpop.f32.mrb[31].mxu0  ;;  %v2665_v8 = vpop.f32.mrb[18].mxu1  ;;  %v1178_v60 = vmul.f32 %v1866_v34, %v1866_v34 }
 0x137   :  { %v1238_v50 = vadd.f32 %v1237_v21, %v1175_v52  ;;  %v1630_v30 = vpack.c.bf16 %v617_v45, %v614_v58  ;;  %v1105_v38 = vadd.f32 %v1104_v28, %v617_v45  ;;  %v1176_v13 = vmul.f32 %v617_v45, %v617_v45  ;;  %v2667_v7 = vpop.f32.mrb[19].mxu1 }
 0x138   :  { %1762 = vst [vmem:[%s2841_s6 + $0x78] sm:$0xff] %v1635_v2   ;;  %v1685_v12 = vpack.c.bf16 %v2665_v8, %v2661_v42  ;;  %v1680_v43 = vpack.c.bf16 %v2667_v7, %v2663_v49  ;;  %v1187_v2 = vmul.f32 %v2615_v23, %v2615_v23 }
 0x139   :  { %1761 = vst [vmem:[%s2841_s6 + $0x70] sm:$0xff] %v1630_v30   ;;  %v1106_v51 = vadd.f32 %v1865_v15, %v1105_v38  ;;  %v1239_v10 = vadd.f32 %v1238_v50, %v1176_v13  ;;  %v1184_v15 = vmul.f32 %v2595_v63, %v2595_v63 }
 0x13a   :  { %1772 = vst [vmem:[%s2841_s6 + $0xc8] sm:$0xff] %v1685_v12   ;;  %1771 = vst [vmem:[%s2841_s6 + $0xc0] sm:$0xff] %v1680_v43   ;;  %v1188_v43 = vmul.f32 %v2619_v5, %v2619_v5 }
 0x13b   :  { %v1240_v20 = vadd.f32 %v1239_v10, %v1177_v53  ;;  %v1107_v40 = vadd.f32 %v1866_v34, %v1106_v51 }
 0x13c   :  { %v2687_v59 = vpop.f32.mrb[20].mxu1 }
 0x13d   :  { %v1108_v48 = vadd.f32 %v1107_v40, %v2567_v31  ;;  %v1241_v36 = vadd.f32 %v1240_v20, %v1178_v60  ;;  %v2690_v41 = vpop.f32.mrb[21].mxu1  ;;  %v1181_v31 = vmul.f32 %v2565_v33, %v2565_v33 }
 0x13e   :  { %v2692_v54 = vpop.f32.mrb[22].mxu1 }
 0x13f   :  { %v1242_v4 = vadd.f32 %v1241_v36, %v1179_v61  ;;  %v1109_v6 = vadd.f32 %v1108_v48, %v2571_v26  ;;  %v1695_v25 = vpack.c.bf16 %v2692_v54, %v2687_v59  ;;  %v2699_v1 = vpop.f32.mrb[23].mxu1  ;;  %v1182_v26 = vmul.f32 %v2569_v55, %v2569_v55 }
 0x140   :  { %v1690_v14 = vpack.c.bf16 %v2699_v1, %v2690_v41  ;;  %v1191_v61 = vmul.f32 %v2639_v46, %v2639_v46 }
 0x141   :  { %v1110_v56 = vadd.f32 %v2565_v33, %v1109_v6  ;;  %v1243_v0 = vadd.f32 %v1242_v4, %v1180_v18  ;;  %1774 = vst [vmem:[%s2841_s6 + $0xd8] sm:$0xff] %v1695_v25   ;;  %v1192_v6 = vmul.f32 %v2643_v37, %v2643_v37  ;;  %v1193_v18 = vmul.f32 %v2637_v24, %v2637_v24 }
 0x142   :  { %1773 = vst [vmem:[%s2841_s6 + $0xd0] sm:$0xff] %v1690_v14  }
 0x143   :  { %v1244_v19 = vadd.f32 %v1243_v0, %v1181_v31  ;;  %v1111_v3 = vadd.f32 %v2569_v55, %v1110_v56 }
 0x144   :  { %v2717_v9 = vpop.f32.mrb[24].mxu1 }
 0x145   :  { %v1112_v33 = vadd.f32 %v1111_v3, %v2591_v29  ;;  %v1245_v27 = vadd.f32 %v1244_v19, %v1182_v26  ;;  %v2720_v47 = vpop.f32.mrb[25].mxu1  ;;  %v1185_v29 = vmul.f32 %v2589_v39, %v2589_v39  ;;  %v1196_v3 = vmul.f32 %v2667_v7, %v2667_v7 }
 0x146   :  { %v2722_v44 = vpop.f32.mrb[26].mxu1 }
 0x147   :  { %v1246_v35 = vadd.f32 %v1245_v27, %v1183_v57  ;;  %v1113_v62 = vadd.f32 %v1112_v33, %v2595_v63  ;;  %v1705_v55 = vpack.c.bf16 %v2722_v44, %v2717_v9  ;;  %v2729_v11 = vpop.f32.mrb[27].mxu1  ;;  %v1186_v63 = vmul.f32 %v2593_v17, %v2593_v17 }
 0x148   :  { %v1700_v58 = vpack.c.bf16 %v2729_v11, %v2720_v47 }
 0x149   :  { %v1114_v28 = vadd.f32 %v2589_v39, %v1113_v62  ;;  %v1247_v52 = vadd.f32 %v1246_v35, %v1184_v15  ;;  %1776 = vst [vmem:[%s2841_s6 + $0xe8] sm:$0xff] %v1705_v55  }
 0x14a   :  { %1775 = vst [vmem:[%s2841_s6 + $0xe0] sm:$0xff] %v1700_v58   ;;  %v1200_v58 = vmul.f32 %v2699_v1, %v2699_v1 }
 0x14b   :  { %v1248_v21 = vadd.f32 %v1247_v52, %v1185_v29  ;;  %v1115_v34 = vadd.f32 %v2593_v17, %v1114_v28 }
 0x14c   :  { %v2747_v45 = vpop.f32.mrb[28].mxu1 }
 0x14d   :  { %v1116_v39 = vadd.f32 %v1115_v34, %v2615_v23  ;;  %v1249_v50 = vadd.f32 %v1248_v21, %v1186_v63  ;;  %v2750_v30 = vpop.f32.mrb[29].mxu1  ;;  %v1189_v23 = vmul.f32 %v2613_v32, %v2613_v32 }
 0x14e   :  { %v2752_v38 = vpop.f32.mrb[30].mxu1 }
 0x14f   :  { %v1250_v13 = vadd.f32 %v1249_v50, %v1187_v2  ;;  %v1117_v12 = vadd.f32 %v1116_v39, %v2619_v5  ;;  %v1715_v17 = vpack.c.bf16 %v2752_v38, %v2747_v45  ;;  %v745_v53 = vpop.f32.mrb[31].mxu1  ;;  %v1190_v5 = vmul.f32 %v2617_v22, %v2617_v22 }
 0x150   :  { %v1710_v51 = vpack.c.bf16 %v745_v53, %v2750_v30  ;;  %v1204_v39 = vmul.f32 %v2729_v11, %v2729_v11 }
 0x151   :  { %v1118_v10 = vadd.f32 %v2613_v32, %v1117_v12  ;;  %v1251_v60 = vadd.f32 %v1250_v13, %v1188_v43  ;;  %1778 = vst [vmem:[%s2841_s6 + $0xf8] sm:$0xff] %v1715_v17  }
 0x152   :  { %1777 = vst [vmem:[%s2841_s6 + $0xf0] sm:$0xff] %v1710_v51  }
 0x153   :  { %v1252_v20 = vadd.f32 %v1251_v60, %v1189_v23  ;;  %v1119_v40 = vadd.f32 %v2617_v22, %v1118_v10  ;;  %v1194_v22 = vmul.f32 %v2641_v16, %v2641_v16  ;;  %v1208_v10 = vmul.f32 %v745_v53, %v745_v53 }
 0x154   :  { %v1209_v60 = vmul.f32 %v2747_v45, %v2747_v45 }
 0x155   :  { %v1120_v32 = vadd.f32 %v1119_v40, %v2639_v46  ;;  %v1253_v48 = vadd.f32 %v1252_v20, %v1190_v5  ;;  %v1195_v46 = vmul.f32 %v2663_v49, %v2663_v49  ;;  %v1210_v20 = vmul.f32 %v2752_v38, %v2752_v38 }
 0x157   :  { %v1254_v36 = vadd.f32 %v1253_v48, %v1191_v61  ;;  %v1121_v4 = vadd.f32 %v1120_v32, %v2643_v37 }
 0x159   :  { %v1122_v25 = vadd.f32 %v2637_v24, %v1121_v4  ;;  %v1255_v14 = vadd.f32 %v1254_v36, %v1192_v6  ;;  %v1197_v24 = vmul.f32 %v2661_v42, %v2661_v42 }
 0x15b   :  { %v1256_v31 = vadd.f32 %v1255_v14, %v1193_v18  ;;  %v1123_v56 = vadd.f32 %v2641_v16, %v1122_v25  ;;  %v1198_v16 = vmul.f32 %v2665_v8, %v2665_v8 }
 0x15d   :  { %v1124_v0 = vadd.f32 %v1123_v56, %v2663_v49  ;;  %v1257_v26 = vadd.f32 %v1256_v31, %v1194_v22  ;;  %v1199_v49 = vmul.f32 %v2690_v41, %v2690_v41 }
 0x15f   :  { %v1258_v19 = vadd.f32 %v1257_v26, %v1195_v46  ;;  %v1125_v37 = vadd.f32 %v1124_v0, %v2667_v7 }
 0x161   :  { %v1126_v57 = vadd.f32 %v2661_v42, %v1125_v37  ;;  %v1259_v33 = vadd.f32 %v1258_v19, %v1196_v3  ;;  %v1201_v42 = vmul.f32 %v2687_v59, %v2687_v59 }
 0x163   :  { %v1260_v27 = vadd.f32 %v1259_v33, %v1197_v24  ;;  %v1127_v35 = vadd.f32 %v2665_v8, %v1126_v57  ;;  %v1202_v8 = vmul.f32 %v2692_v54, %v2692_v54 }
 0x165   :  { %v1128_v62 = vadd.f32 %v1127_v35, %v2690_v41  ;;  %v1261_v15 = vadd.f32 %v1260_v27, %v1198_v16  ;;  %v1203_v41 = vmul.f32 %v2720_v47, %v2720_v47 }
 0x167   :  { %v1262_v55 = vadd.f32 %v1261_v15, %v1199_v49  ;;  %v1129_v7 = vadd.f32 %v1128_v62, %v2699_v1 }
 0x169   :  { %v1130_v29 = vadd.f32 %v2687_v59, %v1129_v7  ;;  %v1263_v28 = vadd.f32 %v1262_v55, %v1200_v58  ;;  %v1205_v59 = vmul.f32 %v2717_v9, %v2717_v9 }
 0x16b   :  { %v1264_v52 = vadd.f32 %v1263_v28, %v1201_v42  ;;  %v1131_v63 = vadd.f32 %v2692_v54, %v1130_v29  ;;  %v1206_v54 = vmul.f32 %v2722_v44, %v2722_v44 }
 0x16d   :  { %v1132_v21 = vadd.f32 %v1131_v63, %v2720_v47  ;;  %v1265_v34 = vadd.f32 %v1264_v52, %v1202_v8  ;;  %v1207_v47 = vmul.f32 %v2750_v30, %v2750_v30 }
 0x16f   :  { %v1266_v2 = vadd.f32 %v1265_v34, %v1203_v41  ;;  %v1133_v1 = vadd.f32 %v1132_v21, %v2729_v11 }
 0x171   :  { %v1134_v50 = vadd.f32 %v2717_v9, %v1133_v1  ;;  %v1267_v13 = vadd.f32 %v1266_v2, %v1204_v39 }
 0x173   :  { %v1268_v12 = vadd.f32 %v1267_v13, %v1205_v59  ;;  %v1135_v43 = vadd.f32 %v2722_v44, %v1134_v50 }
 0x175   :  { %v1136_v17 = vadd.f32 %v1135_v43, %v2750_v30  ;;  %v1269_v51 = vadd.f32 %v1268_v12, %v1206_v54 }
 0x177   :  { %v1270_v23 = vadd.f32 %v1269_v51, %v1207_v47  ;;  %v1137_v11 = vadd.f32 %v1136_v17, %v745_v53 }
 0x179   :  { %v1138_v9 = vadd.f32 %v2747_v45, %v1137_v11  ;;  %v1271_v5 = vadd.f32 %v1270_v23, %v1208_v10 }
 0x17b   :  { %v1139_v44 = vadd.f32 %v2752_v38, %v1138_v9  ;;  %v1272_v40 = vadd.f32 %v1271_v5, %v1209_v60 }
 0x17d   :  { %v1140_v61 = vrot.slane %v1139_v44, 4  ;;  %v1273_v32 = vadd.f32 %v1272_v40, %v1210_v20 }
 0x17f   :  { %v1141_v48 = vadd.f32 %v1140_v61, %v1139_v44  ;;  %v1274_v30 = vrot.slane %v1273_v32, 4 }
 0x181   :  { %v1142_v36 = vrot.slane %v1141_v48, 2  ;;  %v1275_v4 = vadd.f32 %v1274_v30, %v1273_v32 }
 0x183   :  { %v1143_v6 = vadd.f32 %v1142_v36, %v1141_v48  ;;  %v1276_v53 = vrot.slane %v1275_v4, 2 }
 0x185   :  { %v1144_v18 = vrot.slane %v1143_v6, 1  ;;  %v1277_v25 = vadd.f32 %v1276_v53, %v1275_v4 }
 0x187   :  { %v1145_v14 = vadd.f32 %v1144_v18, %v1143_v6  ;;  %v1278_v22 = vrot.slane %v1277_v25, 1 }
 0x189   :  { %1146 = vst [vmem:[%s2842_s7] sm:$0x1] %v1145_v14  ;;  %v1279_v45 = vadd.f32 %v1278_v22, %v1277_v25 }
 0x18b   :  { %1280 = vst [vmem:[%s2843_s8] sm:$0x1] %v1279_v45 }

// kernel: bottleneck_forward.8
= control target key start
LH: loop header
LB: loop body
LE: loop exit
PB: predicated region body
PF: predicated region fallthrough
CT: control target
= control target key end

     0   :  { %s7408_s15 = smov 0   ;;  %s7410_s16 = smov 0   ;;  %s9248_s0 = inlined_call_operand.vmem [shape: bf16[2,18,18,128], index: 0, kind: input, shape index: {}]   ;;  %s9249_s1 = inlined_call_operand.vmem [shape: bf16[9,128,128], index: 1, kind: input, shape index: {}]   ;;  %s9250_s2 = inlined_call_operand.vmem [shape: bf16[32,16,128], index: 2, kind: output, shape index: {0}]   ;;  %s9251_s3 = inlined_call_operand.vmem [shape: f32[2,1,128], index: 3, kind: output, shape index: {1}]   ;;  %s9252_s4 = inlined_call_operand.vmem [shape: f32[2,1,128], index: 4, kind: output, shape index: {2}]  }
   0x1   :  { %s7412_s17 = smov 0  }
   0x2 LB: > { %s27_s18 = sadd.s32 1, %s7377_s16  ;;  %p5473_p0 = scmp.ge.s32.totalorder %s7381_s17, 1  ;;  %s7381_s17 = sphi %s7412_s17, %s15_s17   ;;  %s7377_s16 = sphi %s7410_s16, %s9320_s16   ;;  %s7373_s15 = sphi %s7408_s15, %s9319_s15  }
   0x3   : > { %p29_p1 = scmp.ge.s32.totalorder %s27_s18, 2  ;;  %p185_p2 = scmp.lt.s32.totalorder %s7381_s17, 3 }
   0x5   : > { %s9322_s18 = smov (%p29_p1, %s27_s18), 0  ;;  %p186_p3 = pnand %p5473_p0, %p185_p2 }
   0x7   : > { %189 = sbr.rel (%p186_p3) target bundleno = 605 (0x25d), region = 28 }
   0xe   : > { %v7169_v0 = vld [vmem:[%s9249_s1 + $0x40] sm:$0xff]   ;;  %p221_p4 = scmp.lt.s32.totalorder %s7373_s15, 1  ;;  %v7171_v2 = vld [vmem:[%s9249_s1 + $0x48] sm:$0xff]   ;;  %v7173_v4 = vld [vmem:[%s9249_s1 + $0x50] sm:$0xff]   ;;  %vm314_vm0 = vsmask.f32 3328 }
   0xf   : > { %v7170_v1 = vld [vmem:[%s9249_s1 + $0x100] sm:$0xff]   ;;  %6440 = vmatprep.subr.bf16.mxu1 %v7169_v0  ;;  %v7172_v3 = vld [vmem:[%s9249_s1 + $0x108] sm:$0xff]   ;;  %v7174_v5 = vld [vmem:[%s9249_s1 + $0x110] sm:$0xff]   ;;  %vm315_vm1 = vsmask.f32 7440  ;;  %vm1344_vm3 = vcmask 1042432  }
  0x10   : > { %6632 = vmatprep.subr.bf16.mxu0 %v7170_v1  ;;  %6441 = vmatpush3.bf16.msra.mxu1 %v7169_v0  ;;  %s7448_s5 = scalar_select %p221_p4, %s7373_s15, 1  ;;  %v7175_v6 = vld [vmem:[%s9249_s1 + $0x58] sm:$0xff]   ;;  %v7177_v8 = vld [vmem:[%s9249_s1 + $0x60] sm:$0xff]   ;;  %v7179_v10 = vld [vmem:[%s9249_s1 + $0x68] sm:$0xff]   ;;  %vm1345_vm4 = vcmask 1046532  }
  0x11   : > { %6633 = vmatpush3.bf16.msra.mxu0 %v7170_v1  ;;  %6442 = vmatprep.subr.bf16.mxu1 %v7171_v2  ;;  %v7176_v7 = vld [vmem:[%s9249_s1 + $0x118] sm:$0xff]   ;;  %v7178_v9 = vld [vmem:[%s9249_s1 + $0x120] sm:$0xff]   ;;  %v7180_v11 = vld [vmem:[%s9249_s1 + $0x128] sm:$0xff]  }
  0x12   : > { %6634 = vmatprep.subr.bf16.mxu0 %v7172_v3  ;;  %s7144_s10 = smul.u32 216, %s7448_s5  ;;  %v7181_v25 = vld [vmem:[%s9249_s1 + $0x70] sm:$0xff]   ;;  %v7183_v36 = vld [vmem:[%s9249_s1 + $0x78] sm:$0xff]   ;;  %vm7498_vm2 = vmor %vm314_vm0, %vm315_vm1  ;;  %s238_s27 = scalar_lea.vmem %s9251_s3, %s7448_s5 }
  0x13   : > { %v7182_v30 = vld [vmem:[%s9249_s1 + $0x130] sm:$0xff]   ;;  %v7184_v51 = vld [vmem:[%s9249_s1 + $0x138] sm:$0xff]   ;;  %vm7744_vm5 = vmor %vm1344_vm3, %vm1345_vm4  ;;  %s243_s30 = scalar_lea.vmem %s9252_s4, %s7448_s5 }
  0x14   : > { %6443 = vmatpush3.bf16.msra.mxu1 %v7171_v2  ;;  %s7466_s21 = scalar_lea.vmem %s9248_s0, %s7144_s10 }
  0x15   : > { %6635 = vmatpush3.bf16.msra.mxu0 %v7172_v3  ;;  %6444 = vmatprep.subr.bf16.mxu1 %v7173_v4  ;;  %v250_v12 = vld [vmem:[%s7466_s21] sm:$0xf]  ;;  %v251_v13 = vld [vmem:[%s7466_s21 + $0x4] sm:$0xf]  ;;  %v298_v14 = vld [vmem:[%s7466_s21 + $0x8] sm:$0x1] }
  0x16   : > { %6636 = vmatprep.subr.bf16.mxu0 %v7174_v5  ;;  %v318_v15 = vshrl.u32 %v250_v12, 16  ;;  %v321_v16 = vshll.u32 %v250_v12, 16  ;;  %v327_v17 = vshll.u32 %v251_v13, 16  ;;  %v331_v18 = vshrl.u32 %v251_v13, 16  ;;  %v5670_v20 = vld [vmem:[%s7466_s21 + $0xc] sm:$0xf] }
  0x17   : > { %v337_v19 = vshll.u32 %v298_v14, 16  ;;  %v7479_v23 = vld [vmem:[%s7466_s21 + $0x10] sm:$0xf]  ;;  %v7482_v24 = vld [vmem:[%s7466_s21 + $0x14] sm:$0x1]  ;;  %v2220_v29 = vshrl.u32 %v5670_v20, 16 }
  0x18   : > { %6445 = vmatpush3.bf16.msra.mxu1 %v7173_v4  ;;  %v320_v21 = vrot.slane %v318_v15, 4  ;;  %v323_v22 = vrot.slane %v321_v16, 5  ;;  %v329_v26 = vrot.slane %v327_v17, 5  ;;  %v333_v27 = vrot.slane %v331_v18, 4  ;;  %v252_v35 = vld [vmem:[%s7466_s21 + $0xc] sm:$0xf] }
  0x19   : > { %6637 = vmatpush3.bf16.msra.mxu0 %v7174_v5  ;;  %6446 = vmatprep.subr.bf16.mxu1 %v7175_v6  ;;  %v339_v28 = vrot.slane %v337_v19, 5  ;;  %v2223_v32 = vshll.u32 %v5670_v20, 16  ;;  %v2229_v33 = vshll.u32 %v7479_v23, 16  ;;  %v2233_v34 = vshrl.u32 %v7479_v23, 16  ;;  %v253_v42 = vld [vmem:[%s7466_s21 + $0x10] sm:$0xf] }
  0x1a   : > { %6638 = vmatprep.subr.bf16.mxu0 %v7176_v7  ;;  %v324_v31 = vor.u32 %v323_v22, %v320_v21  ;;  %v334_v38 = vor.u32 %v333_v27, %v329_v26  ;;  %v2222_v39 = vrot.slane %v2220_v29, 4  ;;  %v2239_v40 = vshll.u32 %v7482_v24, 16  ;;  %v299_v55 = vld [vmem:[%s7466_s21 + $0x14] sm:$0x1]  ;;  %v5673_v57 = vld [vmem:[%s7466_s21 + $0x18] sm:$0xf] }
  0x1b   : > { %v2994_v41 = vrot.slane %v7482_v24, 5  ;;  %v2225_v44 = vrot.slane %v2223_v32, 5  ;;  %v2231_v45 = vrot.slane %v2229_v33, 5  ;;  %v2235_v46 = vrot.slane %v2233_v34, 4  ;;  %v7515_v62 = vld [vmem:[%s7466_s21 + $0x1c] sm:$0xf] }
  0x1c   : > { %6447 = vmatpush3.bf16.msra.mxu1 %v7175_v6  ;;  %v325_v43 = vrot.slane %v324_v31, 4  ;;  %v335_v47 = vrot.slane %v334_v38, 4  ;;  %v2241_v48 = vrot.slane %v2239_v40, 5  ;;  %v342_v49 = vshrl.u32 %v252_v35, 16  ;;  %v7185_v3 = vld [vmem:[%s9249_s1] sm:$0xff]  }
  0x1d   : > { %6639 = vmatpush3.bf16.msra.mxu0 %v7176_v7  ;;  %6448 = vmatprep.subr.bf16.mxu1 %v7177_v8  ;;  %v345_v50 = vshll.u32 %v252_v35, 16  ;;  %v2226_v53 = vor.u32 %v2225_v44, %v2222_v39  ;;  %v2236_v54 = vor.u32 %v2235_v46, %v2231_v45  ;;  %v351_v56 = vshll.u32 %v253_v42, 16  ;;  %v7523_v4 = vld [vmem:[%s9249_s1 + $0x140] sm:$0xff]   ;;  %v254_v21 = vld [vmem:[%s7466_s21 + $0x18] sm:$0xf]  ;;  %v7188_v46 = vld [vmem:[%s9249_s1 + $0x8] sm:$0xff]  }
  0x1e   : > { %6640 = vmatprep.subr.bf16.mxu0 %v7178_v9  ;;  %v330_v52 = vsel %vm7498_vm2, %v325_v43, %v329_v26  ;;  %v340_v58 = vsel %vm7498_vm2, %v335_v47, %v339_v28  ;;  %v344_v59 = vrot.slane %v342_v49, 4  ;;  %v355_v61 = vshrl.u32 %v253_v42, 16  ;;  %v255_v28 = vld [vmem:[%s7466_s21 + $0x1c] sm:$0xf]  ;;  %v300_v33 = vld [vmem:[%s7466_s21 + $0x20] sm:$0x1] }
  0x1f   : > { %v347_v60 = vrot.slane %v345_v50, 5  ;;  %v5494_v63 = vcombine.low %v330_v52, %v340_v58  ;;  %v2227_v0 = vrot.slane %v2226_v53, 4  ;;  %v2237_v1 = vrot.slane %v2236_v54, 4  ;;  %v5676_v39 = vld [vmem:[%s7466_s21 + $0x24] sm:$0xf] }
  0x20   : > { %6449 = vmatpush3.bf16.msra.mxu1 %v7177_v8  ;;  %v353_v2 = vrot.slane %v351_v56, 5  ;;  %v357_v6 = vrot.slane %v355_v61, 4  ;;  %v361_v7 = vshll.u32 %v299_v55, 16  ;;  %v7526_v8 = vld [vmem:[%s7466_s21 + $0x20] sm:$0x1]  ;;  %v2247_v12 = vshll.u32 %v5673_v57, 16 }
  0x21   : > { %6641 = vmatpush3.bf16.msra.mxu0 %v7178_v9  ;;  %6450 = vmatprep.subr.bf16.mxu1 %v7179_v10  ;;  %v348_v5 = vor.u32 %v347_v60, %v344_v59  ;;  %v2232_v9 = vsel %vm7498_vm2, %v2227_v0, %v2231_v45  ;;  %v2253_v19 = vshll.u32 %v7515_v62, 16  ;;  %v2257_v20 = vshrl.u32 %v7515_v62, 16  ;;  %v7551_v45 = vld [vmem:[%s7466_s21 + $0x28] sm:$0xf]  ;;  %v256_v52 = vld [vmem:[%s7466_s21 + $0x24] sm:$0xf] }
  0x22   : > { %6642 = vmatprep.subr.bf16.mxu0 %v7180_v11  ;;  %6456 = vmatprep.mubr.bf16.mxu1 %v5494_v63  ;;  %v358_v15 = vor.u32 %v357_v6, %v353_v2  ;;  %v363_v16 = vrot.slane %v361_v7, 5  ;;  %v2249_v18 = vrot.slane %v2247_v12, 5  ;;  %v2263_v26 = vshll.u32 %v7526_v8, 16  ;;  %v7187_v63 = vld [vmem:[%s9249_s1 + $0x148] sm:$0xff]  }
  0x23   : > { %v349_v14 = vrot.slane %v348_v5, 4  ;;  %v2998_v27 = vrot.slane %v7515_v62, 5  ;;  %v2259_v31 = vrot.slane %v2257_v20, 4  ;;  %v3001_v32 = vrot.slane %v7526_v8, 5  ;;  %v257_v5 = vld [vmem:[%s7466_s21 + $0x28] sm:$0xf] }
  0x24   : > { %6451 = vmatpush3.bf16.msra.mxu1 %v7179_v10  ;;  %v2242_v10 = vsel %vm7498_vm2, %v2237_v1, %v2241_v48  ;;  %v2265_v35 = vrot.slane %v2263_v26, 5  ;;  %v366_v38 = vshrl.u32 %v254_v21, 16  ;;  %v369_v44 = vshll.u32 %v254_v21, 16 }
  0x25   : > { %6643 = vmatpush3.bf16.msra.mxu0 %v7180_v11  ;;  %6452 = vmatprep.subr.bf16.mxu1 %v7181_v25  ;;  %v2244_v11 = vshrl.u32 %v5673_v57, 16  ;;  %v5734_v13 = vcombine.low %v2232_v9, %v2242_v10  ;;  %v354_v22 = vsel %vm7498_vm2, %v349_v14, %v353_v2  ;;  %v375_v48 = vshll.u32 %v255_v28, 16 }
  0x26   : > { %6644 = vmatprep.subr.bf16.mxu0 %v7182_v30  ;;  %v368_v47 = vrot.slane %v366_v38, 4  ;;  %v379_v49 = vshrl.u32 %v255_v28, 16  ;;  %v385_v50 = vshll.u32 %v300_v33, 16  ;;  %v371_v55 = vrot.slane %v369_v44, 5  ;;  %v7582_v33 = vld [vmem:[%s7466_s21 + $0x34] sm:$0xf] }
  0x27   : > { %v2246_v17 = vrot.slane %v2244_v11, 4  ;;  %6648 = vmatprep.mubr.bf16.mxu0 %v5734_v13  ;;  %v2268_v56 = vshrl.u32 %v5676_v39, 16  ;;  %v377_v57 = vrot.slane %v375_v48, 5  ;;  %v2271_v60 = vshll.u32 %v5676_v39, 16  ;;  %v301_v11 = vld [vmem:[%s7466_s21 + $0x2c] sm:$0x1] }
  0x28   : > { %6453 = vmatpush3.bf16.msra.mxu1 %v7181_v25  ;;  %v359_v25 = vrot.slane %v358_v15, 4  ;;  %v381_v58 = vrot.slane %v379_v49, 4  ;;  %v387_v59 = vrot.slane %v385_v50, 5  ;;  %v372_v0 = vor.u32 %v371_v55, %v368_v47  ;;  %v7190_v48 = vld [vmem:[%s9249_s1 + $0x158] sm:$0xff]  }
  0x29   : > { %6645 = vmatpush3.bf16.msra.mxu0 %v7182_v30  ;;  %6454 = vmatprep.subr.bf16.mxu1 %v7183_v36  ;;  %v2250_v29 = vor.u32 %v2249_v18, %v2246_v17  ;;  %v2255_v30 = vrot.slane %v2253_v19, 5  ;;  %v2270_v1 = vrot.slane %v2268_v56, 4  ;;  %v2277_v2 = vshll.u32 %v7551_v45, 16 }
  0x2a   : > { %6646 = vmatprep.subr.bf16.mxu0 %v7184_v51  ;;  %v364_v34 = vsel %vm7498_vm2, %v359_v25, %v363_v16  ;;  %v382_v7 = vor.u32 %v381_v58, %v377_v57  ;;  %v2273_v9 = vrot.slane %v2271_v60, 5  ;;  %v2281_v10 = vshrl.u32 %v7551_v45, 16  ;;  %v5679_v16 = vld [vmem:[%s7466_s21 + $0x30] sm:$0xf]  ;;  %v7197_v60 = vld [vmem:[%s9249_s1 + $0x20] sm:$0xff]  }
  0x2b   : > { %v5495_v40 = vcombine.low %v354_v22, %v364_v34  ;;  %v2251_v42 = vrot.slane %v2250_v29, 4  ;;  %v2260_v43 = vor.u32 %v2259_v31, %v2255_v30  ;;  %v373_v12 = vrot.slane %v372_v0, 4  ;;  %v7194_v34 = vld [vmem:[%s9249_s1 + $0x18] sm:$0xff]  }
  0x2c   : > { %6455 = vmatpush3.bf16.msra.mxu1 %v7183_v36  ;;  %v7547_v36 = vrot.slane %v2998_v27, 4  ;;  %v2279_v13 = vrot.slane %v2277_v2, 5  ;;  %v390_v15 = vshrl.u32 %v256_v52, 16  ;;  %v383_v17 = vrot.slane %v382_v7, 4  ;;  %v302_v2 = vld [vmem:[%s7466_s21 + $0x38] sm:$0x1] }
  0x2d   : > { %6647 = vmatpush3.bf16.msra.mxu0 %v7184_v51  ;;  %6488 = vmatprep.subr.bf16.mxu1 %v7185_v3  ;;  %v7557_v51 = vld [vmem:[%s7466_s21 + $0x2c] sm:$0x1]  ;;  %v2256_v53 = vsel %vm7498_vm2, %v2251_v42, %v2255_v30  ;;  %v2261_v54 = vrot.slane %v2260_v43, 4  ;;  %v2274_v18 = vor.u32 %v2273_v9, %v2270_v1  ;;  %v2283_v19 = vrot.slane %v2281_v10, 4  ;;  %v5682_v9 = vld [vmem:[%s7466_s21 + $0x3c] sm:$0xf] }
  0x2e   : > { %6680 = vmatprep.subr.bf16.mxu0 %v7523_v4  ;;  %v2287_v14 = vshll.u32 %v7557_v51, 16  ;;  %v393_v20 = vshll.u32 %v256_v52, 16  ;;  %v378_v21 = vsel %vm7498_vm2, %v373_v12, %v377_v57  ;;  %v392_v25 = vrot.slane %v390_v15, 4 }
  0x2f   : > { %6457 = vmatmul.mubr.bf16.vlgmr.msra.gmra.mrb[0].mxu1 %v5495_v40  ;;  %v2266_v61 = vsel %vm7498_vm2, %v2261_v54, %v2265_v35  ;;  %v399_v26 = vshll.u32 %v257_v5, 16  ;;  %v388_v28 = vsel %vm7498_vm2, %v383_v17, %v387_v59  ;;  %v2275_v29 = vrot.slane %v2274_v18, 4  ;;  %v258_v54 = vld [vmem:[%s7466_s21 + $0x30] sm:$0xf]  ;;  %v259_v59 = vld [vmem:[%s7466_s21 + $0x34] sm:$0xf] }
  0x30   : > { %6489 = vmatpush3.bf16.msra.mxu1 %v7185_v3  ;;  %v7191_v3 = vld [vmem:[%s9249_s1 + $0x10] sm:$0xff]   ;;  %v5735_v6 = vcombine.low %v2256_v53, %v2266_v61  ;;  %v2289_v22 = vrot.slane %v2287_v14, 5  ;;  %v2284_v30 = vor.u32 %v2283_v19, %v2279_v13  ;;  %v395_v31 = vrot.slane %v393_v20, 5  ;;  %v7199_v14 = vld [vmem:[%s9249_s1 + $0x28] sm:$0xff]   ;;  %v7616_v19 = vld [vmem:[%s7466_s21 + $0x40] sm:$0xf] }
  0x31   : > { %6490 = vmatprep.subr.bf16.mxu1 %v7188_v46  ;;  %v5496_v35 = vcombine.low %v378_v21, %v388_v28  ;;  %v401_v38 = vrot.slane %v399_v26, 5  ;;  %v403_v39 = vshrl.u32 %v257_v5, 16  ;;  %v409_v40 = vshll.u32 %v301_v11, 16  ;;  %v7192_v20 = vld [vmem:[%s9249_s1 + $0x160] sm:$0xff]  }
  0x32   : > { %6649 = vmatmul.mubr.bf16.vlgmr.msra.gmra.mrb[0].mxu0 %v5735_v6  ;;  %v2280_v42 = vsel %vm7498_vm2, %v2275_v29, %v2279_v13  ;;  %v2285_v43 = vrot.slane %v2284_v30, 4  ;;  %v396_v44 = vor.u32 %v395_v31, %v392_v25  ;;  %v2292_v47 = vshrl.u32 %v5679_v16, 16  ;;  %v7624_v28 = vld [vmem:[%s7466_s21 + $0x44] sm:$0x1] }
  0x33   : > { %6681 = vmatpush3.bf16.msra.mxu0 %v7523_v4  ;;  %v7189_v4 = vld [vmem:[%s9249_s1 + $0x150] sm:$0xff]   ;;  %6460 = vmatprep.mubr.bf16.mxu1 %v5496_v35  ;;  %v405_v49 = vrot.slane %v403_v39, 4  ;;  %v411_v50 = vrot.slane %v409_v40, 5  ;;  %v2295_v52 = vshll.u32 %v5679_v16, 16  ;;  %v2301_v53 = vshll.u32 %v7582_v33, 16 }
  0x34   : > { %6491 = vmatpush3.bf16.msra.mxu1 %v7188_v46  ;;  %6682 = vmatprep.subr.bf16.mxu0 %v7187_v63  ;;  %v7593_v46 = vld [vmem:[%s7466_s21 + $0x38] sm:$0x1]  ;;  %v2290_v55 = vsel %vm7498_vm2, %v2285_v43, %v2289_v22  ;;  %v397_v56 = vrot.slane %v396_v44, 4  ;;  %v2294_v57 = vrot.slane %v2292_v47, 4  ;;  %v2305_v58 = vshrl.u32 %v7582_v33, 16  ;;  %v7201_v35 = vld [vmem:[%s9249_s1 + $0x30] sm:$0xff]  }
  0x35   : > { %6492 = vmatprep.subr.bf16.mxu1 %v7191_v3  ;;  %v5736_v61 = vcombine.low %v2280_v42, %v2290_v55  ;;  %v2297_v0 = vrot.slane %v2295_v52, 5  ;;  %v2303_v1 = vrot.slane %v2301_v53, 5  ;;  %v2311_v6 = vshll.u32 %v7593_v46, 16  ;;  %v261_v55 = vld [vmem:[%s7466_s21 + $0x40] sm:$0xf] }
  0x36   : > { %v402_v5 = vsel %vm7498_vm2, %v397_v56, %v401_v38  ;;  %v414_v7 = vshrl.u32 %v258_v54, 16  ;;  %v417_v12 = vshll.u32 %v258_v54, 16  ;;  %v423_v13 = vshll.u32 %v259_v59, 16 }
  0x37   : > { %6683 = vmatpush3.bf16.msra.mxu0 %v7187_v63  ;;  %v406_v63 = vor.u32 %v405_v49, %v401_v38  ;;  %6652 = vmatprep.mubr.bf16.mxu0 %v5736_v61  ;;  %v2298_v11 = vor.u32 %v2297_v0, %v2294_v57  ;;  %v2313_v16 = vrot.slane %v2311_v6, 5  ;;  %v427_v18 = vshrl.u32 %v259_v59, 16 }
  0x38   : > { %6493 = vmatpush3.bf16.msra.mxu1 %v7191_v3  ;;  %6684 = vmatprep.subr.bf16.mxu0 %v7189_v4  ;;  %v2307_v3 = vrot.slane %v2305_v58, 4  ;;  %v416_v17 = vrot.slane %v414_v7, 4  ;;  %v419_v25 = vrot.slane %v417_v12, 5  ;;  %v425_v26 = vrot.slane %v423_v13, 5 }
  0x39   : > { %6494 = vmatprep.subr.bf16.mxu1 %v7194_v34  ;;  %v407_v10 = vrot.slane %v406_v63, 4  ;;  %v2299_v22 = vrot.slane %v2298_v11, 4  ;;  %v429_v31 = vrot.slane %v427_v18, 4  ;;  %v2316_v40 = vshrl.u32 %v5682_v9, 16  ;;  %v303_v63 = vld [vmem:[%s7466_s21 + $0x44] sm:$0x1] }
  0x3a   : > { %v2308_v15 = vor.u32 %v2307_v3, %v2303_v1  ;;  %v420_v39 = vor.u32 %v419_v25, %v416_v17  ;;  %v2319_v42 = vshll.u32 %v5682_v9, 16  ;;  %v2325_v49 = vshll.u32 %v7616_v19, 16  ;;  %v5685_v9 = vld [vmem:[%s7466_s21 + $0x48] sm:$0xf] }
  0x3b   : > { %6685 = vmatpush3.bf16.msra.mxu0 %v7189_v4  ;;  %v412_v21 = vsel %vm7498_vm2, %v407_v10, %v411_v50  ;;  %v433_v4 = vshll.u32 %v302_v2, 16  ;;  %v2304_v38 = vsel %vm7498_vm2, %v2299_v22, %v2303_v1  ;;  %v430_v44 = vor.u32 %v429_v31, %v425_v26  ;;  %v7203_v2 = vld [vmem:[%s9249_s1 + $0x38] sm:$0xff]   ;;  %v7657_v22 = vld [vmem:[%s7466_s21 + $0x50] sm:$0x1] }
  0x3c   : > { %6495 = vmatpush3.bf16.msra.mxu1 %v7194_v34  ;;  %6686 = vmatprep.subr.bf16.mxu0 %v7190_v48  ;;  %v5497_v29 = vcombine.low %v402_v5, %v412_v21  ;;  %v2309_v30 = vrot.slane %v2308_v15, 4  ;;  %v260_v34 = vld [vmem:[%s7466_s21 + $0x3c] sm:$0xf]  ;;  %v421_v52 = vrot.slane %v420_v39, 4  ;;  %v2318_v53 = vrot.slane %v2316_v40, 4  ;;  %v7195_v15 = vld [vmem:[%s9249_s1 + $0x170] sm:$0xff]  }
  0x3d   : > { %6496 = vmatprep.subr.bf16.mxu1 %v7197_v60  ;;  %v435_v47 = vrot.slane %v433_v4, 5  ;;  %v2321_v54 = vrot.slane %v2319_v42, 5  ;;  %v431_v56 = vrot.slane %v430_v44, 4  ;;  %v2327_v57 = vrot.slane %v2325_v49, 5  ;;  %v7196_v31 = vld [vmem:[%s9249_s1 + $0x178] sm:$0xff]   ;;  %v7668_v4 = vld [vmem:[%s9249_s1 + $0x80] sm:$0xff]  }
  0x3e   : > { %6461 = vmatmul.mubr.bf16.gmra.mrb[4].mxu1 %v5497_v29  ;;  %v2314_v43 = vsel %vm7498_vm2, %v2309_v30, %v2313_v16  ;;  %v2329_v58 = vshrl.u32 %v7616_v19, 16  ;;  %v2335_v59 = vshll.u32 %v7624_v28, 16  ;;  %v438_v0 = vshrl.u32 %v260_v34, 16  ;;  %v262_v30 = vld [vmem:[%s7466_s21 + $0x48] sm:$0xf] }
  0x3f   : > { %6687 = vmatpush3.bf16.msra.mxu0 %v7190_v48  ;;  %v5737_v50 = vcombine.low %v2304_v38, %v2314_v43  ;;  %v7193_v48 = vld [vmem:[%s9249_s1 + $0x168] sm:$0xff]   ;;  %v2322_v61 = vor.u32 %v2321_v54, %v2318_v53  ;;  %v441_v1 = vshll.u32 %v260_v34, 16  ;;  %v436_v5 = vsel %vm7498_vm2, %v431_v56, %v435_v47  ;;  %v304_v54 = vld [vmem:[%s7466_s21 + $0x50] sm:$0x1] }
  0x40   : > { %6497 = vmatpush3.bf16.msra.mxu1 %v7197_v60  ;;  %6688 = vmatprep.subr.bf16.mxu0 %v7192_v20  ;;  %v426_v60 = vsel %vm7498_vm2, %v421_v52, %v425_v26  ;;  %v2331_v3 = vrot.slane %v2329_v58, 4  ;;  %v2337_v6 = vrot.slane %v2335_v59, 5  ;;  %v447_v7 = vshll.u32 %v261_v55, 16  ;;  %v263_v53 = vld [vmem:[%s7466_s21 + $0x4c] sm:$0xf] }
  0x41   : > { %6498 = vmatprep.subr.bf16.mxu1 %v7199_v14  ;;  %6653 = vmatmul.mubr.bf16.gmra.mrb[4].mxu0 %v5737_v50  ;;  %v5498_v10 = vcombine.low %v426_v60, %v436_v5  ;;  %v2323_v11 = vrot.slane %v2322_v61, 4  ;;  %v440_v12 = vrot.slane %v438_v0, 4  ;;  %v443_v13 = vrot.slane %v441_v1, 5  ;;  %v5688_v58 = vld [vmem:[%s7466_s21 + $0x54] sm:$0xf] }
  0x42   : > { %v2332_v16 = vor.u32 %v2331_v3, %v2327_v57  ;;  %v449_v17 = vrot.slane %v447_v7, 5  ;;  %v451_v18 = vshrl.u32 %v261_v55, 16  ;;  %v457_v21 = vshll.u32 %v303_v63, 16  ;;  %v7682_v0 = vld [vmem:[%s7466_s21 + $0x58] sm:$0xf] }
  0x43   : > { %6689 = vmatpush3.bf16.msra.mxu0 %v7192_v20  ;;  %6464 = vmatprep.mubr.bf16.mxu1 %v5498_v10  ;;  %v2328_v20 = vsel %vm7498_vm2, %v2323_v11, %v2327_v57  ;;  %v444_v25 = vor.u32 %v443_v13, %v440_v12  ;;  %v2340_v26 = vshrl.u32 %v5685_v9, 16  ;;  %v2343_v29 = vshll.u32 %v5685_v9, 16 }
  0x44   : > { %6499 = vmatpush3.bf16.msra.mxu1 %v7199_v14  ;;  %v7651_v14 = vld [vmem:[%s7466_s21 + $0x4c] sm:$0xf]  ;;  %6690 = vmatprep.subr.bf16.mxu0 %v7193_v48  ;;  %v2333_v34 = vrot.slane %v2332_v16, 4  ;;  %v459_v38 = vrot.slane %v457_v21, 5  ;;  %v2359_v52 = vshll.u32 %v7657_v22, 16  ;;  %v462_v61 = vshrl.u32 %v262_v30, 16 }
  0x45   : > { %6500 = vmatprep.subr.bf16.mxu1 %v7201_v35  ;;  %v2349_v39 = vshll.u32 %v7651_v14, 16  ;;  %v445_v40 = vrot.slane %v444_v25, 4  ;;  %v2342_v42 = vrot.slane %v2340_v26, 4  ;;  %v2345_v43 = vrot.slane %v2343_v29, 5 }
  0x46   : > { %v2353_v44 = vshrl.u32 %v7651_v14, 16  ;;  %v2338_v47 = vsel %vm7498_vm2, %v2333_v34, %v2337_v6  ;;  %v2361_v60 = vrot.slane %v2359_v52, 5  ;;  %v465_v63 = vshll.u32 %v262_v30, 16  ;;  %v7687_v6 = vld [vmem:[%s9249_s1 + $0x180] sm:$0xff]  }
  0x47   : > { %6691 = vmatpush3.bf16.msra.mxu0 %v7193_v48  ;;  %v2351_v50 = vrot.slane %v2349_v39, 5  ;;  %v5738_v55 = vcombine.low %v2328_v20, %v2338_v47  ;;  %v450_v48 = vsel %vm7498_vm2, %v445_v40, %v449_v17  ;;  %v2346_v56 = vor.u32 %v2345_v43, %v2342_v42  ;;  %v7694_v20 = vld [vmem:[%s7466_s21 + $0x5c] sm:$0x1]  ;;  %v265_v43 = vld [vmem:[%s7466_s21 + $0x58] sm:$0xf] }
  0x48   : > { %6501 = vmatpush3.bf16.msra.mxu1 %v7201_v35  ;;  %v453_v35 = vrot.slane %v451_v18, 4  ;;  %6692 = vmatprep.subr.bf16.mxu0 %v7195_v15  ;;  %v2355_v57 = vrot.slane %v2353_v44, 4  ;;  %v475_v3 = vshrl.u32 %v263_v53, 16  ;;  %v464_v9 = vrot.slane %v462_v61, 4  ;;  %v5691_v52 = vld [vmem:[%s7466_s21 + $0x60] sm:$0xf] }
  0x49   : > { %6502 = vmatprep.subr.bf16.mxu1 %v7203_v2  ;;  %6656 = vmatprep.mubr.bf16.mxu0 %v5738_v55  ;;  %v2347_v1 = vrot.slane %v2346_v56, 4  ;;  %v467_v10 = vrot.slane %v465_v63, 5  ;;  %v481_v11 = vshll.u32 %v304_v54, 16  ;;  %v2364_v25 = vshrl.u32 %v5688_v58, 16 }
  0x4a   : > { %v454_v49 = vor.u32 %v453_v35, %v449_v17  ;;  %v2356_v5 = vor.u32 %v2355_v57, %v2351_v50  ;;  %v477_v18 = vrot.slane %v475_v3, 4  ;;  %v2367_v29 = vshll.u32 %v5688_v58, 16  ;;  %v264_v35 = vld [vmem:[%s7466_s21 + $0x54] sm:$0xf] }
  0x4b   : > { %6693 = vmatpush3.bf16.msra.mxu0 %v7195_v15  ;;  %v2352_v13 = vsel %vm7498_vm2, %v2347_v1, %v2351_v50  ;;  %v468_v17 = vor.u32 %v467_v10, %v464_v9  ;;  %v483_v21 = vrot.slane %v481_v11, 5  ;;  %v2373_v30 = vshll.u32 %v7682_v0, 16  ;;  %v305_v50 = vld [vmem:[%s7466_s21 + $0x5c] sm:$0x1] }
  0x4c   : > { %6503 = vmatpush3.bf16.msra.mxu1 %v7203_v2  ;;  %v455_v59 = vrot.slane %v454_v49, 4  ;;  %v471_v2 = vshll.u32 %v263_v53, 16  ;;  %6694 = vmatprep.subr.bf16.mxu0 %v7196_v31  ;;  %v2357_v15 = vrot.slane %v2356_v5, 4  ;;  %v2377_v34 = vshrl.u32 %v7682_v0, 16 }
  0x4d   : > { %6536 = vmatprep.subr.bf16.mxu1 %v7668_v4  ;;  %v469_v39 = vrot.slane %v468_v17, 4  ;;  %v2366_v42 = vrot.slane %v2364_v25, 4  ;;  %v2375_v44 = vrot.slane %v2373_v30, 5  ;;  %v2383_v49 = vshll.u32 %v7694_v20, 16  ;;  %v7718_v17 = vld [vmem:[%s7466_s21 + $0x68] sm:$0x1] }
  0x4e   : > { %v460_v7 = vsel %vm7498_vm2, %v455_v59, %v459_v38  ;;  %v473_v16 = vrot.slane %v471_v2, 5  ;;  %v2362_v26 = vsel %vm7498_vm2, %v2357_v15, %v2361_v60  ;;  %v2379_v47 = vrot.slane %v2377_v34, 4  ;;  %v7709_v60 = vld [vmem:[%s7466_s21 + $0x64] sm:$0xf]  ;;  %v7722_v25 = vld [vmem:[%s7466_s21 + $0x60] sm:$0xf] }
  0x4f   : > { %v5499_v12 = vcombine.low %v450_v48, %v460_v7  ;;  %6695 = vmatpush3.bf16.msra.mxu0 %v7196_v31  ;;  %v5739_v38 = vcombine.low %v2352_v13, %v2362_v26  ;;  %v2369_v31 = vrot.slane %v2367_v29, 5  ;;  %v486_v55 = vshrl.u32 %v264_v35, 16 }
  0x50   : > { %6728 = vmatprep.subr.bf16.mxu0 %v7687_v6  ;;  %v478_v40 = vor.u32 %v477_v18, %v473_v16  ;;  %v474_v53 = vsel %vm7498_vm2, %v469_v39, %v473_v16  ;;  %v489_v48 = vshll.u32 %v264_v35, 16  ;;  %v2380_v57 = vor.u32 %v2379_v47, %v2375_v44  ;;  %v7725_v35 = vld [vmem:[%s7466_s21 + $0x64] sm:$0xf] }
  0x51   : > { %6465 = vmatmul.mubr.bf16.gmra.mrb[8].mxu1 %v5499_v12  ;;  %6657 = vmatmul.mubr.bf16.gmra.mrb[8].mxu0 %v5739_v38  ;;  %v2370_v56 = vor.u32 %v2369_v31, %v2366_v42  ;;  %v2385_v58 = vrot.slane %v2383_v49, 5  ;;  %v495_v59 = vshll.u32 %v265_v43, 16  ;;  %v488_v63 = vrot.slane %v486_v55, 4 }
  0x52   : > { %v479_v54 = vrot.slane %v478_v40, 4  ;;  %v491_v1 = vrot.slane %v489_v48, 5  ;;  %v499_v5 = vshrl.u32 %v265_v43, 16  ;;  %v2381_v7 = vrot.slane %v2380_v57, 4  ;;  %v306_v43 = vld [vmem:[%s7466_s21 + $0x68] sm:$0x1] }
  0x53   : > { %v2371_v3 = vrot.slane %v2370_v56, 4  ;;  %v497_v9 = vrot.slane %v495_v59, 5  ;;  %v505_v12 = vshll.u32 %v305_v50, 16  ;;  %v2388_v13 = vshrl.u32 %v5691_v52, 16  ;;  %v5758_v50 = vld [vmem:[%s7466_s21 + $0xc] sm:$0xe] }
  0x54   : > { %v484_v61 = vsel %vm7498_vm2, %v479_v54, %v483_v21  ;;  %v492_v10 = vor.u32 %v491_v1, %v488_v63  ;;  %v501_v11 = vrot.slane %v499_v5, 4  ;;  %v2386_v16 = vsel %vm7498_vm2, %v2381_v7, %v2385_v58  ;;  %v7740_v5 = vld [vmem:[%s7466_s21 + $0x6c] sm:$0xf] }
  0x55   : > { %v5500_v2 = vcombine.low %v474_v53, %v484_v61  ;;  %v2376_v15 = vsel %vm7498_vm2, %v2371_v3, %v2375_v44  ;;  %v2391_v18 = vshll.u32 %v5691_v52, 16  ;;  %v2397_v21 = vshll.u32 %v7709_v60, 16 }
  0x56   : > { %v5740_v26 = vcombine.low %v2376_v15, %v2386_v16  ;;  %v493_v29 = vrot.slane %v492_v10, 4  ;;  %v502_v30 = vor.u32 %v501_v11, %v497_v9  ;;  %v507_v34 = vrot.slane %v505_v12, 5 }
  0x57   : > { %6468 = vmatprep.mubr.bf16.mxu1 %v5500_v2  ;;  %v2390_v38 = vrot.slane %v2388_v13, 4  ;;  %v2393_v39 = vrot.slane %v2391_v18, 5  ;;  %v2399_v40 = vrot.slane %v2397_v21, 5  ;;  %v2401_v42 = vshrl.u32 %v7709_v60, 16  ;;  %v7752_v21 = vld [vmem:[%s7466_s21 + $0x70] sm:$0xf] }
  0x58   : > { %6660 = vmatprep.mubr.bf16.mxu0 %v5740_v26  ;;  %v498_v31 = vsel %vm7498_vm2, %v493_v29, %v497_v9  ;;  %v503_v44 = vrot.slane %v502_v30, 4  ;;  %v2407_v47 = vshll.u32 %v7718_v17, 16  ;;  %v510_v49 = vshrl.u32 %v7722_v25, 16  ;;  %v7287_v9 = vld [vmem:[%s7466_s21 + $0xb4] sm:$0xff]  }
  0x59   : > { %v2394_v52 = vor.u32 %v2393_v39, %v2390_v38  ;;  %v2403_v53 = vrot.slane %v2401_v42, 4  ;;  %v513_v54 = vshll.u32 %v7722_v25, 16  ;;  %v519_v55 = vshll.u32 %v7725_v35, 16 }
  0x5a   : > { %v508_v48 = vsel %vm7498_vm2, %v503_v44, %v507_v34  ;;  %v2409_v56 = vrot.slane %v2407_v47, 5  ;;  %v512_v57 = vrot.slane %v510_v49, 4  ;;  %v523_v58 = vshrl.u32 %v7725_v35, 16  ;;  %v7763_v47 = vld [vmem:[%s7466_s21 + $0x78] sm:$0xf] }
  0x5b   : > { %v5501_v59 = vcombine.low %v498_v31, %v508_v48  ;;  %v2395_v61 = vrot.slane %v2394_v52, 4  ;;  %v2404_v63 = vor.u32 %v2403_v53, %v2399_v40  ;;  %v515_v1 = vrot.slane %v513_v54, 5  ;;  %v7774_v54 = vld [vmem:[%s7466_s21 + $0x7c] sm:$0xf] }
  0x5c   : > { %v521_v2 = vrot.slane %v519_v55, 5  ;;  %v525_v3 = vrot.slane %v523_v58, 4  ;;  %v529_v7 = vshll.u32 %v306_v43, 16  ;;  %v5774_v10 = vrot.slane %v5758_v50, 9  ;;  %v308_v58 = vld [vmem:[%s7466_s21 + $0x80] sm:$0x1] }
  0x5d   : > { %6469 = vmatmul.mubr.bf16.gmra.mrb[12].mxu1 %v5501_v59  ;;  %v2400_v11 = vsel %vm7498_vm2, %v2395_v61, %v2399_v40  ;;  %v2405_v12 = vrot.slane %v2404_v63, 4  ;;  %v516_v13 = vor.u32 %v515_v1, %v512_v57  ;;  %v2991_v15 = vrot.slane %v7479_v23, 5  ;;  %v307_v40 = vld [vmem:[%s7466_s21 + $0x74] sm:$0x1]  ;;  %v5759_v23 = vld [vmem:[%s7466_s21 + $0x18] sm:$0xe] }
  0x5e   : > { %v526_v16 = vor.u32 %v525_v3, %v521_v2  ;;  %v531_v18 = vrot.slane %v529_v7, 5  ;;  %v534_v26 = vshrl.u32 %v7740_v5, 16  ;;  %v537_v29 = vshll.u32 %v7740_v5, 16 }
  0x5f   : > { %v2410_v30 = vsel %vm7498_vm2, %v2405_v12, %v2409_v56  ;;  %v517_v34 = vrot.slane %v516_v13, 4  ;;  %v2992_v38 = vsel %vm7744_vm5, %v5774_v10, %v2991_v15  ;;  %v2993_v39 = vrot.slane %v2991_v15, 4  ;;  %v5760_v13 = vld [vmem:[%s7466_s21 + $0x24] sm:$0xe] }
  0x60   : > { %v5741_v42 = vcombine.low %v2400_v11, %v2410_v30  ;;  %v527_v43 = vrot.slane %v526_v16, 4  ;;  %v536_v31 = vrot.slane %v534_v26, 4  ;;  %v539_v44 = vrot.slane %v537_v29, 5  ;;  %v7796_v16 = vld [vmem:[%s7466_s21 + $0x84] sm:$0xf]  ;;  %v7200_v29 = vld [vmem:[%s9249_s1 + $0x188] sm:$0xff]  }
  0x61   : > { %v522_v49 = vsel %vm7498_vm2, %v517_v34, %v521_v2  ;;  %v2995_v50 = vsel %vm7744_vm5, %v2993_v39, %v2994_v41  ;;  %v543_v52 = vshll.u32 %v7752_v21, 16  ;;  %v547_v53 = vshrl.u32 %v7752_v21, 16 }
  0x62   : > { %6661 = vmatmul.mubr.bf16.gmra.mrb[12].mxu0 %v5741_v42  ;;  %v532_v55 = vsel %vm7498_vm2, %v527_v43, %v531_v18  ;;  %v5806_v48 = vcombine.low %v2992_v38, %v2995_v50  ;;  %v540_v56 = vor.u32 %v539_v44, %v536_v31  ;;  %v553_v57 = vshll.u32 %v307_v40, 16  ;;  %v7804_v40 = vld [vmem:[%s7466_s21 + $0x88] sm:$0xf]  ;;  %v309_v31 = vld [vmem:[%s7466_s21 + $0x8c] sm:$0x1] }
  0x63   : > { %v5502_v59 = vcombine.low %v522_v49, %v532_v55  ;;  %v545_v24 = vrot.slane %v543_v52, 5  ;;  %v549_v61 = vrot.slane %v547_v53, 4  ;;  %v5775_v63 = vrot.slane %v5759_v23, 9 }
  0x64   : > { %6696 = vmatprep.mubr.bf16.mxu0 %v5806_v48  ;;  %v541_v41 = vrot.slane %v540_v56, 4  ;;  %v555_v1 = vrot.slane %v553_v57, 5  ;;  %v3002_v2 = vsel %vm7744_vm5, %v7547_v36, %v3001_v32  ;;  %v558_v3 = vshrl.u32 %v7763_v47, 16 }
  0x65   : > { %6472 = vmatprep.mubr.bf16.mxu1 %v5502_v59  ;;  %v550_v7 = vor.u32 %v549_v61, %v545_v24  ;;  %v2999_v10 = vsel %vm7744_vm5, %v5775_v63, %v2998_v27  ;;  %v561_v11 = vshll.u32 %v7763_v47, 16  ;;  %v567_v12 = vshll.u32 %v7774_v54, 16 }
  0x66   : > { %v546_v8 = vsel %vm7498_vm2, %v541_v41, %v545_v24  ;;  %v5807_v15 = vcombine.low %v2999_v10, %v3002_v2  ;;  %v560_v32 = vrot.slane %v558_v3, 4  ;;  %v571_v36 = vshrl.u32 %v7774_v54, 16  ;;  %v7825_v2 = vld [vmem:[%s7466_s21 + $0x90] sm:$0xf]  ;;  %v7828_v3 = vld [vmem:[%s7466_s21 + $0x94] sm:$0xf] }
  0x67   : > { %v551_v62 = vrot.slane %v550_v7, 4  ;;  %v563_v18 = vrot.slane %v561_v11, 5  ;;  %v569_v26 = vrot.slane %v567_v12, 5  ;;  %v577_v27 = vshll.u32 %v308_v58, 16 }
  0x68   : > { %v573_v30 = vrot.slane %v571_v36, 4  ;;  %v5776_v34 = vrot.slane %v5760_v13, 9  ;;  %v3005_v38 = vrot.slane %v7551_v45, 5  ;;  %v3008_v39 = vrot.slane %v7557_v51, 5  ;;  %v5761_v45 = vld [vmem:[%s7466_s21 + $0x30] sm:$0xe] }
  0x69   : > { %v556_v23 = vsel %vm7498_vm2, %v551_v62, %v555_v1  ;;  %v564_v42 = vor.u32 %v563_v18, %v560_v32  ;;  %v579_v43 = vrot.slane %v577_v27, 5  ;;  %v582_v44 = vshrl.u32 %v7796_v16, 16  ;;  %v310_v62 = vld [vmem:[%s7466_s21 + $0x98] sm:$0x1] }
  0x6a   : > { %v5503_v49 = vcombine.low %v546_v8, %v556_v23  ;;  %6697 = vmatmul.mubr.bf16.vlgmr.msra.gmra.mrb[0].mxu0 %v5807_v15  ;;  %v574_v50 = vor.u32 %v573_v30, %v569_v26  ;;  %v3006_v52 = vsel %vm7744_vm5, %v5776_v34, %v3005_v38  ;;  %v3007_v53 = vrot.slane %v3005_v38, 4  ;;  %v7204_v30 = vld [vmem:[%s9249_s1 + $0x198] sm:$0xff]  }
  0x6b   : > { %6729 = vmatpush3.bf16.msra.mxu0 %v7687_v6  ;;  %v565_v51 = vrot.slane %v564_v42, 4  ;;  %v584_v55 = vrot.slane %v582_v44, 4  ;;  %v585_v48 = vshll.u32 %v7796_v16, 16  ;;  %v591_v56 = vshll.u32 %v7804_v40, 16  ;;  %v7202_v6 = vld [vmem:[%s9249_s1 + $0x190] sm:$0xff]  }
  0x6c   : > { %6473 = vmatmul.mubr.bf16.gmra.mrb[16].mxu1 %v5503_v49  ;;  %v575_v57 = vrot.slane %v574_v50, 4  ;;  %v3009_v58 = vsel %vm7744_vm5, %v3007_v53, %v3008_v39  ;;  %v595_v59 = vshrl.u32 %v7804_v40, 16  ;;  %v601_v24 = vshll.u32 %v309_v31, 16  ;;  %6730 = vmatprep.subr.bf16.mxu0 %v7200_v29  ;;  %v5762_v38 = vld [vmem:[%s7466_s21 + $0x3c] sm:$0xe] }
  0x6d   : > { %v570_v61 = vsel %vm7498_vm2, %v565_v51, %v569_v26  ;;  %v5808_v63 = vcombine.low %v3006_v52, %v3009_v58  ;;  %v587_v41 = vrot.slane %v585_v48, 5  ;;  %v593_v1 = vrot.slane %v591_v56, 5  ;;  %v7846_v31 = vld [vmem:[%s7466_s21 + $0x9c] sm:$0xf]  ;;  %v7855_v48 = vld [vmem:[%s7466_s21 + $0xa0] sm:$0xf] }
  0x6e   : > { %v580_v7 = vsel %vm7498_vm2, %v575_v57, %v579_v43  ;;  %v597_v10 = vrot.slane %v595_v59, 4  ;;  %v603_v11 = vrot.slane %v601_v24, 5  ;;  %v5777_v12 = vrot.slane %v5761_v45, 9  ;;  %v7208_v56 = vld [vmem:[%s9249_s1 + $0x1a0] sm:$0xff]  }
  0x6f   : > { %v5504_v13 = vcombine.low %v570_v61, %v580_v7  ;;  %6700 = vmatprep.mubr.bf16.mxu0 %v5808_v63  ;;  %v588_v8 = vor.u32 %v587_v41, %v584_v55  ;;  %v3012_v15 = vrot.slane %v7582_v33, 5  ;;  %v3015_v32 = vrot.slane %v7593_v46, 5  ;;  %6731 = vmatpush3.bf16.msra.mxu0 %v7200_v29  ;;  %v311_v61 = vld [vmem:[%s7466_s21 + $0xa4] sm:$0x1] }
  0x70   : > { %v598_v36 = vor.u32 %v597_v10, %v593_v1  ;;  %v606_v18 = vshrl.u32 %v7825_v2, 16  ;;  %v609_v26 = vshll.u32 %v7825_v2, 16  ;;  %v615_v27 = vshll.u32 %v7828_v3, 16  ;;  %6732 = vmatprep.subr.bf16.mxu0 %v7202_v6 }
  0x71   : > { %6476 = vmatprep.mubr.bf16.mxu1 %v5504_v13  ;;  %v589_v34 = vrot.slane %v588_v8, 4  ;;  %v3013_v33 = vsel %vm7744_vm5, %v5777_v12, %v3012_v15  ;;  %v3014_v46 = vrot.slane %v3012_v15, 4  ;;  %v619_v29 = vshrl.u32 %v7828_v3, 16  ;;  %v5763_v15 = vld [vmem:[%s7466_s21 + $0x48] sm:$0xe] }
  0x72   : > { %v599_v39 = vrot.slane %v598_v36, 4  ;;  %v608_v23 = vrot.slane %v606_v18, 4  ;;  %v611_v42 = vrot.slane %v609_v26, 5  ;;  %v617_v43 = vrot.slane %v615_v27, 5  ;;  %v7880_v27 = vld [vmem:[%s7466_s21 + $0xa8] sm:$0xf] }
  0x73   : > { %v594_v44 = vsel %vm7498_vm2, %v589_v34, %v593_v1  ;;  %v3016_v49 = vsel %vm7744_vm5, %v3014_v46, %v3015_v32  ;;  %v621_v50 = vrot.slane %v619_v29, 4  ;;  %v625_v52 = vshll.u32 %v310_v62, 16  ;;  %6733 = vmatpush3.bf16.msra.mxu0 %v7202_v6  ;;  %v7212_v32 = vld [vmem:[%s9249_s1 + $0x1a8] sm:$0xff]  }
  0x74   : > { %v604_v53 = vsel %vm7498_vm2, %v599_v39, %v603_v11  ;;  %v5809_v45 = vcombine.low %v3013_v33, %v3016_v49  ;;  %v612_v51 = vor.u32 %v611_v42, %v608_v23  ;;  %v5778_v55 = vrot.slane %v5762_v38, 9  ;;  %6734 = vmatprep.subr.bf16.mxu0 %v7204_v30  ;;  %v7883_v29 = vld [vmem:[%s7466_s21 + $0xac] sm:$0xf] }
  0x75   : > { %v5505_v57 = vcombine.low %v594_v44, %v604_v53  ;;  %v622_v58 = vor.u32 %v621_v50, %v617_v43  ;;  %v627_v59 = vrot.slane %v625_v52, 5  ;;  %v3019_v24 = vrot.slane %v7616_v19, 5  ;;  %v5764_v53 = vld [vmem:[%s7466_s21 + $0x54] sm:$0xe] }
  0x76   : > { %6701 = vmatmul.mubr.bf16.gmra.mrb[4].mxu0 %v5809_v45  ;;  %v613_v6 = vrot.slane %v612_v51, 4  ;;  %v3022_v63 = vrot.slane %v7624_v28, 5  ;;  %v630_v41 = vshrl.u32 %v7846_v31, 16  ;;  %v633_v1 = vshll.u32 %v7846_v31, 16  ;;  %v7216_v45 = vld [vmem:[%s9249_s1 + $0x1b0] sm:$0xff]  }
  0x77   : > { %6477 = vmatmul.mubr.bf16.gmra.mrb[20].mxu1 %v5505_v57  ;;  %v623_v7 = vrot.slane %v622_v58, 4  ;;  %v3020_v10 = vsel %vm7744_vm5, %v5778_v55, %v3019_v24  ;;  %v3021_v11 = vrot.slane %v3019_v24, 4  ;;  %v639_v12 = vshll.u32 %v7855_v48, 16  ;;  %6735 = vmatpush3.bf16.msra.mxu0 %v7204_v30 }
  0x78   : > { %v618_v19 = vsel %vm7498_vm2, %v613_v6, %v617_v43  ;;  %v632_v13 = vrot.slane %v630_v41, 4  ;;  %v635_v28 = vrot.slane %v633_v1, 5  ;;  %v643_v8 = vshrl.u32 %v7855_v48, 16  ;;  %6736 = vmatprep.subr.bf16.mxu0 %v7208_v56  ;;  %v312_v43 = vld [vmem:[%s7466_s21 + $0xb0] sm:$0x1] }
  0x79   : > { %v628_v36 = vsel %vm7498_vm2, %v623_v7, %v627_v59  ;;  %v3023_v62 = vsel %vm7744_vm5, %v3021_v11, %v3022_v63  ;;  %v641_v18 = vrot.slane %v639_v12, 5  ;;  %v649_v26 = vshll.u32 %v311_v61, 16  ;;  %v7903_v41 = vld [vmem:[%s7466_s21 + $0xb4] sm:$0xf]  ;;  %v7908_v12 = vld [vmem:[%s7466_s21 + $0xb8] sm:$0xf] }
  0x7a   : > { %v5506_v30 = vcombine.low %v618_v19, %v628_v36  ;;  %v5810_v34 = vcombine.low %v3020_v10, %v3023_v62  ;;  %v636_v33 = vor.u32 %v635_v28, %v632_v13  ;;  %v645_v46 = vrot.slane %v643_v8, 4  ;;  %v313_v19 = vld [vmem:[%s7466_s21 + $0xbc] sm:$0x1] }
  0x7b   : > { %v651_v38 = vrot.slane %v649_v26, 5  ;;  %v5779_v39 = vrot.slane %v5763_v15, 9  ;;  %v3026_v23 = vrot.slane %v7651_v14, 5  ;;  %v3029_v42 = vrot.slane %v7657_v22, 5  ;;  %6737 = vmatpush3.bf16.msra.mxu0 %v7208_v56  ;;  %v7220_v13 = vld [vmem:[%s9249_s1 + $0x1b8] sm:$0xff]  }
  0x7c   : > { %6480 = vmatprep.mubr.bf16.mxu1 %v5506_v30  ;;  %6704 = vmatprep.mubr.bf16.mxu0 %v5810_v34  ;;  %v637_v44 = vrot.slane %v636_v33, 4  ;;  %v646_v49 = vor.u32 %v645_v46, %v641_v18  ;;  %v654_v50 = vshrl.u32 %v7880_v27, 16  ;;  %v657_v52 = vshll.u32 %v7880_v27, 16  ;;  %v5765_v30 = vld [vmem:[%s7466_s21 + $0x60] sm:$0xe] }
  0x7d   : > { %v3027_v14 = vsel %vm7744_vm5, %v5779_v39, %v3026_v23  ;;  %v3028_v22 = vrot.slane %v3026_v23, 4  ;;  %v663_v51 = vshll.u32 %v7883_v29, 16  ;;  %v667_v55 = vshrl.u32 %v7883_v29, 16  ;;  %6738 = vmatprep.subr.bf16.mxu0 %v7212_v32  ;;  %v5695_v39 = vld [vmem:[%s7466_s21 + $0x70] sm:$0xf] }
  0x7e   : > { %v642_v56 = vsel %vm7498_vm2, %v637_v44, %v641_v18  ;;  %v647_v57 = vrot.slane %v646_v49, 4  ;;  %v656_v58 = vrot.slane %v654_v50, 4  ;;  %v659_v59 = vrot.slane %v657_v52, 5  ;;  %v7930_v44 = vld [vmem:[%s9249_s1 + $0x1c0] sm:$0xff]  }
  0x7f   : > { %v3030_v24 = vsel %vm7744_vm5, %v3028_v22, %v3029_v42  ;;  %v665_v61 = vrot.slane %v663_v51, 5  ;;  %v669_v6 = vrot.slane %v667_v55, 4  ;;  %v673_v63 = vshll.u32 %v312_v43, 16  ;;  %6739 = vmatpush3.bf16.msra.mxu0 %v7212_v32  ;;  %v5766_v43 = vld [vmem:[%s7466_s21 + $0x6c] sm:$0xe] }
  0x80   : > { %v652_v1 = vsel %vm7498_vm2, %v647_v57, %v651_v38  ;;  %v5811_v7 = vcombine.low %v3027_v14, %v3030_v24  ;;  %v660_v10 = vor.u32 %v659_v59, %v656_v58  ;;  %v5780_v11 = vrot.slane %v5764_v53, 9  ;;  %6740 = vmatprep.subr.bf16.mxu0 %v7216_v45  ;;  %v5696_v55 = vld [vmem:[%s7466_s21 + $0x74] sm:$0x1]  ;;  %v5767_v24 = vld [vmem:[%s7466_s21 + $0x78] sm:$0xe] }
  0x81   : > { %v5507_v28 = vcombine.low %v642_v56, %v652_v1  ;;  %v670_v8 = vor.u32 %v669_v6, %v665_v61  ;;  %v675_v15 = vrot.slane %v673_v63, 5  ;;  %v3033_v32 = vrot.slane %v7682_v0, 5 }
  0x82   : > { %6705 = vmatmul.mubr.bf16.gmra.mrb[8].mxu0 %v5811_v7  ;;  %v661_v36 = vrot.slane %v660_v10, 4  ;;  %v3036_v62 = vrot.slane %v7694_v20, 5  ;;  %v678_v18 = vshrl.u32 %v7903_v41, 16  ;;  %v681_v26 = vshll.u32 %v7903_v41, 16 }
  0x83   : > { %6481 = vmatmul.mubr.bf16.gmra.mrb[24].mxu1 %v5507_v28  ;;  %v671_v34 = vrot.slane %v670_v8, 4  ;;  %v3034_v33 = vsel %vm7744_vm5, %v5780_v11, %v3033_v32  ;;  %v3035_v46 = vrot.slane %v3033_v32, 4  ;;  %v687_v38 = vshll.u32 %v7908_v12, 16  ;;  %6741 = vmatpush3.bf16.msra.mxu0 %v7216_v45  ;;  %v7943_v11 = vld [vmem:[%s7466_s21 + $0x7c] sm:$0xf] }
  0x84   : > { %v666_v0 = vsel %vm7498_vm2, %v661_v36, %v665_v61  ;;  %v680_v20 = vrot.slane %v678_v18, 4  ;;  %v683_v23 = vrot.slane %v681_v26, 5  ;;  %v691_v42 = vshrl.u32 %v7908_v12, 16  ;;  %6742 = vmatprep.subr.bf16.mxu0 %v7220_v13  ;;  %v7289_v36 = vld [vmem:[%s7466_s21] sm:$0xf] }
  0x85   : > { %v676_v49 = vsel %vm7498_vm2, %v671_v34, %v675_v15  ;;  %v3037_v50 = vsel %vm7744_vm5, %v3035_v46, %v3036_v62  ;;  %v689_v52 = vrot.slane %v687_v38, 5  ;;  %v697_v53 = vshll.u32 %v313_v19, 16  ;;  %v5701_v15 = vld [vmem:[%s7466_s21 + $0x88] sm:$0xf]  ;;  %v7958_v62 = vld [vmem:[%s7466_s21 + $0x4] sm:$0xf] }
  0x86   : > { %v5508_v45 = vcombine.low %v666_v0, %v676_v49  ;;  %v5812_v14 = vcombine.low %v3034_v33, %v3037_v50  ;;  %v684_v22 = vor.u32 %v683_v23, %v680_v20  ;;  %v693_v51 = vrot.slane %v691_v42, 4  ;;  %v5702_v26 = vld [vmem:[%s7466_s21 + $0x8c] sm:$0x1]  ;;  %v5705_v23 = vld [vmem:[%s7466_s21 + $0x98] sm:$0x1] }
  0x87   : > { %v699_v56 = vrot.slane %v697_v53, 5  ;;  %v5781_v57 = vrot.slane %v5765_v30, 9  ;;  %v3040_v58 = vrot.slane %v7709_v60, 5  ;;  %v3043_v59 = vrot.slane %v7718_v17, 5  ;;  %6743 = vmatpush3.bf16.msra.mxu0 %v7220_v13  ;;  %v7946_v17 = vld [vmem:[%s7466_s21 + $0x80] sm:$0x1] }
  0x88   : > { %6484 = vmatprep.mubr.bf16.mxu1 %v5508_v45  ;;  %6708 = vmatprep.mubr.bf16.mxu0 %v5812_v14  ;;  %v685_v61 = vrot.slane %v684_v22, 4  ;;  %v694_v6 = vor.u32 %v693_v51, %v689_v52  ;;  %v5782_v63 = vrot.slane %v5766_v43, 9  ;;  %v3047_v1 = vrot.slane %v5695_v39, 5  ;;  %v5768_v30 = vld [vmem:[%s7466_s21 + $0x84] sm:$0xe] }
  0x89   : > { %v3041_v7 = vsel %vm7744_vm5, %v5781_v57, %v3040_v58  ;;  %v3042_v10 = vrot.slane %v3040_v58, 4  ;;  %v3050_v60 = vrot.slane %v5696_v55, 5  ;;  %6776 = vmatprep.subr.bf16.mxu0 %v7930_v44  ;;  %v5518_v18 = vcombine.low %v7289_v36, %v7958_v62  ;;  %v5704_v39 = vld [vmem:[%s7466_s21 + $0x94] sm:$0xf]  ;;  %v5769_v42 = vld [vmem:[%s7466_s21 + $0x90] sm:$0xe] }
  0x8a   : > { %v690_v19 = vsel %vm7498_vm2, %v685_v61, %v689_v52  ;;  %v695_v13 = vrot.slane %v694_v6, 4  ;;  %v3048_v28 = vsel %vm7744_vm5, %v5782_v63, %v3047_v1  ;;  %v3049_v8 = vrot.slane %v3047_v1, 4  ;;  %v5770_v50 = vld [vmem:[%s7466_s21 + $0x9c] sm:$0xe]  ;;  %v5707_v14 = vld [vmem:[%s7466_s21 + $0xa0] sm:$0xf] }
  0x8b   : > { %v3044_v32 = vsel %vm7744_vm5, %v3042_v10, %v3043_v59  ;;  %v5783_v38 = vrot.slane %v5767_v24, 9  ;;  %v3054_v43 = vrot.slane %v7943_v11, 5  ;;  %v3057_v49 = vrot.slane %v7946_v17, 5  ;;  %v5708_v22 = vld [vmem:[%s7466_s21 + $0xa4] sm:$0x1] }
  0x8c   : > { %v700_v34 = vsel %vm7498_vm2, %v695_v13, %v699_v56  ;;  %v5813_v33 = vcombine.low %v3041_v7, %v3044_v32  ;;  %v3051_v46 = vsel %vm7744_vm5, %v3049_v8, %v3050_v60  ;;  %v5784_v52 = vrot.slane %v5768_v30, 9  ;;  %v5710_v59 = vld [vmem:[%s7466_s21 + $0xac] sm:$0xf]  ;;  %v7982_v61 = vld [vmem:[%s7466_s21 + $0x10] sm:$0xf] }
  0x8d   : > { %v5509_v0 = vcombine.low %v690_v19, %v700_v34  ;;  %v5814_v20 = vcombine.low %v3048_v28, %v3051_v46  ;;  %v3061_v53 = vrot.slane %v5701_v15, 5  ;;  %v3064_v45 = vrot.slane %v5702_v26, 5  ;;  %v7291_v24 = vld [vmem:[%s7466_s21 + $0xc] sm:$0xf]  ;;  %v7293_v8 = vld [vmem:[%s7466_s21 + $0x18] sm:$0xf] }
  0x8e   : > { %6709 = vmatmul.mubr.bf16.gmra.mrb[12].mxu0 %v5813_v33  ;;  %v3055_v51 = vsel %vm7744_vm5, %v5783_v38, %v3054_v43  ;;  %v3056_v55 = vrot.slane %v3054_v43, 4  ;;  %v3068_v58 = vrot.slane %v5704_v39, 5  ;;  %v5519_v6 = vcombine.low %v7291_v24, %v7982_v61  ;;  %v7211_v19 = vld [vmem:[%s9249_s1 + $0x88] sm:$0xff]   ;;  %v7994_v15 = vld [vmem:[%s7466_s21 + $0x1c] sm:$0xf] }
  0x8f   : > { %6485 = vmatmul.mubr.bf16.gmra.mrb[28].mxu1 %v5509_v0  ;;  %6712 = vmatprep.mubr.bf16.mxu0 %v5814_v20  ;;  %v3062_v56 = vsel %vm7744_vm5, %v5784_v52, %v3061_v53  ;;  %v3063_v57 = vrot.slane %v3061_v53, 4  ;;  %v5785_v1 = vrot.slane %v5769_v42, 9  ;;  %v3071_v7 = vrot.slane %v5705_v23, 5  ;;  %v5711_v30 = vld [vmem:[%s7466_s21 + $0xb0] sm:$0x1] }
  0x90   : > { %6504 = vmatprep.mubr.bf16.mxu1 %v5518_v18  ;;  %v3058_v63 = vsel %vm7744_vm5, %v3056_v55, %v3057_v49  ;;  %v3070_v13 = vrot.slane %v3068_v58, 4  ;;  %v5786_v28 = vrot.slane %v5770_v50, 9  ;;  %v5520_v32 = vcombine.low %v7293_v8, %v7994_v15  ;;  %v5771_v34 = vld [vmem:[%s7466_s21 + $0xa8] sm:$0xe]  ;;  %v5713_v33 = vld [vmem:[%s7466_s21 + $0xb8] sm:$0xf] }
  0x91   : > { %v5815_v10 = vcombine.low %v3055_v51, %v3058_v63  ;;  %v3065_v60 = vsel %vm7744_vm5, %v3063_v57, %v3064_v45  ;;  %v3075_v18 = vrot.slane %v5707_v14, 5  ;;  %v3078_v26 = vrot.slane %v5708_v22, 5  ;;  %v5714_v20 = vld [vmem:[%s7466_s21 + $0xbc] sm:$0x1]  ;;  %v5772_v23 = vld [vmem:[%s7466_s21 + $0xb4] sm:$0xe] }
  0x92   : > { %v5816_v36 = vcombine.low %v3062_v56, %v3065_v60  ;;  %v3082_v38 = vrot.slane %v5710_v59, 5  ;;  %v3069_v39 = vsel %vm7744_vm5, %v5785_v1, %v3068_v58  ;;  %v3072_v0 = vsel %vm7744_vm5, %v3070_v13, %v3071_v7  ;;  %v7215_v50 = vld [vmem:[%s9249_s1 + $0x90] sm:$0xff]   ;;  %v5716_v53 = vld [vmem:[%s7466_s21 + $0xc4] sm:$0xf]  ;;  %v8017_v51 = vld [vmem:[%s7466_s21 + $0x28] sm:$0xf] }
  0x93   : > { %v3077_v46 = vrot.slane %v3075_v18, 4  ;;  %v3076_v42 = vsel %vm7744_vm5, %v5786_v28, %v3075_v18  ;;  %v3089_v49 = vrot.slane %v5713_v33, 5  ;;  %v5787_v52 = vrot.slane %v5771_v34, 9  ;;  %v7295_v22 = vld [vmem:[%s7466_s21 + $0x24] sm:$0xf]  ;;  %v7219_v1 = vld [vmem:[%s9249_s1 + $0x98] sm:$0xff]  }
  0x94   : > { %v5817_v45 = vcombine.low %v3069_v39, %v3072_v0  ;;  %v3084_v14 = vrot.slane %v3082_v38, 4  ;;  %v5521_v55 = vcombine.low %v7295_v22, %v8017_v51  ;;  %v7297_v57 = vld [vmem:[%s7466_s21 + $0x30] sm:$0xf]  ;;  %v8022_v58 = vld [vmem:[%s7466_s21 + $0x34] sm:$0xf]  ;;  %v5788_v24 = vrot.slane %v5772_v23, 9 }
  0x95   : > { %v3079_v43 = vsel %vm7744_vm5, %v3077_v46, %v3078_v26  ;;  %v5522_v59 = vcombine.low %v7297_v57, %v8022_v58  ;;  %v3092_v63 = vrot.slane %v5714_v20, 5  ;;  %v5773_v7 = vld [vmem:[%s7466_s21 + $0xc0] sm:$0xe]  ;;  %v3083_v60 = vsel %vm7744_vm5, %v5787_v52, %v3082_v38  ;;  %v5717_v8 = vld [vmem:[%s7466_s21 + $0xc8] sm:$0x1]  ;;  %v7222_v22 = vld [vmem:[%s7466_s21 + $0x18] sm:$0xff]  }
  0x96   : > { %6713 = vmatmul.mubr.bf16.gmra.mrb[16].mxu0 %v5815_v10  ;;  %v5818_v56 = vcombine.low %v3076_v42, %v3079_v43  ;;  %v3096_v10 = vrot.slane %v5716_v53, 5  ;;  %v3090_v13 = vsel %vm7744_vm5, %v5788_v24, %v3089_v49  ;;  %v5789_v18 = vrot.slane %v5773_v7, 9  ;;  %v7299_v26 = vld [vmem:[%s7466_s21 + $0x3c] sm:$0xf]  ;;  %v7301_v39 = vld [vmem:[%s7466_s21 + $0x48] sm:$0xf] }
  0x97   : > { %6505 = vmatmul.mubr.bf16.vlgmr.msra.gmra.mrb[0].mxu1 %v5519_v6  ;;  %6716 = vmatprep.mubr.bf16.mxu0 %v5816_v36  ;;  %v3091_v6 = vrot.slane %v3089_v49, 4  ;;  %v3099_v38 = vrot.slane %v5717_v8, 5  ;;  %v8048_v0 = vld [vmem:[%s7466_s21 + $0x4c] sm:$0xf]  ;;  %v7236_v49 = vld [vmem:[%s9249_s1 + $0xb0] sm:$0xff]   ;;  %v2449_v52 = vshrl.u32 %v7943_v11, 16 }
  0x98   : > { %6537 = vmatpush3.bf16.msra.mxu1 %v7668_v4  ;;  %6508 = vmatprep.mubr.bf16.mxu1 %v5520_v32  ;;  %v3085_v4 = vrot.slane %v5711_v30, 5  ;;  %v7224_v32 = vld [vmem:[%s9249_s1 + $0xa0] sm:$0xff]   ;;  %v3098_v46 = vrot.slane %v3096_v10, 4  ;;  %v5524_v20 = vcombine.low %v7301_v39, %v8048_v0  ;;  %v7230_v23 = vld [vmem:[%s9249_s1 + $0xa8] sm:$0xff]   ;;  %v3097_v42 = vsel %vm7744_vm5, %v5789_v18, %v3096_v10  ;;  %v7228_v18 = vld [vmem:[%s7466_s21 + $0x30] sm:$0xff]  }
  0x99   : > { %6538 = vmatprep.subr.bf16.mxu1 %v7211_v19  ;;  %v3093_v28 = vsel %vm7744_vm5, %v3091_v6, %v3092_v63  ;;  %v8043_v30 = vld [vmem:[%s7466_s21 + $0x40] sm:$0xf]  ;;  %v8076_v57 = vrot.slane %v2449_v52, 4  ;;  %v7225_v6 = vld [vmem:[%s7466_s21 + $0x24] sm:$0xff]   ;;  %v1356_v7 = vrot.slane %v7982_v61, 5  ;;  %v2455_v8 = vshll.u32 %v7946_v17, 16 }
  0x9a   : > { %v5523_v34 = vcombine.low %v7299_v26, %v8043_v30  ;;  %v5820_v33 = vcombine.low %v3090_v13, %v3093_v28  ;;  %v3100_v43 = vsel %vm7744_vm5, %v3098_v46, %v3099_v38  ;;  %v1296_v63 = vld [vmem:[%s7466_s21] sm:$0xe]  ;;  %v1297_v10 = vld [vmem:[%s7466_s21 + $0xc] sm:$0xe]  ;;  %v1363_v13 = vrot.slane %v7994_v15, 5 }
  0x9b   : > { %v5821_v53 = vcombine.low %v3097_v42, %v3100_v43  ;;  %v1299_v61 = vld [vmem:[%s7466_s21 + $0x24] sm:$0xe]  ;;  %v5529_v15 = vcombine.low %v7796_v16, %v7804_v40  ;;  %v5530_v26 = vcombine.low %v7825_v2, %v7828_v3  ;;  %v5542_v17 = vrot.slane %v1296_v63, 9  ;;  %v7307_v38 = vld [vmem:[%s7466_s21 + $0x20] sm:$0x1]  ;;  %v7237_v2 = vld [vmem:[%s7466_s21 + $0x54] sm:$0xff]  }
  0x9c   : > { %6539 = vmatpush3.bf16.msra.mxu1 %v7211_v19  ;;  %v3086_v19 = vsel %vm7744_vm5, %v3084_v14, %v3085_v4  ;;  %v8065_v14 = vld [vmem:[%s7466_s21 + $0x58] sm:$0xf]  ;;  %v1365_v46 = vrot.slane %v1363_v13, 4  ;;  %v1366_v39 = vrot.slane %v7307_v38, 5  ;;  %v7308_v43 = vld [vmem:[%s7466_s21 + $0x2c] sm:$0x1] }
  0x9d   : > { %6540 = vmatprep.subr.bf16.mxu1 %v7215_v50  ;;  %v5819_v36 = vcombine.low %v3083_v60, %v3086_v19  ;;  %v8091_v60 = vld [vmem:[%s9249_s1 + $0xc0] sm:$0xff]   ;;  %v1298_v19 = vld [vmem:[%s7466_s21 + $0x18] sm:$0xe]  ;;  %v7311_v38 = vld [vmem:[%s7466_s21 + $0x50] sm:$0x1]  ;;  %v1398_v16 = vrot.slane %v8065_v14, 5 }
  0x9e   : > { %6717 = vmatmul.mubr.bf16.gmra.mrb[20].mxu0 %v5817_v45  ;;  %v7303_v45 = vld [vmem:[%s7466_s21 + $0x54] sm:$0xf]  ;;  %v8214_v40 = vld [vmem:[%s7466_s21 + $0x64] sm:$0xf] }
  0x9f   : > { %6509 = vmatmul.mubr.bf16.gmra.mrb[4].mxu1 %v5521_v55  ;;  %6720 = vmatprep.mubr.bf16.mxu0 %v5818_v56  ;;  %v5525_v4 = vcombine.low %v7303_v45, %v8065_v14  ;;  %v5526_v55 = vcombine.low %v7722_v25, %v7725_v35  ;;  %v7242_v56 = vld [vmem:[%s9249_s1 + $0xb8] sm:$0xff]   ;;  %v7306_v25 = vld [vmem:[%s7466_s21 + $0x14] sm:$0x1]  ;;  %v7240_v3 = vld [vmem:[%s7466_s21 + $0x60] sm:$0xff]  }
  0xa0   : > { %6512 = vmatprep.mubr.bf16.mxu1 %v5522_v59  ;;  %6541 = vmatpush3.bf16.msra.mxu1 %v7215_v50  ;;  %v2445_v50 = vshll.u32 %v7943_v11, 16  ;;  %v8079_v59 = vld [vmem:[%s7466_s21 + $0x8] sm:$0x1]  ;;  %v1359_v35 = vrot.slane %v7306_v25, 5 }
  0xa1   : > { %6542 = vmatprep.subr.bf16.mxu1 %v7219_v1  ;;  %v1352_v24 = vrot.slane %v8079_v59, 5 }
  0xa2   : > { %v8074_v11 = vrot.slane %v2445_v50, 5 }
  0xa4   : > { %6543 = vmatpush3.bf16.msra.mxu1 %v7219_v1  ;;  %v1349_v1 = vrot.slane %v7958_v62, 5  ;;  %v5527_v62 = vcombine.low %v7740_v5, %v7752_v21  ;;  %v5543_v21 = vrot.slane %v1297_v10, 9  ;;  %v5902_v10 = vld [vmem:[%s7466_s21 + $0x18] sm:$0xf] }
  0xa5   : > { %6544 = vmatprep.subr.bf16.mxu1 %v7224_v32 }
  0xa6   : > { %6721 = vmatmul.mubr.bf16.gmra.mrb[24].mxu0 %v5819_v36  ;;  %v5528_v36 = vcombine.low %v7763_v47, %v7774_v54  ;;  %v1351_v5 = vrot.slane %v1349_v1, 4  ;;  %v7232_v47 = vld [vmem:[%s9249_s1 + $0x1c8] sm:$0xff]   ;;  %v5544_v54 = vrot.slane %v1298_v19, 9  ;;  %v8134_v59 = vsel %vm7744_vm5, %v5542_v17, %v1349_v1  ;;  %v5903_v19 = vld [vmem:[%s7466_s21 + $0x1c] sm:$0xf] }
  0xa7   : > { %6513 = vmatmul.mubr.bf16.gmra.mrb[8].mxu1 %v5523_v34  ;;  %6724 = vmatprep.mubr.bf16.mxu0 %v5820_v33  ;;  %v1377_v34 = vrot.slane %v8022_v58, 5  ;;  %v1358_v33 = vrot.slane %v1356_v7, 4  ;;  %v5545_v58 = vrot.slane %v1299_v61, 9  ;;  %v1391_v1 = vrot.slane %v8048_v0, 5  ;;  %v7234_v0 = vld [vmem:[%s7466_s21 + $0x48] sm:$0xff]  }
  0xa8   : > { %6516 = vmatprep.mubr.bf16.mxu1 %v5524_v20  ;;  %6545 = vmatpush3.bf16.msra.mxu1 %v7224_v32  ;;  %v1370_v32 = vrot.slane %v8017_v51, 5  ;;  %v1300_v51 = vld [vmem:[%s7466_s21 + $0x30] sm:$0xe]  ;;  %v5531_v20 = vcombine.low %v7846_v31, %v7855_v48  ;;  %v8142_v25 = vsel %vm7744_vm5, %v1351_v5, %v1352_v24  ;;  %v8150_v63 = vsel %vm7744_vm5, %v5544_v54, %v1363_v13  ;;  %v1302_v13 = vld [vmem:[%s7466_s21 + $0x48] sm:$0xe] }
  0xa9   : > { %6546 = vmatprep.subr.bf16.mxu1 %v7230_v23  ;;  %v5546_v50 = vrot.slane %v1300_v51, 9  ;;  %v1379_v52 = vrot.slane %v1377_v34, 4  ;;  %v3862_v5 = vshrl.u32 %v5902_v10, 16  ;;  %v3875_v51 = vshrl.u32 %v5903_v19, 16  ;;  %v7243_v48 = vld [vmem:[%s7466_s21 + $0x6c] sm:$0xff]  }
  0xaa   : > { %v1372_v42 = vrot.slane %v1370_v32, 4  ;;  %v8162_v24 = vsel %vm7744_vm5, %v5545_v58, %v1370_v32  ;;  %v7310_v32 = vld [vmem:[%s7466_s21 + $0x44] sm:$0x1]  ;;  %v5548_v54 = vrot.slane %v1302_v13, 9  ;;  %v5906_v13 = vld [vmem:[%s7466_s21 + $0x28] sm:$0xf] }
  0xab   : > { %v8172_v61 = vsel %vm7744_vm5, %v5546_v50, %v1377_v34  ;;  %v1387_v17 = vrot.slane %v7310_v32, 5  ;;  %v5904_v50 = vld [vmem:[%s7466_s21 + $0x20] sm:$0x1]  ;;  %v1304_v32 = vld [vmem:[%s7466_s21 + $0x60] sm:$0xe] }
  0xac   : > { %6547 = vmatpush3.bf16.msra.mxu1 %v7230_v23  ;;  %v5532_v23 = vcombine.low %v7880_v27, %v7883_v29 }
  0xad   : > { %6548 = vmatprep.subr.bf16.mxu1 %v7236_v49 }
  0xae   : > { %6725 = vmatmul.mubr.bf16.gmra.mrb[28].mxu0 %v5821_v53  ;;  %v7309_v53 = vld [vmem:[%s7466_s21 + $0x38] sm:$0x1] }
  0xaf   : > { %6517 = vmatmul.mubr.bf16.gmra.mrb[12].mxu1 %v5525_v4  ;;  %6744 = vmatprep.mubr.bf16.mxu0 %v7222_v22  ;;  %v1380_v45 = vrot.slane %v7309_v53, 5  ;;  %v1301_v4 = vld [vmem:[%s7466_s21 + $0x3c] sm:$0xe]  ;;  %v1384_v22 = vrot.slane %v8043_v30, 5  ;;  %v8138_v30 = vsel %vm7744_vm5, %v5543_v21, %v1356_v7  ;;  %v3865_v21 = vshll.u32 %v5902_v10, 16  ;;  %v7248_v53 = vld [vmem:[%s9249_s1 + $0x1e0] sm:$0xff]  }
  0xb0   : > { %6520 = vmatprep.mubr.bf16.mxu1 %v5526_v55  ;;  %6549 = vmatpush3.bf16.msra.mxu1 %v7236_v49  ;;  %v1373_v49 = vrot.slane %v7308_v43, 5  ;;  %v8125_v55 = vrot.slane %v2455_v8, 5  ;;  %v7231_v7 = vld [vmem:[%s7466_s21 + $0x3c] sm:$0xff]   ;;  %v8158_v8 = vsel %vm7744_vm5, %v1365_v46, %v1366_v39  ;;  %v1393_v46 = vrot.slane %v1391_v1, 4  ;;  %v5908_v43 = vld [vmem:[%s7466_s21 + $0x30] sm:$0xf] }
  0xb1   : > { %6550 = vmatprep.subr.bf16.mxu1 %v7242_v56  ;;  %v1394_v39 = vrot.slane %v7311_v38, 5  ;;  %v3864_v10 = vrot.slane %v3862_v5, 4 }
  0xb2   : > { %9271 = vst [vmem:[#allocation2_spill] sm:$0xff] %v8125_v55 }
  0xb4   : > { %6551 = vmatpush3.bf16.msra.mxu1 %v7242_v56  ;;  %v7238_v56 = vld [vmem:[%s9249_s1 + $0x1d0] sm:$0xff]  }
  0xb5   : > { %6584 = vmatprep.subr.bf16.mxu1 %v8091_v60 }
  0xb6   : > { %6745 = vmatmul.mubr.bf16.vlgmr.msra.gmra.mrb[0].mxu0 %v7225_v6  ;;  %v8146_v6 = vsel %vm7744_vm5, %v1358_v33, %v1359_v35  ;;  %v8166_v35 = vsel %vm7744_vm5, %v1372_v42, %v1373_v49  ;;  %v3871_v33 = vshll.u32 %v5903_v19, 16  ;;  %v3867_v19 = vrot.slane %v3865_v21, 5  ;;  %v1305_v21 = vld [vmem:[%s7466_s21 + $0x6c] sm:$0xe] }
  0xb7   : > { %6521 = vmatmul.mubr.bf16.gmra.mrb[16].mxu1 %v5527_v62  ;;  %6777 = vmatpush3.bf16.msra.mxu0 %v7930_v44  ;;  %v5547_v62 = vrot.slane %v1301_v4, 9  ;;  %v5551_v58 = vrot.slane %v1305_v21, 9 }
  0xb8   : > { %6524 = vmatprep.mubr.bf16.mxu1 %v5528_v36  ;;  %6748 = vmatprep.mubr.bf16.mxu0 %v7228_v18  ;;  %v8176_v36 = vsel %vm7744_vm5, %v1379_v52, %v1380_v45  ;;  %v1386_v18 = vrot.slane %v1384_v22, 4  ;;  %v5905_v52 = vld [vmem:[%s7466_s21 + $0x24] sm:$0xf]  ;;  %v3899_v45 = vshrl.u32 %v5906_v13, 16 }
  0xb9   : > { %6778 = vmatprep.subr.bf16.mxu0 %v7232_v47  ;;  %v8193_v49 = vsel %vm7744_vm5, %v5547_v62, %v1384_v22  ;;  %v8210_v22 = vld [vmem:[%s7466_s21 + $0x54] sm:$0xe]  ;;  %v3877_v62 = vrot.slane %v3875_v51, 4  ;;  %v3886_v38 = vshrl.u32 %v5905_v52, 16  ;;  %v3889_v28 = vshll.u32 %v5905_v52, 16 }
  0xba   : > { %v8207_v4 = vsel %vm7744_vm5, %v1386_v18, %v1387_v17  ;;  %v3881_v17 = vshll.u32 %v5904_v50, 16  ;;  %v5549_v5 = vrot.slane %v8210_v22, 9  ;;  %v7252_v50 = vld [vmem:[%s9249_s1 + $0x1e8] sm:$0xff]   ;;  %v1400_v52 = vrot.slane %v1398_v16, 4 }
  0xbb   : > { %6779 = vmatpush3.bf16.msra.mxu0 %v7232_v47  ;;  %v7244_v47 = vld [vmem:[%s9249_s1 + $0x1d8] sm:$0xff]   ;;  %v3868_v22 = vor.u32 %v3867_v19, %v3864_v10  ;;  %v3888_v34 = vrot.slane %v3886_v38, 4  ;;  %v3891_v44 = vrot.slane %v3889_v28, 5  ;;  %v7316_v10 = vld [vmem:[%s7466_s21 + $0x74] sm:$0x1]  ;;  %v3901_v28 = vrot.slane %v3899_v45, 4 }
  0xbc   : > { %6780 = vmatprep.subr.bf16.mxu0 %v7238_v56  ;;  %v8248_v42 = vrot.slane %v3881_v17, 5  ;;  %v1415_v19 = vrot.slane %v7316_v10, 5  ;;  %v3910_v38 = vshrl.u32 %v5908_v43, 16  ;;  %v8273_v27 = vsel %vm7744_vm5, %v5549_v5, %v1398_v16 }
  0xbd   : > { %v3869_v21 = vrot.slane %v3868_v22, 4 }
  0xbe   : > { %6749 = vmatmul.mubr.bf16.gmra.mrb[4].mxu0 %v7231_v7  ;;  %v8220_v7 = vrot.slane %v3871_v33, 5  ;;  %v7314_v33 = vld [vmem:[%s7466_s21 + $0x70] sm:$0xf] }
  0xbf   : > { %6525 = vmatmul.mubr.bf16.gmra.mrb[20].mxu1 %v5529_v15  ;;  %6752 = vmatprep.mubr.bf16.mxu0 %v7234_v0  ;;  %v1405_v15 = vrot.slane %v8214_v40, 5  ;;  %v7313_v0 = vld [vmem:[%s7466_s21 + $0x5c] sm:$0x1]  ;;  %v1412_v51 = vrot.slane %v7314_v33, 5 }
  0xc0   : > { %6528 = vmatprep.mubr.bf16.mxu1 %v5530_v26  ;;  %6781 = vmatpush3.bf16.msra.mxu0 %v7238_v56  ;;  %v1401_v18 = vrot.slane %v7313_v0, 5  ;;  %v8229_v26 = vsel %vm7744_vm5, %v5548_v54, %v1391_v1  ;;  %v8233_v56 = vsel %vm7744_vm5, %v1393_v46, %v1394_v39  ;;  %v7315_v1 = vld [vmem:[%s7466_s21 + $0x68] sm:$0x1]  ;;  %v3895_v0 = vshll.u32 %v5906_v13, 16  ;;  %v7260_v40 = vld [vmem:[%s9249_s1 + $0x1f8] sm:$0xff]  }
  0xc1   : > { %6782 = vmatprep.subr.bf16.mxu0 %v7244_v47  ;;  %v1408_v54 = vrot.slane %v7315_v1, 5  ;;  %v5550_v46 = vrot.slane %v1304_v32, 9  ;;  %v1407_v39 = vrot.slane %v1405_v15, 4  ;;  %v3878_v33 = vor.u32 %v3877_v62, %v8220_v7  ;;  %v5909_v1 = vld [vmem:[%s7466_s21 + $0x34] sm:$0xf] }
  0xc2   : > { %v1414_v32 = vrot.slane %v1412_v51, 4  ;;  %v5907_v62 = vld [vmem:[%s7466_s21 + $0x2c] sm:$0x1]  ;;  %v8260_v17 = vrot.slane %v3895_v0, 5  ;;  %v3919_v13 = vshll.u32 %v5909_v1, 16  ;;  %v3923_v31 = vshrl.u32 %v5909_v1, 16 }
  0xc3   : > { %v3879_v10 = vrot.slane %v3878_v33, 4  ;;  %v8277_v29 = vsel %vm7744_vm5, %v1400_v52, %v1401_v18  ;;  %v8284_v45 = vsel %vm7744_vm5, %v5550_v46, %v1405_v15  ;;  %v8288_v14 = vsel %vm7744_vm5, %v1407_v39, %v1408_v54  ;;  %v1306_v18 = vld [vmem:[%s7466_s21 + $0x78] sm:$0xe] }
  0xc4   : > { %6783 = vmatpush3.bf16.msra.mxu0 %v7244_v47  ;;  %v8292_v16 = vsel %vm7744_vm5, %v5551_v58, %v1412_v51  ;;  %v8302_v15 = vsel %vm7744_vm5, %v1414_v32, %v1415_v19  ;;  %v3902_v5 = vor.u32 %v3901_v28, %v8260_v17  ;;  %v3912_v52 = vrot.slane %v3910_v38, 4  ;;  %v5911_v58 = vld [vmem:[%s7466_s21 + $0x3c] sm:$0xf]  ;;  %v5912_v51 = vld [vmem:[%s7466_s21 + $0x40] sm:$0xf] }
  0xc5   : > { %6784 = vmatprep.subr.bf16.mxu0 %v7248_v53  ;;  %v3874_v0 = vsel %vm7498_vm2, %v3869_v21, %v8220_v7  ;;  %v3884_v46 = vsel %vm7498_vm2, %v3879_v10, %v8248_v42  ;;  %v8313_v39 = vrot.slane %v3919_v13, 5  ;;  %v3925_v22 = vrot.slane %v3923_v31, 4  ;;  %v7318_v19 = vld [vmem:[%s7466_s21 + $0x80] sm:$0x1]  ;;  %v8472_v47 = vld [vmem:[%s7466_s21 + $0x68] sm:$0x1] }
  0xc6   : > { %6753 = vmatmul.mubr.bf16.gmra.mrb[8].mxu0 %v7237_v2  ;;  %v3913_v2 = vshll.u32 %v5908_v43, 16  ;;  %v3905_v43 = vshll.u32 %v5907_v62, 16  ;;  %v5552_v32 = vrot.slane %v1306_v18, 9  ;;  %v1307_v62 = vld [vmem:[%s7466_s21 + $0x84] sm:$0xe]  ;;  %v3934_v28 = vshrl.u32 %v5911_v58, 16 }
  0xc7   : > { %6529 = vmatmul.mubr.bf16.gmra.mrb[24].mxu1 %v5531_v20  ;;  %6756 = vmatprep.mubr.bf16.mxu0 %v7240_v3  ;;  %v7256_v20 = vld [vmem:[%s9249_s1 + $0x1f0] sm:$0xff]   ;;  %v7317_v3 = vld [vmem:[%s7466_s21 + $0x7c] sm:$0xf]  ;;  %v3937_v7 = vshll.u32 %v5911_v58, 16  ;;  %v3943_v38 = vshll.u32 %v5912_v51, 16  ;;  %v9272_v42 = vcombine.low %v7903_v41, %v7908_v12  ;;  %v8324_v13 = vrot.slane %v3902_v5, 4 }
  0xc8   : > { %6532 = vmatprep.mubr.bf16.mxu1 %v5532_v23  ;;  %6785 = vmatpush3.bf16.msra.mxu0 %v7248_v53  ;;  %v3892_v23 = vor.u32 %v3891_v44, %v3888_v34  ;;  %v7245_v53 = vld [vmem:[%s7466_s21 + $0x78] sm:$0xff]   ;;  %v1419_v44 = vrot.slane %v7317_v3, 5  ;;  %v3915_v54 = vrot.slane %v3913_v2, 5  ;;  %v8317_v1 = vrot.slane %v3905_v43, 5  ;;  %v8329_v21 = vld [vmem:[%s9249_s1 + $0x200] sm:$0xff]   ;;  %9280 = vst [vmem:[#allocation5_spill] sm:$0xff] %v8472_v47 }
  0xc9   : > { %6786 = vmatprep.subr.bf16.mxu0 %v7252_v50  ;;  %v5910_v34 = vld [vmem:[%s7466_s21 + $0x38] sm:$0x1]  ;;  %v3947_v2 = vshrl.u32 %v5912_v51, 16  ;;  %v7247_v43 = vld [vmem:[%s7466_s21 + $0x84] sm:$0xff]   ;;  %v3926_v12 = vor.u32 %v3925_v22, %v8313_v39  ;;  %v3939_v58 = vrot.slane %v3937_v7, 5  ;;  %v8351_v51 = vrot.slane %v3943_v38, 5 }
  0xca   : > { %v8315_v33 = vrot.slane %v3892_v23, 4  ;;  %v1421_v10 = vrot.slane %v1419_v44, 4  ;;  %v3916_v31 = vor.u32 %v3915_v54, %v3912_v52  ;;  %v9273_v23 = vcombine.low %v8134_v59, %v8142_v25  ;;  %v7319_v18 = vld [vmem:[%s7466_s21 + $0x88] sm:$0xf]  ;;  %v5913_v5 = vld [vmem:[%s7466_s21 + $0x44] sm:$0x1] }
  0xcb   : > { %v1426_v3 = vrot.slane %v7319_v18, 5  ;;  %v8342_v59 = vcombine.low %v3874_v0, %v3884_v46  ;;  %v5914_v52 = vld [vmem:[%s7466_s21 + $0x48] sm:$0xf]  ;;  %v3936_v54 = vrot.slane %v3934_v28, 4  ;;  %v3949_v22 = vrot.slane %v3947_v2, 4 }
  0xcc   : > { %6787 = vmatpush3.bf16.msra.mxu0 %v7252_v50  ;;  %v1422_v50 = vrot.slane %v7318_v19, 5  ;;  %v7249_v19 = vld [vmem:[%s7466_s21 + $0x90] sm:$0xff]   ;;  %v3898_v0 = vsel %vm7498_vm2, %v8315_v33, %v8260_v17  ;;  %v3917_v46 = vrot.slane %v3916_v31, 4  ;;  %v3908_v28 = vsel %vm7498_vm2, %v8324_v13, %v8317_v1  ;;  %v8373_v33 = vld [vmem:[%s7466_s21 + $0x58] sm:$0xf]  ;;  %v7250_v31 = vld [vmem:[%s9249_s1 + $0xc8] sm:$0xff]  }
  0xcd   : > { %6788 = vmatprep.subr.bf16.mxu0 %v7256_v20  ;;  %v3927_v38 = vrot.slane %v3926_v12, 4  ;;  %v1428_v2 = vrot.slane %v1426_v3, 4  ;;  %v5917_v17 = vld [vmem:[%s7466_s21 + $0x54] sm:$0xf]  ;;  %v3953_v1 = vshll.u32 %v5913_v5, 16  ;;  %v3958_v13 = vshrl.u32 %v5914_v52, 16 }
  0xce   : > { %6757 = vmatmul.mubr.bf16.gmra.mrb[12].mxu0 %v7243_v48  ;;  %v3929_v48 = vshll.u32 %v5910_v34, 16  ;;  %v8369_v7 = vsel %vm7744_vm5, %v1421_v10, %v1422_v50  ;;  %v3961_v50 = vshll.u32 %v5914_v52, 16  ;;  %v3940_v10 = vor.u32 %v3939_v58, %v3936_v54  ;;  %v7251_v54 = vld [vmem:[%s7466_s21 + $0x9c] sm:$0xff]   ;;  %v7325_v41 = vld [vmem:[%s7466_s21 + $0xac] sm:$0xf] }
  0xcf   : > { %6533 = vmatmul.mubr.bf16.gmra.mrb[28].mxu1 %v9272_v42  ;;  %6760 = vmatprep.mubr.bf16.mxu0 %v7245_v53  ;;  %v5553_v53 = vrot.slane %v1307_v62, 9  ;;  %v7320_v42 = vld [vmem:[%s7466_s21 + $0x8c] sm:$0x1]  ;;  %v3991_v5 = vshll.u32 %v8373_v33, 16  ;;  %v9275_v52 = vcombine.low %v8150_v63, %v8158_v8  ;;  %v8409_v63 = vld [vmem:[%s7466_s21 + $0x50] sm:$0x1] }
  0xd0   : > { %6552 = vmatprep.mubr.bf16.mxu1 %v9273_v23  ;;  %6789 = vmatpush3.bf16.msra.mxu0 %v7256_v20  ;;  %v8348_v20 = vsel %vm7744_vm5, %v5552_v32, %v1419_v44  ;;  %v3931_v62 = vrot.slane %v3929_v48, 5  ;;  %v1429_v23 = vrot.slane %v7320_v42, 5  ;;  %v1308_v44 = vld [vmem:[%s7466_s21 + $0x90] sm:$0xe]  ;;  %v8361_v32 = vld [vmem:[%s7466_s21 + $0x4c] sm:$0xf]  ;;  %v3950_v48 = vor.u32 %v3949_v22, %v8351_v51 }
  0xd1   : > { %6790 = vmatprep.subr.bf16.mxu0 %v7260_v40  ;;  %v3967_v12 = vshll.u32 %v8361_v32, 16  ;;  %v3971_v18 = vshrl.u32 %v8361_v32, 16  ;;  %v9274_v42 = vcombine.low %v8138_v30, %v8146_v6  ;;  %v7254_v30 = vld [vmem:[%s9249_s1 + $0xd0] sm:$0xff]   ;;  %v3922_v6 = vsel %vm7498_vm2, %v3917_v46, %v8313_v39  ;;  %v7253_v8 = vld [vmem:[%s7466_s21 + $0xa8] sm:$0xff]   ;;  %v8416_v39 = vld [vmem:[%s7466_s21 + $0x5c] sm:$0x1] }
  0xd2   : > { %v3932_v58 = vsel %vm7498_vm2, %v3927_v38, %v3931_v62  ;;  %v5554_v22 = vrot.slane %v1308_v44, 9  ;;  %v3963_v25 = vrot.slane %v3961_v50, 5  ;;  %9276 = vst [vmem:[#allocation3_spill] sm:$0xff] %v8416_v39  ;;  %v3941_v46 = vrot.slane %v3940_v10, 4 }
  0xd3   : > { %v3951_v62 = vrot.slane %v3950_v48, 4  ;;  %v8418_v38 = vrot.slane %v3967_v12, 5  ;;  %v8420_v34 = vrot.slane %v3991_v5, 5  ;;  %v8425_v50 = vcombine.low %v3898_v0, %v3908_v28  ;;  %v5920_v28 = vld [vmem:[%s7466_s21 + $0x60] sm:$0xf] }
  0xd4   : > { %6791 = vmatpush3.bf16.msra.mxu0 %v7260_v40  ;;  %v8381_v40 = vsel %vm7744_vm5, %v5553_v53, %v1426_v3  ;;  %v3982_v53 = vshrl.u32 %v5917_v17, 16  ;;  %v3985_v3 = vshll.u32 %v5917_v17, 16  ;;  %v7321_v17 = vld [vmem:[%s7466_s21 + $0x94] sm:$0xf]  ;;  %v8429_v48 = vcombine.low %v3922_v6, %v3932_v58 }
  0xd5   : > { %6824 = vmatprep.subr.bf16.mxu0 %v8329_v21  ;;  %v3977_v0 = vshll.u32 %v8409_v63, 16  ;;  %v3946_v6 = vsel %vm7498_vm2, %v3941_v46, %v8351_v51  ;;  %v9279_v46 = vcombine.low %v8172_v61, %v8176_v36 }
  0xd6   : > { %6761 = vmatmul.mubr.bf16.gmra.mrb[16].mxu0 %v7247_v43  ;;  %v3995_v43 = vshrl.u32 %v8373_v33, 16  ;;  %v3984_v44 = vrot.slane %v3982_v53, 4  ;;  %v7322_v53 = vld [vmem:[%s7466_s21 + $0x98] sm:$0x1] }
  0xd7   : > { %6553 = vmatmul.mubr.bf16.vlgmr.msra.gmra.mrb[0].mxu1 %v9274_v42  ;;  %6764 = vmatprep.mubr.bf16.mxu0 %v7249_v19  ;;  %v8412_v19 = vrot.slane %v3953_v1, 5  ;;  %v1433_v42 = vrot.slane %v7321_v17, 5  ;;  %v7323_v17 = vld [vmem:[%s7466_s21 + $0xa0] sm:$0xf]  ;;  %v3979_v36 = vrot.slane %v3977_v0, 5 }
  0xd8   : > { %6585 = vmatpush3.bf16.msra.mxu1 %v8091_v60  ;;  %6556 = vmatprep.mubr.bf16.mxu1 %v9275_v52  ;;  %v8406_v60 = vsel %vm7744_vm5, %v1428_v2, %v1429_v23  ;;  %v3960_v52 = vrot.slane %v3958_v13, 4  ;;  %v3973_v23 = vrot.slane %v3971_v18, 4  ;;  %v3987_v2 = vrot.slane %v3985_v3, 5  ;;  %v7258_v13 = vld [vmem:[%s9249_s1 + $0xd8] sm:$0xff]  }
  0xd9   : > { %6586 = vmatprep.subr.bf16.mxu1 %v7250_v31  ;;  %v3997_v1 = vrot.slane %v3995_v43, 4  ;;  %v1309_v18 = vld [vmem:[%s7466_s21 + $0x9c] sm:$0xe]  ;;  %v1436_v3 = vrot.slane %v7322_v53, 5  ;;  %v8442_v43 = vld [vmem:[%s7466_s21 + $0x64] sm:$0xf] }
  0xda   : > { %v3964_v5 = vor.u32 %v3963_v25, %v3960_v52  ;;  %9277 = vst [vmem:[#allocation4_spill] sm:$0xff] %v8442_v43  ;;  %v3974_v58 = vor.u32 %v3973_v23, %v8418_v38  ;;  %v1440_v12 = vrot.slane %v7323_v17, 5  ;;  %v9278_v25 = vcombine.low %v8162_v24, %v8166_v35  ;;  %v7255_v23 = vld [vmem:[%s7466_s21 + $0xb4] sm:$0xff]   ;;  %v7261_v24 = vld [vmem:[%s9249_s1 + $0xe0] sm:$0xff]   ;;  %v5923_v17 = vld [vmem:[%s7466_s21 + $0x6c] sm:$0xf] }
  0xdb   : > { %v1435_v52 = vrot.slane %v1433_v42, 4  ;;  %v3988_v53 = vor.u32 %v3987_v2, %v3984_v44  ;;  %v3998_v51 = vor.u32 %v3997_v1, %v8420_v34  ;;  %v4006_v35 = vshrl.u32 %v5920_v28, 16  ;;  %v7324_v2 = vld [vmem:[%s7466_s21 + $0xa4] sm:$0x1] }
  0xdc   : > { %6587 = vmatpush3.bf16.msra.mxu1 %v7250_v31  ;;  %v8436_v31 = vsel %vm7744_vm5, %v5554_v22, %v1433_v42  ;;  %v4001_v22 = vshll.u32 %v8416_v39, 16  ;;  %v4019_v42 = vshrl.u32 %v8442_v43, 16  ;;  %v3965_v61 = vrot.slane %v3964_v5, 4  ;;  %v8611_v39 = vld [vmem:[%s7466_s21 + $0x98] sm:$0x1] }
  0xdd   : > { %6588 = vmatprep.subr.bf16.mxu1 %v7254_v30  ;;  %v5555_v44 = vrot.slane %v1309_v18, 9  ;;  %v1443_v1 = vrot.slane %v7324_v2, 5  ;;  %v3989_v5 = vrot.slane %v3988_v53, 4  ;;  %v3999_v18 = vrot.slane %v3998_v51, 4  ;;  %9293 = vst [vmem:[#allocation14_spill] sm:$0xff] %v8611_v39 }
  0xde   : > { %6765 = vmatmul.mubr.bf16.gmra.mrb[20].mxu0 %v7251_v54  ;;  %v3956_v54 = vsel %vm7498_vm2, %v3951_v62, %v8412_v19  ;;  %v4015_v19 = vshll.u32 %v8442_v43, 16  ;;  %v7257_v62 = vld [vmem:[%s7466_s21 + $0xc0] sm:$0xff]   ;;  %v4003_v10 = vrot.slane %v4001_v22, 5  ;;  %v8478_v43 = vsel %vm7744_vm5, %v1435_v52, %v1436_v3 }
  0xdf   : > { %6557 = vmatmul.mubr.bf16.gmra.mrb[4].mxu1 %v9278_v25  ;;  %6768 = vmatprep.mubr.bf16.mxu0 %v7253_v8  ;;  %v4009_v8 = vshll.u32 %v5920_v28, 16  ;;  %v3975_v25 = vrot.slane %v3974_v58, 4  ;;  %v1447_v28 = vrot.slane %v7325_v41, 5  ;;  %v8474_v55 = vcombine.low %v3946_v6, %v3956_v54  ;;  %v7263_v41 = vld [vmem:[%s9249_s1 + $0xe8] sm:$0xff]  }
  0xe0   : > { %6560 = vmatprep.mubr.bf16.mxu1 %v9279_v46  ;;  %6589 = vmatpush3.bf16.msra.mxu1 %v7254_v30  ;;  %v1310_v30 = vld [vmem:[%s7466_s21 + $0xa8] sm:$0xe]  ;;  %v1442_v46 = vrot.slane %v1440_v12, 4  ;;  %v4008_v0 = vrot.slane %v4006_v35, 4  ;;  %v8480_v58 = vrot.slane %v4015_v19, 5  ;;  %v4021_v22 = vrot.slane %v4019_v42, 4 }
  0xe1   : > { %6590 = vmatprep.subr.bf16.mxu1 %v7258_v13  ;;  %v4011_v2 = vrot.slane %v4009_v8, 5  ;;  %v3970_v3 = vsel %vm7498_vm2, %v3965_v61, %v8418_v38  ;;  %v8490_v6 = vsel %vm7744_vm5, %v5555_v44, %v1440_v12  ;;  %v4030_v54 = vshrl.u32 %v5923_v17, 16  ;;  %v7326_v38 = vld [vmem:[%s7466_s21 + $0xb0] sm:$0x1]  ;;  %v1311_v19 = vld [vmem:[%s7466_s21 + $0xb4] sm:$0xe] }
  0xe2   : > { %v4033_v52 = vshll.u32 %v5923_v17, 16  ;;  %v3980_v53 = vsel %vm7498_vm2, %v3975_v25, %v3979_v36  ;;  %v8499_v51 = vsel %vm7744_vm5, %v1442_v46, %v1443_v1  ;;  %v5556_v35 = vrot.slane %v1310_v30, 9  ;;  %v8521_v30 = vld [vmem:[%s7466_s21 + $0x74] sm:$0x1]  ;;  %v7327_v25 = vld [vmem:[%s7466_s21 + $0xb8] sm:$0xf] }
  0xe3   : > { %v1450_v8 = vrot.slane %v7326_v38, 5  ;;  %v9282_v12 = vcombine.low %v8193_v49, %v8207_v4  ;;  %v3994_v42 = vsel %vm7498_vm2, %v3989_v5, %v8420_v34  ;;  %v4004_v61 = vsel %vm7498_vm2, %v3999_v18, %v4003_v10  ;;  %v7259_v4 = vld [vmem:[%s7466_s21 + $0xcc] sm:$0xff]   ;;  %9284 = vst [vmem:[#allocation7_spill] sm:$0xff] %v8521_v30  ;;  %v5929_v38 = vld [vmem:[%s7466_s21 + $0x84] sm:$0xf] }
  0xe4   : > { %6591 = vmatpush3.bf16.msra.mxu1 %v7258_v13  ;;  %v8493_v13 = vld [vmem:[%s7466_s21 + $0x70] sm:$0xf]  ;;  %v1449_v36 = vrot.slane %v1447_v28, 4  ;;  %v4025_v44 = vshll.u32 %v8472_v47, 16  ;;  %v9283_v49 = vcombine.low %v8229_v26, %v8233_v56  ;;  %v4022_v1 = vor.u32 %v4021_v22, %v8480_v58  ;;  %v8538_v22 = vld [vmem:[%s7466_s21 + $0x7c] sm:$0xf] }
  0xe5   : > { %6592 = vmatprep.subr.bf16.mxu1 %v7261_v24  ;;  %9281 = vst [vmem:[#allocation6_spill] sm:$0xff] %v8493_v13  ;;  %v4039_v34 = vshll.u32 %v8493_v13, 16  ;;  %v4043_v10 = vshrl.u32 %v8493_v13, 16  ;;  %v5557_v17 = vrot.slane %v1311_v19, 9  ;;  %v1454_v46 = vrot.slane %v7327_v25, 5  ;;  %9285 = vst [vmem:[#allocation8_spill] sm:$0xff] %v8538_v22 }
  0xe6   : > { %6769 = vmatmul.mubr.bf16.gmra.mrb[24].mxu0 %v7255_v23  ;;  %v7265_v23 = vld [vmem:[%s9249_s1 + $0xf0] sm:$0xff]   ;;  %v4032_v26 = vrot.slane %v4030_v54, 4  ;;  %v4035_v56 = vrot.slane %v4033_v52, 5  ;;  %v8529_v18 = vcombine.low %v3970_v3, %v3980_v53  ;;  %v8541_v19 = vcombine.low %v3994_v42, %v4004_v61  ;;  %v7328_v3 = vld [vmem:[%s7466_s21 + $0xbc] sm:$0x1] }
  0xe7   : > { %6561 = vmatmul.mubr.bf16.gmra.mrb[8].mxu1 %v9282_v12  ;;  %6772 = vmatprep.mubr.bf16.mxu0 %v7257_v62  ;;  %v4012_v62 = vor.u32 %v4011_v2, %v4008_v0  ;;  %v8535_v2 = vsel %vm7744_vm5, %v5556_v35, %v1447_v28  ;;  %v8545_v54 = vsel %vm7744_vm5, %v1449_v36, %v1450_v8  ;;  %v8547_v52 = vrot.slane %v4025_v44, 5  ;;  %v7267_v12 = vld [vmem:[%s9249_s1 + $0xf8] sm:$0xff]   ;;  %v8554_v28 = vld [vmem:[%s7466_s21 + $0x88] sm:$0xf] }
  0xe8   : > { %6564 = vmatprep.mubr.bf16.mxu1 %v9283_v49  ;;  %6593 = vmatpush3.bf16.msra.mxu1 %v7261_v24  ;;  %v5926_v24 = vld [vmem:[%s7466_s21 + $0x78] sm:$0xf]  ;;  %v1457_v53 = vrot.slane %v7328_v3, 5  ;;  %9286 = vst [vmem:[#allocation9_spill] sm:$0xff] %v8554_v28  ;;  %v8558_v42 = vrot.slane %v4022_v1, 4  ;;  %v8560_v61 = vrot.slane %v4039_v34, 5  ;;  %v8564_v36 = vsel %vm7744_vm5, %v5557_v17, %v1454_v46 }
  0xe9   : > { %6594 = vmatprep.subr.bf16.mxu1 %v7263_v41  ;;  %v8556_v35 = vrot.slane %v4012_v62, 4  ;;  %v4045_v8 = vrot.slane %v4043_v10, 4  ;;  %v1456_v44 = vrot.slane %v1454_v46, 4  ;;  %v4036_v49 = vor.u32 %v4035_v56, %v4032_v26  ;;  %v5932_v3 = vld [vmem:[%s7466_s21 + $0x90] sm:$0xf] }
  0xea   : > { %v4049_v25 = vshll.u32 %v8521_v30, 16  ;;  %v4057_v0 = vshll.u32 %v5926_v24, 16  ;;  %v4063_v62 = vshll.u32 %v8538_v22, 16  ;;  %v4067_v1 = vshrl.u32 %v8538_v22, 16  ;;  %v8571_v34 = vld [vmem:[%s7466_s21 + $0x94] sm:$0xf] }
  0xeb   : > { %9287 = vst [vmem:[#allocation10_spill] sm:$0xff] %v8571_v34  ;;  %v9288_v10 = vcombine.low %v8273_v27, %v8277_v29  ;;  %v4078_v17 = vshrl.u32 %v5929_v38, 16  ;;  %v4081_v46 = vshll.u32 %v5929_v38, 16  ;;  %v4091_v26 = vshrl.u32 %v8554_v28, 16  ;;  %v5935_v38 = vld [vmem:[%s7466_s21 + $0x9c] sm:$0xf] }
  0xec   : > { %6595 = vmatpush3.bf16.msra.mxu1 %v7263_v41  ;;  %v4054_v41 = vshrl.u32 %v5926_v24, 16  ;;  %v9289_v56 = vcombine.low %v8284_v45, %v8288_v14  ;;  %v4046_v29 = vor.u32 %v4045_v8, %v8560_v61  ;;  %v4105_v24 = vshll.u32 %v5932_v3, 16  ;;  %v8593_v45 = vld [vmem:[%s7466_s21 + $0x80] sm:$0x1] }
  0xed   : > { %6596 = vmatprep.subr.bf16.mxu1 %v7265_v23  ;;  %v8590_v5 = vrot.slane %v4049_v25, 5  ;;  %9290 = vst [vmem:[#allocation11_spill] sm:$0xff] %v8593_v45  ;;  %v4111_v14 = vshll.u32 %v8571_v34, 16  ;;  %v4059_v27 = vrot.slane %v4057_v0, 5  ;;  %v4069_v8 = vrot.slane %v4067_v1, 4 }
  0xee   : > { %6773 = vmatmul.mubr.bf16.gmra.mrb[28].mxu0 %v7259_v4  ;;  %v4087_v4 = vshll.u32 %v8554_v28, 16  ;;  %v8597_v28 = vrot.slane %v4063_v62, 5  ;;  %v8603_v22 = vld [vmem:[%s7466_s21 + $0xa0] sm:$0xf]  ;;  %v4080_v25 = vrot.slane %v4078_v17, 4  ;;  %v4083_v30 = vrot.slane %v4081_v46, 5 }
  0xef   : > { %6565 = vmatmul.mubr.bf16.gmra.mrb[12].mxu1 %v9288_v10  ;;  %6792 = vmatprep.mubr.bf16.mxu0 %v8342_v59  ;;  %v4102_v59 = vshrl.u32 %v5932_v3, 16  ;;  %v8588_v10 = vrot.slane %v4036_v49, 4  ;;  %v8600_v3 = vld [vmem:[%s7466_s21 + $0x8c] sm:$0x1]  ;;  %9292 = vst [vmem:[#allocation13_spill] sm:$0xff] %v8603_v22  ;;  %v4093_v47 = vrot.slane %v4091_v26, 4  ;;  %v8620_v62 = vsel %vm7744_vm5, %v1456_v44, %v1457_v53 }
  0xf0   : > { %6568 = vmatprep.mubr.bf16.mxu1 %v9289_v56  ;;  %6597 = vmatpush3.bf16.msra.mxu1 %v7265_v23  ;;  %v4115_v23 = vshrl.u32 %v8571_v34, 16  ;;  %v4056_v56 = vrot.slane %v4054_v41, 4  ;;  %9291 = vst [vmem:[#allocation12_spill] sm:$0xff] %v8600_v3  ;;  %v7264_v49 = vld [vmem:[%s9249_s1 + $0x208] sm:$0xff]   ;;  %v8608_v13 = vrot.slane %v4087_v4, 5  ;;  %v4107_v34 = vrot.slane %v4105_v24, 5 }
  0xf1   : > { %6598 = vmatprep.subr.bf16.mxu1 %v7267_v12  ;;  %v5938_v41 = vld [vmem:[%s7466_s21 + $0xa8] sm:$0xf]  ;;  %v4104_v1 = vrot.slane %v4102_v59, 4  ;;  %v8625_v17 = vld [vmem:[%s9249_s1 + $0x100] sm:$0xff]   ;;  %v8628_v46 = vrot.slane %v4111_v14, 5  ;;  %v4126_v26 = vshrl.u32 %v5935_v38, 16  ;;  %v9295_v24 = vcombine.low %v8292_v16, %v8302_v15 }
  0xf2   : > { %9294 = vst [vmem:[#allocation15_spill] sm:$0xff] %v8625_v17  ;;  %v4117_v4 = vrot.slane %v4115_v23, 4  ;;  %v4129_v0 = vshll.u32 %v5935_v38, 16  ;;  %v8631_v53 = vrot.slane %v4046_v29, 4  ;;  %v4135_v44 = vshll.u32 %v8603_v22, 16  ;;  %v7266_v16 = vld [vmem:[%s9249_s1 + $0x210] sm:$0xff]  }
  0xf3   : > { %v4139_v59 = vshrl.u32 %v8603_v22, 16  ;;  %v4060_v14 = vor.u32 %v4059_v27, %v4056_v56  ;;  %v4070_v38 = vor.u32 %v4069_v8, %v8597_v28  ;;  %v4084_v23 = vor.u32 %v4083_v30, %v4080_v25  ;;  %v8643_v29 = vld [vmem:[%s7466_s21 + $0xac] sm:$0xf]  ;;  %v8656_v25 = vld [vmem:[%s7466_s21 + $0xa4] sm:$0x1] }
  0xf4   : > { %6599 = vmatpush3.bf16.msra.mxu1 %v7267_v12  ;;  %v4073_v12 = vshll.u32 %v8593_v45, 16  ;;  %9296 = vst [vmem:[#allocation16_spill] sm:$0xff] %v8643_v29  ;;  %v4094_v15 = vor.u32 %v4093_v47, %v8608_v13  ;;  %v4150_v27 = vshrl.u32 %v5938_v41, 16  ;;  %v4153_v30 = vshll.u32 %v5938_v41, 16 }
  0xf5   : > { %6872 = vmatprep.subr.bf16.mxu1 %v8625_v17  ;;  %v9297_v17 = vcombine.low %v8348_v20, %v8369_v7  ;;  %v4108_v56 = vor.u32 %v4107_v34, %v4104_v1  ;;  %v4118_v8 = vor.u32 %v4117_v4, %v8628_v46  ;;  %v4128_v20 = vrot.slane %v4126_v26, 4 }
  0xf6   : > { %6793 = vmatmul.mubr.bf16.vlgmr.msra.gmra.mrb[0].mxu0 %v8425_v50  ;;  %v4097_v50 = vshll.u32 %v8600_v3, 16  ;;  %v4131_v7 = vrot.slane %v4129_v0, 5  ;;  %v4163_v22 = vshrl.u32 %v8643_v29, 16  ;;  %v4061_v47 = vrot.slane %v4060_v14, 4  ;;  %v7268_v0 = vld [vmem:[%s9249_s1 + $0x218] sm:$0xff]  }
  0xf7   : > { %6569 = vmatmul.mubr.bf16.gmra.mrb[16].mxu1 %v9295_v24  ;;  %6825 = vmatpush3.bf16.msra.mxu0 %v8329_v21  ;;  %v4121_v21 = vshll.u32 %v8611_v39, 16  ;;  %v4159_v24 = vshll.u32 %v8643_v29, 16  ;;  %v4071_v39 = vrot.slane %v4070_v38, 4  ;;  %v4075_v3 = vrot.slane %v4073_v12, 5 }
  0xf8   : > { %6572 = vmatprep.mubr.bf16.mxu1 %v9297_v17  ;;  %6796 = vmatprep.mubr.bf16.mxu0 %v8429_v48  ;;  %v8658_v17 = vrot.slane %v4135_v44, 5  ;;  %v4141_v48 = vrot.slane %v4139_v59, 4  ;;  %v4099_v41 = vrot.slane %v4097_v50, 5  ;;  %v4085_v34 = vrot.slane %v4084_v23, 4 }
  0xf9   : > { %6826 = vmatprep.subr.bf16.mxu0 %v7264_v49  ;;  %v4095_v1 = vrot.slane %v4094_v15, 4  ;;  %v4152_v4 = vrot.slane %v4150_v27, 4  ;;  %v4155_v45 = vrot.slane %v4153_v30, 5  ;;  %v4109_v26 = vrot.slane %v4108_v56, 4  ;;  %v8724_v27 = vld [vmem:[%s7466_s21 + $0xbc] sm:$0x1] }
  0xfa   : > { %v4123_v44 = vrot.slane %v4121_v21, 5  ;;  %v4132_v59 = vor.u32 %v4131_v7, %v4128_v20  ;;  %v4145_v29 = vshll.u32 %v8656_v25, 16  ;;  %v4142_v12 = vor.u32 %v4141_v48, %v8658_v17  ;;  %v8691_v21 = vld [vmem:[%s7466_s21 + $0xb0] sm:$0x1] }
  0xfb   : > { %6827 = vmatpush3.bf16.msra.mxu0 %v7264_v49  ;;  %v4119_v49 = vrot.slane %v4118_v8, 4  ;;  %v8668_v14 = vrot.slane %v4159_v24, 5  ;;  %v4165_v38 = vrot.slane %v4163_v22, 4  ;;  %v9298_v23 = vor.u32 %v8076_v57, %v8074_v11 }
  0xfc   : > { %6828 = vmatprep.subr.bf16.mxu0 %v7266_v16  ;;  %v9299_v15 = vcombine.low %v8381_v40, %v8406_v60  ;;  %v4052_v22 = vsel %vm7498_vm2, %v8631_v53, %v8590_v5  ;;  %v4066_v57 = vsel %vm7498_vm2, %v4061_v47, %v8597_v28  ;;  %v9300_v40 = vcombine.low %v8436_v31, %v8478_v43  ;;  %v7271_v31 = vld [vmem:[%s9249_s1 + $0x220] sm:$0xff]  }
  0xfd   : > { %v8673_v50 = vrot.slane %v9298_v23, 4  ;;  %v4076_v60 = vsel %vm7498_vm2, %v4071_v39, %v4075_v3  ;;  %v4156_v5 = vor.u32 %v4155_v45, %v4152_v4  ;;  %v4100_v28 = vsel %vm7498_vm2, %v4095_v1, %v4099_v41  ;;  %v5994_v41 = vld [vmem:[%s7466_s21 + $0x48] sm:$0xe] }
  0xfe   : > { %6797 = vmatmul.mubr.bf16.gmra.mrb[4].mxu0 %v8474_v55  ;;  %v4042_v55 = vsel %vm7498_vm2, %v8588_v10, %v8560_v61  ;;  %v5941_v61 = vld [vmem:[%s7466_s21 + $0xb4] sm:$0xf]  ;;  %v8703_v10 = vld [vmem:[%s7466_s21 + $0xb8] sm:$0xf]  ;;  %v4114_v39 = vsel %vm7498_vm2, %v4109_v26, %v8628_v46  ;;  %v8713_v43 = vrot.slane %v4132_v59, 4  ;;  %v8715_v3 = vrot.slane %v4145_v29, 5 }
  0xff   : > { %6573 = vmatmul.mubr.bf16.gmra.mrb[20].mxu1 %v9299_v15  ;;  %6800 = vmatprep.mubr.bf16.mxu0 %v8529_v18  ;;  %v4090_v18 = vsel %vm7498_vm2, %v4085_v34, %v8608_v13  ;;  %v4124_v13 = vsel %vm7498_vm2, %v4119_v49, %v4123_v44  ;;  %v8719_v45 = vrot.slane %v4142_v12, 4  ;;  %v4166_v53 = vor.u32 %v4165_v38, %v8668_v14  ;;  %v5995_v26 = vld [vmem:[%s7466_s21 + $0x54] sm:$0xe] }
 0x100   : > { %6576 = vmatprep.mubr.bf16.mxu1 %v9300_v40  ;;  %6829 = vmatpush3.bf16.msra.mxu0 %v7266_v16  ;;  %v4169_v16 = vshll.u32 %v8691_v21, 16  ;;  %v9301_v46 = vsel %vm7498_vm2, %v8558_v42, %v8547_v52  ;;  %v9302_v29 = vsel %vm7498_vm2, %v8556_v35, %v8480_v58  ;;  %v4174_v56 = vshrl.u32 %v5941_v61, 16 }
 0x101   : > { %6830 = vmatprep.subr.bf16.mxu0 %v7268_v0  ;;  %v5972_v30 = vcombine.low %v9302_v29, %v9301_v46  ;;  %v4177_v8 = vshll.u32 %v5941_v61, 16  ;;  %v4183_v20 = vshll.u32 %v8703_v10, 16  ;;  %v5588_v7 = vcombine.low %v8535_v2, %v8545_v54  ;;  %v7274_v2 = vld [vmem:[%s9249_s1 + $0x228] sm:$0xff]   ;;  %v5944_v54 = vld [vmem:[%s7466_s21 + $0xc0] sm:$0xf]  ;;  %v9306_v29 = vld [vmem:[#allocation5_spill] sm:$0xff] }
 0x102   : > { %v5589_v48 = vcombine.low %v8564_v36, %v8620_v62  ;;  %v5973_v24 = vcombine.low %v4042_v55, %v4052_v22  ;;  %v8741_v52 = vrot.slane %v4156_v5, 4  ;;  %v5974_v42 = vcombine.low %v4066_v57, %v4076_v60 }
 0x103   : > { %v8743_v58 = vcombine.low %v4090_v18, %v4100_v28  ;;  %v8745_v35 = vcombine.low %v4114_v39, %v4124_v13  ;;  %v4138_v47 = vsel %vm7498_vm2, %v8713_v43, %v8658_v17  ;;  %v4148_v34 = vsel %vm7498_vm2, %v8719_v45, %v8715_v3  ;;  %v5997_v28 = vld [vmem:[%s7466_s21 + $0x6c] sm:$0xe] }
 0x104   : > { %6831 = vmatpush3.bf16.msra.mxu0 %v7268_v0  ;;  %v8761_v1 = vrot.slane %v4166_v53, 4  ;;  %v8763_v4 = vrot.slane %v4169_v16, 5  ;;  %v4187_v0 = vshrl.u32 %v8703_v10, 16  ;;  %v9303_v44 = vcombine.low %v8490_v6, %v8499_v51  ;;  %v7277_v6 = vld [vmem:[%s9249_s1 + $0x230] sm:$0xff]   ;;  %v8785_v51 = vld [vmem:[%s7466_s21 + $0xc4] sm:$0xf] }
 0x105   : > { %6832 = vmatprep.subr.bf16.mxu0 %v7271_v31  ;;  %v8770_v59 = vrot.slane %v4174_v56, 4  ;;  %v8774_v49 = vrot.slane %v4183_v20, 5  ;;  %v4193_v12 = vshll.u32 %v8724_v27, 16  ;;  %v4162_v38 = vsel %vm7498_vm2, %v8741_v52, %v8668_v14  ;;  %v5996_v14 = vld [vmem:[%s7466_s21 + $0x60] sm:$0xe]  ;;  %v9304_v39 = vld [vmem:[#allocation3_spill] sm:$0xff] }
 0x106   : > { %6801 = vmatmul.mubr.bf16.gmra.mrb[8].mxu0 %v8541_v19  ;;  %v8772_v19 = vrot.slane %v4177_v8, 5  ;;  %v4198_v23 = vshrl.u32 %v5944_v54, 16  ;;  %v6010_v15 = vrot.slane %v5994_v41, 9  ;;  %v4661_v55 = vrot.slane %v8361_v32, 5  ;;  %v7269_v13 = vld [vmem:[%s7466_s21 + $0xc] sm:$0xff]   ;;  %v7280_v56 = vld [vmem:[%s9249_s1 + $0x238] sm:$0xff]  }
 0x107   : > { %6577 = vmatmul.mubr.bf16.gmra.mrb[24].mxu1 %v9303_v44  ;;  %6804 = vmatprep.mubr.bf16.mxu0 %v5972_v30  ;;  %v4201_v22 = vshll.u32 %v5944_v54, 16  ;;  %v4664_v57 = vrot.slane %v8409_v63, 5  ;;  %v6011_v40 = vrot.slane %v5995_v26, 9  ;;  %v4668_v60 = vrot.slane %v8373_v33, 5  ;;  %v9305_v16 = vld [vmem:[#allocation4_spill] sm:$0xff]  ;;  %v9307_v52 = vld [vmem:[#allocation6_spill] sm:$0xff] }
 0x108   : > { %6580 = vmatprep.mubr.bf16.mxu1 %v5588_v7  ;;  %6833 = vmatpush3.bf16.msra.mxu0 %v7271_v31  ;;  %v4172_v18 = vsel %vm7498_vm2, %v8761_v1, %v8763_v4  ;;  %v8795_v5 = vrot.slane %v4187_v0, 4  ;;  %v8799_v61 = vsel %vm7744_vm5, %v6010_v15, %v4661_v55  ;;  %v4663_v32 = vrot.slane %v4661_v55, 4  ;;  %v9308_v4 = vld [vmem:[#allocation7_spill] sm:$0xff] }
 0x109   : > { %6834 = vmatprep.subr.bf16.mxu0 %v7274_v2  ;;  %v4207_v31 = vshll.u32 %v8785_v51, 16  ;;  %v8805_v63 = vsel %vm7744_vm5, %v6011_v40, %v4668_v60  ;;  %v4670_v33 = vrot.slane %v4668_v60, 4  ;;  %v4671_v3 = vrot.slane %v9304_v39, 5  ;;  %v8836_v26 = vld [vmem:[%s7466_s21 + $0xc8] sm:$0x1]  ;;  %v7270_v40 = vld [vmem:[%s7466_s21 + $0x18] sm:$0xff]  }
 0x10a   : > { %v8811_v45 = vsel %vm7744_vm5, %v4663_v32, %v4664_v57  ;;  %v6012_v53 = vrot.slane %v5996_v14, 9  ;;  %v4675_v46 = vrot.slane %v9305_v16, 5  ;;  %v4678_v30 = vrot.slane %v9306_v29, 5  ;;  %v7272_v39 = vld [vmem:[%s7466_s21 + $0x24] sm:$0xff]  }
 0x10b   : > { %v6042_v8 = vcombine.low %v8799_v61, %v8811_v45  ;;  %v8822_v20 = vsel %vm7744_vm5, %v4670_v33, %v4671_v3  ;;  %v6013_v7 = vrot.slane %v5997_v28, 9  ;;  %v4685_v0 = vrot.slane %v9308_v4, 5  ;;  %v9310_v28 = vld [vmem:[#allocation11_spill] sm:$0xff]  ;;  %v5703_v61 = vld [vmem:[%s7466_s21 + $0x90] sm:$0xf] }
 0x10c   : > { %6835 = vmatpush3.bf16.msra.mxu0 %v7274_v2  ;;  %v4682_v2 = vrot.slane %v9307_v52, 5  ;;  %v6043_v54 = vcombine.low %v8805_v63, %v8822_v20  ;;  %v8829_v41 = vsel %vm7744_vm5, %v6012_v53, %v4675_v46  ;;  %v4677_v1 = vrot.slane %v4675_v46, 4  ;;  %v9311_v53 = vld [vmem:[#allocation2_spill] sm:$0xff]  ;;  %v7286_v45 = vld [vmem:[%s7466_s21 + $0xa8] sm:$0xff]  }
 0x10d   : > { %6836 = vmatprep.subr.bf16.mxu0 %v7277_v6  ;;  %v8838_v44 = vrot.slane %v4198_v23, 4  ;;  %v8851_v36 = vcombine.low %v4138_v47, %v4148_v34  ;;  %v4180_v62 = vor.u32 %v8772_v19, %v8770_v59  ;;  %v5998_v23 = vld [vmem:[%s7466_s21 + $0x78] sm:$0xe]  ;;  %v8863_v57 = vrot.slane %v4193_v12, 5  ;;  %v5947_v12 = vld [vmem:[%s7466_s21 + $0xcc] sm:$0xf] }
 0x10e   : > { %6805 = vmatmul.mubr.bf16.gmra.mrb[12].mxu0 %v5973_v24  ;;  %v8840_v24 = vrot.slane %v4201_v22, 5  ;;  %v8844_v15 = vsel %vm7744_vm5, %v6013_v7, %v4682_v2  ;;  %v4684_v55 = vrot.slane %v4682_v2, 4  ;;  %v8861_v22 = vcombine.low %v4162_v38, %v4172_v18  ;;  %v5697_v47 = vld [vmem:[%s7466_s21 + $0x78] sm:$0xf]  ;;  %v9309_v18 = vld [vmem:[#allocation8_spill] sm:$0xff] }
 0x10f   : > { %6581 = vmatmul.mubr.bf16.gmra.mrb[28].mxu1 %v5589_v48  ;;  %6808 = vmatprep.mubr.bf16.mxu0 %v5974_v42  ;;  %v4211_v48 = vshrl.u32 %v8785_v51, 16  ;;  %v8858_v42 = vsel %vm7744_vm5, %v4677_v1, %v4678_v30  ;;  %v4190_v34 = vor.u32 %v8795_v5, %v8774_v49  ;;  %v8874_v59 = vrot.slane %v4207_v31, 5  ;;  %v8888_v31 = vld [vmem:[%s7466_s21 + $0xd0] sm:$0xf]  ;;  %v9312_v1 = vld [vmem:[#allocation9_spill] sm:$0xff] }
 0x110   : > { %6600 = vmatprep.mubr.bf16.mxu1 %v7269_v13  ;;  %6837 = vmatpush3.bf16.msra.mxu0 %v7277_v6  ;;  %v6044_v17 = vcombine.low %v8829_v41, %v8858_v42  ;;  %v8869_v43 = vsel %vm7744_vm5, %v4684_v55, %v4685_v0  ;;  %v4217_v19 = vshll.u32 %v8836_v26, 16  ;;  %v5999_v6 = vld [vmem:[%s7466_s21 + $0x84] sm:$0xe]  ;;  %v4204_v60 = vor.u32 %v8840_v24, %v8838_v44  ;;  %v9313_v24 = vld [vmem:[#allocation12_spill] sm:$0xff]  ;;  %v7350_v63 = vld [vmem:[%s7466_s21 + $0x8c] sm:$0x1] }
 0x111   : > { %6838 = vmatprep.subr.bf16.mxu0 %v7280_v56  ;;  %v6045_v38 = vcombine.low %v8844_v15, %v8869_v43  ;;  %v6014_v14 = vrot.slane %v5998_v23, 9  ;;  %v4689_v32 = vrot.slane %v9309_v18, 5  ;;  %v4692_v33 = vrot.slane %v9310_v28, 5 }
 0x112   : > { %v4213_v5 = vrot.slane %v4211_v48, 4  ;;  %v2436_v3 = vshrl.u32 %v5697_v47, 16  ;;  %v2439_v13 = vshll.u32 %v5697_v47, 16  ;;  %v2458_v16 = vsel %vm7498_vm2, %v8673_v50, %v9311_v53 }
 0x113   : > { %v4222_v46 = vshrl.u32 %v5947_v12, 16  ;;  %v8896_v29 = vsel %vm7744_vm5, %v6014_v14, %v4689_v32  ;;  %v4691_v30 = vrot.slane %v4689_v32, 4  ;;  %v6015_v7 = vrot.slane %v5999_v6, 9  ;;  %v7330_v6 = vld [vmem:[%s9249_s1 + $0x108] sm:$0xff]  }
 0x114   : > { %6839 = vmatpush3.bf16.msra.mxu0 %v7280_v56  ;;  %v4225_v52 = vshll.u32 %v5947_v12, 16  ;;  %v2438_v2 = vrot.slane %v2436_v3, 4  ;;  %v2441_v56 = vrot.slane %v2439_v13, 5  ;;  %v4696_v4 = vrot.slane %v9312_v1, 5  ;;  %v6000_v12 = vld [vmem:[%s7466_s21 + $0x90] sm:$0xe] }
 0x115   : > { %v4231_v50 = vshll.u32 %v8888_v31, 16  ;;  %v4235_v0 = vshrl.u32 %v8888_v31, 16  ;;  %v8905_v44 = vsel %vm7744_vm5, %v4691_v30, %v4692_v33  ;;  %v4699_v55 = vrot.slane %v9313_v24, 5  ;;  %v7273_v3 = vld [vmem:[%s7466_s21 + $0x30] sm:$0xff]  }
 0x116   : > { %6809 = vmatmul.mubr.bf16.gmra.mrb[16].mxu0 %v8743_v58  ;;  %v9314_v58 = vld [vmem:[#allocation15_spill] sm:$0xff]  ;;  %v4214_v48 = vor.u32 %v4213_v5, %v8874_v59  ;;  %v2442_v23 = vor.u32 %v2441_v56, %v2438_v2  ;;  %v4698_v47 = vrot.slane %v4696_v4, 4  ;;  %v4191_v14 = vrot.slane %v4190_v34, 4  ;;  %v8926_v13 = vld [vmem:[%s7466_s21 + $0xd4] sm:$0x1]  ;;  %v9315_v2 = vld [vmem:[#allocation10_spill] sm:$0xff] }
 0x117   : > { %6601 = vmatmul.mubr.bf16.vlgmr.msra.gmra.mrb[0].mxu1 %v7270_v40  ;;  %6812 = vmatprep.mubr.bf16.mxu0 %v8745_v35  ;;  %v6046_v35 = vcombine.low %v8896_v29, %v8905_v44  ;;  %v4181_v40 = vrot.slane %v4180_v62, 4  ;;  %v4219_v18 = vrot.slane %v4217_v19, 5  ;;  %v8918_v32 = vsel %vm7744_vm5, %v6015_v7, %v4696_v4  ;;  %v7275_v19 = vld [vmem:[%s7466_s21 + $0x3c] sm:$0xff]   ;;  %v7331_v1 = vld [vmem:[%s9249_s1 + $0x110] sm:$0xff]  }
 0x118   : > { %6880 = vmatpush3.bf16.msra.mxu1 %v9314_v58  ;;  %6604 = vmatprep.mubr.bf16.mxu1 %v7272_v39  ;;  %v4224_v28 = vrot.slane %v4222_v46, 4  ;;  %v4227_v33 = vrot.slane %v4225_v52, 5  ;;  %v2443_v39 = vrot.slane %v2442_v23, 4  ;;  %v8922_v5 = vsel %vm7744_vm5, %v4698_v47, %v4699_v55  ;;  %v7332_v47 = vld [vmem:[%s7466_s21 + $0x1c] sm:$0xf] }
 0x119   : > { %6873 = vmatprep.subr.bf16.mxu1 %v7330_v6  ;;  %v8928_v53 = vrot.slane %v4231_v50, 5  ;;  %v4237_v30 = vrot.slane %v4235_v0, 4  ;;  %v6047_v62 = vcombine.low %v8918_v32, %v8922_v5  ;;  %v6016_v34 = vrot.slane %v6000_v12, 9 }
 0x11a   : > { %v4205_v7 = vrot.slane %v4204_v60, 4  ;;  %v4215_v46 = vrot.slane %v4214_v48, 4  ;;  %v2448_v52 = vsel %vm7498_vm2, %v2443_v39, %v8074_v11  ;;  %v4703_v56 = vrot.slane %v9315_v2, 5  ;;  %v9316_v11 = vld [vmem:[#allocation14_spill] sm:$0xff]  ;;  %v7276_v39 = vld [vmem:[%s7466_s21 + $0x48] sm:$0xff]  }
 0x11b   : > { %v4186_v4 = vsel %vm7498_vm2, %v4181_v40, %v8774_v49  ;;  %v4196_v60 = vsel %vm7498_vm2, %v4191_v14, %v8863_v57  ;;  %v8946_v50 = vcombine.low %v2448_v52, %v2458_v16  ;;  %v4706_v0 = vrot.slane %v9316_v11, 5  ;;  %v5990_v57 = vld [vmem:[%s7466_s21 + $0x18] sm:$0xe]  ;;  %v6001_v16 = vld [vmem:[%s7466_s21 + $0x9c] sm:$0xe] }
 0x11c   : > { %6881 = vmatpush3.bf16.msra.mxu1 %v7330_v6  ;;  %v4228_v24 = vor.u32 %v4227_v33, %v4224_v28  ;;  %v4241_v55 = vshll.u32 %v8926_v13, 16  ;;  %v8953_v58 = vsel %vm7744_vm5, %v6016_v34, %v4703_v56  ;;  %v4705_v48 = vrot.slane %v4703_v56, 4  ;;  %v7333_v40 = vld [vmem:[%s9249_s1 + $0x118] sm:$0xff]   ;;  %v7334_v2 = vld [vmem:[%s7466_s21 + $0x20] sm:$0x1] }
 0x11d   : > { %6874 = vmatprep.subr.bf16.mxu1 %v7331_v1  ;;  %v4238_v49 = vor.u32 %v4237_v30, %v8928_v53  ;;  %v4220_v23 = vsel %vm7498_vm2, %v4215_v46, %v4219_v18  ;;  %v4633_v12 = vrot.slane %v7332_v47, 5  ;;  %v5979_v6 = vcombine.low %v4186_v4, %v4196_v60  ;;  %v9317_v34 = vld [vmem:[#allocation13_spill] sm:$0xff]  ;;  %v6002_v11 = vld [vmem:[%s7466_s21 + $0xa8] sm:$0xe] }
 0x11e   : > { %6813 = vmatmul.mubr.bf16.gmra.mrb[20].mxu0 %v8851_v36  ;;  %v4210_v36 = vsel %vm7498_vm2, %v4205_v7, %v8874_v59  ;;  %v4229_v14 = vrot.slane %v4228_v24, 4  ;;  %v4243_v28 = vrot.slane %v4241_v55, 5  ;;  %v6006_v18 = vrot.slane %v5990_v57, 9  ;;  %v7278_v46 = vld [vmem:[%s7466_s21 + $0x54] sm:$0xff]   ;;  %v5991_v55 = vld [vmem:[%s7466_s21 + $0x24] sm:$0xe] }
 0x11f   : > { %6605 = vmatmul.mubr.bf16.gmra.mrb[4].mxu1 %v7273_v3  ;;  %6816 = vmatprep.mubr.bf16.mxu0 %v8861_v22  ;;  %v8967_v22 = vsel %vm7744_vm5, %v4705_v48, %v4706_v0  ;;  %v6017_v33 = vrot.slane %v6001_v16, 9  ;;  %v5980_v3 = vcombine.low %v4210_v36, %v4220_v23  ;;  %v4239_v30 = vrot.slane %v4238_v49, 4  ;;  %v7336_v48 = vld [vmem:[%s7466_s21 + $0x28] sm:$0xf]  ;;  %v7337_v36 = vld [vmem:[%s7466_s21 + $0x34] sm:$0xf] }
 0x120   : > { %6608 = vmatprep.mubr.bf16.mxu1 %v7275_v19  ;;  %6882 = vmatpush3.bf16.msra.mxu1 %v7331_v1  ;;  %v6048_v59 = vcombine.low %v8953_v58, %v8967_v22  ;;  %v4710_v19 = vrot.slane %v9317_v34, 5  ;;  %v4713_v7 = vrot.slane %v8656_v25, 5  ;;  %v4635_v52 = vrot.slane %v4633_v12, 4  ;;  %v7335_v1 = vld [vmem:[%s9249_s1 + $0x120] sm:$0xff]  }
 0x121   : > { %6875 = vmatprep.subr.bf16.mxu1 %v7333_v40  ;;  %v4636_v56 = vrot.slane %v7334_v2, 5  ;;  %v4634_v25 = vsel %vm7744_vm5, %v6006_v18, %v4633_v12  ;;  %v4234_v0 = vsel %vm7498_vm2, %v4229_v14, %v8928_v53  ;;  %v4244_v24 = vsel %vm7498_vm2, %v4239_v30, %v4243_v28  ;;  %v5992_v12 = vld [vmem:[%s7466_s21 + $0x30] sm:$0xe]  ;;  %v7279_v30 = vld [vmem:[%s7466_s21 + $0x60] sm:$0xff]  }
 0x122   : > { %v8984_v4 = vsel %vm7744_vm5, %v6017_v33, %v4710_v19  ;;  %v4712_v60 = vrot.slane %v4710_v19, 4  ;;  %v4640_v49 = vrot.slane %v7336_v48, 5  ;;  %v4647_v23 = vrot.slane %v7337_v36, 5  ;;  %v7339_v33 = vld [vmem:[%s7466_s21 + $0x2c] sm:$0x1] }
 0x123   : > { %v4637_v16 = vsel %vm7744_vm5, %v4635_v52, %v4636_v56  ;;  %v6018_v47 = vrot.slane %v6002_v11, 9  ;;  %v5981_v28 = vcombine.low %v4234_v0, %v4244_v24  ;;  %v6007_v18 = vrot.slane %v5991_v55, 9  ;;  %v7281_v52 = vld [vmem:[%s7466_s21 + $0x6c] sm:$0xff]   ;;  %v6003_v11 = vld [vmem:[%s7466_s21 + $0xb4] sm:$0xe] }
 0x124   : > { %6883 = vmatpush3.bf16.msra.mxu1 %v7333_v40  ;;  %v8998_v57 = vsel %vm7744_vm5, %v4712_v60, %v4713_v7  ;;  %v9318_v40 = vld [vmem:[#allocation16_spill] sm:$0xff]  ;;  %v6038_v34 = vcombine.low %v4634_v25, %v4637_v16  ;;  %v4642_v19 = vrot.slane %v4640_v49, 4  ;;  %v6008_v2 = vrot.slane %v5992_v12, 9  ;;  %v5993_v0 = vld [vmem:[%s7466_s21 + $0x3c] sm:$0xe] }
 0x125   : > { %6876 = vmatprep.subr.bf16.mxu1 %v7335_v1  ;;  %v6049_v53 = vcombine.low %v8984_v4, %v8998_v57  ;;  %v4717_v14 = vrot.slane %v9318_v40, 5  ;;  %v4649_v56 = vrot.slane %v4647_v23, 4  ;;  %v7341_v24 = vld [vmem:[%s7466_s21 + $0x40] sm:$0xf]  ;;  %v4641_v48 = vsel %vm7744_vm5, %v6007_v18, %v4640_v49  ;;  %v7343_v18 = vld [vmem:[%s7466_s21 + $0x44] sm:$0x1] }
 0x126   : > { %6817 = vmatmul.mubr.bf16.gmra.mrb[24].mxu0 %v5979_v6  ;;  %v7338_v6 = vld [vmem:[%s9249_s1 + $0x128] sm:$0xff]   ;;  %v4654_v55 = vrot.slane %v7341_v24, 5  ;;  %v4724_v12 = vrot.slane %v8703_v10, 5  ;;  %v4648_v49 = vsel %vm7744_vm5, %v6008_v2, %v4647_v23  ;;  %v7344_v10 = vld [vmem:[%s9249_s1 + $0x138] sm:$0xff]   ;;  %v6004_v23 = vld [vmem:[%s7466_s21 + $0xc0] sm:$0xe] }
 0x127   : > { %6609 = vmatmul.mubr.bf16.gmra.mrb[8].mxu1 %v7276_v39  ;;  %6820 = vmatprep.mubr.bf16.mxu0 %v5980_v3  ;;  %v4643_v39 = vrot.slane %v7339_v33, 5  ;;  %v4720_v3 = vrot.slane %v8691_v21, 5  ;;  %v9015_v7 = vsel %vm7744_vm5, %v6018_v47, %v4717_v14  ;;  %v7342_v21 = vld [vmem:[%s9249_s1 + $0x130] sm:$0xff]   ;;  %v6019_v47 = vrot.slane %v6003_v11, 9 }
 0x128   : > { %6612 = vmatprep.mubr.bf16.mxu1 %v7278_v46  ;;  %6884 = vmatpush3.bf16.msra.mxu1 %v7335_v1  ;;  %v4719_v46 = vrot.slane %v4717_v14, 4  ;;  %v7340_v1 = vld [vmem:[%s7466_s21 + $0x38] sm:$0x1]  ;;  %v6009_v14 = vrot.slane %v5993_v0, 9  ;;  %v4657_v33 = vrot.slane %v7343_v18, 5  ;;  %v4731_v11 = vrot.slane %v8785_v51, 5 }
 0x129   : > { %6877 = vmatprep.subr.bf16.mxu1 %v7338_v6  ;;  %v4650_v60 = vrot.slane %v7340_v1, 5  ;;  %v4644_v36 = vsel %vm7744_vm5, %v4642_v19, %v4643_v39  ;;  %v4726_v39 = vrot.slane %v4724_v12, 4  ;;  %v5694_v19 = vld [vmem:[%s7466_s21 + $0x6c] sm:$0xf]  ;;  %v7284_v18 = vld [vmem:[%s7466_s21 + $0x90] sm:$0xff]   ;;  %v2479_v20 = vshll.u32 %v7350_v63, 16 }
 0x12a   : > { %v9027_v25 = vsel %vm7744_vm5, %v4719_v46, %v4720_v3  ;;  %v6039_v3 = vcombine.low %v4641_v48, %v4644_v36  ;;  %v4655_v1 = vsel %vm7744_vm5, %v6009_v14, %v4654_v55  ;;  %v2412_v0 = vshrl.u32 %v5694_v19, 16  ;;  %v6005_v51 = vld [vmem:[%s7466_s21 + $0xcc] sm:$0xe] }
 0x12b   : > { %v6050_v16 = vcombine.low %v9015_v7, %v9027_v25  ;;  %v4651_v40 = vsel %vm7744_vm5, %v4649_v56, %v4650_v60  ;;  %v6020_v56 = vrot.slane %v6004_v23, 9  ;;  %v2415_v24 = vshll.u32 %v5694_v19, 16 }
 0x12c   : > { %6885 = vmatpush3.bf16.msra.mxu1 %v7338_v6  ;;  %v4727_v6 = vrot.slane %v8724_v27, 5  ;;  %v9047_v27 = vsel %vm7744_vm5, %v6019_v47, %v4724_v12  ;;  %v4734_v36 = vrot.slane %v8836_v26, 5  ;;  %v4733_v12 = vrot.slane %v4731_v11, 4 }
 0x12d   : > { %6878 = vmatprep.subr.bf16.mxu1 %v7342_v21  ;;  %v2417_v26 = vrot.slane %v2415_v24, 5  ;;  %v4741_v23 = vrot.slane %v8926_v13, 5 }
 0x12e   : > { %6821 = vmatmul.mubr.bf16.gmra.mrb[28].mxu0 %v5981_v28  ;;  %v4656_v28 = vrot.slane %v4654_v55, 4  ;;  %v9054_v46 = vsel %vm7744_vm5, %v4726_v39, %v4727_v6  ;;  %v9068_v55 = vsel %vm7744_vm5, %v6020_v56, %v4731_v11  ;;  %v4738_v39 = vrot.slane %v8888_v31, 5  ;;  %v7346_v56 = vld [vmem:[%s7466_s21 + $0x74] sm:$0x1] }
 0x12f   : > { %6613 = vmatmul.mubr.bf16.gmra.mrb[12].mxu1 %v7279_v30  ;;  %6840 = vmatprep.mubr.bf16.mxu0 %v6038_v34  ;;  %v7282_v30 = vld [vmem:[%s7466_s21 + $0x78] sm:$0xff]   ;;  %v6040_v34 = vcombine.low %v4648_v49, %v4651_v40  ;;  %v6051_v2 = vcombine.low %v9047_v27, %v9054_v46  ;;  %v9073_v49 = vsel %vm7744_vm5, %v4733_v12, %v4734_v36  ;;  %v2414_v40 = vrot.slane %v2412_v0, 4  ;;  %v7347_v0 = vld [vmem:[%s7466_s21 + $0x88] sm:$0xf] }
 0x130   : > { %6616 = vmatprep.mubr.bf16.mxu1 %v7281_v52  ;;  %6886 = vmatpush3.bf16.msra.mxu1 %v7342_v21  ;;  %v7283_v52 = vld [vmem:[%s7466_s21 + $0x84] sm:$0xff]   ;;  %v4658_v60 = vsel %vm7744_vm5, %v4656_v28, %v4657_v33  ;;  %v7345_v21 = vld [vmem:[%s7466_s21 + $0x70] sm:$0xf]  ;;  %v6052_v28 = vcombine.low %v9068_v55, %v9073_v49  ;;  %v4740_v19 = vrot.slane %v4738_v39, 4  ;;  %v2469_v24 = vshll.u32 %v7347_v0, 16 }
 0x131   : > { %6879 = vmatprep.subr.bf16.mxu1 %v7344_v10  ;;  %v2421_v48 = vshll.u32 %v7345_v21, 16  ;;  %v2425_v47 = vshrl.u32 %v7345_v21, 16  ;;  %v6041_v6 = vcombine.low %v4655_v1, %v4658_v60  ;;  %v2431_v1 = vshll.u32 %v7346_v56, 16 }
 0x132   : > { %v9095_v11 = vsel %vm7744_vm5, %v4740_v19, %v4741_v23  ;;  %v2473_v21 = vshrl.u32 %v7347_v0, 16  ;;  %v7349_v19 = vld [vmem:[%s7466_s21 + $0xa0] sm:$0xf] }
 0x133   : > { %v9075_v14 = vrot.slane %v2421_v48, 5  ;;  %v2427_v33 = vrot.slane %v2425_v47, 4  ;;  %v2521_v56 = vshrl.u32 %v7349_v19, 16 }
 0x134   : > { %6887 = vmatpush3.bf16.msra.mxu1 %v7344_v10  ;;  %v6021_v10 = vrot.slane %v6005_v51, 9 }
 0x135   : > { %v2428_v31 = vor.u32 %v2427_v33, %v9075_v14  ;;  %v2487_v33 = vshll.u32 %v5703_v61, 16 }
 0x136   : > { %6841 = vmatmul.mubr.bf16.vlgmr.msra.gmra.mrb[0].mxu0 %v6039_v3  ;;  %v7285_v3 = vld [vmem:[%s7466_s21 + $0x9c] sm:$0xff]  }
 0x137   : > { %6617 = vmatmul.mubr.bf16.gmra.mrb[16].mxu1 %v7282_v30  ;;  %6844 = vmatprep.mubr.bf16.mxu0 %v6040_v34  ;;  %v5700_v30 = vld [vmem:[%s7466_s21 + $0x84] sm:$0xf]  ;;  %v9086_v34 = vsel %vm7744_vm5, %v6021_v10, %v4738_v39  ;;  %v2429_v47 = vrot.slane %v2428_v31, 4  ;;  %v7348_v10 = vld [vmem:[%s7466_s21 + $0x94] sm:$0xf]  ;;  %v2489_v0 = vrot.slane %v2487_v33, 5 }
 0x138   : > { %6620 = vmatprep.mubr.bf16.mxu1 %v7283_v52  ;;  %v2418_v52 = vor.u32 %v2417_v26, %v2414_v40  ;;  %v2460_v13 = vshrl.u32 %v5700_v30, 16  ;;  %v2463_v60 = vshll.u32 %v5700_v30, 16  ;;  %v6053_v48 = vcombine.low %v9086_v34, %v9095_v11 }
 0x139   : > { %v9104_v40 = vrot.slane %v2469_v24, 5  ;;  %v2475_v26 = vrot.slane %v2473_v21, 4  ;;  %v2493_v39 = vshll.u32 %v7348_v10, 16  ;;  %v2497_v23 = vshrl.u32 %v7348_v10, 16  ;;  %v7352_v10 = vld [vmem:[%s7466_s21 + $0xa4] sm:$0x1] }
 0x13a   : > { %v2419_v36 = vrot.slane %v2418_v52, 4  ;;  %v2462_v12 = vrot.slane %v2460_v13, 4  ;;  %v2465_v51 = vrot.slane %v2463_v60, 5  ;;  %v2517_v52 = vshll.u32 %v7349_v19, 16  ;;  %v7353_v19 = vld [vmem:[%s7466_s21 + $0xac] sm:$0xf] }
 0x13b   : > { %v2476_v13 = vor.u32 %v2475_v26, %v9104_v40  ;;  %v9121_v41 = vrot.slane %v2493_v39, 5  ;;  %v2499_v42 = vrot.slane %v2497_v23, 4  ;;  %v2523_v21 = vrot.slane %v2521_v56, 4  ;;  %v5712_v23 = vld [vmem:[%s7466_s21 + $0xb4] sm:$0xf] }
 0x13c   : > { %v2527_v39 = vshll.u32 %v7352_v10, 16  ;;  %v2545_v15 = vshrl.u32 %v7353_v19, 16  ;;  %v2559_v63 = vshll.u32 %v5712_v23, 16 }
 0x13d   : > { %v2500_v26 = vor.u32 %v2499_v42, %v9121_v41 }
 0x13e   : > { %6845 = vmatmul.mubr.bf16.gmra.mrb[4].mxu0 %v6041_v6  ;;  %v5706_v6 = vld [vmem:[%s7466_s21 + $0x9c] sm:$0xf] }
 0x13f   : > { %6621 = vmatmul.mubr.bf16.gmra.mrb[20].mxu1 %v7284_v18  ;;  %6848 = vmatprep.mubr.bf16.mxu0 %v6042_v8  ;;  %v2433_v8 = vrot.slane %v2431_v1, 5  ;;  %v2484_v18 = vshrl.u32 %v5703_v61, 16  ;;  %v2511_v30 = vshll.u32 %v5706_v6, 16  ;;  %v2424_v1 = vsel %vm7498_vm2, %v2419_v36, %v9075_v14  ;;  %v7288_v61 = vld [vmem:[%s7466_s21 + $0xc0] sm:$0xff]  }
 0x140   : > { %6624 = vmatprep.mubr.bf16.mxu1 %v7285_v3  ;;  %v2508_v3 = vshrl.u32 %v5706_v6, 16  ;;  %v9123_v14 = vrot.slane %v2517_v52, 5  ;;  %v2541_v52 = vshll.u32 %v7353_v19, 16 }
 0x141   : > { %v2434_v31 = vsel %vm7498_vm2, %v2429_v47, %v2433_v8  ;;  %v2486_v60 = vrot.slane %v2484_v18, 4  ;;  %v2513_v24 = vrot.slane %v2511_v30, 5  ;;  %v2481_v8 = vrot.slane %v2479_v20, 5  ;;  %v7354_v20 = vld [vmem:[%s7466_s21 + $0xb8] sm:$0xf] }
 0x142   : > { %v2477_v47 = vrot.slane %v2476_v13, 4  ;;  %v2524_v33 = vor.u32 %v2523_v21, %v9123_v14  ;;  %v2565_v29 = vshll.u32 %v7354_v20, 16  ;;  %v2569_v44 = vshrl.u32 %v7354_v20, 16 }
 0x144   : > { %v2525_v13 = vrot.slane %v2524_v33, 4 }
 0x146   : > { %6849 = vmatmul.mubr.bf16.gmra.mrb[8].mxu0 %v6043_v54  ;;  %v2466_v54 = vor.u32 %v2465_v51, %v2462_v12  ;;  %v2490_v12 = vor.u32 %v2489_v0, %v2486_v60  ;;  %v7351_v51 = vld [vmem:[%s7466_s21 + $0x98] sm:$0x1]  ;;  %v2529_v60 = vrot.slane %v2527_v39, 5 }
 0x147   : > { %6625 = vmatmul.mubr.bf16.gmra.mrb[24].mxu1 %v7286_v45  ;;  %6852 = vmatprep.mubr.bf16.mxu0 %v6044_v17  ;;  %v2510_v17 = vrot.slane %v2508_v3, 4  ;;  %v5742_v45 = vcombine.low %v2424_v1, %v2434_v31  ;;  %v2503_v6 = vshll.u32 %v7351_v51, 16  ;;  %v2556_v31 = vshrl.u32 %v5712_v23, 16 }
 0x148   : > { %6628 = vmatprep.mubr.bf16.mxu1 %v7287_v9  ;;  %v2467_v36 = vrot.slane %v2466_v54, 4  ;;  %v5709_v9 = vld [vmem:[%s7466_s21 + $0xa8] sm:$0xf]  ;;  %v2491_v56 = vrot.slane %v2490_v12, 4  ;;  %v2530_v32 = vsel %vm7498_vm2, %v2525_v13, %v2529_v60 }
 0x149   : > { %v2514_v18 = vor.u32 %v2513_v24, %v2510_v17  ;;  %v2532_v3 = vshrl.u32 %v5709_v9, 16  ;;  %v2535_v30 = vshll.u32 %v5709_v9, 16  ;;  %v2505_v1 = vrot.slane %v2503_v6, 5 }
 0x14a   : > { %v2472_v43 = vsel %vm7498_vm2, %v2467_v36, %v9104_v40  ;;  %v2543_v17 = vrot.slane %v2541_v52, 5  ;;  %v2547_v24 = vrot.slane %v2545_v15, 4  ;;  %v2558_v21 = vrot.slane %v2556_v31, 4  ;;  %v5715_v36 = vld [vmem:[%s7466_s21 + $0xc0] sm:$0xf] }
 0x14b   : > { %v2515_v54 = vrot.slane %v2514_v18, 4  ;;  %v2534_v0 = vrot.slane %v2532_v3, 4  ;;  %v2537_v42 = vrot.slane %v2535_v30, 5  ;;  %v2580_v9 = vshrl.u32 %v5715_v36, 16  ;;  %v7356_v18 = vld [vmem:[%s7466_s21 + $0xc4] sm:$0xf] }
 0x14c   : > { %v2589_v33 = vshll.u32 %v7356_v18, 16 }
 0x14d   : > { %v2520_v51 = vsel %vm7498_vm2, %v2515_v54, %v9123_v14  ;;  %v2538_v5 = vor.u32 %v2537_v42, %v2534_v0  ;;  %v2593_v14 = vshrl.u32 %v7356_v18, 16  ;;  %v2582_v19 = vrot.slane %v2580_v9, 4 }
 0x14e   : > { %6853 = vmatmul.mubr.bf16.gmra.mrb[12].mxu0 %v6045_v38  ;;  %v2482_v38 = vsel %vm7498_vm2, %v2477_v47, %v2481_v8  ;;  %v2571_v8 = vrot.slane %v2569_v44, 4  ;;  %v2496_v47 = vsel %vm7498_vm2, %v2491_v56, %v9121_v41  ;;  %v7355_v41 = vld [vmem:[%s7466_s21 + $0xb0] sm:$0x1]  ;;  %v5746_v58 = vcombine.low %v2520_v51, %v2530_v32  ;;  %v7358_v44 = vld [vmem:[%s7466_s21 + $0xc8] sm:$0x1] }
 0x14f   : > { %6629 = vmatmul.mubr.bf16.gmra.mrb[28].mxu1 %v7288_v61  ;;  %6856 = vmatprep.mubr.bf16.mxu0 %v6046_v35  ;;  %v2501_v35 = vrot.slane %v2500_v26, 4  ;;  %v5744_v40 = vcombine.low %v2472_v43, %v2482_v38  ;;  %v2561_v61 = vrot.slane %v2559_v63, 5  ;;  %v2551_v6 = vshll.u32 %v7355_v41, 16 }
 0x150   : > { %6664 = vmatprep.mubr.bf16.mxu1 %v5742_v45  ;;  %v2567_v45 = vrot.slane %v2565_v29, 5  ;;  %v2583_v26 = vshll.u32 %v5715_v36, 16  ;;  %v2539_v22 = vrot.slane %v2538_v5, 4  ;;  %v2591_v15 = vrot.slane %v2589_v33, 5 }
 0x151   : > { %v2506_v12 = vsel %vm7498_vm2, %v2501_v35, %v2505_v1  ;;  %v2562_v10 = vor.u32 %v2561_v61, %v2558_v21  ;;  %v2553_v30 = vrot.slane %v2551_v6, 5  ;;  %v2595_v43 = vrot.slane %v2593_v14, 4 }
 0x152   : > { %v2572_v39 = vor.u32 %v2571_v8, %v2567_v45  ;;  %v5745_v3 = vcombine.low %v2496_v47, %v2506_v12  ;;  %v2585_v52 = vrot.slane %v2583_v26, 5  ;;  %v2544_v31 = vsel %vm7498_vm2, %v2539_v22, %v2543_v17 }
 0x153   : > { %v2563_v38 = vrot.slane %v2562_v10, 4  ;;  %v2596_v29 = vor.u32 %v2595_v43, %v2591_v15  ;;  %v2599_v35 = vshll.u32 %v7358_v44, 16 }
 0x154   : > { %v2573_v56 = vrot.slane %v2572_v39, 4  ;;  %v2586_v20 = vor.u32 %v2585_v52, %v2582_v19 }
 0x155   : > { %v2568_v4 = vsel %vm7498_vm2, %v2563_v38, %v2567_v45  ;;  %v2601_v54 = vrot.slane %v2599_v35, 5 }
 0x156   : > { %6857 = vmatmul.mubr.bf16.gmra.mrb[16].mxu0 %v6047_v62  ;;  %v2548_v62 = vor.u32 %v2547_v24, %v2543_v17  ;;  %v2587_v25 = vrot.slane %v2586_v20, 4 }
 0x157   : > { %6665 = vmatmul.mubr.bf16.vlgmr.msra.gmra.mrb[16].mxu1 %v8946_v50  ;;  %6860 = vmatprep.mubr.bf16.mxu0 %v6048_v59  ;;  %v7357_v50 = vld [vmem:[%s7466_s21 + $0xbc] sm:$0x1]  ;;  %s5475_s21 = sshll.u32 %s7373_s15, 4 }
 0x158   : > { %6668 = vmatprep.mubr.bf16.mxu1 %v5744_v40  ;;  %v2575_v23 = vshll.u32 %v7357_v50, 16  ;;  %v2549_v59 = vrot.slane %v2548_v62, 4  ;;  %v2592_v13 = vsel %vm7498_vm2, %v2587_v25, %v2591_v15  ;;  %p228_p5 = scmp.lt.s32.totalorder %s5475_s21, 31 }
 0x15a   : > { %v2577_v1 = vrot.slane %v2575_v23, 5  ;;  %v2554_v63 = vsel %vm7498_vm2, %v2549_v59, %v2553_v30  ;;  %s9324_s21 = smov (!%p228_p5, %s5475_s21), 31 }
 0x15b   : > { %s6096_s22 = sshll.u32 %s9324_s21, 3 }
 0x15c   : > { %v2578_v57 = vsel %vm7498_vm2, %v2573_v56, %v2577_v1  ;;  %s9208_s24 = scalar_lea.vmem %s9250_s2, %s6096_s22 }
 0x15d   : > { %v5748_v7 = vcombine.low %v2568_v4, %v2578_v57 }
 0x15e   : > { %6861 = vmatmul.mubr.bf16.gmra.mrb[20].mxu0 %v6049_v53  ;;  %v5747_v53 = vcombine.low %v2544_v31, %v2554_v63 }
 0x15f   : > { %6669 = vmatmul.mubr.bf16.gmra.mrb[20].mxu1 %v5745_v3  ;;  %6864 = vmatprep.mubr.bf16.mxu0 %v6050_v16  ;;  %v2597_v16 = vrot.slane %v2596_v29, 4 }
 0x160   : > { %6672 = vmatprep.mubr.bf16.mxu1 %v5746_v58 }
 0x161   : > { %v2602_v60 = vsel %vm7498_vm2, %v2597_v16, %v2601_v54 }
 0x162   : > { %v5749_v0 = vcombine.low %v2592_v13, %v2602_v60 }
 0x166   : > { %6865 = vmatmul.mubr.bf16.gmra.mrb[24].mxu0 %v6051_v2 }
 0x167   : > { %6673 = vmatmul.mubr.bf16.gmra.mrb[24].mxu1 %v5747_v53  ;;  %6868 = vmatprep.mubr.bf16.mxu0 %v6052_v28 }
 0x168   : > { %6676 = vmatprep.mubr.bf16.mxu1 %v5748_v7 }
 0x16e   : > { %6869 = vmatmul.mubr.bf16.gmra.mrb[28].mxu0 %v6053_v48 }
 0x16f   : > { %6677 = vmatmul.mubr.bf16.gmra.mrb[28].mxu1 %v5749_v0 }
 0x1ea   : > { %v6602_v27 = vpop.f32.mrb[0].mxu1 }
 0x1eb   : > { %v2012_v46 = vpop.f32.mrb[1].mxu1 }
 0x1ec   : > { %v6603_v2 = vpop.f32.mrb[2].mxu1 }
 0x1ed   : > { %v2015_v42 = vpop.f32.mrb[3].mxu1 }
 0x1f2   : > { %v6606_v55 = vpop.f32.mrb[4].mxu1 }
 0x1f3   : > { %v2028_v49 = vpop.f32.mrb[5].mxu1 }
 0x1f4   : > { %v6607_v28 = vpop.f32.mrb[6].mxu1 }
 0x1f5   : > { %v2031_v17 = vpop.f32.mrb[7].mxu1 }
 0x1fa   : > { %v6610_v24 = vpop.f32.mrb[8].mxu1 }
 0x1fb   : > { %v2044_v40 = vpop.f32.mrb[9].mxu1 }
 0x1fc   : > { %v6611_v21 = vpop.f32.mrb[10].mxu1 }
 0x1fd   : > { %v9194_v37 = vpop.f32.mrb[11].mxu1 }
 0x202   : > { %v9197_v61 = vpop.f32.mrb[12].mxu1 }
 0x203   : > { %v9199_v34 = vpop.f32.mrb[13].mxu1 }
 0x204   : > { %v9201_v11 = vpop.f32.mrb[14].mxu1 }
 0x205   : > { %v9203_v48 = vpop.f32.mrb[15].mxu1 }
 0x209   : > { %v6842_v45 = vpop.f32.mrb[0].mxu0 }
 0x20a   : > { %v6888_v8 = vadd.f32 %v6842_v45, %v6602_v27  ;;  %v4906_v36 = vpop.f32.mrb[1].mxu0 }
 0x20b   : > { %v6889_v47 = vadd.f32 %v4906_v36, %v2012_v46  ;;  %v6843_v12 = vpop.f32.mrb[2].mxu0 }
 0x20c   : > { %v6890_v51 = vadd.f32 %v6843_v12, %v6603_v2  ;;  %v4909_v32 = vpop.f32.mrb[3].mxu0  ;;  %v5105_v18 = vmul.f32 %v6888_v8, %v6888_v8 }
 0x20d   : > { %v6891_v5 = vadd.f32 %v4909_v32, %v2015_v42  ;;  %v5103_v41 = vmul.f32 %v6889_v47, %v6889_v47 }
 0x20e   : > { %v6137_v62 = vpack.c.bf16 %v6890_v51, %v6888_v8  ;;  %v5106_v23 = vmul.f32 %v6890_v51, %v6890_v51 }
 0x20f   : > { %v5065_v6 = vadd.f32 %v6891_v5, %v6889_v47  ;;  %v5104_v9 = vmul.f32 %v6891_v5, %v6891_v5  ;;  %v6132_v26 = vpack.c.bf16 %v6891_v5, %v6889_v47 }
 0x210   : > { %6209 = vst [vmem:[%s9208_s24 + $0x8] sm:$0xff] %v6137_v62  }
 0x211   : > { %v5066_v33 = vadd.f32 %v6888_v8, %v5065_v6  ;;  %v5135_v14 = vadd.f32 %v5104_v9, %v5103_v41  ;;  %6133 = vst [vmem:[%s9208_s24] sm:$0xff] %v6132_v26   ;;  %v6846_v10 = vpop.f32.mrb[4].mxu0 }
 0x212   : > { %v6892_v39 = vadd.f32 %v6846_v10, %v6606_v55  ;;  %v4922_v50 = vpop.f32.mrb[5].mxu0 }
 0x213   : > { %v5136_v3 = vadd.f32 %v5135_v14, %v5105_v18  ;;  %v6893_v58 = vadd.f32 %v4922_v50, %v2028_v49  ;;  %v5067_v22 = vadd.f32 %v6890_v51, %v5066_v33  ;;  %v6847_v59 = vpop.f32.mrb[6].mxu0 }
 0x214   : > { %v6894_v30 = vadd.f32 %v6847_v59, %v6607_v28  ;;  %v4925_v19 = vpop.f32.mrb[7].mxu0  ;;  %v5109_v29 = vmul.f32 %v6892_v39, %v6892_v39 }
 0x215   : > { %v5068_v52 = vadd.f32 %v6893_v58, %v5067_v22  ;;  %v5107_v15 = vmul.f32 %v6893_v58, %v6893_v58  ;;  %v5137_v43 = vadd.f32 %v5136_v3, %v5106_v23  ;;  %v6895_v38 = vadd.f32 %v4925_v19, %v2031_v17 }
 0x216   : > { %v6147_v56 = vpack.c.bf16 %v6894_v30, %v6892_v39  ;;  %v5110_v7 = vmul.f32 %v6894_v30, %v6894_v30 }
 0x217   : > { %v5138_v1 = vadd.f32 %v5137_v43, %v5107_v15  ;;  %v5069_v31 = vadd.f32 %v6895_v38, %v5068_v52  ;;  %v5108_v63 = vmul.f32 %v6895_v38, %v6895_v38  ;;  %v6142_v20 = vpack.c.bf16 %v6895_v38, %v6893_v58 }
 0x218   : > { %6211 = vst [vmem:[%s9208_s24 + $0x18] sm:$0xff] %v6147_v56  }
 0x219   : > { %v5070_v44 = vadd.f32 %v6892_v39, %v5069_v31  ;;  %v5139_v35 = vadd.f32 %v5138_v1, %v5108_v63  ;;  %6210 = vst [vmem:[%s9208_s24 + $0x10] sm:$0xff] %v6142_v20   ;;  %v6850_v4 = vpop.f32.mrb[8].mxu0 }
 0x21a   : > { %v6896_v57 = vadd.f32 %v6850_v4, %v6610_v24  ;;  %v4938_v53 = vpop.f32.mrb[9].mxu0 }
 0x21b   : > { %v5140_v25 = vadd.f32 %v5139_v35, %v5109_v29  ;;  %v6897_v16 = vadd.f32 %v4938_v53, %v2044_v40  ;;  %v5071_v54 = vadd.f32 %v6894_v30, %v5070_v44  ;;  %v6851_v13 = vpop.f32.mrb[10].mxu0 }
 0x21c   : > { %v6898_v60 = vadd.f32 %v6851_v13, %v6611_v21  ;;  %v4941_v0 = vpop.f32.mrb[11].mxu0  ;;  %v5113_v45 = vmul.f32 %v6896_v57, %v6896_v57 }
 0x21d   : > { %v5072_v27 = vadd.f32 %v6897_v16, %v5071_v54  ;;  %v5111_v46 = vmul.f32 %v6897_v16, %v6897_v16  ;;  %v5141_v2 = vadd.f32 %v5140_v25, %v5110_v7  ;;  %v6899_v42 = vadd.f32 %v4941_v0, %v9194_v37 }
 0x21e   : > { %v6157_v55 = vpack.c.bf16 %v6898_v60, %v6896_v57  ;;  %v5114_v12 = vmul.f32 %v6898_v60, %v6898_v60 }
 0x21f   : > { %v5142_v49 = vadd.f32 %v5141_v2, %v5111_v46  ;;  %v5073_v28 = vadd.f32 %v6899_v42, %v5072_v27  ;;  %v5112_v17 = vmul.f32 %v6899_v42, %v6899_v42  ;;  %v6152_v24 = vpack.c.bf16 %v6899_v42, %v6897_v16 }
 0x220   : > { %6213 = vst [vmem:[%s9208_s24 + $0x28] sm:$0xff] %v6157_v55  }
 0x221   : > { %v5074_v8 = vadd.f32 %v6896_v57, %v5073_v28  ;;  %v5143_v36 = vadd.f32 %v5142_v49, %v5112_v17  ;;  %6212 = vst [vmem:[%s9208_s24 + $0x20] sm:$0xff] %v6152_v24   ;;  %v6854_v40 = vpop.f32.mrb[12].mxu0 }
 0x222   : > { %v6900_v47 = vadd.f32 %v6854_v40, %v9197_v61  ;;  %v4954_v21 = vpop.f32.mrb[13].mxu0 }
 0x223   : > { %v5144_v51 = vadd.f32 %v5143_v36, %v5113_v45  ;;  %v6901_v32 = vadd.f32 %v4954_v21, %v9199_v34  ;;  %v5075_v37 = vadd.f32 %v6898_v60, %v5074_v8  ;;  %v6855_v5 = vpop.f32.mrb[14].mxu0 }
 0x224   : > { %v6902_v62 = vadd.f32 %v6855_v5, %v9201_v11  ;;  %v4957_v41 = vpop.f32.mrb[15].mxu0  ;;  %v5117_v50 = vmul.f32 %v6900_v47, %v6900_v47 }
 0x225   : > { %v5076_v6 = vadd.f32 %v6901_v32, %v5075_v37  ;;  %v5115_v9 = vmul.f32 %v6901_v32, %v6901_v32  ;;  %v5145_v26 = vadd.f32 %v5144_v51, %v5114_v12  ;;  %v6903_v18 = vadd.f32 %v4957_v41, %v9203_v48 }
 0x226   : > { %v6167_v33 = vpack.c.bf16 %v6902_v62, %v6900_v47  ;;  %v5118_v11 = vmul.f32 %v6902_v62, %v6902_v62 }
 0x227   : > { %v5146_v14 = vadd.f32 %v5145_v26, %v5115_v9  ;;  %v5077_v61 = vadd.f32 %v6903_v18, %v5076_v6  ;;  %v5116_v10 = vmul.f32 %v6903_v18, %v6903_v18  ;;  %v6162_v39 = vpack.c.bf16 %v6903_v18, %v6901_v32 }
 0x228   : > { %6215 = vst [vmem:[%s9208_s24 + $0x38] sm:$0xff] %v6167_v33  }
 0x229   : > { %v5078_v23 = vadd.f32 %v6900_v47, %v5077_v61  ;;  %v5147_v34 = vadd.f32 %v5146_v14, %v5116_v10  ;;  %6214 = vst [vmem:[%s9208_s24 + $0x30] sm:$0xff] %v6162_v39   ;;  %v6858_v3 = vpop.f32.mrb[16].mxu0 }
 0x22a   : > { %v6666_v58 = vpop.f32.mrb[16].mxu1  ;;  %v4970_v22 = vpop.f32.mrb[17].mxu0 }
 0x22b   : > { %v5148_v59 = vadd.f32 %v5147_v34, %v5117_v50  ;;  %v6904_v30 = vadd.f32 %v6858_v3, %v6666_v58  ;;  %v2830_v19 = vpop.f32.mrb[17].mxu1  ;;  %v5079_v52 = vadd.f32 %v6902_v62, %v5078_v23  ;;  %v6859_v48 = vpop.f32.mrb[18].mxu0 }
 0x22c   : > { %v6905_v15 = vadd.f32 %v4970_v22, %v2830_v19  ;;  %v6667_v43 = vpop.f32.mrb[18].mxu1  ;;  %v4973_v38 = vpop.f32.mrb[19].mxu0 }
 0x22d   : > { %v5149_v56 = vadd.f32 %v5148_v59, %v5118_v11  ;;  %v6906_v1 = vadd.f32 %v6859_v48, %v6667_v43  ;;  %v2833_v31 = vpop.f32.mrb[19].mxu1  ;;  %v5121_v25 = vmul.f32 %v6904_v30, %v6904_v30 }
 0x22e   : > { %v5080_v63 = vadd.f32 %v6905_v15, %v5079_v52  ;;  %v5119_v20 = vmul.f32 %v6905_v15, %v6905_v15  ;;  %v6907_v29 = vadd.f32 %v4973_v38, %v2833_v31 }
 0x22f   : > { %v6177_v44 = vpack.c.bf16 %v6906_v1, %v6904_v30  ;;  %v5122_v2 = vmul.f32 %v6906_v1, %v6906_v1 }
 0x230   : > { %v5150_v35 = vadd.f32 %v5149_v56, %v5119_v20  ;;  %v5081_v4 = vadd.f32 %v6907_v29, %v5080_v63  ;;  %v5120_v57 = vmul.f32 %v6907_v29, %v6907_v29  ;;  %v6172_v53 = vpack.c.bf16 %v6907_v29, %v6905_v15 }
 0x231   : > { %6217 = vst [vmem:[%s9208_s24 + $0x48] sm:$0xff] %v6177_v44   ;;  %v6862_v7 = vpop.f32.mrb[20].mxu0 }
 0x232   : > { %v5082_v16 = vadd.f32 %v6904_v30, %v5081_v4  ;;  %v5151_v54 = vadd.f32 %v5150_v35, %v5120_v57  ;;  %6216 = vst [vmem:[%s9208_s24 + $0x40] sm:$0xff] %v6172_v53   ;;  %v6670_v13 = vpop.f32.mrb[20].mxu1  ;;  %v4986_v60 = vpop.f32.mrb[21].mxu0 }
 0x233   : > { %v6908_v0 = vadd.f32 %v6862_v7, %v6670_v13  ;;  %v2846_v27 = vpop.f32.mrb[21].mxu1  ;;  %v6863_v46 = vpop.f32.mrb[22].mxu0 }
 0x234   : > { %v5152_v42 = vadd.f32 %v5151_v54, %v5121_v25  ;;  %v6909_v55 = vadd.f32 %v4986_v60, %v2846_v27  ;;  %v5083_v49 = vadd.f32 %v6906_v1, %v5082_v16  ;;  %v6671_v28 = vpop.f32.mrb[22].mxu1  ;;  %v4989_v17 = vpop.f32.mrb[23].mxu0 }
 0x235   : > { %v6910_v24 = vadd.f32 %v6863_v46, %v6671_v28  ;;  %v2849_v45 = vpop.f32.mrb[23].mxu1  ;;  %v5125_v62 = vmul.f32 %v6908_v0, %v6908_v0 }
 0x236   : > { %v5084_v8 = vadd.f32 %v6909_v55, %v5083_v49  ;;  %v5123_v36 = vmul.f32 %v6909_v55, %v6909_v55  ;;  %v5153_v40 = vadd.f32 %v5152_v42, %v5122_v2  ;;  %v6911_v47 = vadd.f32 %v4989_v17, %v2849_v45 }
 0x237   : > { %v6187_v21 = vpack.c.bf16 %v6910_v24, %v6908_v0  ;;  %v5126_v61 = vmul.f32 %v6910_v24, %v6910_v24 }
 0x238   : > { %v5154_v12 = vadd.f32 %v5153_v40, %v5123_v36  ;;  %v5085_v51 = vadd.f32 %v6911_v47, %v5084_v8  ;;  %v5124_v32 = vmul.f32 %v6911_v47, %v6911_v47  ;;  %v6182_v37 = vpack.c.bf16 %v6911_v47, %v6909_v55 }
 0x239   : > { %6219 = vst [vmem:[%s9208_s24 + $0x58] sm:$0xff] %v6187_v21   ;;  %v6866_v5 = vpop.f32.mrb[24].mxu0 }
 0x23a   : > { %v5086_v41 = vadd.f32 %v6908_v0, %v5085_v51  ;;  %v5155_v6 = vadd.f32 %v5154_v12, %v5124_v32  ;;  %6218 = vst [vmem:[%s9208_s24 + $0x50] sm:$0xff] %v6182_v37   ;;  %v6674_v9 = vpop.f32.mrb[24].mxu1  ;;  %v5002_v26 = vpop.f32.mrb[25].mxu0 }
 0x23b   : > { %v6912_v18 = vadd.f32 %v6866_v5, %v6674_v9  ;;  %v2862_v33 = vpop.f32.mrb[25].mxu1  ;;  %v6867_v14 = vpop.f32.mrb[26].mxu0 }
 0x23c   : > { %v5156_v10 = vadd.f32 %v5155_v6, %v5125_v62  ;;  %v6913_v39 = vadd.f32 %v5002_v26, %v2862_v33  ;;  %v5087_v50 = vadd.f32 %v6910_v24, %v5086_v41  ;;  %v6675_v23 = vpop.f32.mrb[26].mxu1  ;;  %v5005_v34 = vpop.f32.mrb[27].mxu0 }
 0x23d   : > { %v6914_v3 = vadd.f32 %v6867_v14, %v6675_v23  ;;  %v2865_v58 = vpop.f32.mrb[27].mxu1  ;;  %v5129_v56 = vmul.f32 %v6912_v18, %v6912_v18 }
 0x23e   : > { %v5088_v22 = vadd.f32 %v6913_v39, %v5087_v50  ;;  %v5127_v11 = vmul.f32 %v6913_v39, %v6913_v39  ;;  %v5157_v59 = vadd.f32 %v5156_v10, %v5126_v61  ;;  %v6915_v30 = vadd.f32 %v5005_v34, %v2865_v58 }
 0x23f   : > { %v6197_v19 = vpack.c.bf16 %v6914_v3, %v6912_v18  ;;  %v5130_v4 = vmul.f32 %v6914_v3, %v6914_v3 }
 0x240   : > { %v5158_v52 = vadd.f32 %v5157_v59, %v5127_v11  ;;  %v5089_v48 = vadd.f32 %v6915_v30, %v5088_v22  ;;  %v5128_v15 = vmul.f32 %v6915_v30, %v6915_v30  ;;  %v6192_v43 = vpack.c.bf16 %v6915_v30, %v6913_v39 }
 0x241   : > { %6221 = vst [vmem:[%s9208_s24 + $0x68] sm:$0xff] %v6197_v19   ;;  %v6870_v38 = vpop.f32.mrb[28].mxu0 }
 0x242   : > { %v5090_v1 = vadd.f32 %v6912_v18, %v5089_v48  ;;  %v5159_v31 = vadd.f32 %v5158_v52, %v5128_v15  ;;  %6220 = vst [vmem:[%s9208_s24 + $0x60] sm:$0xff] %v6192_v43   ;;  %v6678_v63 = vpop.f32.mrb[28].mxu1  ;;  %v5018_v20 = vpop.f32.mrb[29].mxu0 }
 0x243   : > { %v6916_v29 = vadd.f32 %v6870_v38, %v6678_v63  ;;  %v2878_v44 = vpop.f32.mrb[29].mxu1  ;;  %v6871_v35 = vpop.f32.mrb[30].mxu0 }
 0x244   : > { %v5160_v57 = vadd.f32 %v5159_v31, %v5129_v56  ;;  %v6917_v53 = vadd.f32 %v5018_v20, %v2878_v44  ;;  %v5091_v7 = vadd.f32 %v6914_v3, %v5090_v1  ;;  %v6679_v25 = vpop.f32.mrb[30].mxu1  ;;  %v5021_v16 = vpop.f32.mrb[31].mxu0 }
 0x245   : > { %v6918_v54 = vadd.f32 %v6871_v35, %v6679_v25  ;;  %v2881_v13 = vpop.f32.mrb[31].mxu1  ;;  %v5133_v17 = vmul.f32 %v6916_v29, %v6916_v29 }
 0x246   : > { %v5092_v60 = vadd.f32 %v6917_v53, %v5091_v7  ;;  %v5131_v0 = vmul.f32 %v6917_v53, %v6917_v53  ;;  %v5161_v27 = vadd.f32 %v5160_v57, %v5130_v4  ;;  %v6919_v46 = vadd.f32 %v5021_v16, %v2881_v13 }
 0x247   : > { %v6207_v2 = vpack.c.bf16 %v6918_v54, %v6916_v29  ;;  %v5134_v8 = vmul.f32 %v6918_v54, %v6918_v54 }
 0x248   : > { %v5162_v42 = vadd.f32 %v5161_v27, %v5131_v0  ;;  %v5093_v55 = vadd.f32 %v6919_v46, %v5092_v60  ;;  %v5132_v49 = vmul.f32 %v6919_v46, %v6919_v46  ;;  %v6202_v28 = vpack.c.bf16 %v6919_v46, %v6917_v53 }
 0x249   : > { %6223 = vst [vmem:[%s9208_s24 + $0x78] sm:$0xff] %v6207_v2  }
 0x24a   : > { %v5094_v24 = vadd.f32 %v6916_v29, %v5093_v55  ;;  %v5163_v45 = vadd.f32 %v5162_v42, %v5132_v49  ;;  %6222 = vst [vmem:[%s9208_s24 + $0x70] sm:$0xff] %v6202_v28  }
 0x24c   : > { %v5095_v36 = vadd.f32 %v6918_v54, %v5094_v24  ;;  %v5164_v40 = vadd.f32 %v5163_v45, %v5133_v17 }
 0x24e   : > { %v5096_v47 = vrot.slane %v5095_v36, 4  ;;  %v5165_v21 = vadd.f32 %v5164_v40, %v5134_v8 }
 0x250   : > { %v5097_v12 = vadd.f32 %v5096_v47, %v5095_v36  ;;  %v5166_v51 = vrot.slane %v5165_v21, 4 }
 0x252   : > { %v5098_v32 = vrot.slane %v5097_v12, 2  ;;  %v5167_v37 = vadd.f32 %v5166_v51, %v5165_v21 }
 0x254   : > { %v5099_v5 = vadd.f32 %v5098_v32, %v5097_v12  ;;  %v5168_v62 = vrot.slane %v5167_v37, 2 }
 0x256   : > { %v5100_v41 = vrot.slane %v5099_v5, 1  ;;  %v5169_v6 = vadd.f32 %v5168_v62, %v5167_v37 }
 0x258   : > { %v5101_v9 = vadd.f32 %v5100_v41, %v5099_v5  ;;  %v5170_v26 = vrot.slane %v5169_v6, 1 }
 0x25a   : > { %5102 = vst [vmem:[%s238_s27] sm:$0x1] %v5101_v9  ;;  %v5171_v18 = vadd.f32 %v5170_v26, %v5169_v6 }
 0x25c   : > { %5172 = vst [vmem:[%s243_s30] sm:$0x1] %v5171_v18 }
 0x25d PF: > { %s15_s17 = sadd.s32 1, %s7381_s17   ;;  %s9319_s15 = smov %s7377_s16 }
 0x25e   : > { %p12_p6 = scmp.ge.s32.totalorder %s15_s17, 4   ;;  %s9320_s16 = smov %s9322_s18 }
 0x260   :  { %14 = sbr.rel (!%p12_p6) target bundleno = 2 (0x2), region = 93 }

</bundles_post_ra>
